<compile_context>
chip_gen: v5e
topology: v5e:2x2
jax: 0.10.0
libtpu: 0.0.40
codegen_flags: <defaults>
</compile_context>

<pallas_src>
import functools

import jax
import jax.numpy as jnp
from jax.experimental import pallas as pl
from jax.experimental.pallas import tpu as pltpu

GRID_SIZE = 10
N_ACTIONS = 4                       # len(ACTIONS)
PAD = GRID_SIZE + 2                 # 12 : padded spatial extent
C_IN, C1, C2 = 3, 16, 32
HIDDEN = 128
FEAT = C2 * GRID_SIZE * GRID_SIZE   # 3200
K1 = 128                            # conv1 LHS lane width (36 real + zero pad)
OUT_LANES = 128                     # lane-dense output block width
MAX_TB = 128                        # batch-tile cap (M of the head dots)


# ----------------------------------------------------------------------------
# Fused Pallas kernel: conv1 + conv2 + dueling head for a tile of TB images
# ----------------------------------------------------------------------------
def _dueling_dqn_kernel(x_ref, w1c_ref, b1c_ref, w2c_ref, b2c_ref,
                        wh1_ref, bh1_ref, wh2_ref, bh2_ref, o_ref, *, tb):
    n1 = 12 * tb    # conv1 output rows (padded y in 0..11, image-minor)
    n2 = 10 * tb    # conv2 output rows (grid rows r in 0..9, image-minor)

    # ---- conv1: 3 banded matmuls over ky, batch stacked in M ---------------
    a0 = jnp.dot(x_ref[0 * tb:0 * tb + n1, :], w1c_ref[0],
                 preferred_element_type=jnp.float32)
    a1 = jnp.dot(x_ref[1 * tb:1 * tb + n1, :], w1c_ref[1],
                 preferred_element_type=jnp.float32)
    a0 = a0 + jnp.dot(x_ref[2 * tb:2 * tb + n1, :], w1c_ref[2],
                      preferred_element_type=jnp.float32)
    y1 = jnp.maximum((a0 + a1) + b1c_ref[...], 0.0)                 # f32
    # Zero the y-padding rows (y in {0, 11}) so they act as conv2's zero pad;
    # x-pad columns are already exactly zero (band matrices / biases zeroed).
    rows = jax.lax.broadcasted_iota(jnp.int32, y1.shape, 0)
    y1 = jnp.where((rows >= tb) & (rows < 11 * tb), y1, 0.0)
    y1 = y1.astype(jnp.bfloat16)                                    # (12*TB,192)

    # ---- conv2 --------------------------------------------------------------
    c0 = jnp.dot(y1[0 * tb:0 * tb + n2, :], w2c_ref[0],
                 preferred_element_type=jnp.float32)
    c1 = jnp.dot(y1[1 * tb:1 * tb + n2, :], w2c_ref[1],
                 preferred_element_type=jnp.float32)
    c0 = c0 + jnp.dot(y1[2 * tb:2 * tb + n2, :], w2c_ref[2],
                      preferred_element_type=jnp.float32)
    y2 = jnp.maximum((c0 + c1) + b2c_ref[...], 0.0).astype(jnp.bfloat16)

    # ---- dueling head, layer 1: 10 x (TB, 384) @ (384, 256) ----------------
    h0 = jnp.dot(y2[0 * tb:1 * tb, :], wh1_ref[0],
                 preferred_element_type=jnp.float32)
    h1 = jnp.dot(y2[1 * tb:2 * tb, :], wh1_ref[1],
                 preferred_element_type=jnp.float32)
    for r in range(2, GRID_SIZE, 2):
        h0 = h0 + jnp.dot(y2[r * tb:(r + 1) * tb, :], wh1_ref[r],
                          preferred_element_type=jnp.float32)
        h1 = h1 + jnp.dot(y2[(r + 1) * tb:(r + 2) * tb, :], wh1_ref[r + 1],
                          preferred_element_type=jnp.float32)
    h = jnp.maximum((h0 + h1) + bh1_ref[...], 0.0)                  # (TB, 256)

    # ---- head layer 2 + dueling combine, lane-dense (TB, 128) store --------
    out = jnp.dot(h, wh2_ref[...],
                  preferred_element_type=jnp.float32) + bh2_ref[...]
    adv = out[:, :N_ACTIONS]
    val = out[:, N_ACTIONS:N_ACTIONS + 1]
    # Q-values land in lanes 0..3; remaining lanes are don't-care (finite).
    o_ref[...] = out + (val - jnp.mean(adv, axis=1, keepdims=True))


def _rep_spec(shape):
    """Full-array block, same block for every grid step (loaded once)."""
    zero = (0,) * len(shape)
    return pl.BlockSpec(shape, lambda i: zero)


def _round_up(x, m):
    return ((x + m - 1) // m) * m


def _batch_tile(b):
    # Multiple of 8 (aligned sublane slices); capped so activations stay a few
    # MB even on v7x (64 MiB physical VMEM).  Tiny batches -> single grid step.
    return min(_round_up(b, 8), MAX_TB)


def dueling_dqn_forward(x_nchw, kp):
    b = x_nchw.shape[0]
    tb = _batch_tile(b)
    b_pad = _round_up(b, tb)
    nt = b_pad // tb

    # Offline input packing (tiny, one-time format glue): NCHW -> per-image rows
    # y in -1..12 (14 rows) with lanes = x_pad*C_IN + c, stacked y-major /
    # image-minor inside each tile, zero-padded to 128 lanes -> dense DMA.
    x = jnp.transpose(x_nchw, (0, 2, 3, 1)).astype(jnp.float32)     # (B,10,10,3)
    x = jnp.pad(x, ((0, b_pad - b), (2, 2), (1, 1), (0, 0)))        # (Bp,14,12,3)
    x = x.reshape(b_pad, 14, PAD * C_IN)
    x = x.reshape(nt, tb, 14, PAD * C_IN).transpose(0, 2, 1, 3)     # (nt,14,TB,36)
    x = x.reshape(nt, 14 * tb, PAD * C_IN)
    x = jnp.pad(x, ((0, 0), (0, 0), (0, K1 - PAD * C_IN)))
    xb = x.astype(jnp.bfloat16)                                     # (nt,14TB,128)

    flops = int(b_pad) * 2 * (3 * 12 * K1 * (PAD * C1)
                              + 3 * 10 * (PAD * C1) * (PAD * C2)
                              + GRID_SIZE * (PAD * C2) * (2 * HIDDEN)
                              + (2 * HIDDEN) * OUT_LANES)
    bytes_accessed = int(
        xb.size * 2 + b_pad * OUT_LANES * 4
        + kp["w1c"].size * 2 + kp["b1c"].size * 4
        + kp["w2c"].size * 2 + kp["b2c"].size * 4
        + kp["wh1"].size * 2 + kp["bh1"].size * 4
        + kp["wh2"].size * 4 + kp["bh2"].size * 4)

    out = pl.pallas_call(
        functools.partial(_dueling_dqn_kernel, tb=tb),
        out_shape=jax.ShapeDtypeStruct((b_pad, OUT_LANES), jnp.float32),
        grid=(nt,),
        in_specs=[
            pl.BlockSpec((None, 14 * tb, K1), lambda i: (i, 0, 0)),  # input tile
            _rep_spec((3, K1, PAD * C1)),              # conv1 banded weights bf16
            _rep_spec((1, PAD * C1)),                  # conv1 bias (x-pad zeroed)
            _rep_spec((3, PAD * C1, PAD * C2)),        # conv2 banded weights bf16
            _rep_spec((1, PAD * C2)),                  # conv2 bias (x-pad zeroed)
            _rep_spec((GRID_SIZE, PAD * C2, 2 * HIDDEN)),  # head W1 (bf16)
            _rep_spec((1, 2 * HIDDEN)),                # head b1 (adv || val)
            _rep_spec((2 * HIDDEN, OUT_LANES)),        # head W2 (block packed)
            _rep_spec((1, OUT_LANES)),                 # head b2
        ],
        out_specs=pl.BlockSpec((tb, OUT_LANES), lambda i: (i, 0)),
        compiler_params=pltpu.CompilerParams(
            dimension_semantics=("parallel",),
            vmem_limit_bytes=32 * 1024 * 1024),
        cost_estimate=pl.CostEstimate(
            flops=flops, transcendentals=0, bytes_accessed=bytes_accessed),
    )(xb, kp["w1c"], kp["b1c"], kp["w2c"], kp["b2c"],
      kp["wh1"], kp["bh1"], kp["wh2"], kp["bh2"])

    return out[:b, :N_ACTIONS]


# ----------------------------------------------------------------------------
# One-time parameter packing (offline weight restructuring)
# ----------------------------------------------------------------------------
def _conv_band_matrices(w, k_rows=None):
    """w: (Cout, Cin, 3, 3) torch OIHW -> (3, K, 12*Cout) banded matrices, bf16.

    band[ky][xin*Cin+ci, xo*Cout+co] = w[co, ci, ky, xin-xo+1] (0 outside the
    band).  Output columns at x-pad positions (xo in {0, 11}) are zeroed so the
    conv's spatial zero-padding is exact without any lane mask.
    """
    c_out, c_in = w.shape[0], w.shape[1]
    bands = []
    for ky in range(3):
        m = jnp.zeros((PAD * c_in, PAD * c_out), jnp.float32)
        for kx in range(3):
            shift = jnp.eye(PAD, k=1 - kx, dtype=jnp.float32)
            m = m + jnp.kron(shift, w[:, :, ky, kx].T)
        bands.append(m)
    bands = jnp.stack(bands)                                 # (3,12*Cin,12*Cout)
    col_keep = jnp.zeros((PAD,), jnp.float32).at[1:PAD - 1].set(1.0)
    bands = bands * jnp.repeat(col_keep, c_out)[None, None, :]
    if k_rows is not None and k_rows > PAD * c_in:
        bands = jnp.pad(bands, ((0, 0), (0, k_rows - PAD * c_in), (0, 0)))
    return bands.astype(jnp.bfloat16)


def _tiled_bias(bias, c_out):
    """Tile per-channel bias over x_pad (lane = x*C + c); zero at x-pad cols."""
    col_keep = jnp.zeros((PAD,), jnp.float32).at[1:PAD - 1].set(1.0)
    return (jnp.tile(bias, PAD) * jnp.repeat(col_keep, c_out))[None, :]


def pack_params(p):
    w1c = _conv_band_matrices(p["conv1_w"], k_rows=K1)       # (3, 128, 192)
    w2c = _conv_band_matrices(p["conv2_w"])                  # (3, 192, 384)
    b1c = _tiled_bias(p["conv1_b"], C1)                      # (1, 192)
    b2c = _tiled_bias(p["conv2_b"], C2)                      # (1, 384)

    # Head layer 1: pack adv||val into (3200, 256) and scatter torch's (C,H,W)
    # flatten rows into the conv-output layout (row r = grid row, lane =
    # x_pad*C2 + c), with zero rows at x-pad positions.
    w1p = jnp.concatenate([p["adv_w1"], p["val_w1"]], axis=1)        # (3200,256)
    t = w1p.reshape(C2, GRID_SIZE, GRID_SIZE, 2 * HIDDEN)            # [c,y,x,j]
    t = jnp.transpose(t, (1, 2, 0, 3))                               # [y,x,c,j]
    t = jnp.pad(t, ((0, 0), (1, 1), (0, 0), (0, 0)))                 # [y,xp,c,j]
    wh1 = t.reshape(GRID_SIZE, PAD * C2, 2 * HIDDEN).astype(jnp.bfloat16)

    # Head layer 2, block-packed lane-dense (256, 128): adv -> cols 0..3 from
    # the first 128 hidden units, val -> col 4 from the last 128.
    wh2 = jnp.zeros((2 * HIDDEN, OUT_LANES), jnp.float32)
    wh2 = wh2.at[:HIDDEN, :N_ACTIONS].set(p["adv_w2"])
    wh2 = wh2.at[HIDDEN:, N_ACTIONS].set(p["val_w2"][:, 0])
    bh2 = jnp.zeros((1, OUT_LANES), jnp.float32)
    bh2 = bh2.at[0, :N_ACTIONS].set(p["adv_b2"])
    bh2 = bh2.at[0, N_ACTIONS].set(p["val_b2"][0])

    # Packing invariants the kernel relies on: conv weights/biases exactly zero
    # at x-pad output columns, head W1 exactly zero at x-pad input rows.
    assert float(jnp.max(jnp.abs(w1c[:, :, :C1]))) == 0.0
    assert float(jnp.max(jnp.abs(w2c[:, :, (PAD - 1) * C2:]))) == 0.0
    assert float(jnp.max(jnp.abs(wh1[:, :C2, :]))) == 0.0

    return {
        "w1c": w1c, "b1c": b1c, "w2c": w2c, "b2c": b2c,
        "wh1": wh1,
        "bh1": jnp.concatenate([p["adv_b1"], p["val_b1"]])[None, :],
        "wh2": wh2, "bh2": bh2,
    }


# ----------------------------------------------------------------------------
# Deterministic synthetic init (shapes match the nn.Module; torch conventions)
# ----------------------------------------------------------------------------
def init_params(key):
    ks = jax.random.split(key, 12)

    def u(k, shape, fan_in):
        bound = 1.0 / jnp.sqrt(float(fan_in))
        return jax.random.uniform(k, shape, jnp.float32, -bound, bound)

    return {
        "conv1_w": u(ks[0], (C1, C_IN, 3, 3), C_IN * 9),   # OIHW
        "conv1_b": u(ks[1], (C1,), C_IN * 9),
        "conv2_w": u(ks[2], (C2, C1, 3, 3), C1 * 9),
        "conv2_b": u(ks[3], (C2,), C1 * 9),
        "adv_w1": u(ks[4], (FEAT, HIDDEN), FEAT),          # stored (in, out)
        "adv_b1": u(ks[5], (HIDDEN,), FEAT),
        "adv_w2": u(ks[6], (HIDDEN, N_ACTIONS), HIDDEN),
        "adv_b2": u(ks[7], (N_ACTIONS,), HIDDEN),
        "val_w1": u(ks[8], (FEAT, HIDDEN), FEAT),
        "val_b1": u(ks[9], (HIDDEN,), FEAT),
        "val_w2": u(ks[10], (HIDDEN, 1), HIDDEN),
        "val_b2": u(ks[11], (1,), HIDDEN),
    }


# ----------------------------------------------------------------------------
# Pure-JAX reference (same math; mirrors the kernel's bf16-operand / f32-accum
# precision at each stage so only summation order differs)
# ----------------------------------------------------------------------------
def reference_forward(x_nchw, p):
    x = x_nchw.astype(jnp.bfloat16)
    y1 = jax.lax.conv_general_dilated(
        x, p["conv1_w"].astype(jnp.bfloat16), (1, 1), ((1, 1), (1, 1)),
        dimension_numbers=("NCHW", "OIHW", "NCHW"),
        preferred_element_type=jnp.float32)
    y1 = jnp.maximum(y1 + p["conv1_b"][None, :, None, None], 0.0)
    y1 = y1.astype(jnp.bfloat16)
    y2 = jax.lax.conv_general_dilated(
        y1, p["conv2_w"].astype(jnp.bfloat16), (1, 1), ((1, 1), (1, 1)),
        dimension_numbers=("NCHW", "OIHW", "NCHW"),
        preferred_element_type=jnp.float32)
    y2 = jnp.maximum(y2 + p["conv2_b"][None, :, None, None], 0.0)
    feat = y2.reshape(x.shape[0], -1).astype(jnp.bfloat16)   # torch (C,H,W) flat
    ha = jnp.maximum(
        jnp.dot(feat, p["adv_w1"].astype(jnp.bfloat16),
                preferred_element_type=jnp.float32) + p["adv_b1"], 0.0)
    adv = jnp.dot(ha, p["adv_w2"]) + p["adv_b2"]
    hv = jnp.maximum(
        jnp.dot(feat, p["val_w1"].astype(jnp.bfloat16),
                preferred_element_type=jnp.float32) + p["val_b1"], 0.0)
    val = jnp.dot(hv, p["val_w2"]) + p["val_b2"]
    return val + adv - adv.mean(axis=1, keepdims=True)


if __name__ == "__main__":
    key = jax.random.PRNGKey(0)
    pkey, xkey = jax.random.split(key)
    params = init_params(pkey)
    kparams = pack_params(params)

    fwd = jax.jit(dueling_dqn_forward)

    # Deployment-sized input matching the module: (2, 3, 10, 10) NCHW.
    x_small = jax.random.normal(xkey, (2, C_IN, GRID_SIZE, GRID_SIZE),
                                jnp.float32)
    q_small = jax.block_until_ready(fwd(x_small, kparams))
    ref_small = reference_forward(x_small, params)
    assert q_small.shape == (2, N_ACTIONS)
    assert bool(jnp.all(jnp.isfinite(q_small)))
    assert jnp.allclose(q_small, ref_small, rtol=2e-2, atol=2e-2), (q_small,
                                                                    ref_small)

    # Larger batch: exercises batch tiling (TB=128) and a multi-step grid.
    x_big = jax.random.normal(jax.random.PRNGKey(1),
                              (200, C_IN, GRID_SIZE, GRID_SIZE), jnp.float32)
    q_big = jax.block_until_ready(fwd(x_big, kparams))
    ref_big = reference_forward(x_big, params)
    assert q_big.shape == (200, N_ACTIONS)
    assert bool(jnp.all(jnp.isfinite(q_big)))
    assert jnp.allclose(q_big, ref_big, rtol=2e-2, atol=2e-2)

    print("KERNEL_OK")
</pallas_src>

<mosaic_0001>
module attributes {stable_mosaic.version = 11 : i64} {
  func.func @_dueling_dqn_kernel(%arg0: i32, %arg1: memref<1x112x128xbf16, #tpu.memory_space<vmem>>, %arg2: memref<3x128x192xbf16, #tpu.memory_space<vmem>>, %arg3: memref<1x192xf32, #tpu.memory_space<vmem>>, %arg4: memref<3x192x384xbf16, #tpu.memory_space<vmem>>, %arg5: memref<1x384xf32, #tpu.memory_space<vmem>>, %arg6: memref<10x384x256xbf16, #tpu.memory_space<vmem>>, %arg7: memref<1x256xf32, #tpu.memory_space<vmem>>, %arg8: memref<256x128xf32, #tpu.memory_space<vmem>>, %arg9: memref<1x128xf32, #tpu.memory_space<vmem>>, %arg10: memref<8x128xf32, #tpu.memory_space<vmem>>) attributes {dimension_semantics = [#tpu.dimension_semantics<parallel>], iteration_bounds = array<i64: 1>, scalar_prefetch = 0 : i64, scratch_operands = 0 : i64, tpu.core_type = #tpu.core_type<tc>, window_params = [{transform_indices = @transform_0, window_bounds = array<i64: 1, 112, 128>}, {pipeline_mode = #tpu.pipeline_mode<synchronous>, transform_indices = @transform_1, window_bounds = array<i64: 3, 128, 192>}, {pipeline_mode = #tpu.pipeline_mode<synchronous>, transform_indices = @transform_2, window_bounds = array<i64: 1, 192>}, {pipeline_mode = #tpu.pipeline_mode<synchronous>, transform_indices = @transform_3, window_bounds = array<i64: 3, 192, 384>}, {pipeline_mode = #tpu.pipeline_mode<synchronous>, transform_indices = @transform_4, window_bounds = array<i64: 1, 384>}, {pipeline_mode = #tpu.pipeline_mode<synchronous>, transform_indices = @transform_5, window_bounds = array<i64: 10, 384, 256>}, {pipeline_mode = #tpu.pipeline_mode<synchronous>, transform_indices = @transform_6, window_bounds = array<i64: 1, 256>}, {pipeline_mode = #tpu.pipeline_mode<synchronous>, transform_indices = @transform_7, window_bounds = array<i64: 256, 128>}, {pipeline_mode = #tpu.pipeline_mode<synchronous>, transform_indices = @transform_8, window_bounds = array<i64: 1, 128>}, {transform_indices = @transform_9, window_bounds = array<i64: 8, 128>}]} {
    %c0 = arith.constant 0 : index
    %c0_0 = arith.constant 0 : index
    %c0_1 = arith.constant 0 : index
    %0 = vector.load %arg1[%c0, %c0_0, %c0_1] : memref<1x112x128xbf16, #tpu.memory_space<vmem>>, vector<1x96x128xbf16>
    %1 = vector.shape_cast %0 : vector<1x96x128xbf16> to vector<96x128xbf16>
    %c0_2 = arith.constant 0 : index
    %c0_3 = arith.constant 0 : index
    %c0_4 = arith.constant 0 : index
    %2 = vector.load %arg2[%c0_2, %c0_3, %c0_4] : memref<3x128x192xbf16, #tpu.memory_space<vmem>>, vector<1x128x192xbf16>
    %3 = vector.shape_cast %2 : vector<1x128x192xbf16> to vector<128x192xbf16>
    %cst = arith.constant dense<0.000000e+00> : vector<96x192xf32>
    %4 = tpu.matmul %1, %3, %cst {dimension_numbers = #tpu.dot_dimension_numbers<[1], [0], [0], [1], [0, 0, 1, 1], [], []>} : vector<96x128xbf16>, vector<128x192xbf16>, vector<96x192xf32> -> vector<96x192xf32>
    %c0_5 = arith.constant 0 : index
    %c8 = arith.constant 8 : index
    %c0_6 = arith.constant 0 : index
    %5 = vector.load %arg1[%c0_5, %c8, %c0_6] : memref<1x112x128xbf16, #tpu.memory_space<vmem>>, vector<1x96x128xbf16>
    %6 = vector.shape_cast %5 : vector<1x96x128xbf16> to vector<96x128xbf16>
    %c1 = arith.constant 1 : index
    %c0_7 = arith.constant 0 : index
    %c0_8 = arith.constant 0 : index
    %7 = vector.load %arg2[%c1, %c0_7, %c0_8] : memref<3x128x192xbf16, #tpu.memory_space<vmem>>, vector<1x128x192xbf16>
    %8 = vector.shape_cast %7 : vector<1x128x192xbf16> to vector<128x192xbf16>
    %cst_9 = arith.constant dense<0.000000e+00> : vector<96x192xf32>
    %9 = tpu.matmul %6, %8, %cst_9 {dimension_numbers = #tpu.dot_dimension_numbers<[1], [0], [0], [1], [0, 0, 1, 1], [], []>} : vector<96x128xbf16>, vector<128x192xbf16>, vector<96x192xf32> -> vector<96x192xf32>
    %c0_10 = arith.constant 0 : index
    %c16 = arith.constant 16 : index
    %c0_11 = arith.constant 0 : index
    %10 = vector.load %arg1[%c0_10, %c16, %c0_11] : memref<1x112x128xbf16, #tpu.memory_space<vmem>>, vector<1x96x128xbf16>
    %11 = vector.shape_cast %10 : vector<1x96x128xbf16> to vector<96x128xbf16>
    %c2 = arith.constant 2 : index
    %c0_12 = arith.constant 0 : index
    %c0_13 = arith.constant 0 : index
    %12 = vector.load %arg2[%c2, %c0_12, %c0_13] : memref<3x128x192xbf16, #tpu.memory_space<vmem>>, vector<1x128x192xbf16>
    %13 = vector.shape_cast %12 : vector<1x128x192xbf16> to vector<128x192xbf16>
    %cst_14 = arith.constant dense<0.000000e+00> : vector<96x192xf32>
    %14 = tpu.matmul %11, %13, %cst_14 {dimension_numbers = #tpu.dot_dimension_numbers<[1], [0], [0], [1], [0, 0, 1, 1], [], []>} : vector<96x128xbf16>, vector<128x192xbf16>, vector<96x192xf32> -> vector<96x192xf32>
    %15 = arith.addf %4, %14 : vector<96x192xf32>
    %16 = arith.addf %15, %9 : vector<96x192xf32>
    %c0_15 = arith.constant 0 : index
    %c0_16 = arith.constant 0 : index
    %17 = vector.load %arg3[%c0_15, %c0_16] : memref<1x192xf32, #tpu.memory_space<vmem>>, vector<1x192xf32>
    %18 = vector.broadcast %17 : vector<1x192xf32> to vector<96x192xf32>
    %19 = arith.addf %16, %18 : vector<96x192xf32>
    %cst_17 = arith.constant 0.000000e+00 : f32
    %20 = vector.broadcast %cst_17 : f32 to vector<96x192xf32>
    %21 = arith.maximumf %19, %20 : vector<96x192xf32>
    %22 = tpu.iota {dimensions = array<i32: 0>} : vector<96x192xi32>
    %c8_i32 = arith.constant 8 : i32
    %23 = vector.broadcast %c8_i32 : i32 to vector<96x192xi32>
    %24 = arith.cmpi sge, %22, %23 : vector<96x192xi32>
    %c88_i32 = arith.constant 88 : i32
    %25 = vector.broadcast %c88_i32 : i32 to vector<96x192xi32>
    %26 = arith.cmpi slt, %22, %25 : vector<96x192xi32>
    %27 = arith.andi %24, %26 : vector<96x192xi1>
    %cst_18 = arith.constant 0.000000e+00 : f32
    %28 = vector.broadcast %cst_18 : f32 to vector<96x192xf32>
    %29 = arith.select %27, %21, %28 : vector<96x192xi1>, vector<96x192xf32>
    %30 = arith.truncf %29 : vector<96x192xf32> to vector<96x192xbf16>
    %31 = vector.extract_strided_slice %30 {offsets = [0, 0], sizes = [80, 192], strides = [1, 1]} : vector<96x192xbf16> to vector<80x192xbf16>
    %c0_19 = arith.constant 0 : index
    %c0_20 = arith.constant 0 : index
    %c0_21 = arith.constant 0 : index
    %32 = vector.load %arg4[%c0_19, %c0_20, %c0_21] : memref<3x192x384xbf16, #tpu.memory_space<vmem>>, vector<1x192x384xbf16>
    %33 = vector.shape_cast %32 : vector<1x192x384xbf16> to vector<192x384xbf16>
    %cst_22 = arith.constant dense<0.000000e+00> : vector<80x384xf32>
    %34 = tpu.matmul %31, %33, %cst_22 {dimension_numbers = #tpu.dot_dimension_numbers<[1], [0], [0], [1], [0, 0, 1, 1], [], []>} : vector<80x192xbf16>, vector<192x384xbf16>, vector<80x384xf32> -> vector<80x384xf32>
    %35 = vector.extract_strided_slice %30 {offsets = [8, 0], sizes = [80, 192], strides = [1, 1]} : vector<96x192xbf16> to vector<80x192xbf16>
    %c1_23 = arith.constant 1 : index
    %c0_24 = arith.constant 0 : index
    %c0_25 = arith.constant 0 : index
    %36 = vector.load %arg4[%c1_23, %c0_24, %c0_25] : memref<3x192x384xbf16, #tpu.memory_space<vmem>>, vector<1x192x384xbf16>
    %37 = vector.shape_cast %36 : vector<1x192x384xbf16> to vector<192x384xbf16>
    %cst_26 = arith.constant dense<0.000000e+00> : vector<80x384xf32>
    %38 = tpu.matmul %35, %37, %cst_26 {dimension_numbers = #tpu.dot_dimension_numbers<[1], [0], [0], [1], [0, 0, 1, 1], [], []>} : vector<80x192xbf16>, vector<192x384xbf16>, vector<80x384xf32> -> vector<80x384xf32>
    %39 = vector.extract_strided_slice %30 {offsets = [16, 0], sizes = [80, 192], strides = [1, 1]} : vector<96x192xbf16> to vector<80x192xbf16>
    %c2_27 = arith.constant 2 : index
    %c0_28 = arith.constant 0 : index
    %c0_29 = arith.constant 0 : index
    %40 = vector.load %arg4[%c2_27, %c0_28, %c0_29] : memref<3x192x384xbf16, #tpu.memory_space<vmem>>, vector<1x192x384xbf16>
    %41 = vector.shape_cast %40 : vector<1x192x384xbf16> to vector<192x384xbf16>
    %cst_30 = arith.constant dense<0.000000e+00> : vector<80x384xf32>
    %42 = tpu.matmul %39, %41, %cst_30 {dimension_numbers = #tpu.dot_dimension_numbers<[1], [0], [0], [1], [0, 0, 1, 1], [], []>} : vector<80x192xbf16>, vector<192x384xbf16>, vector<80x384xf32> -> vector<80x384xf32>
    %43 = arith.addf %34, %42 : vector<80x384xf32>
    %44 = arith.addf %43, %38 : vector<80x384xf32>
    %c0_31 = arith.constant 0 : index
    %c0_32 = arith.constant 0 : index
    %45 = vector.load %arg5[%c0_31, %c0_32] : memref<1x384xf32, #tpu.memory_space<vmem>>, vector<1x384xf32>
    %46 = vector.broadcast %45 : vector<1x384xf32> to vector<80x384xf32>
    %47 = arith.addf %44, %46 : vector<80x384xf32>
    %cst_33 = arith.constant 0.000000e+00 : f32
    %48 = vector.broadcast %cst_33 : f32 to vector<80x384xf32>
    %49 = arith.maximumf %47, %48 : vector<80x384xf32>
    %50 = arith.truncf %49 : vector<80x384xf32> to vector<80x384xbf16>
    %51 = vector.extract_strided_slice %50 {offsets = [0, 0], sizes = [8, 384], strides = [1, 1]} : vector<80x384xbf16> to vector<8x384xbf16>
    %c0_34 = arith.constant 0 : index
    %c0_35 = arith.constant 0 : index
    %c0_36 = arith.constant 0 : index
    %52 = vector.load %arg6[%c0_34, %c0_35, %c0_36] : memref<10x384x256xbf16, #tpu.memory_space<vmem>>, vector<1x384x256xbf16>
    %53 = vector.shape_cast %52 : vector<1x384x256xbf16> to vector<384x256xbf16>
    %cst_37 = arith.constant dense<0.000000e+00> : vector<8x256xf32>
    %54 = tpu.matmul %51, %53, %cst_37 {dimension_numbers = #tpu.dot_dimension_numbers<[1], [0], [0], [1], [0, 0, 1, 1], [], []>} : vector<8x384xbf16>, vector<384x256xbf16>, vector<8x256xf32> -> vector<8x256xf32>
    %55 = vector.extract_strided_slice %50 {offsets = [8, 0], sizes = [8, 384], strides = [1, 1]} : vector<80x384xbf16> to vector<8x384xbf16>
    %c1_38 = arith.constant 1 : index
    %c0_39 = arith.constant 0 : index
    %c0_40 = arith.constant 0 : index
    %56 = vector.load %arg6[%c1_38, %c0_39, %c0_40] : memref<10x384x256xbf16, #tpu.memory_space<vmem>>, vector<1x384x256xbf16>
    %57 = vector.shape_cast %56 : vector<1x384x256xbf16> to vector<384x256xbf16>
    %cst_41 = arith.constant dense<0.000000e+00> : vector<8x256xf32>
    %58 = tpu.matmul %55, %57, %cst_41 {dimension_numbers = #tpu.dot_dimension_numbers<[1], [0], [0], [1], [0, 0, 1, 1], [], []>} : vector<8x384xbf16>, vector<384x256xbf16>, vector<8x256xf32> -> vector<8x256xf32>
    %59 = vector.extract_strided_slice %50 {offsets = [16, 0], sizes = [8, 384], strides = [1, 1]} : vector<80x384xbf16> to vector<8x384xbf16>
    %c2_42 = arith.constant 2 : index
    %c0_43 = arith.constant 0 : index
    %c0_44 = arith.constant 0 : index
    %60 = vector.load %arg6[%c2_42, %c0_43, %c0_44] : memref<10x384x256xbf16, #tpu.memory_space<vmem>>, vector<1x384x256xbf16>
    %61 = vector.shape_cast %60 : vector<1x384x256xbf16> to vector<384x256xbf16>
    %cst_45 = arith.constant dense<0.000000e+00> : vector<8x256xf32>
    %62 = tpu.matmul %59, %61, %cst_45 {dimension_numbers = #tpu.dot_dimension_numbers<[1], [0], [0], [1], [0, 0, 1, 1], [], []>} : vector<8x384xbf16>, vector<384x256xbf16>, vector<8x256xf32> -> vector<8x256xf32>
    %63 = arith.addf %54, %62 : vector<8x256xf32>
    %64 = vector.extract_strided_slice %50 {offsets = [24, 0], sizes = [8, 384], strides = [1, 1]} : vector<80x384xbf16> to vector<8x384xbf16>
    %c3 = arith.constant 3 : index
    %c0_46 = arith.constant 0 : index
    %c0_47 = arith.constant 0 : index
    %65 = vector.load %arg6[%c3, %c0_46, %c0_47] : memref<10x384x256xbf16, #tpu.memory_space<vmem>>, vector<1x384x256xbf16>
    %66 = vector.shape_cast %65 : vector<1x384x256xbf16> to vector<384x256xbf16>
    %cst_48 = arith.constant dense<0.000000e+00> : vector<8x256xf32>
    %67 = tpu.matmul %64, %66, %cst_48 {dimension_numbers = #tpu.dot_dimension_numbers<[1], [0], [0], [1], [0, 0, 1, 1], [], []>} : vector<8x384xbf16>, vector<384x256xbf16>, vector<8x256xf32> -> vector<8x256xf32>
    %68 = arith.addf %58, %67 : vector<8x256xf32>
    %69 = vector.extract_strided_slice %50 {offsets = [32, 0], sizes = [8, 384], strides = [1, 1]} : vector<80x384xbf16> to vector<8x384xbf16>
    %c4 = arith.constant 4 : index
    %c0_49 = arith.constant 0 : index
    %c0_50 = arith.constant 0 : index
    %70 = vector.load %arg6[%c4, %c0_49, %c0_50] : memref<10x384x256xbf16, #tpu.memory_space<vmem>>, vector<1x384x256xbf16>
    %71 = vector.shape_cast %70 : vector<1x384x256xbf16> to vector<384x256xbf16>
    %cst_51 = arith.constant dense<0.000000e+00> : vector<8x256xf32>
    %72 = tpu.matmul %69, %71, %cst_51 {dimension_numbers = #tpu.dot_dimension_numbers<[1], [0], [0], [1], [0, 0, 1, 1], [], []>} : vector<8x384xbf16>, vector<384x256xbf16>, vector<8x256xf32> -> vector<8x256xf32>
    %73 = arith.addf %63, %72 : vector<8x256xf32>
    %74 = vector.extract_strided_slice %50 {offsets = [40, 0], sizes = [8, 384], strides = [1, 1]} : vector<80x384xbf16> to vector<8x384xbf16>
    %c5 = arith.constant 5 : index
    %c0_52 = arith.constant 0 : index
    %c0_53 = arith.constant 0 : index
    %75 = vector.load %arg6[%c5, %c0_52, %c0_53] : memref<10x384x256xbf16, #tpu.memory_space<vmem>>, vector<1x384x256xbf16>
    %76 = vector.shape_cast %75 : vector<1x384x256xbf16> to vector<384x256xbf16>
    %cst_54 = arith.constant dense<0.000000e+00> : vector<8x256xf32>
    %77 = tpu.matmul %74, %76, %cst_54 {dimension_numbers = #tpu.dot_dimension_numbers<[1], [0], [0], [1], [0, 0, 1, 1], [], []>} : vector<8x384xbf16>, vector<384x256xbf16>, vector<8x256xf32> -> vector<8x256xf32>
    %78 = arith.addf %68, %77 : vector<8x256xf32>
    %79 = vector.extract_strided_slice %50 {offsets = [48, 0], sizes = [8, 384], strides = [1, 1]} : vector<80x384xbf16> to vector<8x384xbf16>
    %c6 = arith.constant 6 : index
    %c0_55 = arith.constant 0 : index
    %c0_56 = arith.constant 0 : index
    %80 = vector.load %arg6[%c6, %c0_55, %c0_56] : memref<10x384x256xbf16, #tpu.memory_space<vmem>>, vector<1x384x256xbf16>
    %81 = vector.shape_cast %80 : vector<1x384x256xbf16> to vector<384x256xbf16>
    %cst_57 = arith.constant dense<0.000000e+00> : vector<8x256xf32>
    %82 = tpu.matmul %79, %81, %cst_57 {dimension_numbers = #tpu.dot_dimension_numbers<[1], [0], [0], [1], [0, 0, 1, 1], [], []>} : vector<8x384xbf16>, vector<384x256xbf16>, vector<8x256xf32> -> vector<8x256xf32>
    %83 = arith.addf %73, %82 : vector<8x256xf32>
    %84 = vector.extract_strided_slice %50 {offsets = [56, 0], sizes = [8, 384], strides = [1, 1]} : vector<80x384xbf16> to vector<8x384xbf16>
    %c7 = arith.constant 7 : index
    %c0_58 = arith.constant 0 : index
    %c0_59 = arith.constant 0 : index
    %85 = vector.load %arg6[%c7, %c0_58, %c0_59] : memref<10x384x256xbf16, #tpu.memory_space<vmem>>, vector<1x384x256xbf16>
    %86 = vector.shape_cast %85 : vector<1x384x256xbf16> to vector<384x256xbf16>
    %cst_60 = arith.constant dense<0.000000e+00> : vector<8x256xf32>
    %87 = tpu.matmul %84, %86, %cst_60 {dimension_numbers = #tpu.dot_dimension_numbers<[1], [0], [0], [1], [0, 0, 1, 1], [], []>} : vector<8x384xbf16>, vector<384x256xbf16>, vector<8x256xf32> -> vector<8x256xf32>
    %88 = arith.addf %78, %87 : vector<8x256xf32>
    %89 = vector.extract_strided_slice %50 {offsets = [64, 0], sizes = [8, 384], strides = [1, 1]} : vector<80x384xbf16> to vector<8x384xbf16>
    %c8_61 = arith.constant 8 : index
    %c0_62 = arith.constant 0 : index
    %c0_63 = arith.constant 0 : index
    %90 = vector.load %arg6[%c8_61, %c0_62, %c0_63] : memref<10x384x256xbf16, #tpu.memory_space<vmem>>, vector<1x384x256xbf16>
    %91 = vector.shape_cast %90 : vector<1x384x256xbf16> to vector<384x256xbf16>
    %cst_64 = arith.constant dense<0.000000e+00> : vector<8x256xf32>
    %92 = tpu.matmul %89, %91, %cst_64 {dimension_numbers = #tpu.dot_dimension_numbers<[1], [0], [0], [1], [0, 0, 1, 1], [], []>} : vector<8x384xbf16>, vector<384x256xbf16>, vector<8x256xf32> -> vector<8x256xf32>
    %93 = arith.addf %83, %92 : vector<8x256xf32>
    %94 = vector.extract_strided_slice %50 {offsets = [72, 0], sizes = [8, 384], strides = [1, 1]} : vector<80x384xbf16> to vector<8x384xbf16>
    %c9 = arith.constant 9 : index
    %c0_65 = arith.constant 0 : index
    %c0_66 = arith.constant 0 : index
    %95 = vector.load %arg6[%c9, %c0_65, %c0_66] : memref<10x384x256xbf16, #tpu.memory_space<vmem>>, vector<1x384x256xbf16>
    %96 = vector.shape_cast %95 : vector<1x384x256xbf16> to vector<384x256xbf16>
    %cst_67 = arith.constant dense<0.000000e+00> : vector<8x256xf32>
    %97 = tpu.matmul %94, %96, %cst_67 {dimension_numbers = #tpu.dot_dimension_numbers<[1], [0], [0], [1], [0, 0, 1, 1], [], []>} : vector<8x384xbf16>, vector<384x256xbf16>, vector<8x256xf32> -> vector<8x256xf32>
    %98 = arith.addf %88, %97 : vector<8x256xf32>
    %99 = arith.addf %93, %98 : vector<8x256xf32>
    %c0_68 = arith.constant 0 : index
    %c0_69 = arith.constant 0 : index
    %100 = vector.load %arg7[%c0_68, %c0_69] : memref<1x256xf32, #tpu.memory_space<vmem>>, vector<1x256xf32>
    %101 = vector.broadcast %100 : vector<1x256xf32> to vector<8x256xf32>
    %102 = arith.addf %99, %101 : vector<8x256xf32>
    %cst_70 = arith.constant 0.000000e+00 : f32
    %103 = vector.broadcast %cst_70 : f32 to vector<8x256xf32>
    %104 = arith.maximumf %102, %103 : vector<8x256xf32>
    %c0_71 = arith.constant 0 : index
    %c0_72 = arith.constant 0 : index
    %105 = vector.load %arg8[%c0_71, %c0_72] : memref<256x128xf32, #tpu.memory_space<vmem>>, vector<256x128xf32>
    %cst_73 = arith.constant dense<0.000000e+00> : vector<8x128xf32>
    %106 = tpu.matmul %104, %105, %cst_73 {dimension_numbers = #tpu.dot_dimension_numbers<[1], [0], [0], [1], [0, 0, 1, 1], [], []>} : vector<8x256xf32>, vector<256x128xf32>, vector<8x128xf32> -> vector<8x128xf32>
    %c0_74 = arith.constant 0 : index
    %c0_75 = arith.constant 0 : index
    %107 = vector.load %arg9[%c0_74, %c0_75] : memref<1x128xf32, #tpu.memory_space<vmem>>, vector<1x128xf32>
    %108 = vector.broadcast %107 : vector<1x128xf32> to vector<8x128xf32>
    %109 = arith.addf %106, %108 : vector<8x128xf32>
    %110 = vector.extract_strided_slice %109 {offsets = [0, 0], sizes = [8, 4], strides = [1, 1]} : vector<8x128xf32> to vector<8x4xf32>
    %111 = vector.extract_strided_slice %109 {offsets = [0, 4], sizes = [8, 1], strides = [1, 1]} : vector<8x128xf32> to vector<8x1xf32>
    %cst_76 = arith.constant dense<0.000000e+00> : vector<8xf32>
    %112 = vector.multi_reduction <add>, %110, %cst_76 [1] : vector<8x4xf32> to vector<8xf32>
    %113 = vector.shape_cast %112 : vector<8xf32> to vector<8x1xf32>
    %cst_77 = arith.constant 4.000000e+00 : f32
    %114 = vector.broadcast %cst_77 : f32 to vector<8x1xf32>
    %115 = arith.divf %113, %114 : vector<8x1xf32>
    %116 = arith.subf %111, %115 : vector<8x1xf32>
    %117 = vector.broadcast %116 : vector<8x1xf32> to vector<8x128xf32>
    %118 = arith.addf %109, %117 : vector<8x128xf32>
    %c0_78 = arith.constant 0 : index
    %c0_79 = arith.constant 0 : index
    %119 = vector.load %arg10[%c0_78, %c0_79] : memref<8x128xf32, #tpu.memory_space<vmem>>, vector<8x128xf32>
    tpu.vector_store %arg10[%c0_78, %c0_79], %118 {strides = array<i32>} : memref<8x128xf32, #tpu.memory_space<vmem>>, vector<8x128xf32>,
    return
  }
  func.func @transform_0(%arg0: i32) -> (i32, i32, i32) {
    %c0_i32 = arith.constant 0 : i32
    %c0_i32_0 = arith.constant 0 : i32
    %c0_i32_1 = arith.constant 0 : i32
    return %arg0, %c0_i32, %c0_i32_0 : i32, i32, i32
  }
  func.func @transform_1(%arg0: i32) -> (i32, i32, i32) {
    %c0_i32 = arith.constant 0 : i32
    %c0_i32_0 = arith.constant 0 : i32
    %c0_i32_1 = arith.constant 0 : i32
    %c0_i32_2 = arith.constant 0 : i32
    return %c0_i32, %c0_i32_0, %c0_i32_1 : i32, i32, i32
  }
  func.func @transform_2(%arg0: i32) -> (i32, i32) {
    %c0_i32 = arith.constant 0 : i32
    %c0_i32_0 = arith.constant 0 : i32
    %c0_i32_1 = arith.constant 0 : i32
    return %c0_i32, %c0_i32_0 : i32, i32
  }
  func.func @transform_3(%arg0: i32) -> (i32, i32, i32) {
    %c0_i32 = arith.constant 0 : i32
    %c0_i32_0 = arith.constant 0 : i32
    %c0_i32_1 = arith.constant 0 : i32
    %c0_i32_2 = arith.constant 0 : i32
    return %c0_i32, %c0_i32_0, %c0_i32_1 : i32, i32, i32
  }
  func.func @transform_4(%arg0: i32) -> (i32, i32) {
    %c0_i32 = arith.constant 0 : i32
    %c0_i32_0 = arith.constant 0 : i32
    %c0_i32_1 = arith.constant 0 : i32
    return %c0_i32, %c0_i32_0 : i32, i32
  }
  func.func @transform_5(%arg0: i32) -> (i32, i32, i32) {
    %c0_i32 = arith.constant 0 : i32
    %c0_i32_0 = arith.constant 0 : i32
    %c0_i32_1 = arith.constant 0 : i32
    %c0_i32_2 = arith.constant 0 : i32
    return %c0_i32, %c0_i32_0, %c0_i32_1 : i32, i32, i32
  }
  func.func @transform_6(%arg0: i32) -> (i32, i32) {
    %c0_i32 = arith.constant 0 : i32
    %c0_i32_0 = arith.constant 0 : i32
    %c0_i32_1 = arith.constant 0 : i32
    return %c0_i32, %c0_i32_0 : i32, i32
  }
  func.func @transform_7(%arg0: i32) -> (i32, i32) {
    %c0_i32 = arith.constant 0 : i32
    %c0_i32_0 = arith.constant 0 : i32
    %c0_i32_1 = arith.constant 0 : i32
    return %c0_i32, %c0_i32_0 : i32, i32
  }
  func.func @transform_8(%arg0: i32) -> (i32, i32) {
    %c0_i32 = arith.constant 0 : i32
    %c0_i32_0 = arith.constant 0 : i32
    %c0_i32_1 = arith.constant 0 : i32
    return %c0_i32, %c0_i32_0 : i32, i32
  }
  func.func @transform_9(%arg0: i32) -> (i32, i32) {
    %c0_i32 = arith.constant 0 : i32
    %c0_i32_0 = arith.constant 0 : i32
    return %arg0, %c0_i32 : i32, i32
  }
}

</mosaic_0001>

<bundles_post_ra>
// kernel: dueling_dqn_forward.1
= control target key start
LH: loop header
LB: loop body
LE: loop exit
PB: predicated region body
PF: predicated region fallthrough
CT: control target
= control target key end

     0   :  { %14 = vsyncpa [#allocation3], 0  ;;  %s11245_s0 = inlined_call_operand.vmem [shape: bf16[1,112,128], index: 0, kind: input, shape index: {}]   ;;  %s11246_s1 = inlined_call_operand.vmem [shape: bf16[3,128,192], index: 1, kind: input, shape index: {}]   ;;  %s11247_s2 = inlined_call_operand.hbm [shape: f32[1,192], index: 2, kind: input, shape index: {}]   ;;  %s11248_s3 = inlined_call_operand.hbm [shape: bf16[3,192,384], index: 3, kind: input, shape index: {}]   ;;  %s11249_s4 = inlined_call_operand.hbm [shape: f32[1,384], index: 4, kind: input, shape index: {}]   ;;  %s11250_s5 = inlined_call_operand.hbm [shape: bf16[10,384,256], index: 5, kind: input, shape index: {}]   ;;  %s11251_s6 = inlined_call_operand.hbm [shape: f32[1,256], index: 6, kind: input, shape index: {}]   ;;  %s11252_s7 = inlined_call_operand.hbm [shape: f32[256,128], index: 7, kind: input, shape index: {}]   ;;  %s11253_s8 = inlined_call_operand.hbm [shape: f32[1,128], index: 8, kind: input, shape index: {}]   ;;  %s11254_s9 = inlined_call_operand.vmem [shape: f32[8,128], index: 9, kind: output, shape index: {}]  }
   0x1   :  { %15 = vsyncpa [#allocation5], 0 }
   0x2   :  { %16 = vsyncpa [#allocation8], 0  ;;  %s37_s11 = sshll.u32 %s11248_s3, 4  ;;  %s38_s11 = int_to_ptr.hbm [resolvable:$true] %s37_s11 }
   0x3   :  { %17 = vsyncpa [#allocation11], 0  ;;  %s9946_s12 = smov [#allocation4]   ;;  %s61_s16 = sshll.u32 %s11250_s5, 4  ;;  %s62_s16 = int_to_ptr.hbm [resolvable:$true] %s61_s16 }
   0x4   :  { %s39_s13 = sshll.u32 %s9946_s12, 4  ;;  %s9947_s17 = smov 192   ;;  %s40_s13 = int_to_ptr.vmem [resolvable:$true] %s39_s13 }
   0x5   :  { %s9948_s18 = smov 12   ;;  %s9949_s19 = smov [#allocation7]  }
   0x6   :  { %45 = dma.hbm_to_vmem [thread:$0]  %s38_s11, 13824, %s40_s13, [#allocation5], %s9947_s17, %s9947_s17, %s9948_s18  }
   0x7   :  { %s63_s20 = sshll.u32 %s9949_s19, 4  ;;  %s9950_s21 = smov 128   ;;  %s64_s20 = int_to_ptr.vmem [resolvable:$true] %s63_s20 }
   0x8   :  { %s9951_s22 = smov 8   ;;  %s85_s24 = sshll.u32 %s11252_s7, 4  ;;  %s86_s24 = int_to_ptr.hbm [resolvable:$true] %s85_s24 }
   0x9   :  { %69 = dma.hbm_to_vmem [thread:$0]  %s62_s16, 61440, %s64_s20, [#allocation8], %s9950_s21, %s9950_s21, %s9951_s22  }
   0xa   :  { %s9952_s25 = smov [#allocation10]   ;;  %s27_s28 = sshll.u32 %s11247_s2, 4  ;;  %s28_s28 = int_to_ptr.hbm [resolvable:$true] %s27_s28 }
   0xb   :  { %s87_s26 = sshll.u32 %s9952_s25, 4  ;;  %s9953_s29 = smov [#allocation2]   ;;  %s88_s26 = int_to_ptr.vmem [resolvable:$true] %s87_s26 }
   0xc   :  { %93 = dma.hbm_to_vmem [thread:$0]  %s86_s24, 4096, %s88_s26, [#allocation11], %s9950_s21, %s9950_s21, %s9951_s22  }
   0xd   :  { %s29_s30 = sshll.u32 %s9953_s29, 4  ;;  %s51_s12 = sshll.u32 %s11249_s4, 4  ;;  %s30_s30 = int_to_ptr.vmem [resolvable:$true] %s29_s30  ;;  %s52_s12 = int_to_ptr.hbm [resolvable:$true] %s51_s12 }
   0xe   :  { %32 = dma.hbm_to_vmem [thread:$0]  %s28_s28, 32, %s30_s30, [#allocation3]  }
   0xf   :  { %s75_s14 = sshll.u32 %s11251_s6, 4  ;;  %s9954_s15 = smov [#allocation6]   ;;  %s76_s14 = int_to_ptr.hbm [resolvable:$true] %s75_s14 }
  0x10   :  { %s53_s16 = sshll.u32 %s9954_s15, 4  ;;  %s9955_s2 = smov [#allocation9]   ;;  %s54_s16 = int_to_ptr.vmem [resolvable:$true] %s53_s16 }
  0x11   :  { %56 = dma.hbm_to_vmem [thread:$0]  %s52_s12, 48, %s54_s16, [#allocation5]  }
  0x12   :  { %s77_s17 = sshll.u32 %s9955_s2, 4  ;;  %s99_s20 = sshll.u32 %s11253_s8, 4  ;;  %s78_s17 = int_to_ptr.vmem [resolvable:$true] %s77_s17  ;;  %s100_s20 = int_to_ptr.hbm [resolvable:$true] %s99_s20 }
  0x13   :  { %80 = dma.hbm_to_vmem [thread:$0]  %s76_s14, 32, %s78_s17, [#allocation8]  }
  0x14   :  { %s9956_s4 = smov [#allocation12]  }
  0x15   :  { %s101_s21 = sshll.u32 %s9956_s4, 4  ;;  %s102_s21 = int_to_ptr.vmem [resolvable:$true] %s101_s21 }
  0x16   :  { %104 = dma.hbm_to_vmem [thread:$0]  %s100_s20, 16, %s102_s21, [#allocation11]  }
  0x17   :  { %9938 = dma.done.wait [#allocation3], 32  }
  0x18   :  { %9939 = vsyncadd [#allocation3], 4294967264 }
  0x19   :  { %9940 = dma.done.wait [#allocation5], 13872  }
  0x1a   :  { %9941 = vsyncadd [#allocation5], 4294953424 }
  0x1b   :  { %9942 = dma.done.wait [#allocation8], 61472  }
  0x1c   :  { %9943 = vsyncadd [#allocation8], 4294905824 }
  0x1d   :  { %9944 = dma.done.wait [#allocation11], 4112  }
  0x1e   :  { %9945 = vsyncadd [#allocation11], 4294963184  ;;  %v6468_v0 = vld [vmem:[%s11246_s1 + $0xf0] sm:$0xf]  ;;  %v9070_v1 = vld [vmem:[%s11246_s1 + $0xf4] sm:$0xf0] }
  0x1f   :  { %v9069_v2 = vld [vmem:[%s11246_s1 + $0xf4] sm:$0xf]  ;;  %v6469_v3 = vor.u32 %v9070_v1, %v6468_v0  ;;  %v6470_v4 = vld [vmem:[%s11246_s1 + $0xf8] sm:$0xf0]  ;;  %v6460_v5 = vld [vmem:[%s11246_s1 + $0xe0] sm:$0xf] }
  0x20   :  { %v9068_v6 = vld [vmem:[%s11246_s1 + $0xe4] sm:$0xf0]  ;;  %v6473_v7 = vor.u32 %v9069_v2, %v6470_v4  ;;  %v9067_v8 = vld [vmem:[%s11246_s1 + $0xe4] sm:$0xf]  ;;  %v6462_v9 = vld [vmem:[%s11246_s1 + $0xe8] sm:$0xf0] }
  0x21   :  { %296 = vmatpush.bf16.msra.mxu0 %v6469_v3  ;;  %v6461_v10 = vor.u32 %v9068_v6, %v6460_v5  ;;  %v6465_v11 = vor.u32 %v9067_v8, %v6462_v9  ;;  %v6452_v12 = vld [vmem:[%s11246_s1 + $0xd0] sm:$0xf]  ;;  %v9066_v13 = vld [vmem:[%s11246_s1 + $0xd4] sm:$0xf0]  ;;  %v9065_v14 = vld [vmem:[%s11246_s1 + $0xd4] sm:$0xf] }
  0x22   :  { %335 = vmatpush.bf16.msra.mxu1 %v6473_v7  ;;  %v6454_v15 = vld [vmem:[%s11246_s1 + $0xd8] sm:$0xf0]  ;;  %v6453_v16 = vor.u32 %v9066_v13, %v6452_v12  ;;  %v6444_v18 = vld [vmem:[%s11246_s1 + $0xc0] sm:$0xf]  ;;  %v9064_v19 = vld [vmem:[%s11246_s1 + $0xc4] sm:$0xf0] }
  0x23   :  { %v6457_v17 = vor.u32 %v9065_v14, %v6454_v15  ;;  %v9063_v20 = vld [vmem:[%s11246_s1 + $0xc4] sm:$0xf]  ;;  %v6446_v21 = vld [vmem:[%s11246_s1 + $0xc8] sm:$0xf0]  ;;  %v6445_v22 = vor.u32 %v9064_v19, %v6444_v18  ;;  %v6436_v24 = vld [vmem:[%s11246_s1 + $0xb0] sm:$0xf] }
  0x24   :  { %v6449_v23 = vor.u32 %v9063_v20, %v6446_v21  ;;  %v9062_v25 = vld [vmem:[%s11246_s1 + $0xb4] sm:$0xf0]  ;;  %v9061_v26 = vld [vmem:[%s11246_s1 + $0xb4] sm:$0xf]  ;;  %v6438_v27 = vld [vmem:[%s11246_s1 + $0xb8] sm:$0xf0] }
  0x25   :  { %297 = vmatpush.bf16.msra.mxu0 %v6461_v10  ;;  %v6437_v28 = vor.u32 %v9062_v25, %v6436_v24  ;;  %v6441_v29 = vor.u32 %v9061_v26, %v6438_v27  ;;  %v6428_v30 = vld [vmem:[%s11246_s1 + $0xa0] sm:$0xf]  ;;  %v9060_v31 = vld [vmem:[%s11246_s1 + $0xa4] sm:$0xf0]  ;;  %v9059_v32 = vld [vmem:[%s11246_s1 + $0xa4] sm:$0xf] }
  0x26   :  { %336 = vmatpush.bf16.msra.mxu1 %v6465_v11  ;;  %v6430_v33 = vld [vmem:[%s11246_s1 + $0xa8] sm:$0xf0]  ;;  %v6429_v34 = vor.u32 %v9060_v31, %v6428_v30  ;;  %v6420_v36 = vld [vmem:[%s11246_s1 + $0x90] sm:$0xf]  ;;  %v9058_v37 = vld [vmem:[%s11246_s1 + $0x94] sm:$0xf0] }
  0x27   :  { %v6433_v35 = vor.u32 %v9059_v32, %v6430_v33  ;;  %v9057_v38 = vld [vmem:[%s11246_s1 + $0x94] sm:$0xf]  ;;  %v6422_v39 = vld [vmem:[%s11246_s1 + $0x98] sm:$0xf0]  ;;  %v6421_v40 = vor.u32 %v9058_v37, %v6420_v36  ;;  %v6412_v42 = vld [vmem:[%s11246_s1 + $0x80] sm:$0xf] }
  0x28   :  { %v6425_v41 = vor.u32 %v9057_v38, %v6422_v39  ;;  %v9056_v43 = vld [vmem:[%s11246_s1 + $0x84] sm:$0xf0]  ;;  %v9055_v44 = vld [vmem:[%s11246_s1 + $0x84] sm:$0xf]  ;;  %v6414_v45 = vld [vmem:[%s11246_s1 + $0x88] sm:$0xf0] }
  0x29   :  { %298 = vmatpush.bf16.msra.mxu0 %v6453_v16  ;;  %v6413_v46 = vor.u32 %v9056_v43, %v6412_v42  ;;  %v6417_v47 = vor.u32 %v9055_v44, %v6414_v45  ;;  %v9742_v48 = vld [vmem:[%s11245_s0 + $0x4] sm:$0xff]   ;;  %v9744_v49 = vld [vmem:[%s11245_s0 + $0xc] sm:$0xff]   ;;  %v9092_v51 = vld [vmem:[%s11246_s1 + $0x174] sm:$0xf0]  ;;  %vm1266_vm0 = vcmask 523264   ;;  %vm6366_vm1 = vcmask 31744  }
  0x2a   :  { %337 = vmatpush.bf16.msra.mxu1 %v6457_v17  ;;  %v6572_v50 = vld [vmem:[%s11246_s1 + $0x170] sm:$0xf]  ;;  %v9091_v52 = vld [vmem:[%s11246_s1 + $0x174] sm:$0xf]  ;;  %v6574_v54 = vld [vmem:[%s11246_s1 + $0x178] sm:$0xf0] }
  0x2b   :  { %v6573_v53 = vor.u32 %v9092_v51, %v6572_v50  ;;  %v6564_v55 = vld [vmem:[%s11246_s1 + $0x160] sm:$0xf]  ;;  %v9090_v56 = vld [vmem:[%s11246_s1 + $0x164] sm:$0xf0]  ;;  %v6577_v57 = vor.u32 %v9091_v52, %v6574_v54  ;;  %v9089_v58 = vld [vmem:[%s11246_s1 + $0x164] sm:$0xf] }
  0x2c   :  { %v6566_v59 = vld [vmem:[%s11246_s1 + $0x168] sm:$0xf0]  ;;  %v6565_v60 = vor.u32 %v9090_v56, %v6564_v55  ;;  %v6556_v62 = vld [vmem:[%s11246_s1 + $0x150] sm:$0xf]  ;;  %v9088_v63 = vld [vmem:[%s11246_s1 + $0x154] sm:$0xf0] }
  0x2d   :  { %299 = vmatpush.bf16.msra.mxu0 %v6445_v22  ;;  %519 = vmatpush.bf16.msra.mxu2 %v6573_v53  ;;  %v6569_v61 = vor.u32 %v9089_v58, %v6566_v59  ;;  %v9087_v0 = vld [vmem:[%s11246_s1 + $0x154] sm:$0xf]  ;;  %v6558_v1 = vld [vmem:[%s11246_s1 + $0x158] sm:$0xf0]  ;;  %v6557_v2 = vor.u32 %v9088_v63, %v6556_v62  ;;  %v6548_v4 = vld [vmem:[%s11246_s1 + $0x140] sm:$0xf] }
  0x2e   :  { %338 = vmatpush.bf16.msra.mxu1 %v6449_v23  ;;  %558 = vmatpush.bf16.msra.mxu3 %v6577_v57  ;;  %v6561_v3 = vor.u32 %v9087_v0, %v6558_v1  ;;  %v9086_v5 = vld [vmem:[%s11246_s1 + $0x144] sm:$0xf0]  ;;  %v9085_v6 = vld [vmem:[%s11246_s1 + $0x144] sm:$0xf]  ;;  %v6550_v7 = vld [vmem:[%s11246_s1 + $0x148] sm:$0xf0] }
  0x2f   :  { %v9746_v8 = vld [vmem:[%s11245_s0 + $0x14] sm:$0xff]   ;;  %v6549_v9 = vor.u32 %v9086_v5, %v6548_v4  ;;  %v6553_v10 = vor.u32 %v9085_v6, %v6550_v7  ;;  %v6636_v11 = vld [vmem:[%s11246_s1 + $0x70] sm:$0xf]  ;;  %v6638_v15 = vld [vmem:[%s11246_s1 + $0x78] sm:$0xf0] }
  0x30   :  { %v9054_v12 = vld [vmem:[%s11246_s1 + $0x74] sm:$0xf0]  ;;  %v9053_v13 = vld [vmem:[%s11246_s1 + $0x74] sm:$0xf]  ;;  %v6540_v17 = vld [vmem:[%s11246_s1 + $0x130] sm:$0xf] }
  0x31   :  { %300 = vmatpush.bf16.msra.mxu0 %v6437_v28  ;;  %520 = vmatpush.bf16.msra.mxu2 %v6565_v60  ;;  %v6637_v14 = vor.u32 %v9054_v12, %v6636_v11  ;;  %v6641_v16 = vor.u32 %v9053_v13, %v6638_v15  ;;  %v9084_v18 = vld [vmem:[%s11246_s1 + $0x134] sm:$0xf0]  ;;  %v9083_v19 = vld [vmem:[%s11246_s1 + $0x134] sm:$0xf]  ;;  %v6542_v21 = vld [vmem:[%s11246_s1 + $0x138] sm:$0xf0] }
  0x32   :  { %339 = vmatpush.bf16.msra.mxu1 %v6441_v29  ;;  %559 = vmatpush.bf16.msra.mxu3 %v6569_v61  ;;  %v6541_v20 = vor.u32 %v9084_v18, %v6540_v17  ;;  %v6628_v22 = vld [vmem:[%s11246_s1 + $0x60] sm:$0xf]  ;;  %v9052_v23 = vld [vmem:[%s11246_s1 + $0x64] sm:$0xf0]  ;;  %v6545_v24 = vor.u32 %v9083_v19, %v6542_v21  ;;  %v9051_v26 = vld [vmem:[%s11246_s1 + $0x64] sm:$0xf] }
  0x33   :  { %v6629_v25 = vor.u32 %v9052_v23, %v6628_v22  ;;  %v6630_v27 = vld [vmem:[%s11246_s1 + $0x68] sm:$0xf0]  ;;  %v6532_v28 = vld [vmem:[%s11246_s1 + $0x120] sm:$0xf]  ;;  %v9082_v30 = vld [vmem:[%s11246_s1 + $0x124] sm:$0xf0] }
  0x34   :  { %v6633_v29 = vor.u32 %v9051_v26, %v6630_v27  ;;  %v9081_v31 = vld [vmem:[%s11246_s1 + $0x124] sm:$0xf]  ;;  %v6534_v32 = vld [vmem:[%s11246_s1 + $0x128] sm:$0xf0]  ;;  %v6533_v33 = vor.u32 %v9082_v30, %v6532_v28  ;;  %v9050_v36 = vld [vmem:[%s11246_s1 + $0x54] sm:$0xf0] }
  0x35   :  { %301 = vmatpush.bf16.msra.mxu0 %v6429_v34  ;;  %521 = vmatpush.bf16.msra.mxu2 %v6557_v2  ;;  %v6537_v34 = vor.u32 %v9081_v31, %v6534_v32  ;;  %v9049_v37 = vld [vmem:[%s11246_s1 + $0x54] sm:$0xf]  ;;  %v6622_v39 = vld [vmem:[%s11246_s1 + $0x58] sm:$0xf0]  ;;  %v6612_v45 = vld [vmem:[%s11246_s1 + $0x40] sm:$0xf] }
  0x36   :  { %340 = vmatpush.bf16.msra.mxu1 %v6433_v35  ;;  %560 = vmatpush.bf16.msra.mxu3 %v6561_v3  ;;  %v6620_v35 = vld [vmem:[%s11246_s1 + $0x50] sm:$0xf]  ;;  %v6625_v42 = vor.u32 %v9049_v37, %v6622_v39  ;;  %v9079_v43 = vld [vmem:[%s11246_s1 + $0x114] sm:$0xf]  ;;  %v6526_v44 = vld [vmem:[%s11246_s1 + $0x118] sm:$0xf0] }
  0x37   :  { %v6621_v38 = vor.u32 %v9050_v36, %v6620_v35  ;;  %v6529_v50 = vor.u32 %v9079_v43, %v6526_v44  ;;  %v6516_v51 = vld [vmem:[%s11246_s1 + $0x100] sm:$0xf]  ;;  %v9078_v52 = vld [vmem:[%s11246_s1 + $0x104] sm:$0xf0]  ;;  %v9077_v54 = vld [vmem:[%s11246_s1 + $0x104] sm:$0xf] }
  0x38   :  { %v6518_v55 = vld [vmem:[%s11246_s1 + $0x108] sm:$0xf0]  ;;  %v9748_v57 = vld [vmem:[%s11245_s0 + $0x1c] sm:$0xff]   ;;  %v6517_v58 = vor.u32 %v9078_v52, %v6516_v51  ;;  %v6604_v60 = vld [vmem:[%s11246_s1 + $0x30] sm:$0xf] }
  0x39   :  { %302 = vmatpush.bf16.msra.mxu0 %v6421_v40  ;;  %522 = vmatpush.bf16.msra.mxu2 %v6549_v9  ;;  %v6524_v40 = vld [vmem:[%s11246_s1 + $0x110] sm:$0xf]  ;;  %v6521_v59 = vor.u32 %v9077_v54, %v6518_v55  ;;  %v9046_v61 = vld [vmem:[%s11246_s1 + $0x34] sm:$0xf0]  ;;  %v9045_v62 = vld [vmem:[%s11246_s1 + $0x34] sm:$0xf] }
  0x3a   :  { %341 = vmatpush.bf16.msra.mxu1 %v6425_v41  ;;  %561 = vmatpush.bf16.msra.mxu3 %v6553_v10  ;;  %v9080_v41 = vld [vmem:[%s11246_s1 + $0x114] sm:$0xf0]  ;;  %v6605_v63 = vor.u32 %v9046_v61, %v6604_v60  ;;  %v6606_v0 = vld [vmem:[%s11246_s1 + $0x38] sm:$0xf0]  ;;  %v9071_v2 = vld [vmem:[%s11245_s0 + $0x8] sm:$0xff] }
  0x3b   :  { %v6609_v1 = vor.u32 %v9045_v62, %v6606_v0  ;;  %v6596_v3 = vld [vmem:[%s11246_s1 + $0x20] sm:$0xf]  ;;  %v9044_v4 = vld [vmem:[%s11246_s1 + $0x24] sm:$0xf0]  ;;  %v9043_v6 = vld [vmem:[%s11246_s1 + $0x24] sm:$0xf] }
  0x3c   :  { %v6597_v5 = vor.u32 %v9044_v4, %v6596_v3  ;;  %v6598_v7 = vld [vmem:[%s11246_s1 + $0x28] sm:$0xf0]  ;;  %v6588_v9 = vld [vmem:[%s11246_s1 + $0x10] sm:$0xf]  ;;  %v9042_v10 = vld [vmem:[%s11246_s1 + $0x14] sm:$0xf0] }
  0x3d   :  { %303 = vmatpush.bf16.msra.mxu0 %v6413_v46  ;;  %523 = vmatpush.bf16.msra.mxu2 %v6541_v20  ;;  %v6525_v46 = vor.u32 %v9080_v41, %v6524_v40  ;;  %v9041_v11 = vld [vmem:[%s11246_s1 + $0x14] sm:$0xf]  ;;  %v6590_v12 = vld [vmem:[%s11246_s1 + $0x18] sm:$0xf0]  ;;  %v6589_v13 = vor.u32 %v9042_v10, %v6588_v9  ;;  %v6580_v15 = vld [vmem:[%s11246_s1] sm:$0xf] }
  0x3e   :  { %342 = vmatpush.bf16.msra.mxu1 %v6417_v47  ;;  %562 = vmatpush.bf16.msra.mxu3 %v6545_v24  ;;  %v9048_v47 = vld [vmem:[%s11246_s1 + $0x44] sm:$0xf0]  ;;  %v9039_v17 = vld [vmem:[%s11246_s1 + $0x4] sm:$0xf]  ;;  %v6582_v18 = vld [vmem:[%s11246_s1 + $0x8] sm:$0xf0] }
  0x3f   :  { %v6613_v53 = vor.u32 %v9048_v47, %v6612_v45  ;;  %v6585_v20 = vor.u32 %v9039_v17, %v6582_v18  ;;  %v9750_v21 = vld [vmem:[%s11245_s0 + $0x24] sm:$0xff]   ;;  %v9072_v22 = vld [vmem:[%s11245_s0 + $0x10] sm:$0xff]  ;;  %v9073_v24 = vld [vmem:[%s11245_s0 + $0x18] sm:$0xff] }
  0x40   :  { %304 = vmatmul.bf16.vlgmr.msra.gmra.mxu0 %v9742_v48  ;;  %v9751_v23 = vld [vmem:[%s11245_s0 + $0x2c] sm:$0xff]  ;;  %v9074_v26 = vld [vmem:[%s11245_s0 + $0x20] sm:$0xff]  ;;  %v9707_v36 = vld [vmem:[%s11245_s0 + $0x18] sm:$0xff]  }
  0x41   :  { %343 = vmatmul.bf16.vlgmr.msra.gmra.mxu1 %v9742_v48  ;;  %691 = vmatpush.bf16.msrb.mxu0 %v6637_v14  ;;  %v9047_v48 = vld [vmem:[%s11246_s1 + $0x44] sm:$0xf]  ;;  %v6593_v14 = vor.u32 %v9041_v11, %v6590_v12  ;;  %v9705_v27 = vld [vmem:[%s11245_s0 + $0x8] sm:$0xff]   ;;  %v9706_v30 = vld [vmem:[%s11245_s0 + $0x10] sm:$0xff]  }
  0x42   :  { %730 = vmatpush.bf16.msrb.mxu1 %v6641_v16  ;;  %524 = vmatpush.bf16.msra.mxu2 %v6533_v33  ;;  %v9040_v16 = vld [vmem:[%s11246_s1 + $0x4] sm:$0xf0]  ;;  %v9076_v32 = vld [vmem:[%s11245_s0 + $0x30] sm:$0xff]  ;;  %v9708_v41 = vld [vmem:[%s11245_s0 + $0x20] sm:$0xff]  }
  0x43   :  { %563 = vmatpush.bf16.msra.mxu3 %v6537_v34  ;;  %v6581_v19 = vor.u32 %v9040_v16, %v6580_v15  ;;  %v9075_v28 = vld [vmem:[%s11245_s0 + $0x28] sm:$0xff]  ;;  %v6736_v54 = vld [vmem:[#allocation4 + $0x1d0] sm:$0xf]  ;;  %v9148_v62 = vld [vmem:[#allocation4 + $0x1b8] sm:$0xf0] }
  0x44   :  { %v6728_v52 = vld [vmem:[#allocation4 + $0x1c8] sm:$0xf]  ;;  %v6716_v61 = vld [vmem:[#allocation4 + $0x1b0] sm:$0xf]  ;;  %v6704_v4 = vld [vmem:[#allocation4 + $0x198] sm:$0xf] }
  0x45   :  { %692 = vmatpush.bf16.msrb.mxu0 %v6629_v25  ;;  %v9682_v25 = vld [vmem:[%s11245_s0] sm:$0xff]   ;;  %v9142_v15 = vld [vmem:[#allocation4 + $0x188] sm:$0xf0]  ;;  %v6700_v16 = vld [vmem:[#allocation4 + $0x188] sm:$0xf] }
  0x46   :  { %731 = vmatpush.bf16.msrb.mxu1 %v6633_v29  ;;  %525 = vmatpush.bf16.msra.mxu2 %v6525_v46  ;;  %v9709_v46 = vld [vmem:[%s11245_s0 + $0x28] sm:$0xff]   ;;  %v9143_v18 = vld [vmem:[#allocation4 + $0x190] sm:$0xf0] }
  0x47   :  { %564 = vmatpush.bf16.msra.mxu3 %v6529_v50 }
  0x49   :  { %693 = vmatpush.bf16.msrb.mxu0 %v6621_v38 }
  0x4a   :  { %732 = vmatpush.bf16.msrb.mxu1 %v6625_v42  ;;  %526 = vmatpush.bf16.msra.mxu2 %v6517_v58 }
  0x4b   :  { %565 = vmatpush.bf16.msra.mxu3 %v6521_v59 }
  0x4d   :  { %694 = vmatpush.bf16.msrb.mxu0 %v6613_v53  ;;  %527 = vmatmul.bf16.vlgmr.msra.gmra.mxu2 %v9071_v2  ;;  %v9151_v53 = vld [vmem:[#allocation4 + $0x1d0] sm:$0xf0] }
  0x4e   :  { %566 = vmatmul.bf16.vlgmr.msra.gmra.mxu3 %v9071_v2  ;;  %v6729_v55 = vor.u32 %v9151_v53, %v6728_v52  ;;  %v9149_v2 = vld [vmem:[#allocation4 + $0x1c0] sm:$0xf0]  ;;  %v6764_v52 = vld [vmem:[#allocation4 + $0x210] sm:$0xf] }
  0x50   :  { %309 = vmatmul.bf16.gmra.mxu0 %v9744_v49  ;;  %1282 = vmatpush.bf16.msrb.mxu2 %v6729_v55  ;;  %v6676_v55 = vld [vmem:[#allocation4 + $0x158] sm:$0xf] }
  0x51   :  { %348 = vmatmul.bf16.gmra.mxu1 %v9744_v49  ;;  %v6614_v49 = vld [vmem:[%s11246_s1 + $0x48] sm:$0xf0]  ;;  %695 = vmatpush.bf16.msrb.mxu0 %v6605_v63  ;;  %v6724_v63 = vld [vmem:[#allocation4 + $0x1b8] sm:$0xf] }
  0x52   :  { %v6617_v56 = vor.u32 %v9047_v48, %v6614_v49  ;;  %v6725_v3 = vor.u32 %v9149_v2, %v6724_v63  ;;  %v9161_v63 = vld [vmem:[#allocation4 + $0x220] sm:$0xf0]  ;;  %v6656_v2 = vld [vmem:[#allocation4 + $0x138] sm:$0xf] }
  0x54   :  { %733 = vmatpush.bf16.msrb.mxu1 %v6617_v56  ;;  %v9152_v56 = vld [vmem:[#allocation4 + $0x1d8] sm:$0xf0] }
  0x55   :  { %696 = vmatpush.bf16.msrb.mxu0 %v6597_v5  ;;  %v6737_v58 = vor.u32 %v9152_v56, %v6736_v54  ;;  %v9145_v5 = vld [vmem:[#allocation4 + $0x1a0] sm:$0xf0]  ;;  %v9160_v54 = vld [vmem:[#allocation4 + $0x218] sm:$0xf0] }
  0x56   :  { %v9137_v56 = vld [vmem:[#allocation4 + $0x160] sm:$0xf0] }
  0x58   :  { %734 = vmatpush.bf16.msrb.mxu1 %v6609_v1  ;;  %v6717_v1 = vor.u32 %v9148_v62, %v6716_v61  ;;  %v6677_v61 = vor.u32 %v9137_v56, %v6676_v55  ;;  %v6772_v62 = vld [vmem:[#allocation4 + $0x218] sm:$0xf] }
  0x59   :  { %697 = vmatpush.bf16.msrb.mxu0 %v6589_v13 }
  0x5a   :  { %1283 = vmatpush.bf16.msrb.mxu2 %v6717_v1  ;;  %v6773_v1 = vor.u32 %v9161_v63, %v6772_v62 }
  0x5d   :  { %698 = vmatpush.bf16.msrb.mxu0 %v6581_v19  ;;  %532 = vmatmul.bf16.gmra.mxu2 %v9072_v22  ;;  %v6701_v19 = vor.u32 %v9143_v18, %v6700_v16  ;;  %v6760_v16 = vld [vmem:[#allocation4 + $0x200] sm:$0xf] }
  0x5e   :  { %571 = vmatmul.bf16.gmra.mxu3 %v9072_v22  ;;  %v6776_v22 = vld [vmem:[#allocation4 + $0x228] sm:$0xf] }
  0x60   :  { %314 = vmatmul.bf16.gmra.mxu0 %v9746_v8 }
  0x61   :  { %353 = vmatmul.bf16.gmra.mxu1 %v9746_v8  ;;  %v6601_v8 = vor.u32 %v9043_v6, %v6598_v7  ;;  %1418 = vmatpush.bf16.msra.mxu0 %v6737_v58  ;;  %v6712_v6 = vld [vmem:[#allocation4 + $0x1a0] sm:$0xf]  ;;  %v6705_v7 = vor.u32 %v9145_v5, %v6704_v4  ;;  %v6765_v58 = vor.u32 %v9160_v54, %v6764_v52  ;;  %v6752_v4 = vld [vmem:[#allocation4 + $0x1f8] sm:$0xf] }
  0x63   :  { %735 = vmatpush.bf16.msrb.mxu1 %v6601_v8  ;;  %v9146_v8 = vld [vmem:[#allocation4 + $0x1a8] sm:$0xf0]  ;;  %1284 = vmatpush.bf16.msrb.mxu2 %v6705_v7  ;;  %v6664_v7 = vld [vmem:[#allocation4 + $0x140] sm:$0xf] }
  0x64   :  { %v6713_v10 = vor.u32 %v9146_v8, %v6712_v6  ;;  %v9157_v6 = vld [vmem:[#allocation4 + $0x200] sm:$0xf0]  ;;  %v9134_v8 = vld [vmem:[#allocation4 + $0x148] sm:$0xf0] }
  0x65   :  { %1419 = vmatpush.bf16.msra.mxu0 %v6725_v3  ;;  %v9133_v3 = vld [vmem:[#allocation4 + $0x140] sm:$0xf0] }
  0x66   :  { %v6657_v5 = vor.u32 %v9133_v3, %v6656_v2 }
  0x67   :  { %736 = vmatpush.bf16.msrb.mxu1 %v6593_v14  ;;  %v6692_v14 = vld [vmem:[#allocation4 + $0x180] sm:$0xf] }
  0x68   :  { %v6693_v17 = vor.u32 %v9142_v15, %v6692_v14  ;;  %v6753_v14 = vor.u32 %v9157_v6, %v6752_v4  ;;  %v6665_v15 = vor.u32 %v9134_v8, %v6664_v7 }
  0x69   :  { %1420 = vmatpush.bf16.msra.mxu0 %v6713_v10 }
  0x6a   :  { %1285 = vmatpush.bf16.msrb.mxu2 %v6693_v17  ;;  %v9158_v17 = vld [vmem:[#allocation4 + $0x208] sm:$0xf0] }
  0x6b   :  { %737 = vmatpush.bf16.msrb.mxu1 %v6585_v20  ;;  %v6680_v20 = vld [vmem:[#allocation4 + $0x168] sm:$0xf] }
  0x6d   :  { %537 = vmatmul.bf16.gmra.mxu2 %v9073_v24  ;;  %1421 = vmatpush.bf16.msra.mxu0 %v6701_v19 }
  0x6e   :  { %576 = vmatmul.bf16.gmra.mxu3 %v9073_v24  ;;  %v9163_v24 = vld [vmem:[#allocation4 + $0x230] sm:$0xf0] }
  0x70   :  { %319 = vmatmul.bf16.gmra.mxu0 %v9748_v57 }
  0x71   :  { %358 = vmatmul.bf16.gmra.mxu1 %v9748_v57 }
  0x7d   :  { %542 = vmatmul.bf16.gmra.mxu2 %v9074_v26 }
  0x7e   :  { %581 = vmatmul.bf16.gmra.mxu3 %v9074_v26  ;;  %v9140_v26 = vld [vmem:[#allocation4 + $0x178] sm:$0xf0] }
  0x80   :  { %324 = vmatmul.bf16.gmra.mxu0 %v9750_v21 }
  0x81   :  { %363 = vmatmul.bf16.gmra.mxu1 %v9750_v21  ;;  %v9139_v21 = vld [vmem:[#allocation4 + $0x170] sm:$0xf0] }
  0x8d   :  { %547 = vmatmul.bf16.gmra.mxu2 %v9075_v28 }
  0x8e   :  { %586 = vmatmul.bf16.gmra.mxu3 %v9075_v28  ;;  %v6777_v28 = vor.u32 %v9163_v24, %v6776_v22  ;;  %v6644_v22 = vld [vmem:[#allocation4 + $0x120] sm:$0xf] }
  0x8f   :  { %v6740_v24 = vld [vmem:[#allocation4 + $0x1e0] sm:$0xf] }
  0x90   :  { %329 = vmatmul.bf16.gmra.mxu0 %v9751_v23  ;;  %1320 = vmatpush.bf16.msrb.mxu3 %v6777_v28  ;;  %v6652_v28 = vld [vmem:[#allocation4 + $0x128] sm:$0xf] }
  0x91   :  { %368 = vmatmul.bf16.gmra.mxu1 %v9751_v23  ;;  %v6681_v23 = vor.u32 %v9139_v21, %v6680_v20  ;;  %v6761_v20 = vor.u32 %v9158_v17, %v6760_v16 }
  0x93   :  { %1286 = vmatpush.bf16.msrb.mxu2 %v6681_v23  ;;  %v9130_v23 = vld [vmem:[#allocation4 + $0x128] sm:$0xf0] }
  0x94   :  { %1321 = vmatpush.bf16.msrb.mxu3 %v6765_v58  ;;  %v793_v58 = vld [vmem:[#allocation2] sm:$0x3] }
  0x95   :  { %v10440_v4 = vperm.slane %v793_v58, 0 }
  0x98   :  { %1322 = vmatpush.bf16.msrb.mxu3 %v6753_v14 }
  0x9d   :  { %552 = vmatmul.bf16.gmra.mxu2 %v9076_v32 }
  0x9e   :  { %591 = vmatmul.bf16.gmra.mxu3 %v9076_v32 }
  0xa0   :  { %699 = vmatmul.bf16.vlgmr.msrb.gmra.mxu0 %v9682_v25 }
  0xa1   :  { %738 = vmatmul.bf16.vlgmr.msrb.gmra.mxu1 %v9682_v25  ;;  %v6688_v25 = vld [vmem:[#allocation4 + $0x170] sm:$0xf] }
  0xb0   :  { %704 = vmatmul.bf16.gmra.mxu0 %v9705_v27 }
  0xb1   :  { %743 = vmatmul.bf16.gmra.mxu1 %v9705_v27 }
  0xbd   :  { %v305_v29 = vpop.f32.mrf.mxu0 }
  0xbe   :  { %v344_v31 = vpop.f32.mrf.mxu1  ;;  %v6689_v29 = vor.u32 %v9140_v26, %v6688_v25  ;;  %v6645_v25 = vor.u32 %v9130_v23, %v6644_v22  ;;  %v9154_v26 = vld [vmem:[#allocation4 + $0x1e8] sm:$0xf0] }
  0xbf   :  { %v9164_v31 = vld [vmem:[#allocation4 + $0x238] sm:$0xf0] }
  0xc0   :  { %709 = vmatmul.bf16.gmra.mxu0 %v9706_v30 }
  0xc1   :  { %748 = vmatmul.bf16.gmra.mxu1 %v9706_v30  ;;  %v6784_v30 = vld [vmem:[#allocation4 + $0x230] sm:$0xf]  ;;  %1422 = vmatpush.bf16.msra.mxu0 %v6689_v29  ;;  %v9131_v29 = vld [vmem:[#allocation4 + $0x130] sm:$0xf0] }
  0xc5   :  { %v10364_v33 = vpop.f32.mrf.mxu0  ;;  %1423 = vmatpush.bf16.msra.mxu0 %v6677_v61 }
  0xc6   :  { %v10366_v34 = vpop.f32.mrf.mxu1 }
  0xc9   :  { %1424 = vmatpush.bf16.msra.mxu0 %v6665_v15 }
  0xcd   :  { %v10368_v35 = vpop.f32.mrf.mxu0 }
  0xce   :  { %v10373_v37 = vpop.f32.mrf.mxu1 }
  0xd0   :  { %714 = vmatmul.bf16.gmra.mxu0 %v9707_v36  ;;  %v528_v50 = vpop.f32.mrf.mxu2 }
  0xd1   :  { %753 = vmatmul.bf16.gmra.mxu1 %v9707_v36  ;;  %v567_v51 = vpop.f32.mrf.mxu3  ;;  %v6668_v50 = vld [vmem:[#allocation4 + $0x150] sm:$0xf] }
  0xd2   :  { %v9136_v51 = vld [vmem:[#allocation4 + $0x158] sm:$0xf0] }
  0xd3   :  { %v6669_v53 = vor.u32 %v9136_v51, %v6668_v50  ;;  %v9155_v50 = vld [vmem:[#allocation4 + $0x1f0] sm:$0xf0] }
  0xd5   :  { %v10375_v38 = vpop.f32.mrf.mxu0  ;;  %1287 = vmatpush.bf16.msrb.mxu2 %v6669_v53 }
  0xd6   :  { %v10377_v39 = vpop.f32.mrf.mxu1 }
  0xd8   :  { %v10405_v60 = vpop.f32.mrf.mxu2 }
  0xd9   :  { %v10407_v0 = vpop.f32.mrf.mxu3  ;;  %1288 = vmatpush.bf16.msrb.mxu2 %v6657_v5  ;;  %v10442_v5 = vperm.slane %v793_v58, 1 }
  0xdd   :  { %v10379_v40 = vpop.f32.mrf.mxu0  ;;  %1289 = vmatpush.bf16.msrb.mxu2 %v6645_v25 }
  0xde   :  { %v10384_v42 = vpop.f32.mrf.mxu1 }
  0xe0   :  { %719 = vmatmul.bf16.gmra.mxu0 %v9708_v41  ;;  %v10413_v12 = vpop.f32.mrf.mxu2 }
  0xe1   :  { %758 = vmatmul.bf16.gmra.mxu1 %v9708_v41  ;;  %v10415_v13 = vpop.f32.mrf.mxu3  ;;  %v6785_v41 = vor.u32 %v9164_v31, %v6784_v30  ;;  %v6741_v30 = vor.u32 %v9154_v26, %v6740_v24  ;;  %v6653_v31 = vor.u32 %v9131_v29, %v6652_v28 }
  0xe3   :  { %1456 = vmatpush.bf16.msra.mxu1 %v6785_v41  ;;  %v6748_v41 = vld [vmem:[#allocation4 + $0x1e8] sm:$0xf]  ;;  %1323 = vmatpush.bf16.msrb.mxu3 %v6741_v30 }
  0xe4   :  { %v6749_v51 = vor.u32 %v9155_v50, %v6748_v41  ;;  %1425 = vmatpush.bf16.msra.mxu0 %v6653_v31 }
  0xe5   :  { %v10386_v43 = vpop.f32.mrf.mxu0 }
  0xe6   :  { %v10388_v44 = vpop.f32.mrf.mxu1 }
  0xe7   :  { %1457 = vmatpush.bf16.msra.mxu1 %v6773_v1 }
  0xe8   :  { %v10421_v36 = vpop.f32.mrf.mxu2 }
  0xeb   :  { %1458 = vmatpush.bf16.msra.mxu1 %v6761_v20 }
  0xed   :  { %v10390_v45 = vpop.f32.mrf.mxu0 }
  0xee   :  { %v10395_v47 = vpop.f32.mrf.mxu1 }
  0xef   :  { %1459 = vmatpush.bf16.msra.mxu1 %v6749_v51 }
  0xf0   :  { %724 = vmatmul.bf16.gmra.mxu0 %v9709_v46  ;;  %v10425_v19 = vpop.f32.mrf.mxu2 }
  0xf1   :  { %763 = vmatmul.bf16.gmra.mxu1 %v9709_v46  ;;  %v10423_v46 = vpop.f32.mrf.mxu3 }
  0xf5   :  { %v10397_v48 = vpop.f32.mrf.mxu0 }
  0xf6   :  { %v10399_v49 = vpop.f32.mrf.mxu1 }
  0xf8   :  { %v10429_v54 = vpop.f32.mrf.mxu2 }
  0xf9   :  { %v10427_v21 = vpop.f32.mrf.mxu3 }
  0xfd   :  { %v10401_v57 = vpop.f32.mrf.mxu0 }
  0xfe   :  { %v10403_v59 = vpop.f32.mrf.mxu1 }
 0x100   :  { %v10435_v1 = vpop.f32.mrf.mxu2 }
 0x101   :  { %v10431_v55 = vpop.f32.mrf.mxu3 }
 0x105   :  { %v10409_v9 = vpop.f32.mrf.mxu0 }
 0x106   :  { %v10411_v11 = vpop.f32.mrf.mxu1 }
 0x108   :  { %v10449_v15 = vpop.f32.mrf.mxu2 }
 0x109   :  { %v10437_v2 = vpop.f32.mrf.mxu3 }
 0x10d   :  { %v10417_v27 = vpop.f32.mrf.mxu0 }
 0x10e   :  { %v10419_v32 = vpop.f32.mrf.mxu1 }
 0x110   :  { %v10461_v30 = vpop.f32.mrf.mxu2 }
 0x111   :  { %v10451_v16 = vpop.f32.mrf.mxu3 }
 0x115   :  { %v332_v10 = vpop.f32.mrf.mxu0 }
 0x116   :  { %v371_v18 = vpop.f32.mrf.mxu1 }
 0x11d   :  { %v700_v52 = vpop.f32.mrf.mxu0 }
 0x11e   :  { %v739_v53 = vpop.f32.mrf.mxu1 }
 0x125   :  { %v702_v56 = vpop.f32.mrf.mxu0 }
 0x126   :  { %v703_v61 = vadd.f32 %v702_v56, %v10405_v60  ;;  %v741_v62 = vpop.f32.mrf.mxu1 }
 0x127   :  { %v742_v63 = vadd.f32 %v741_v62, %v10407_v0 }
 0x128   :  { %v771_v3 = vadd.f32 %v703_v61, %v10364_v33 }
 0x129   :  { %v772_v6 = vadd.f32 %v742_v63, %v10366_v34 }
 0x12a   :  { %v801_v7 = vadd.f32 %v10440_v4, %v771_v3 }
 0x12b   :  { %v802_v8 = vadd.f32 %v10442_v5, %v772_v6  ;;  %v10487_v6 = vpop.f32.mrf.mxu2 }
 0x12c   :  { %v825_v33 = vmax.f32 %v801_v7, 0.0 }
 0x12d   :  { %v705_v60 = vpop.f32.mrf.mxu0  ;;  %v826_v17 = vmax.f32 %v802_v8, 0.0 }
 0x12e   :  { %v706_v10 = vadd.f32 %v705_v60, %v10413_v12  ;;  %v744_v0 = vpop.f32.mrf.mxu1 }
 0x12f   :  { %v745_v14 = vadd.f32 %v744_v0, %v10415_v13  ;;  %v10457_v24 = vpack.c.bf16 %v826_v17, %v825_v33 }
 0x130   :  { %v773_v18 = vadd.f32 %v706_v10, %v10368_v35  ;;  %v10463_v35 = vpop.f32.mrf.mxu3 }
 0x131   :  { %v774_v34 = vadd.f32 %v745_v14, %v10373_v37  ;;  %v1039_v31 = vunpack.c.l.b16 %v10457_v24  ;;  %v1040_v52 = vunpack.c.h.b16 %v10457_v24 }
 0x132   :  { %v803_v20 = vadd.f32 %v10440_v4, %v773_v18 }
 0x133   :  { %v804_v22 = vadd.f32 %v10442_v5, %v774_v34 }
 0x134   :  { %v827_v23 = vmax.f32 %v803_v20, 0.0 }
 0x135   :  { %v828_v12 = vmax.f32 %v804_v22, 0.0  ;;  %v707_v25 = vpop.f32.mrf.mxu0 }
 0x136   :  { %v708_v13 = vadd.f32 %v707_v25, %v10421_v36  ;;  %v746_v26 = vpop.f32.mrf.mxu1 }
 0x137   :  { %v922_v28 = vpack.c.bf16 %v828_v12, %v827_v23  ;;  %v747_v29 = vadd.f32 %v746_v26, %v10423_v46 }
 0x138   :  { %v775_v37 = vadd.f32 %v708_v13, %v10375_v38  ;;  %v10489_v7 = vpop.f32.mrf.mxu3 }
 0x139   :  { %v1042_v41 = vunpack.c.h.b16 %v922_v28  ;;  %v776_v50 = vadd.f32 %v747_v29, %v10377_v39  ;;  %v1041_v51 = vunpack.c.l.b16 %v922_v28 }
 0x13a   :  { %v805_v36 = vadd.f32 %v10440_v4, %v775_v37 }
 0x13b   :  { %v806_v53 = vadd.f32 %v10442_v5, %v776_v50  ;;  %v10473_v46 = vpack.c.b16 %v1041_v51, %v1039_v31  ;;  %v10477_v38 = vpack.c.b16 %v1042_v41, %v1040_v52 }
 0x13c   :  { %v829_v56 = vmax.f32 %v805_v36, 0.0 }
 0x13d   :  { %v830_v58 = vmax.f32 %v806_v53, 0.0  ;;  %1290 = vmatmul.bf16.vlgmr.msrb.gmra.mxu2 %v10473_v46  ;;  %6786 = vmatmul.msk.bf16.vlgmr.msrb.gmra.mxu3 %vm1266_vm0, %v10477_v38  ;;  %v710_v39 = vpop.f32.mrf.mxu0  ;;  %v9186_v53 = vld [vmem:[#allocation4 + $0x2ec] sm:$0xf] }
 0x13e   :  { %1426 = vmatmul.bf16.vlgmr.msra.gmra.mxu0 %v10473_v46  ;;  %6796 = vmatmul.msk.bf16.vlgmr.msra.gmra.mxu1 %vm1266_vm0, %v10477_v38  ;;  %v711_v61 = vadd.f32 %v710_v39, %v10425_v19  ;;  %v749_v62 = vpop.f32.mrf.mxu1 }
 0x13f   :  { %v750_v63 = vadd.f32 %v749_v62, %v10427_v21  ;;  %v923_v3 = vpack.c.bf16 %v830_v58, %v829_v56  ;;  %v6889_v56 = vld [vmem:[#allocation4 + $0x2f4] sm:$0xf0] }
 0x140   :  { %v777_v8 = vadd.f32 %v711_v61, %v10379_v40  ;;  %v10503_v12 = vpop.f32.mrf.mxu3  ;;  %v6892_v61 = vor.u32 %v9186_v53, %v6889_v56  ;;  %v6694_v53 = vld [vmem:[#allocation4 + $0x18c] sm:$0xf0]  ;;  %v9177_v56 = vld [vmem:[#allocation4 + $0x2a4] sm:$0xf] }
 0x141   :  { %v778_v60 = vadd.f32 %v750_v63, %v10384_v42  ;;  %v1043_v10 = vunpack.c.l.b16 %v923_v3  ;;  %v1044_v0 = vunpack.c.h.b16 %v923_v3  ;;  %v10501_v42 = vpop.f32.mrf.mxu2 }
 0x142   :  { %v807_v14 = vadd.f32 %v10440_v4, %v777_v8  ;;  %1828 = vmatpush.bf16.msrb.mxu0 %v6892_v61  ;;  %v6853_v61 = vld [vmem:[#allocation4 + $0x2ac] sm:$0xf0] }
 0x143   :  { %v808_v33 = vadd.f32 %v10442_v5, %v778_v60  ;;  %v10495_v17 = vpack.c.b16 %v1043_v10, %v1041_v51  ;;  %v10497_v19 = vpack.c.b16 %v1044_v0, %v1042_v41  ;;  %v6730_v51 = vld [vmem:[#allocation4 + $0x1d4] sm:$0xf0] }
 0x144   :  { %v831_v21 = vmax.f32 %v807_v14, 0.0  ;;  %v9183_v14 = vld [vmem:[#allocation4 + $0x2d4] sm:$0xf] }
 0x145   :  { %v832_v18 = vmax.f32 %v808_v33, 0.0  ;;  %v712_v34 = vpop.f32.mrf.mxu0 }
 0x146   :  { %v713_v20 = vadd.f32 %v712_v34, %v10429_v54  ;;  %v751_v22 = vpop.f32.mrf.mxu1 }
 0x147   :  { %v924_v23 = vpack.c.bf16 %v832_v18, %v831_v21  ;;  %v752_v40 = vadd.f32 %v751_v22, %v10431_v55  ;;  %v9150_v55 = vld [vmem:[#allocation4 + $0x1cc] sm:$0xf] }
 0x148   :  { %v779_v25 = vadd.f32 %v713_v20, %v10386_v43  ;;  %v594_v8 = vpop.f32.mrf.mxu3 }
 0x149   :  { %v780_v13 = vadd.f32 %v752_v40, %v10388_v44  ;;  %v1045_v26 = vunpack.c.l.b16 %v924_v23  ;;  %v1046_v28 = vunpack.c.h.b16 %v924_v23  ;;  %v6733_v44 = vor.u32 %v9150_v55, %v6730_v51  ;;  %v555_v3 = vpop.f32.mrf.mxu2  ;;  %v6865_v55 = vld [vmem:[#allocation4 + $0x2c4] sm:$0xf0] }
 0x14a   :  { %v809_v29 = vadd.f32 %v10440_v4, %v779_v25  ;;  %v9144_v25 = vld [vmem:[#allocation4 + $0x19c] sm:$0xf]  ;;  %v6856_v3 = vor.u32 %v9177_v56, %v6853_v61  ;;  %v6925_v61 = vld [vmem:[#allocation4 + $0x33c] sm:$0xf0] }
 0x14b   :  { %v810_v37 = vadd.f32 %v10442_v5, %v780_v13  ;;  %v10509_v41 = vpack.c.b16 %v1045_v26, %v1043_v10  ;;  %v10511_v54 = vpack.c.b16 %v1046_v28, %v1044_v0  ;;  %1350 = vmatpush.bf16.msra.mxu2 %v6733_v44  ;;  %v9147_v10 = vld [vmem:[#allocation4 + $0x1b4] sm:$0xf]  ;;  %v6718_v0 = vld [vmem:[#allocation4 + $0x1bc] sm:$0xf0]  ;;  %v6706_v13 = vld [vmem:[#allocation4 + $0x1a4] sm:$0xf0] }
 0x14c   :  { %v833_v50 = vmax.f32 %v809_v29, 0.0  ;;  %v6721_v34 = vor.u32 %v9147_v10, %v6718_v0  ;;  %v9138_v0 = vld [vmem:[#allocation4 + $0x16c] sm:$0xf] }
 0x14d   :  { %v834_v36 = vmax.f32 %v810_v37, 0.0  ;;  %1295 = vmatmul.bf16.gmra.mxu2 %v10509_v41  ;;  %6787 = vmatmul.msk.bf16.gmra.mxu3 %vm1266_vm0, %v10511_v54  ;;  %v715_v43 = vpop.f32.mrf.mxu0  ;;  %v6709_v37 = vor.u32 %v9144_v25, %v6706_v13  ;;  %v9198_v25 = vld [vmem:[#allocation4 + $0x34c] sm:$0xf] }
 0x14e   :  { %1431 = vmatmul.bf16.gmra.mxu0 %v10509_v41  ;;  %6797 = vmatmul.msk.bf16.gmra.mxu1 %vm1266_vm0, %v10511_v54  ;;  %v716_v58 = vadd.f32 %v715_v43, %v10435_v1  ;;  %v754_v39 = vpop.f32.mrf.mxu1  ;;  %v6877_v1 = vld [vmem:[#allocation4 + $0x2dc] sm:$0xf0] }
 0x14f   :  { %v755_v62 = vadd.f32 %v754_v39, %v10437_v2  ;;  %v925_v63 = vpack.c.bf16 %v834_v36, %v833_v50  ;;  %v6880_v22 = vor.u32 %v9183_v14, %v6877_v1  ;;  %1351 = vmatpush.bf16.msra.mxu2 %v6721_v34  ;;  %v9180_v50 = vld [vmem:[#allocation4 + $0x2bc] sm:$0xf]  ;;  %v6682_v14 = vld [vmem:[#allocation4 + $0x174] sm:$0xf0]  ;;  %v9162_v1 = vld [vmem:[#allocation4 + $0x22c] sm:$0xf] }
 0x150   :  { %v781_v60 = vadd.f32 %v716_v58, %v10390_v45  ;;  %v6868_v43 = vor.u32 %v9180_v50, %v6865_v55  ;;  %v6685_v34 = vor.u32 %v9138_v0, %v6682_v14  ;;  %v9135_v50 = vld [vmem:[#allocation4 + $0x154] sm:$0xf]  ;;  %v6670_v55 = vld [vmem:[#allocation4 + $0x15c] sm:$0xf0] }
 0x151   :  { %v782_v33 = vadd.f32 %v755_v62, %v10395_v47  ;;  %v1047_v21 = vunpack.c.l.b16 %v925_v63  ;;  %v1048_v18 = vunpack.c.h.b16 %v925_v63  ;;  %1829 = vmatpush.bf16.msrb.mxu0 %v6880_v22 }
 0x152   :  { %v811_v20 = vadd.f32 %v10440_v4, %v781_v60 }
 0x153   :  { %v812_v2 = vadd.f32 %v10442_v5, %v782_v33  ;;  %v10525_v23 = vpack.c.b16 %v1047_v21, %v1045_v26  ;;  %v10527_v40 = vpack.c.b16 %v1048_v18, %v1046_v28  ;;  %1352 = vmatpush.bf16.msra.mxu2 %v6709_v37  ;;  %v9141_v28 = vld [vmem:[#allocation4 + $0x184] sm:$0xf]  ;;  %v6937_v37 = vld [vmem:[#allocation4 + $0x354] sm:$0xf0] }
 0x154   :  { %v835_v45 = vmax.f32 %v811_v20, 0.0  ;;  %v6697_v39 = vor.u32 %v9141_v28, %v6694_v53  ;;  %v6778_v20 = vld [vmem:[#allocation4 + $0x234] sm:$0xf0] }
 0x155   :  { %v836_v29 = vmax.f32 %v812_v2, 0.0  ;;  %v717_v47 = vpop.f32.mrf.mxu0  ;;  %1830 = vmatpush.bf16.msrb.mxu0 %v6868_v43  ;;  %v6781_v22 = vor.u32 %v9162_v1, %v6778_v20  ;;  %v9174_v2 = vld [vmem:[#allocation4 + $0x28c] sm:$0xf]  ;;  %v6673_v43 = vor.u32 %v9135_v50, %v6670_v55  ;;  %v6817_v1 = vld [vmem:[#allocation4 + $0x264] sm:$0xf0] }
 0x156   :  { %v718_v51 = vadd.f32 %v717_v47, %v10449_v15  ;;  %v756_v36 = vpop.f32.mrf.mxu1  ;;  %v6742_v50 = vld [vmem:[#allocation4 + $0x1ec] sm:$0xf0] }
 0x157   :  { %v10530_v44 = vpack.c.bf16 %v836_v29, %v835_v45  ;;  %v757_v26 = vadd.f32 %v756_v36, %v10451_v16  ;;  %1353 = vmatpush.bf16.msra.mxu2 %v6697_v39  ;;  %v6841_v45 = vld [vmem:[#allocation4 + $0x294] sm:$0xf0]  ;;  %1388 = vmatpush.bf16.msra.mxu3 %v6781_v22  ;;  %v6940_v36 = vor.u32 %v9198_v25, %v6937_v37  ;;  %v9195_v39 = vld [vmem:[#allocation4 + $0x334] sm:$0xf]  ;;  %v6913_v22 = vld [vmem:[#allocation4 + $0x324] sm:$0xf0] }
 0x158   :  { %v783_v58 = vadd.f32 %v718_v51, %v10397_v48  ;;  %v6844_v47 = vor.u32 %v9174_v2, %v6841_v45  ;;  %v9153_v37 = vld [vmem:[#allocation4 + $0x1e4] sm:$0xf] }
 0x159   :  { %v784_v62 = vadd.f32 %v757_v26, %v10399_v49  ;;  %v1049_v63 = vunpack.c.l.b16 %v10530_v44  ;;  %v1050_v15 = vunpack.c.h.b16 %v10530_v44  ;;  %1831 = vmatpush.bf16.msrb.mxu0 %v6856_v3  ;;  %v6766_v44 = vld [vmem:[#allocation4 + $0x21c] sm:$0xf0]  ;;  %v9171_v26 = vld [vmem:[#allocation4 + $0x274] sm:$0xf]  ;;  %1866 = vmatpush.bf16.msrb.mxu1 %v6940_v36  ;;  %v6928_v3 = vor.u32 %v9195_v39, %v6925_v61 }
 0x15a   :  { %v813_v8 = vadd.f32 %v10440_v4, %v783_v58  ;;  %v6829_v58 = vld [vmem:[#allocation4 + $0x27c] sm:$0xf0] }
 0x15b   :  { %v814_v16 = vadd.f32 %v10442_v5, %v784_v62  ;;  %v10539_v60 = vpack.c.b16 %v1049_v63, %v1047_v21  ;;  %v10541_v10 = vpack.c.b16 %v1050_v15, %v1048_v18  ;;  %1354 = vmatpush.bf16.msra.mxu2 %v6685_v34  ;;  %v9168_v34 = vld [vmem:[#allocation4 + $0x25c] sm:$0xf] }
 0x15c   :  { %v837_v48 = vmax.f32 %v813_v8, 0.0  ;;  %v9132_v8 = vld [vmem:[#allocation4 + $0x13c] sm:$0xf]  ;;  %v6820_v25 = vor.u32 %v9168_v34, %v6817_v1 }
 0x15d   :  { %v838_v33 = vmax.f32 %v814_v16, 0.0  ;;  %1300 = vmatmul.bf16.gmra.mxu2 %v10539_v60  ;;  %6788 = vmatmul.msk.bf16.gmra.mxu3 %vm1266_vm0, %v10541_v10  ;;  %v720_v49 = vpop.f32.mrf.mxu0  ;;  %v6658_v16 = vld [vmem:[#allocation4 + $0x144] sm:$0xf0] }
 0x15e   :  { %1436 = vmatmul.bf16.gmra.mxu0 %v10539_v60  ;;  %6798 = vmatmul.msk.bf16.gmra.mxu1 %vm1266_vm0, %v10541_v10  ;;  %v721_v21 = vadd.f32 %v720_v49, %v10461_v30  ;;  %v759_v18 = vpop.f32.mrf.mxu1  ;;  %v9159_v30 = vld [vmem:[#allocation4 + $0x214] sm:$0xf]  ;;  %v6754_v49 = vld [vmem:[#allocation4 + $0x204] sm:$0xf0] }
 0x15f   :  { %v760_v13 = vadd.f32 %v759_v18, %v10463_v35  ;;  %v10551_v29 = vpack.c.bf16 %v838_v33, %v837_v48  ;;  %1832 = vmatpush.bf16.msrb.mxu0 %v6844_v47  ;;  %v6769_v56 = vor.u32 %v9159_v30, %v6766_v44  ;;  %v9156_v48 = vld [vmem:[#allocation4 + $0x1fc] sm:$0xf]  ;;  %1355 = vmatpush.bf16.msra.mxu2 %v6673_v43  ;;  %v9165_v43 = vld [vmem:[#allocation4 + $0x244] sm:$0xf]  ;;  %v6805_v30 = vld [vmem:[#allocation4 + $0x24c] sm:$0xf0] }
 0x160   :  { %v785_v51 = vadd.f32 %v721_v21, %v10401_v57  ;;  %v6832_v57 = vor.u32 %v9171_v26, %v6829_v58  ;;  %v6661_v33 = vor.u32 %v9132_v8, %v6658_v16  ;;  %v6757_v21 = vor.u32 %v9156_v48, %v6754_v49  ;;  %v9192_v18 = vld [vmem:[#allocation4 + $0x31c] sm:$0xf]  ;;  %1867 = vmatpush.bf16.msrb.mxu1 %v6928_v3 }
 0x161   :  { %v786_v28 = vadd.f32 %v760_v13, %v10403_v59  ;;  %v1051_v53 = vunpack.c.l.b16 %v10551_v29  ;;  %v1052_v35 = vunpack.c.h.b16 %v10551_v29  ;;  %1389 = vmatpush.bf16.msra.mxu3 %v6769_v56  ;;  %v9129_v13 = vld [vmem:[#allocation4 + $0x124] sm:$0xf]  ;;  %v6646_v29 = vld [vmem:[#allocation4 + $0x12c] sm:$0xf0]  ;;  %v6916_v47 = vor.u32 %v9192_v18, %v6913_v22 }
 0x162   :  { %v815_v62 = vadd.f32 %v10440_v4, %v785_v51  ;;  %v6649_v36 = vor.u32 %v9129_v13, %v6646_v29  ;;  %v6745_v26 = vor.u32 %v9153_v37, %v6742_v50  ;;  %v6901_v56 = vld [vmem:[#allocation4 + $0x30c] sm:$0xf0]  ;;  %v9187_v29 = vld [vmem:[#allocation4 + $0x2f0] sm:$0xf0]  ;;  %v9184_v37 = vld [vmem:[#allocation4 + $0x2d8] sm:$0xf0] }
 0x163   :  { %v816_v0 = vadd.f32 %v10442_v5, %v786_v28  ;;  %v10559_v59 = vpack.c.b16 %v1051_v53, %v1049_v63  ;;  %v10561_v14 = vpack.c.b16 %v1052_v35, %v1050_v15  ;;  %1833 = vmatpush.bf16.msrb.mxu0 %v6832_v57  ;;  %1356 = vmatpush.bf16.msra.mxu2 %v6661_v33  ;;  %v9189_v28 = vld [vmem:[#allocation4 + $0x304] sm:$0xf]  ;;  %v7034_v50 = vld [vmem:[#allocation4 + $0x90] sm:$0xf] }
 0x164   :  { %v839_v20 = vmax.f32 %v815_v62, 0.0  ;;  %1868 = vmatpush.bf16.msrb.mxu1 %v6916_v47  ;;  %v6808_v62 = vor.u32 %v9165_v43, %v6805_v30  ;;  %v9115_v47 = vld [vmem:[#allocation4 + $0xb0] sm:$0xf0]  ;;  %v7022_v43 = vld [vmem:[#allocation4 + $0x78] sm:$0xf] }
 0x165   :  { %v840_v2 = vmax.f32 %v816_v0, 0.0  ;;  %v722_v45 = vpop.f32.mrf.mxu0  ;;  %1390 = vmatpush.bf16.msra.mxu3 %v6757_v21 }
 0x166   :  { %v723_v63 = vadd.f32 %v722_v45, %v10487_v6  ;;  %v761_v15 = vpop.f32.mrf.mxu1 }
 0x167   :  { %v928_v55 = vpack.c.bf16 %v840_v2, %v839_v20  ;;  %v762_v51 = vadd.f32 %v761_v15, %v10489_v7  ;;  %1834 = vmatpush.bf16.msrb.mxu0 %v6820_v25  ;;  %1357 = vmatpush.bf16.msra.mxu2 %v6649_v36 }
 0x168   :  { %v787_v44 = vadd.f32 %v723_v63, %v10409_v9  ;;  %v6904_v9 = vor.u32 %v9189_v28, %v6901_v56  ;;  %v7046_v63 = vld [vmem:[#allocation4 + $0xa8] sm:$0xf]  ;;  %v6851_v28 = vld [vmem:[#allocation4 + $0x2a0] sm:$0xf]  ;;  %v9178_v56 = vld [vmem:[#allocation4 + $0x2a8] sm:$0xf0] }
 0x169   :  { %v788_v6 = vadd.f32 %v762_v51, %v10411_v11  ;;  %v1053_v58 = vunpack.c.l.b16 %v928_v55  ;;  %v1054_v39 = vunpack.c.h.b16 %v928_v55  ;;  %1391 = vmatpush.bf16.msra.mxu3 %v6745_v26  ;;  %v9112_v51 = vld [vmem:[#allocation4 + $0x98] sm:$0xf0] }
 0x16a   :  { %v817_v61 = vadd.f32 %v10440_v4, %v787_v44  ;;  %1869 = vmatpush.bf16.msrb.mxu1 %v6904_v9  ;;  %v7035_v36 = vor.u32 %v9112_v51, %v7034_v50  ;;  %v9109_v44 = vld [vmem:[#allocation4 + $0x80] sm:$0xf0]  ;;  %v6935_v9 = vld [vmem:[#allocation4 + $0x348] sm:$0xf] }
 0x16b   :  { %v818_v7 = vadd.f32 %v10442_v5, %v788_v6  ;;  %v10569_v57 = vpack.c.b16 %v1053_v58, %v1051_v53  ;;  %v10571_v3 = vpack.c.b16 %v1054_v39, %v1052_v35  ;;  %1835 = vmatpush.bf16.msrb.mxu0 %v6808_v62  ;;  %v7023_v26 = vor.u32 %v9109_v44, %v7022_v43  ;;  %v7010_v6 = vld [vmem:[#allocation4 + $0x60] sm:$0xf]  ;;  %v6839_v62 = vld [vmem:[#allocation4 + $0x288] sm:$0xf]  ;;  %v9097_v50 = vld [vmem:[#allocation4 + $0x20] sm:$0xf0] }
 0x16c   :  { %v841_v8 = vmax.f32 %v817_v61, 0.0  ;;  %v6803_v43 = vld [vmem:[#allocation4 + $0x240] sm:$0xf] }
 0x16d   :  { %v842_v16 = vmax.f32 %v818_v7, 0.0  ;;  %1305 = vmatmul.bf16.gmra.mxu2 %v10569_v57  ;;  %6789 = vmatmul.msk.bf16.gmra.mxu3 %vm1266_vm0, %v10571_v3  ;;  %v725_v11 = vpop.f32.mrf.mxu0  ;;  %v9175_v7 = vld [vmem:[#allocation4 + $0x290] sm:$0xf0]  ;;  %v6899_v44 = vld [vmem:[#allocation4 + $0x300] sm:$0xf] }
 0x16e   :  { %1441 = vmatmul.bf16.gmra.mxu0 %v10569_v57  ;;  %6799 = vmatmul.msk.bf16.gmra.mxu1 %vm1266_vm0, %v10571_v3  ;;  %v726_v53 = vadd.f32 %v725_v11, %v10501_v42  ;;  %v764_v35 = vpop.f32.mrf.mxu1  ;;  %v6998_v11 = vld [vmem:[#allocation4 + $0x48] sm:$0xf] }
 0x16f   :  { %v765_v48 = vadd.f32 %v764_v35, %v10503_v12  ;;  %v929_v0 = vpack.c.bf16 %v842_v16, %v841_v8  ;;  %v6840_v8 = vor.u32 %v9175_v7, %v6839_v62  ;;  %v9199_v16 = vld [vmem:[#allocation4 + $0x350] sm:$0xf0]  ;;  %v9118_v62 = vld [vmem:[#allocation4 + $0xc8] sm:$0xf0] }
 0x170   :  { %v789_v33 = vadd.f32 %v726_v53, %v10417_v27  ;;  %v9103_v53 = vld [vmem:[#allocation4 + $0x50] sm:$0xf0]  ;;  %v6936_v35 = vor.u32 %v9199_v16, %v6935_v9 }
 0x171   :  { %v790_v49 = vadd.f32 %v765_v48, %v10419_v32  ;;  %v1055_v34 = vunpack.c.l.b16 %v929_v0  ;;  %v1056_v1 = vunpack.c.h.b16 %v929_v0  ;;  %v6999_v48 = vor.u32 %v9103_v53, %v6998_v11  ;;  %v7094_v0 = vld [vmem:[#allocation4 + $0x108] sm:$0xf] }
 0x172   :  { %v819_v20 = vadd.f32 %v10440_v4, %v789_v33  ;;  %v9127_v33 = vld [vmem:[#allocation4 + $0x110] sm:$0xf0]  ;;  %1798 = vmatpush.bf16.msrb.mxu3 %v6936_v35 }
 0x173   :  { %v820_v21 = vadd.f32 %v10442_v5, %v790_v49  ;;  %v10585_v18 = vpack.c.b16 %v1055_v34, %v1053_v58  ;;  %v10587_v22 = vpack.c.b16 %v1056_v1, %v1054_v39  ;;  %v6887_v5 = vld [vmem:[#allocation4 + $0x2e8] sm:$0xf]  ;;  %v6852_v58 = vor.u32 %v9178_v56, %v6851_v28  ;;  %v9106_v39 = vld [vmem:[#allocation4 + $0x68] sm:$0xf0]  ;;  %v6962_v56 = vld [vmem:[#allocation4] sm:$0xf] }
 0x174   :  { %v843_v42 = vmax.f32 %v819_v20, 0.0  ;;  %v6888_v15 = vor.u32 %v9187_v29, %v6887_v5  ;;  %v7011_v61 = vor.u32 %v9106_v39, %v7010_v6  ;;  %v7095_v49 = vor.u32 %v9127_v33, %v7094_v0  ;;  %v9196_v20 = vld [vmem:[#allocation4 + $0x338] sm:$0xf0]  ;;  %v9190_v28 = vld [vmem:[#allocation4 + $0x308] sm:$0xf0] }
 0x175   :  { %v844_v2 = vmax.f32 %v820_v21, 0.0  ;;  %v727_v12 = vpop.f32.mrf.mxu0  ;;  %v6986_v21 = vld [vmem:[#allocation4 + $0x30] sm:$0xf]  ;;  %v9124_v5 = vld [vmem:[#allocation4 + $0xf8] sm:$0xf0] }
 0x176   :  { %v766_v45 = vpop.f32.mrf.mxu1  ;;  %1760 = vmatpush.bf16.msrb.mxu2 %v6888_v15  ;;  %2203 = vmatpush.bf16.msra.mxu1 %v7095_v49  ;;  %v9169_v15 = vld [vmem:[#allocation4 + $0x260] sm:$0xf0]  ;;  %v9094_v6 = vld [vmem:[#allocation4 + $0x8] sm:$0xf0] }
 0x177   :  { %v10589_v25 = vpack.c.bf16 %v844_v2, %v843_v42  ;;  %v9100_v42 = vld [vmem:[#allocation4 + $0x38] sm:$0xf0]  ;;  %v7082_v45 = vld [vmem:[#allocation4 + $0xf0] sm:$0xf]  ;;  %v6963_v39 = vor.u32 %v9094_v6, %v6962_v56 }
 0x178   :  { %v6987_v12 = vor.u32 %v9100_v42, %v6986_v21  ;;  %v7083_v29 = vor.u32 %v9124_v5, %v7082_v45  ;;  %v9116_v6 = vld [vmem:[#allocation4 + $0xb8] sm:$0xf0] }
 0x179   :  { %v1057_v27 = vunpack.c.l.b16 %v10589_v25  ;;  %v1058_v32 = vunpack.c.h.b16 %v10589_v25 }
 0x17a   :  { %2204 = vmatpush.bf16.msra.mxu1 %v7083_v29 }
 0x17b   :  { %v10595_v13 = vpack.c.b16 %v1057_v27, %v1055_v34  ;;  %v10599_v4 = vpack.c.b16 %v1058_v32, %v1056_v1  ;;  %v9172_v34 = vld [vmem:[#allocation4 + $0x278] sm:$0xf0] }
 0x17d   :  { %1310 = vmatmul.bf16.gmra.mxu2 %v10595_v13  ;;  %6790 = vmatmul.msk.bf16.gmra.mxu3 %vm1266_vm0, %v10599_v4 }
 0x17e   :  { %1446 = vmatmul.bf16.gmra.mxu0 %v10595_v13  ;;  %6800 = vmatmul.msk.bf16.gmra.mxu1 %vm1266_vm0, %v10599_v4 }
 0x18d   :  { %1358 = vmatmul.bf16.vlgmr.msra.gmra.mxu2 %v10473_v46  ;;  %6791 = vmatmul.msk.bf16.vlgmr.msra.gmra.mxu3 %vm1266_vm0, %v10477_v38  ;;  %v7047_v46 = vor.u32 %v9115_v47, %v7046_v63  ;;  %v6875_v38 = vld [vmem:[#allocation4 + $0x2d0] sm:$0xf]  ;;  %v6815_v63 = vld [vmem:[#allocation4 + $0x258] sm:$0xf] }
 0x18e   :  { %1836 = vmatmul.bf16.vlgmr.msrb.gmra.mxu0 %v10495_v17  ;;  %6950 = vmatmul.msk.bf16.vlgmr.msrb.gmra.mxu1 %vm1266_vm0, %v10497_v19  ;;  %v6876_v55 = vor.u32 %v9184_v37, %v6875_v38  ;;  %v6911_v47 = vld [vmem:[#allocation4 + $0x318] sm:$0xf]  ;;  %v9193_v38 = vld [vmem:[#allocation4 + $0x320] sm:$0xf0] }
 0x18f   :  { %2165 = vmatpush.bf16.msra.mxu0 %v7047_v46  ;;  %v6816_v46 = vor.u32 %v9169_v15, %v6815_v63  ;;  %v6974_v37 = vld [vmem:[#allocation4 + $0x18] sm:$0xf] }
 0x190   :  { %1761 = vmatpush.bf16.msrb.mxu2 %v6876_v55  ;;  %v6912_v55 = vor.u32 %v9193_v38, %v6911_v47  ;;  %v6975_v51 = vor.u32 %v9097_v50, %v6974_v37 }
 0x193   :  { %2166 = vmatpush.bf16.msra.mxu0 %v7035_v36  ;;  %v7070_v36 = vld [vmem:[#allocation4 + $0xd8] sm:$0xf] }
 0x197   :  { %2167 = vmatpush.bf16.msra.mxu0 %v7023_v26 }
 0x19b   :  { %2168 = vmatpush.bf16.msra.mxu0 %v7011_v61  ;;  %v7058_v61 = vld [vmem:[#allocation4 + $0xc0] sm:$0xf] }
 0x19d   :  { %1363 = vmatmul.bf16.gmra.mxu2 %v10509_v41  ;;  %6792 = vmatmul.msk.bf16.gmra.mxu3 %vm1266_vm0, %v10511_v54  ;;  %v6863_v41 = vld [vmem:[#allocation4 + $0x2b8] sm:$0xf]  ;;  %v9181_v54 = vld [vmem:[#allocation4 + $0x2c0] sm:$0xf0] }
 0x19e   :  { %1841 = vmatmul.bf16.gmra.mxu0 %v10525_v23  ;;  %6951 = vmatmul.msk.bf16.gmra.mxu1 %vm1266_vm0, %v10527_v40  ;;  %v6864_v30 = vor.u32 %v9181_v54, %v6863_v41  ;;  %v9121_v41 = vld [vmem:[#allocation4 + $0xe0] sm:$0xf0] }
 0x19f   :  { %2169 = vmatpush.bf16.msra.mxu0 %v6999_v48  ;;  %v7071_v54 = vor.u32 %v9121_v41, %v7070_v36 }
 0x1a0   :  { %1762 = vmatpush.bf16.msrb.mxu2 %v6864_v30  ;;  %v9166_v30 = vld [vmem:[#allocation4 + $0x248] sm:$0xf0] }
 0x1a1   :  { %2205 = vmatpush.bf16.msra.mxu1 %v7071_v54  ;;  %v6804_v26 = vor.u32 %v9166_v30, %v6803_v43 }
 0x1a3   :  { %2170 = vmatpush.bf16.msra.mxu0 %v6987_v12 }
 0x1a4   :  { %1763 = vmatpush.bf16.msrb.mxu2 %v6852_v58  ;;  %v6900_v58 = vor.u32 %v9190_v28, %v6899_v44  ;;  %v6895_v44 = vld [vmem:[#allocation4 + $0x2f0] sm:$0xf] }
 0x1a5   :  { %v7054_v28 = vld [vmem:[#allocation4 + $0xb0] sm:$0xf] }
 0x1a7   :  { %2171 = vmatpush.bf16.msra.mxu0 %v6975_v51 }
 0x1a8   :  { %1764 = vmatpush.bf16.msrb.mxu2 %v6840_v8  ;;  %v7059_v8 = vor.u32 %v9118_v62, %v7058_v61  ;;  %v6883_v62 = vld [vmem:[#allocation4 + $0x2d8] sm:$0xf] }
 0x1aa   :  { %2206 = vmatpush.bf16.msra.mxu1 %v7059_v8 }
 0x1ab   :  { %2172 = vmatpush.bf16.msra.mxu0 %v6963_v39 }
 0x1ad   :  { %1368 = vmatmul.bf16.gmra.mxu2 %v10539_v60  ;;  %6793 = vmatmul.msk.bf16.gmra.mxu3 %vm1266_vm0, %v10541_v10  ;;  %v6827_v60 = vld [vmem:[#allocation4 + $0x270] sm:$0xf] }
 0x1ae   :  { %1846 = vmatmul.bf16.gmra.mxu0 %v10559_v59  ;;  %6952 = vmatmul.msk.bf16.gmra.mxu1 %vm1266_vm0, %v10561_v14  ;;  %v6923_v10 = vld [vmem:[#allocation4 + $0x330] sm:$0xf]  ;;  %v6828_v1 = vor.u32 %v9172_v34, %v6827_v60  ;;  %v9957_v34 = vmov 0.0|0.0  }
 0x1af   :  { %v6924_v2 = vor.u32 %v9196_v20, %v6923_v10  ;;  %v1537_v10 = vunpack.c.h.b16 %v9957_v34 }
 0x1b0   :  { %1765 = vmatpush.bf16.msrb.mxu2 %v6828_v1 }
 0x1b1   :  { %1799 = vmatpush.bf16.msrb.mxu3 %v6924_v2  ;;  %v10647_v2 = vpack.c.b16 %v1537_v10, %v1058_v32 }
 0x1b4   :  { %1766 = vmatpush.bf16.msrb.mxu2 %v6816_v46  ;;  %v10667_v46 = vpack.c.b16 %v1040_v52, %v1537_v10  ;;  %v7030_v10 = vld [vmem:[#allocation4 + $0x80] sm:$0xf] }
 0x1b5   :  { %1800 = vmatpush.bf16.msrb.mxu3 %v6912_v55 }
 0x1b8   :  { %1767 = vmatpush.bf16.msrb.mxu2 %v6804_v26  ;;  %v9188_v26 = vld [vmem:[#allocation4 + $0x2f8] sm:$0xf0] }
 0x1b9   :  { %1801 = vmatpush.bf16.msrb.mxu3 %v6900_v58  ;;  %v6896_v56 = vor.u32 %v9188_v26, %v6895_v44  ;;  %v7055_v58 = vor.u32 %v9116_v6, %v7054_v28  ;;  %v9200_v26 = vld [vmem:[#allocation4 + $0x358] sm:$0xf0]  ;;  %v7006_v28 = vld [vmem:[#allocation4 + $0x50] sm:$0xf] }
 0x1bb   :  { %v1427_v7 = vpop.f32.mrf.mxu0  ;;  %v1461_v9 = vpop.f32.mrf.mxu1  ;;  %2301 = vmatpush.bf16.msrb.mxu0 %v7055_v58 }
 0x1bc   :  { %v10625_v16 = vadd.f32 %v1461_v9, %v1427_v7  ;;  %1896 = vmatpush.bf16.msra.mxu2 %v6896_v56  ;;  %v9185_v7 = vld [vmem:[#allocation4 + $0x2e0] sm:$0xf0]  ;;  %v7042_v9 = vld [vmem:[#allocation4 + $0x98] sm:$0xf]  ;;  %v9104_v56 = vld [vmem:[#allocation4 + $0x58] sm:$0xf0] }
 0x1bd   :  { %1373 = vmatmul.bf16.gmra.mxu2 %v10569_v57  ;;  %6794 = vmatmul.msk.bf16.gmra.mxu3 %vm1266_vm0, %v10571_v3  ;;  %v1536_v3 = vunpack.c.l.b16 %v9957_v34  ;;  %v6871_v34 = vld [vmem:[#allocation4 + $0x2c0] sm:$0xf]  ;;  %v7007_v58 = vor.u32 %v9104_v56, %v7006_v28  ;;  %v9122_v28 = vld [vmem:[#allocation4 + $0xe8] sm:$0xf0] }
 0x1be   :  { %1851 = vmatmul.bf16.gmra.mxu0 %v10585_v18  ;;  %6953 = vmatmul.msk.bf16.gmra.mxu1 %vm1266_vm0, %v10587_v22 }
 0x1bf   :  { %v10643_v42 = vpack.c.b16 %v1536_v3, %v1057_v27 }
 0x1c0   :  { %v1291_v11 = vpop.f32.mrf.mxu2  ;;  %v1325_v53 = vpop.f32.mrf.mxu3 }
 0x1c1   :  { %v10633_v35 = vadd.f32 %v1325_v53, %v1291_v11  ;;  %v6884_v11 = vor.u32 %v9185_v7, %v6883_v62  ;;  %v9113_v53 = vld [vmem:[#allocation4 + $0xa0] sm:$0xf0] }
 0x1c3   :  { %v1429_v48 = vpop.f32.mrf.mxu0  ;;  %v1463_v0 = vpop.f32.mrf.mxu1  ;;  %1897 = vmatpush.bf16.msra.mxu2 %v6884_v11  ;;  %v6835_v11 = vld [vmem:[#allocation4 + $0x278] sm:$0xf] }
 0x1c4   :  { %v10635_v33 = vadd.f32 %v1463_v0, %v1429_v48  ;;  %v7043_v48 = vor.u32 %v9113_v53, %v7042_v9  ;;  %v9173_v53 = vld [vmem:[#allocation4 + $0x280] sm:$0xf0] }
 0x1c6   :  { %11255 = vst [vmem:[#allocation17_spill] sm:$0xff] %v10635_v33  ;;  %2302 = vmatpush.bf16.msrb.mxu0 %v7043_v48  ;;  %v6931_v48 = vld [vmem:[#allocation4 + $0x338] sm:$0xf] }
 0x1c8   :  { %v1293_v49 = vpop.f32.mrf.mxu2  ;;  %v1327_v60 = vpop.f32.mrf.mxu3 }
 0x1c9   :  { %v10637_v57 = vadd.f32 %v1327_v60, %v1293_v49 }
 0x1cb   :  { %v1432_v1 = vpop.f32.mrf.mxu0  ;;  %v1466_v20 = vpop.f32.mrf.mxu1 }
 0x1cc   :  { %v10639_v21 = vadd.f32 %v1466_v20, %v1432_v1  ;;  %v9110_v20 = vld [vmem:[#allocation4 + $0x88] sm:$0xf0] }
 0x1cd   :  { %1378 = vmatmul.bf16.gmra.mxu2 %v10595_v13  ;;  %6795 = vmatmul.msk.bf16.gmra.mxu3 %vm1266_vm0, %v10599_v4  ;;  %v10663_v4 = vpack.c.b16 %v1039_v31, %v1536_v3  ;;  %v9182_v3 = vld [vmem:[#allocation4 + $0x2c8] sm:$0xf0] }
 0x1ce   :  { %1856 = vmatmul.bf16.gmra.mxu0 %v10643_v42  ;;  %6954 = vmatmul.msk.bf16.gmra.mxu1 %vm1266_vm0, %v10647_v2  ;;  %v6872_v1 = vor.u32 %v9182_v3, %v6871_v34  ;;  %v9197_v34 = vld [vmem:[#allocation4 + $0x340] sm:$0xf0]  ;;  %v6994_v3 = vld [vmem:[#allocation4 + $0x38] sm:$0xf] }
 0x1d0   :  { %v1296_v12 = vpop.f32.mrf.mxu2  ;;  %v1330_v45 = vpop.f32.mrf.mxu3  ;;  %1898 = vmatpush.bf16.msra.mxu2 %v6872_v1  ;;  %v6932_v1 = vor.u32 %v9197_v34, %v6931_v48  ;;  %v9095_v48 = vld [vmem:[#allocation4 + $0x10] sm:$0xf0] }
 0x1d1   :  { %v10655_v5 = vadd.f32 %v1330_v45, %v1296_v12  ;;  %v7031_v12 = vor.u32 %v9110_v20, %v7030_v10  ;;  %v9101_v10 = vld [vmem:[#allocation4 + $0x40] sm:$0xf0] }
 0x1d2   :  { %v6995_v20 = vor.u32 %v9101_v10, %v6994_v3  ;;  %v7066_v3 = vld [vmem:[#allocation4 + $0xc8] sm:$0xf]  ;;  %v9119_v10 = vld [vmem:[#allocation4 + $0xd0] sm:$0xf0] }
 0x1d3   :  { %v1434_v27 = vpop.f32.mrf.mxu0  ;;  %v1468_v29 = vpop.f32.mrf.mxu1  ;;  %2303 = vmatpush.bf16.msrb.mxu0 %v7031_v12  ;;  %v7090_v12 = vld [vmem:[#allocation4 + $0xf8] sm:$0xf] }
 0x1d4   :  { %v10657_v63 = vadd.f32 %v1468_v29, %v1434_v27  ;;  %v6859_v29 = vld [vmem:[#allocation4 + $0x2a8] sm:$0xf] }
 0x1d8   :  { %v1298_v25 = vpop.f32.mrf.mxu2  ;;  %v1332_v32 = vpop.f32.mrf.mxu3 }
 0x1d9   :  { %v10659_v15 = vadd.f32 %v1332_v32, %v1298_v25  ;;  %v9179_v25 = vld [vmem:[#allocation4 + $0x2b0] sm:$0xf0]  ;;  %v7018_v32 = vld [vmem:[#allocation4 + $0x68] sm:$0xf] }
 0x1db   :  { %v1437_v13 = vpop.f32.mrf.mxu0  ;;  %v1471_v47 = vpop.f32.mrf.mxu1 }
 0x1dc   :  { %v10669_v38 = vadd.f32 %v1471_v47, %v1437_v13  ;;  %v6860_v47 = vor.u32 %v9179_v25, %v6859_v29 }
 0x1dd   :  { %1768 = vmatmul.bf16.vlgmr.msrb.gmra.mxu2 %v10495_v17  ;;  %6945 = vmatmul.msk.bf16.vlgmr.msrb.gmra.mxu3 %vm1266_vm0, %v10497_v19 }
 0x1de   :  { %2173 = vmatmul.bf16.vlgmr.msra.gmra.mxu0 %v10663_v4  ;;  %7104 = vmatmul.msk.bf16.vlgmr.msra.gmra.mxu1 %vm1266_vm0, %v10667_v46 }
 0x1df   :  { %1899 = vmatpush.bf16.msra.mxu2 %v6860_v47  ;;  %v6823_v47 = vld [vmem:[#allocation4 + $0x260] sm:$0xf] }
 0x1e0   :  { %v1301_v37 = vpop.f32.mrf.mxu2  ;;  %v1335_v50 = vpop.f32.mrf.mxu3 }
 0x1e1   :  { %v10677_v31 = vadd.f32 %v1335_v50, %v1301_v37  ;;  %v9107_v37 = vld [vmem:[#allocation4 + $0x70] sm:$0xf0] }
 0x1e2   :  { %v7019_v50 = vor.u32 %v9107_v37, %v7018_v32  ;;  %v9170_v37 = vld [vmem:[#allocation4 + $0x268] sm:$0xf0] }
 0x1e3   :  { %v1439_v55 = vpop.f32.mrf.mxu0  ;;  %v1473_v24 = vpop.f32.mrf.mxu1 }
 0x1e4   :  { %v10679_v52 = vadd.f32 %v1473_v24, %v1439_v55  ;;  %2304 = vmatpush.bf16.msrb.mxu0 %v7019_v50  ;;  %v6919_v50 = vld [vmem:[#allocation4 + $0x320] sm:$0xf] }
 0x1e6   :  { %11256 = vst [vmem:[#allocation18_spill] sm:$0xff] %v10679_v52  ;;  %v7072_v52 = vld [vmem:[#allocation4 + $0xe4] sm:$0xf0] }
 0x1e8   :  { %v1303_v51 = vpop.f32.mrf.mxu2  ;;  %v1337_v36 = vpop.f32.mrf.mxu3  ;;  %2305 = vmatpush.bf16.msrb.mxu0 %v7007_v58 }
 0x1e9   :  { %v10681_v41 = vadd.f32 %v1337_v36, %v1303_v51  ;;  %v6847_v36 = vld [vmem:[#allocation4 + $0x290] sm:$0xf] }
 0x1eb   :  { %v1442_v54 = vpop.f32.mrf.mxu0  ;;  %v1476_v43 = vpop.f32.mrf.mxu1 }
 0x1ec   :  { %v10683_v30 = vadd.f32 %v1476_v43, %v1442_v54  ;;  %v9176_v54 = vld [vmem:[#allocation4 + $0x298] sm:$0xf0]  ;;  %v6943_v43 = vld [vmem:[#allocation4 + $0x350] sm:$0xf]  ;;  %2306 = vmatpush.bf16.msrb.mxu0 %v6995_v20 }
 0x1ed   :  { %1773 = vmatmul.bf16.gmra.mxu2 %v10525_v23  ;;  %6946 = vmatmul.msk.bf16.gmra.mxu3 %vm1266_vm0, %v10527_v40  ;;  %v6848_v44 = vor.u32 %v9176_v54, %v6847_v36  ;;  %v6944_v6 = vor.u32 %v9200_v26, %v6943_v43  ;;  %v6982_v36 = vld [vmem:[#allocation4 + $0x20] sm:$0xf]  ;;  %v9098_v54 = vld [vmem:[#allocation4 + $0x28] sm:$0xf0] }
 0x1ee   :  { %2178 = vmatmul.bf16.gmra.mxu0 %v10495_v17  ;;  %7105 = vmatmul.msk.bf16.gmra.mxu1 %vm1266_vm0, %v10497_v19  ;;  %v7078_v26 = vld [vmem:[#allocation4 + $0xe0] sm:$0xf] }
 0x1ef   :  { %1900 = vmatpush.bf16.msra.mxu2 %v6848_v44  ;;  %1934 = vmatpush.bf16.msra.mxu3 %v6944_v6  ;;  %v6983_v44 = vor.u32 %v9098_v54, %v6982_v36  ;;  %v7079_v56 = vor.u32 %v9122_v28, %v7078_v26 }
 0x1f0   :  { %v1306_v39 = vpop.f32.mrf.mxu2  ;;  %v1340_v61 = vpop.f32.mrf.mxu3 }
 0x1f1   :  { %v10691_v8 = vadd.f32 %v1340_v61, %v1306_v39  ;;  %v7102_v39 = vld [vmem:[#allocation4 + $0x110] sm:$0xf]  ;;  %v9128_v61 = vld [vmem:[#allocation4 + $0x118] sm:$0xf0]  ;;  %2307 = vmatpush.bf16.msrb.mxu0 %v6983_v44 }
 0x1f2   :  { %v7103_v62 = vor.u32 %v9128_v61, %v7102_v39  ;;  %v6811_v39 = vld [vmem:[#allocation4 + $0x248] sm:$0xf]  ;;  %v9167_v61 = vld [vmem:[#allocation4 + $0x250] sm:$0xf0] }
 0x1f3   :  { %v1444_v0 = vpop.f32.mrf.mxu0  ;;  %v1478_v49 = vpop.f32.mrf.mxu1  ;;  %1935 = vmatpush.bf16.msra.mxu3 %v6932_v1 }
 0x1f4   :  { %v10693_v60 = vadd.f32 %v1478_v49, %v1444_v0  ;;  %2339 = vmatpush.bf16.msrb.mxu1 %v7103_v62  ;;  %v6836_v49 = vor.u32 %v9173_v53, %v6835_v11  ;;  %v6907_v62 = vld [vmem:[#allocation4 + $0x308] sm:$0xf]  ;;  %v9191_v11 = vld [vmem:[#allocation4 + $0x310] sm:$0xf0] }
 0x1f5   :  { %v6970_v53 = vld [vmem:[#allocation4 + $0x8] sm:$0xf] }
 0x1f6   :  { %11257 = vst [vmem:[#allocation19_spill] sm:$0xff] %v10693_v60  ;;  %1901 = vmatpush.bf16.msra.mxu2 %v6836_v49  ;;  %v6908_v49 = vor.u32 %v9191_v11, %v6907_v62  ;;  %v6971_v34 = vor.u32 %v9095_v48, %v6970_v53  ;;  %v9096_v60 = vld [vmem:[#allocation4 + $0x1c] sm:$0xf] }
 0x1f8   :  { %v1308_v45 = vpop.f32.mrf.mxu2  ;;  %v1342_v27 = vpop.f32.mrf.mxu3  ;;  %2308 = vmatpush.bf16.msrb.mxu0 %v6971_v34 }
 0x1f9   :  { %v10695_v13 = vadd.f32 %v1342_v27, %v1308_v45  ;;  %v9125_v45 = vld [vmem:[#allocation4 + $0x100] sm:$0xf0] }
 0x1fa   :  { %v7091_v25 = vor.u32 %v9125_v45, %v7090_v12  ;;  %v7067_v12 = vor.u32 %v9119_v10, %v7066_v3 }
 0x1fb   :  { %v1447_v55 = vpop.f32.mrf.mxu0  ;;  %v1481_v24 = vpop.f32.mrf.mxu1 }
 0x1fc   :  { %v10697_v51 = vadd.f32 %v1481_v24, %v1447_v55  ;;  %2340 = vmatpush.bf16.msrb.mxu1 %v7091_v25  ;;  %v6824_v55 = vor.u32 %v9170_v37, %v6823_v47  ;;  %v9194_v24 = vld [vmem:[#allocation4 + $0x328] sm:$0xf0] }
 0x1fd   :  { %1778 = vmatmul.bf16.gmra.mxu2 %v10559_v59  ;;  %6947 = vmatmul.msk.bf16.gmra.mxu3 %vm1266_vm0, %v10561_v14  ;;  %v6920_v43 = vor.u32 %v9194_v24, %v6919_v50 }
 0x1fe   :  { %2183 = vmatmul.bf16.gmra.mxu0 %v10525_v23  ;;  %7106 = vmatmul.msk.bf16.gmra.mxu1 %vm1266_vm0, %v10527_v40 }
 0x1ff   :  { %1902 = vmatpush.bf16.msra.mxu2 %v6824_v55  ;;  %1936 = vmatpush.bf16.msra.mxu3 %v6920_v43 }
 0x200   :  { %v1311_v7 = vpop.f32.mrf.mxu2  ;;  %v1345_v9 = vpop.f32.mrf.mxu3  ;;  %2341 = vmatpush.bf16.msrb.mxu1 %v7079_v56 }
 0x201   :  { %v10705_v0 = vadd.f32 %v1345_v9, %v1311_v7  ;;  %v6812_v9 = vor.u32 %v9167_v61, %v6811_v39 }
 0x203   :  { %v1449_v27 = vpop.f32.mrf.mxu0  ;;  %v1483_v29 = vpop.f32.mrf.mxu1  ;;  %1903 = vmatpush.bf16.msra.mxu2 %v6812_v9  ;;  %1937 = vmatpush.bf16.msra.mxu3 %v6908_v49 }
 0x204   :  { %v10707_v32 = vadd.f32 %v1483_v29, %v1449_v27  ;;  %2342 = vmatpush.bf16.msrb.mxu1 %v7067_v12 }
 0x206   :  { %11258 = vst [vmem:[#allocation20_spill] sm:$0xff] %v10707_v32 }
 0x208   :  { %v1313_v6 = vpop.f32.mrf.mxu2  ;;  %v1347_v58 = vpop.f32.mrf.mxu3 }
 0x209   :  { %v10709_v7 = vadd.f32 %v1347_v58, %v1313_v6 }
 0x20b   :  { %11259 = vst [vmem:[#allocation21_spill] sm:$0xff] %v10709_v7  ;;  %v1837_v1 = vpop.f32.mrf.mxu0  ;;  %v1871_v20 = vpop.f32.mrf.mxu1 }
 0x20c   :  { %v10711_v45 = vadd.f32 %v1871_v20, %v1837_v1 }
 0x20d   :  { %1783 = vmatmul.bf16.gmra.mxu2 %v10585_v18  ;;  %6948 = vmatmul.msk.bf16.gmra.mxu3 %vm1266_vm0, %v10587_v22 }
 0x20e   :  { %2188 = vmatmul.bf16.gmra.mxu0 %v10559_v59  ;;  %7107 = vmatmul.msk.bf16.gmra.mxu1 %vm1266_vm0, %v10561_v14 }
 0x210   :  { %v1359_v27 = vpop.f32.mrf.mxu2  ;;  %v1393_v29 = vpop.f32.mrf.mxu3 }
 0x211   :  { %v10719_v25 = vadd.f32 %v1393_v29, %v1359_v27 }
 0x213   :  { %v1839_v47 = vpop.f32.mrf.mxu0  ;;  %v1873_v37 = vpop.f32.mrf.mxu1 }
 0x214   :  { %v10721_v50 = vadd.f32 %v1873_v37, %v1839_v47 }
 0x218   :  { %v1361_v55 = vpop.f32.mrf.mxu2  ;;  %v1395_v24 = vpop.f32.mrf.mxu3 }
 0x219   :  { %v10723_v36 = vadd.f32 %v1395_v24, %v1361_v55  ;;  %v9114_v24 = vld [vmem:[#allocation4 + $0xac] sm:$0xf] }
 0x21b   :  { %v1842_v54 = vpop.f32.mrf.mxu0  ;;  %v1876_v43 = vpop.f32.mrf.mxu1 }
 0x21c   :  { %v10725_v44 = vadd.f32 %v1876_v43, %v1842_v54  ;;  %v7048_v54 = vld [vmem:[#allocation4 + $0xb4] sm:$0xf0] }
 0x21d   :  { %1788 = vmatmul.bf16.gmra.mxu2 %v10643_v42  ;;  %6949 = vmatmul.msk.bf16.gmra.mxu3 %vm1266_vm0, %v10647_v2  ;;  %v7051_v43 = vor.u32 %v9114_v24, %v7048_v54 }
 0x21e   :  { %2193 = vmatmul.bf16.gmra.mxu0 %v10585_v18  ;;  %7108 = vmatmul.msk.bf16.gmra.mxu1 %vm1266_vm0, %v10587_v22 }
 0x21f   :  { %2233 = vmatpush.bf16.msrb.mxu2 %v7051_v43 }
 0x220   :  { %v1364_v26 = vpop.f32.mrf.mxu2  ;;  %v1398_v28 = vpop.f32.mrf.mxu3 }
 0x221   :  { %v10733_v56 = vadd.f32 %v1398_v28, %v1364_v26 }
 0x223   :  { %v1844_v6 = vpop.f32.mrf.mxu0  ;;  %v1878_v58 = vpop.f32.mrf.mxu1 }
 0x224   :  { %v10735_v39 = vadd.f32 %v1878_v58, %v1844_v6  ;;  %v9111_v6 = vld [vmem:[#allocation4 + $0x94] sm:$0xf]  ;;  %v7036_v58 = vld [vmem:[#allocation4 + $0x9c] sm:$0xf0] }
 0x228   :  { %v1366_v61 = vpop.f32.mrf.mxu2  ;;  %v1400_v62 = vpop.f32.mrf.mxu3 }
 0x229   :  { %v10737_v9 = vadd.f32 %v1400_v62, %v1366_v61  ;;  %v7039_v62 = vor.u32 %v9111_v6, %v7036_v58  ;;  %v7000_v6 = vld [vmem:[#allocation4 + $0x54] sm:$0xf0]  ;;  %v9126_v58 = vld [vmem:[#allocation4 + $0x10c] sm:$0xf] }
 0x22b   :  { %v1847_v11 = vpop.f32.mrf.mxu0  ;;  %v1881_v53 = vpop.f32.mrf.mxu1  ;;  %2234 = vmatpush.bf16.msrb.mxu2 %v7039_v62 }
 0x22c   :  { %v10739_v48 = vadd.f32 %v1881_v53, %v1847_v11 }
 0x22d   :  { %1904 = vmatmul.bf16.vlgmr.msra.gmra.mxu2 %v10495_v17  ;;  %6955 = vmatmul.msk.bf16.vlgmr.msra.gmra.mxu3 %vm1266_vm0, %v10497_v19 }
 0x22e   :  { %2309 = vmatmul.bf16.vlgmr.msrb.gmra.mxu0 %v10663_v4  ;;  %7114 = vmatmul.msk.bf16.vlgmr.msrb.gmra.mxu1 %vm1266_vm0, %v10667_v46 }
 0x230   :  { %v1369_v49 = vpop.f32.mrf.mxu2  ;;  %v1403_v34 = vpop.f32.mrf.mxu3 }
 0x231   :  { %v10747_v3 = vadd.f32 %v1403_v34, %v1369_v49  ;;  %v9108_v49 = vld [vmem:[#allocation4 + $0x7c] sm:$0xf]  ;;  %v7024_v34 = vld [vmem:[#allocation4 + $0x84] sm:$0xf0] }
 0x233   :  { %v1849_v10 = vpop.f32.mrf.mxu0  ;;  %v1883_v1 = vpop.f32.mrf.mxu1 }
 0x234   :  { %v10749_v20 = vadd.f32 %v1883_v1, %v1849_v10  ;;  %v7027_v10 = vor.u32 %v9108_v49, %v7024_v34  ;;  %v7096_v49 = vld [vmem:[#allocation4 + $0x114] sm:$0xf0] }
 0x235   :  { %v7099_v34 = vor.u32 %v9126_v58, %v7096_v49  ;;  %v6976_v58 = vld [vmem:[#allocation4 + $0x24] sm:$0xf0] }
 0x236   :  { %2235 = vmatpush.bf16.msrb.mxu2 %v7027_v10  ;;  %v6979_v49 = vor.u32 %v9096_v60, %v6976_v58 }
 0x237   :  { %2271 = vmatpush.bf16.msrb.mxu3 %v7099_v34 }
 0x238   :  { %v1371_v12 = vpop.f32.mrf.mxu2  ;;  %v1405_v27 = vpop.f32.mrf.mxu3 }
 0x239   :  { %v10751_v29 = vadd.f32 %v1405_v27, %v1371_v12  ;;  %v9105_v27 = vld [vmem:[#allocation4 + $0x64] sm:$0xf] }
 0x23b   :  { %v1852_v47 = vpop.f32.mrf.mxu0  ;;  %v1886_v37 = vpop.f32.mrf.mxu1 }
 0x23c   :  { %v10753_v55 = vadd.f32 %v1886_v37, %v1852_v47  ;;  %v7012_v47 = vld [vmem:[#allocation4 + $0x6c] sm:$0xf0] }
 0x23d   :  { %1909 = vmatmul.bf16.gmra.mxu2 %v10525_v23  ;;  %6956 = vmatmul.msk.bf16.gmra.mxu3 %vm1266_vm0, %v10527_v40  ;;  %v7015_v24 = vor.u32 %v9105_v27, %v7012_v47  ;;  %v6988_v27 = vld [vmem:[#allocation4 + $0x3c] sm:$0xf0]  ;;  %v9123_v47 = vld [vmem:[#allocation4 + $0xf4] sm:$0xf] }
 0x23e   :  { %2314 = vmatmul.bf16.gmra.mxu0 %v10495_v17  ;;  %7115 = vmatmul.msk.bf16.gmra.mxu1 %vm1266_vm0, %v10497_v19 }
 0x23f   :  { %2236 = vmatpush.bf16.msrb.mxu2 %v7015_v24 }
 0x240   :  { %v1374_v26 = vpop.f32.mrf.mxu2  ;;  %v1408_v28 = vpop.f32.mrf.mxu3 }
 0x241   :  { %v10761_v61 = vadd.f32 %v1408_v28, %v1374_v26  ;;  %v9102_v28 = vld [vmem:[#allocation4 + $0x4c] sm:$0xf] }
 0x242   :  { %v7003_v62 = vor.u32 %v9102_v28, %v7000_v6 }
 0x243   :  { %v10763_v11 = vpop.f32.mrf.mxu0  ;;  %v10765_v53 = vpop.f32.mrf.mxu1 }
 0x244   :  { %2237 = vmatpush.bf16.msrb.mxu2 %v7003_v62  ;;  %v9120_v62 = vld [vmem:[#allocation4 + $0xdc] sm:$0xf] }
 0x245   :  { %v7075_v34 = vor.u32 %v9120_v62, %v7072_v52 }
 0x248   :  { %v1376_v1 = vpop.f32.mrf.mxu2  ;;  %v1410_v12 = vpop.f32.mrf.mxu3 }
 0x249   :  { %v10767_v37 = vadd.f32 %v1410_v12, %v1376_v1  ;;  %v9099_v12 = vld [vmem:[#allocation4 + $0x34] sm:$0xf] }
 0x24b   :  { %11260 = vst [vmem:[#allocation22_spill] sm:$0xff] %v10767_v37  ;;  %v1857_v54 = vpop.f32.mrf.mxu0  ;;  %v1891_v43 = vpop.f32.mrf.mxu1 }
 0x24c   :  { %v10769_v26 = vadd.f32 %v1891_v43, %v1857_v54  ;;  %v6991_v54 = vor.u32 %v9099_v12, %v6988_v27  ;;  %v7084_v43 = vld [vmem:[#allocation4 + $0xfc] sm:$0xf0]  ;;  %v9117_v12 = vld [vmem:[#allocation4 + $0xc4] sm:$0xf] }
 0x24d   :  { %1914 = vmatmul.bf16.gmra.mxu2 %v10559_v59  ;;  %6957 = vmatmul.msk.bf16.gmra.mxu3 %vm1266_vm0, %v10561_v14  ;;  %v7087_v32 = vor.u32 %v9123_v47, %v7084_v43  ;;  %v7060_v43 = vld [vmem:[#allocation4 + $0xcc] sm:$0xf0] }
 0x24e   :  { %11261 = vst [vmem:[#allocation23_spill] sm:$0xff] %v10769_v26  ;;  %2319 = vmatmul.bf16.gmra.mxu0 %v10525_v23  ;;  %7116 = vmatmul.msk.bf16.gmra.mxu1 %vm1266_vm0, %v10527_v40  ;;  %v7329_v26 = vld [vmem:[#allocation7 + $0x20] sm:$0xf] }
 0x24f   :  { %2238 = vmatpush.bf16.msrb.mxu2 %v6991_v54  ;;  %2272 = vmatpush.bf16.msrb.mxu3 %v7087_v32 }
 0x250   :  { %v1379_v10 = vpop.f32.mrf.mxu2  ;;  %v1413_v1 = vpop.f32.mrf.mxu3 }
 0x251   :  { %v10777_v24 = vadd.f32 %v1413_v1, %v1379_v10  ;;  %v9093_v10 = vld [vmem:[#allocation4 + $0x4] sm:$0xf]  ;;  %v6964_v1 = vld [vmem:[#allocation4 + $0xc] sm:$0xf0] }
 0x252   :  { %v6967_v47 = vor.u32 %v9093_v10, %v6964_v1 }
 0x253   :  { %11262 = vst [vmem:[#allocation24_spill] sm:$0xff] %v10777_v24  ;;  %v10779_v28 = vpop.f32.mrf.mxu0  ;;  %v10781_v6 = vpop.f32.mrf.mxu1  ;;  %2239 = vmatpush.bf16.msrb.mxu2 %v6979_v49  ;;  %2273 = vmatpush.bf16.msrb.mxu3 %v7075_v34 }
 0x254   :  { %11263 = vst [vmem:[#allocation25_spill] sm:$0xff] %v10779_v28  ;;  %v7233_v28 = vld [vmem:[#allocation7 + $0x3e0] sm:$0xf] }
 0x255   :  { %11264 = vst [vmem:[#allocation26_spill] sm:$0xff] %v10781_v6  ;;  %v7063_v6 = vor.u32 %v9117_v12, %v7060_v43 }
 0x257   :  { %2240 = vmatpush.bf16.msrb.mxu2 %v6967_v47  ;;  %2274 = vmatpush.bf16.msrb.mxu3 %v7063_v6 }
 0x258   :  { %v1381_v33 = vpop.f32.mrf.mxu2  ;;  %v1415_v7 = vpop.f32.mrf.mxu3 }
 0x259   :  { %v10783_v27 = vadd.f32 %v1415_v7, %v1381_v33 }
 0x25b   :  { %11265 = vst [vmem:[#allocation27_spill] sm:$0xff] %v10783_v27  ;;  %v2174_v54 = vpop.f32.mrf.mxu0  ;;  %v2208_v32 = vpop.f32.mrf.mxu1 }
 0x25d   :  { %1919 = vmatmul.bf16.gmra.mxu2 %v10585_v18  ;;  %6958 = vmatmul.msk.bf16.gmra.mxu3 %vm1266_vm0, %v10587_v22 }
 0x25e   :  { %2324 = vmatmul.bf16.gmra.mxu0 %v10559_v59  ;;  %7117 = vmatmul.msk.bf16.gmra.mxu1 %vm1266_vm0, %v10561_v14 }
 0x260   :  { %v1769_v52 = vpop.f32.mrf.mxu2  ;;  %v1803_v33 = vpop.f32.mrf.mxu3 }
 0x261   :  { %v1804_v60 = vadd.f32 %v1803_v33, %v1769_v52 }
 0x263   :  { %v2175_v7 = vadd.f32 %v2174_v54, %v1804_v60  ;;  %v2176_v58 = vpop.f32.mrf.mxu0  ;;  %v2210_v62 = vpop.f32.mrf.mxu1 }
 0x265   :  { %v2209_v49 = vadd.f32 %v2208_v32, %v2175_v7 }
 0x267   :  { %v10792_v34 = vadd.f32 %v2209_v49, %v10633_v35 }
 0x268   :  { %v1771_v6 = vpop.f32.mrf.mxu2  ;;  %v1805_v10 = vpop.f32.mrf.mxu3 }
 0x269   :  { %v1806_v1 = vadd.f32 %v1805_v10, %v1771_v6 }
 0x26b   :  { %v2177_v12 = vadd.f32 %v2176_v58, %v1806_v1  ;;  %v2179_v47 = vpop.f32.mrf.mxu0  ;;  %v2213_v43 = vpop.f32.mrf.mxu1 }
 0x26d   :  { %v2211_v27 = vadd.f32 %v2210_v62, %v2177_v12  ;;  %1924 = vmatmul.bf16.gmra.mxu2 %v10643_v42  ;;  %6959 = vmatmul.msk.bf16.gmra.mxu3 %vm1266_vm0, %v10647_v2 }
 0x26e   :  { %2329 = vmatmul.bf16.gmra.mxu0 %v10585_v18  ;;  %7118 = vmatmul.msk.bf16.gmra.mxu1 %vm1266_vm0, %v10587_v22 }
 0x26f   :  { %v10801_v35 = vadd.f32 %v2211_v27, %v10637_v57 }
 0x270   :  { %v1774_v54 = vpop.f32.mrf.mxu2  ;;  %v1808_v32 = vpop.f32.mrf.mxu3 }
 0x271   :  { %v1809_v52 = vadd.f32 %v1808_v32, %v1774_v54 }
 0x273   :  { %v2180_v33 = vadd.f32 %v2179_v47, %v1809_v52  ;;  %v2181_v60 = vpop.f32.mrf.mxu0  ;;  %v2215_v7 = vpop.f32.mrf.mxu1 }
 0x275   :  { %v2214_v58 = vadd.f32 %v2213_v43, %v2180_v33 }
 0x277   :  { %v10804_v42 = vadd.f32 %v2214_v58, %v10655_v5 }
 0x278   :  { %v1776_v62 = vpop.f32.mrf.mxu2  ;;  %v1810_v2 = vpop.f32.mrf.mxu3 }
 0x279   :  { %v1811_v49 = vadd.f32 %v1810_v2, %v1776_v62 }
 0x27b   :  { %v2182_v6 = vadd.f32 %v2181_v60, %v1811_v49  ;;  %v2184_v10 = vpop.f32.mrf.mxu0  ;;  %v2218_v1 = vpop.f32.mrf.mxu1 }
 0x27d   :  { %v2216_v12 = vadd.f32 %v2215_v7, %v2182_v6  ;;  %2241 = vmatmul.bf16.vlgmr.msrb.gmra.mxu2 %v10663_v4  ;;  %7109 = vmatmul.msk.bf16.vlgmr.msrb.gmra.mxu3 %vm1266_vm0, %v10667_v46 }
 0x27f   :  { %v10810_v57 = vadd.f32 %v2216_v12, %v10659_v15 }
 0x280   :  { %v1779_v27 = vpop.f32.mrf.mxu2  ;;  %v1813_v47 = vpop.f32.mrf.mxu3 }
 0x281   :  { %v1814_v43 = vadd.f32 %v1813_v47, %v1779_v27 }
 0x283   :  { %v2185_v5 = vadd.f32 %v2184_v10, %v1814_v43  ;;  %v2186_v54 = vpop.f32.mrf.mxu0  ;;  %v2220_v32 = vpop.f32.mrf.mxu1 }
 0x285   :  { %v2219_v52 = vadd.f32 %v2218_v1, %v2185_v5  ;;  %v9344_v1 = vld [vmem:[#allocation7 + $0x474] sm:$0xf0] }
 0x287   :  { %v10813_v33 = vadd.f32 %v2219_v52, %v10677_v31  ;;  %v7305_v31 = vld [vmem:[#allocation7 + $0x470] sm:$0xf] }
 0x288   :  { %v1781_v60 = vpop.f32.mrf.mxu2  ;;  %v1815_v7 = vpop.f32.mrf.mxu3  ;;  %v7306_v43 = vor.u32 %v9344_v1, %v7305_v31  ;;  %v7273_v31 = vld [vmem:[#allocation7 + $0x430] sm:$0xf]  ;;  %v9336_v1 = vld [vmem:[#allocation7 + $0x434] sm:$0xf0] }
 0x289   :  { %v1816_v58 = vadd.f32 %v1815_v7, %v1781_v60  ;;  %v7289_v60 = vld [vmem:[#allocation7 + $0x450] sm:$0xf]  ;;  %v9340_v7 = vld [vmem:[#allocation7 + $0x454] sm:$0xf0] }
 0x28a   :  { %2910 = vmatpush.bf16.msra.mxu0 %v7306_v43 }
 0x28b   :  { %v2187_v4 = vadd.f32 %v2186_v54, %v1816_v58  ;;  %v2189_v62 = vpop.f32.mrf.mxu0  ;;  %v2223_v2 = vpop.f32.mrf.mxu1  ;;  %v9342_v54 = vld [vmem:[#allocation7 + $0x464] sm:$0xf0] }
 0x28d   :  { %v2221_v46 = vadd.f32 %v2220_v32, %v2187_v4  ;;  %2246 = vmatmul.bf16.gmra.mxu2 %v10495_v17  ;;  %7110 = vmatmul.msk.bf16.gmra.mxu3 %vm1266_vm0, %v10497_v19  ;;  %v7297_v17 = vld [vmem:[#allocation7 + $0x460] sm:$0xf] }
 0x28f   :  { %v10819_v15 = vadd.f32 %v2221_v46, %v10681_v41  ;;  %v7298_v41 = vor.u32 %v9342_v54, %v7297_v17  ;;  %v7274_v17 = vor.u32 %v9336_v1, %v7273_v31  ;;  %v7265_v54 = vld [vmem:[#allocation7 + $0x420] sm:$0xf] }
 0x290   :  { %v1784_v49 = vpop.f32.mrf.mxu2  ;;  %v1818_v6 = vpop.f32.mrf.mxu3 }
 0x291   :  { %v1819_v10 = vadd.f32 %v1818_v6, %v1784_v49  ;;  %2911 = vmatpush.bf16.msra.mxu0 %v7298_v41 }
 0x293   :  { %v2190_v12 = vadd.f32 %v2189_v62, %v1819_v10  ;;  %v10821_v27 = vpop.f32.mrf.mxu0  ;;  %v10823_v47 = vpop.f32.mrf.mxu1  ;;  %v7290_v62 = vor.u32 %v9340_v7, %v7289_v60 }
 0x295   :  { %v2224_v5 = vadd.f32 %v2223_v2, %v2190_v12  ;;  %2912 = vmatpush.bf16.msra.mxu0 %v7290_v62  ;;  %v7281_v2 = vld [vmem:[#allocation7 + $0x440] sm:$0xf] }
 0x297   :  { %v10826_v19 = vadd.f32 %v2224_v5, %v10691_v8  ;;  %v9338_v8 = vld [vmem:[#allocation7 + $0x444] sm:$0xf0] }
 0x298   :  { %v10828_v32 = vpop.f32.mrf.mxu2  ;;  %v10830_v52 = vpop.f32.mrf.mxu3  ;;  %v7282_v46 = vor.u32 %v9338_v8, %v7281_v2  ;;  %v7257_v2 = vld [vmem:[#allocation7 + $0x410] sm:$0xf] }
 0x29a   :  { %2913 = vmatpush.bf16.msra.mxu0 %v7282_v46 }
 0x29b   :  { %v2194_v58 = vpop.f32.mrf.mxu0  ;;  %v2228_v4 = vpop.f32.mrf.mxu1 }
 0x29d   :  { %2251 = vmatmul.bf16.gmra.mxu2 %v10525_v23  ;;  %7111 = vmatmul.msk.bf16.gmra.mxu3 %vm1266_vm0, %v10527_v40  ;;  %v9334_v40 = vld [vmem:[#allocation7 + $0x424] sm:$0xf0] }
 0x29e   :  { %2914 = vmatpush.bf16.msra.mxu0 %v7274_v17  ;;  %v7266_v60 = vor.u32 %v9334_v40, %v7265_v54  ;;  %v7369_v40 = vld [vmem:[#allocation7 + $0x70] sm:$0xf] }
 0x2a0   :  { %v1789_v49 = vpop.f32.mrf.mxu2  ;;  %v1823_v6 = vpop.f32.mrf.mxu3 }
 0x2a1   :  { %v1824_v10 = vadd.f32 %v1823_v6, %v1789_v49 }
 0x2a2   :  { %2915 = vmatpush.bf16.msra.mxu0 %v7266_v60  ;;  %v9216_v60 = vld [vmem:[#allocation7 + $0x74] sm:$0xf0] }
 0x2a3   :  { %v2195_v12 = vadd.f32 %v2194_v58, %v1824_v10  ;;  %v10835_v43 = vpop.f32.mrf.mxu0  ;;  %v10837_v5 = vpop.f32.mrf.mxu1  ;;  %v9332_v58 = vld [vmem:[#allocation7 + $0x414] sm:$0xf0] }
 0x2a4   :  { %11266 = vst [vmem:[#allocation28_spill] sm:$0xff] %v10835_v43  ;;  %v7258_v49 = vor.u32 %v9332_v58, %v7257_v2  ;;  %v7163_v43 = vld [vmem:[#allocation7 + $0x358] sm:$0xf0] }
 0x2a5   :  { %11267 = vst [vmem:[#allocation29_spill] sm:$0xff] %v10837_v5  ;;  %v2229_v23 = vadd.f32 %v2228_v4, %v2195_v12  ;;  %v7249_v4 = vld [vmem:[#allocation7 + $0x400] sm:$0xf] }
 0x2a6   :  { %2916 = vmatpush.bf16.msra.mxu0 %v7258_v49  ;;  %v7361_v49 = vld [vmem:[#allocation7 + $0x60] sm:$0xf] }
 0x2a7   :  { %v10840_v41 = vadd.f32 %v2229_v23, %v10705_v0  ;;  %v9330_v0 = vld [vmem:[#allocation7 + $0x404] sm:$0xf0] }
 0x2a8   :  { %v10842_v7 = vpop.f32.mrf.mxu2  ;;  %v10844_v62 = vpop.f32.mrf.mxu3  ;;  %v7250_v6 = vor.u32 %v9330_v0, %v7249_v4  ;;  %v9214_v4 = vld [vmem:[#allocation7 + $0x64] sm:$0xf0] }
 0x2a9   :  { %11268 = vst [vmem:[#allocation30_spill] sm:$0xff] %v10840_v41  ;;  %v7362_v0 = vor.u32 %v9214_v4, %v7361_v49 }
 0x2aa   :  { %11269 = vst [vmem:[#allocation31_spill] sm:$0xff] %v10844_v62  ;;  %2917 = vmatpush.bf16.msra.mxu0 %v7250_v6 }
 0x2ab   :  { %v2310_v8 = vpop.f32.mrf.mxu0  ;;  %v2344_v46 = vpop.f32.mrf.mxu1 }
 0x2ad   :  { %2256 = vmatmul.bf16.gmra.mxu2 %v10559_v59  ;;  %7112 = vmatmul.msk.bf16.gmra.mxu3 %vm1266_vm0, %v10561_v14  ;;  %v7370_v59 = vor.u32 %v9216_v60, %v7369_v40  ;;  %v9210_v40 = vld [vmem:[#allocation7 + $0x44] sm:$0xf0] }
 0x2af   :  { %3213 = vmatpush.bf16.msrb.mxu0 %v7370_v59 }
 0x2b0   :  { %v1905_v10 = vpop.f32.mrf.mxu2  ;;  %v1939_v31 = vpop.f32.mrf.mxu3 }
 0x2b1   :  { %v1940_v1 = vadd.f32 %v1939_v31, %v1905_v10  ;;  %v9212_v10 = vld [vmem:[#allocation7 + $0x54] sm:$0xf0] }
 0x2b3   :  { %v2311_v12 = vadd.f32 %v2310_v8, %v1940_v1  ;;  %v10849_v17 = vpop.f32.mrf.mxu0  ;;  %v10851_v23 = vpop.f32.mrf.mxu1  ;;  %3214 = vmatpush.bf16.msrb.mxu0 %v7362_v0  ;;  %v10867_v0 = vld [vmem:[#allocation6] sm:$0x7] }
 0x2b4   :  { %11270 = vst [vmem:[#allocation32_spill] sm:$0xff] %v10849_v17  ;;  %v7241_v17 = vld [vmem:[#allocation7 + $0x3f0] sm:$0xf] }
 0x2b5   :  { %11271 = vst [vmem:[#allocation33_spill] sm:$0xff] %v10851_v23  ;;  %v2345_v54 = vadd.f32 %v2344_v46, %v2311_v12  ;;  %v7353_v46 = vld [vmem:[#allocation7 + $0x50] sm:$0xf]  ;;  %v9312_v23 = vld [vmem:[#allocation7 + $0x374] sm:$0xf0] }
 0x2b7   :  { %v10854_v2 = vadd.f32 %v2345_v54, %v10625_v16  ;;  %v7354_v16 = vor.u32 %v9212_v10, %v7353_v46  ;;  %v7345_v54 = vld [vmem:[#allocation7 + $0x40] sm:$0xf]  ;;  %v9328_v10 = vld [vmem:[#allocation7 + $0x3f4] sm:$0xf0] }
 0x2b8   :  { %v10856_v14 = vpop.f32.mrf.mxu2  ;;  %v10858_v58 = vpop.f32.mrf.mxu3  ;;  %v7346_v60 = vor.u32 %v9210_v40, %v7345_v54  ;;  %v7337_v54 = vld [vmem:[#allocation7 + $0x30] sm:$0xf]  ;;  %v9208_v40 = vld [vmem:[#allocation7 + $0x34] sm:$0xf0] }
 0x2b9   :  { %11272 = vst [vmem:[#allocation34_spill] sm:$0xff] %v10856_v14  ;;  %3215 = vmatpush.bf16.msrb.mxu0 %v7354_v16  ;;  %v7179_v16 = vld [vmem:[#allocation7 + $0x378] sm:$0xf0] }
 0x2ba   :  { %11273 = vst [vmem:[#allocation35_spill] sm:$0xff] %v10858_v58  ;;  %v9311_v58 = vld [vmem:[#allocation7 + $0x374] sm:$0xf] }
 0x2bb   :  { %v2315_v8 = vpop.f32.mrf.mxu0  ;;  %v2349_v6 = vpop.f32.mrf.mxu1 }
 0x2bd   :  { %2261 = vmatmul.bf16.gmra.mxu2 %v10585_v18  ;;  %7113 = vmatmul.msk.bf16.gmra.mxu3 %vm1266_vm0, %v10587_v22  ;;  %v7177_v22 = vld [vmem:[#allocation7 + $0x370] sm:$0xf] }
 0x2be   :  { %3216 = vmatpush.bf16.msrb.mxu0 %v7346_v60  ;;  %v7178_v46 = vor.u32 %v9312_v23, %v7177_v22  ;;  %v9310_v22 = vld [vmem:[#allocation7 + $0x364] sm:$0xf0] }
 0x2c0   :  { %v1910_v31 = vpop.f32.mrf.mxu2  ;;  %v1944_v1 = vpop.f32.mrf.mxu3  ;;  %2884 = vmatpush.bf16.msra.mxu2 %v7178_v46  ;;  %v9206_v46 = vld [vmem:[#allocation7 + $0x24] sm:$0xf0] }
 0x2c1   :  { %v1945_v12 = vadd.f32 %v1944_v1, %v1910_v31  ;;  %v10870_v31 = vperm.slane %v10867_v0, 2  ;;  %v7242_v1 = vor.u32 %v9328_v10, %v7241_v17  ;;  %v9309_v17 = vld [vmem:[#allocation7 + $0x364] sm:$0xf] }
 0x2c3   :  { %v2316_v59 = vadd.f32 %v2315_v8, %v1945_v12  ;;  %v10863_v49 = vpop.f32.mrf.mxu0  ;;  %v10865_v4 = vpop.f32.mrf.mxu1  ;;  %v7182_v12 = vor.u32 %v9311_v58, %v7179_v16  ;;  %2897 = vmatpush.bf16.msra.mxu3 %v7242_v1  ;;  %v7171_v58 = vld [vmem:[#allocation7 + $0x368] sm:$0xf0]  ;;  %v7161_v1 = vld [vmem:[#allocation7 + $0x350] sm:$0xf] }
 0x2c4   :  { %v7174_v41 = vor.u32 %v9309_v17, %v7171_v58 }
 0x2c5   :  { %v2350_v18 = vadd.f32 %v2349_v6, %v2316_v59  ;;  %v7338_v6 = vor.u32 %v9208_v40, %v7337_v54  ;;  %2923 = vmatpush.bf16.msra.mxu1 %v7182_v12  ;;  %v7169_v59 = vld [vmem:[#allocation7 + $0x360] sm:$0xf]  ;;  %v7330_v54 = vor.u32 %v9206_v46, %v7329_v26  ;;  %v9308_v12 = vld [vmem:[#allocation7 + $0x354] sm:$0xf0]  ;;  %v7225_v40 = vld [vmem:[#allocation7 + $0x3d0] sm:$0xf] }
 0x2c6   :  { %v7170_v24 = vor.u32 %v9310_v22, %v7169_v59  ;;  %v9324_v59 = vld [vmem:[#allocation7 + $0x3d4] sm:$0xf0]  ;;  %v9307_v22 = vld [vmem:[#allocation7 + $0x354] sm:$0xf]  ;;  %v7217_v46 = vld [vmem:[#allocation7 + $0x3c0] sm:$0xf] }
 0x2c7   :  { %v2377_v8 = vadd.f32 %v2350_v18, %v10639_v21  ;;  %3217 = vmatpush.bf16.msrb.mxu0 %v7338_v6  ;;  %v9326_v21 = vld [vmem:[#allocation7 + $0x3e4] sm:$0xf0]  ;;  %v7162_v6 = vor.u32 %v9308_v12, %v7161_v1  ;;  %v7226_v37 = vor.u32 %v9324_v59, %v7225_v40  ;;  %v7166_v62 = vor.u32 %v9307_v22, %v7163_v43  ;;  %v7155_v12 = vld [vmem:[#allocation7 + $0x348] sm:$0xf0]  ;;  %v7313_v22 = vld [vmem:[#allocation7] sm:$0xf] }
 0x2c8   :  { %v10873_v14 = vpop.f32.mrf.mxu2  ;;  %v10875_v60 = vpop.f32.mrf.mxu3  ;;  %v7234_v5 = vor.u32 %v9326_v21, %v7233_v28  ;;  %2885 = vmatpush.bf16.msra.mxu2 %v7170_v24  ;;  %v7321_v28 = vld [vmem:[#allocation7 + $0x10] sm:$0xf]  ;;  %v9204_v21 = vld [vmem:[#allocation7 + $0x14] sm:$0xf0]  ;;  %v9322_v1 = vld [vmem:[#allocation7 + $0x3c4] sm:$0xf0] }
 0x2c9   :  { %v2415_v23 = vadd.f32 %v10870_v31, %v2377_v8  ;;  %2924 = vmatpush.bf16.msra.mxu1 %v7174_v41  ;;  %v7322_v26 = vor.u32 %v9204_v21, %v7321_v28  ;;  %v7153_v41 = vld [vmem:[#allocation7 + $0x340] sm:$0xf]  ;;  %v7435_v28 = vld [vmem:[#allocation7 + $0xf8] sm:$0xf0] }
 0x2ca   :  { %2898 = vmatpush.bf16.msra.mxu3 %v7234_v5 }
 0x2cb   :  { %v2445_v18 = vmax.f32 %v2415_v23, 0.0  ;;  %v2320_v10 = vpop.f32.mrf.mxu0  ;;  %v2354_v16 = vpop.f32.mrf.mxu1  ;;  %3218 = vmatpush.bf16.msrb.mxu0 %v7330_v54 }
 0x2cc   :  { %2886 = vmatpush.bf16.msra.mxu2 %v7162_v6  ;;  %v7218_v6 = vor.u32 %v9322_v1, %v7217_v46  ;;  %v9303_v46 = vld [vmem:[#allocation7 + $0x334] sm:$0xf]  ;;  %v7147_v1 = vld [vmem:[#allocation7 + $0x338] sm:$0xf0] }
 0x2cd   :  { %v2472_v8 = vpack.c.bf16 %v2445_v18, %v2445_v18  ;;  %2925 = vmatpush.bf16.msra.mxu1 %v7166_v62  ;;  %v9306_v18 = vld [vmem:[#allocation7 + $0x344] sm:$0xf0]  ;;  %v9231_v62 = vld [vmem:[#allocation7 + $0xf4] sm:$0xf] }
 0x2ce   :  { %2899 = vmatpush.bf16.msra.mxu3 %v7226_v37  ;;  %v7154_v54 = vor.u32 %v9306_v18, %v7153_v41  ;;  %v9320_v18 = vld [vmem:[#allocation7 + $0x3b4] sm:$0xf0] }
 0x2cf   :  { %v2637_v23 = vunpack.c.l.b16 %v2472_v8  ;;  %3219 = vmatpush.bf16.msrb.mxu0 %v7322_v26  ;;  %v9305_v8 = vld [vmem:[#allocation7 + $0x344] sm:$0xf]  ;;  %v7145_v26 = vld [vmem:[#allocation7 + $0x330] sm:$0xf] }
 0x2d0   :  { %v1915_v17 = vpop.f32.mrf.mxu2  ;;  %v1949_v58 = vpop.f32.mrf.mxu3  ;;  %v7158_v59 = vor.u32 %v9305_v8, %v7155_v12  ;;  %2887 = vmatpush.bf16.msra.mxu2 %v7154_v54  ;;  %v7150_v12 = vor.u32 %v9303_v46, %v7147_v1 }
 0x2d1   :  { %v10878_v24 = vpack.c.b16 %v2637_v23, %v2637_v23  ;;  %v1950_v5 = vadd.f32 %v1949_v58, %v1915_v17  ;;  %v9202_v23 = vld [vmem:[#allocation7 + $0x4] sm:$0xf0]  ;;  %v7438_v58 = vor.u32 %v9231_v62, %v7435_v28  ;;  %v7201_v62 = vld [vmem:[#allocation7 + $0x3a0] sm:$0xf] }
 0x2d2   :  { %v7314_v37 = vor.u32 %v9202_v23, %v7313_v22  ;;  %2900 = vmatpush.bf16.msra.mxu3 %v7218_v6  ;;  %2926 = vmatpush.bf16.msra.mxu1 %v7158_v59  ;;  %v7137_v23 = vld [vmem:[#allocation7 + $0x320] sm:$0xf] }
 0x2d3   :  { %v2321_v43 = vadd.f32 %v2320_v10, %v1950_v5  ;;  %v10880_v40 = vpop.f32.mrf.mxu0  ;;  %2918 = vmatmul.bf16.vlgmr.msra.gmra.mxu0 %v10878_v24  ;;  %v10883_v17 = vpop.f32.mrf.mxu1  ;;  %v9304_v10 = vld [vmem:[#allocation7 + $0x334] sm:$0xf0]  ;;  %v7209_v5 = vld [vmem:[#allocation7 + $0x3b0] sm:$0xf] }
 0x2d4   :  { %11274 = vst [vmem:[#allocation36_spill] sm:$0xff] %v10880_v40  ;;  %3220 = vmatpush.bf16.msrb.mxu0 %v7314_v37  ;;  %v7146_v41 = vor.u32 %v9304_v10, %v7145_v26  ;;  %v7210_v54 = vor.u32 %v9320_v18, %v7209_v5  ;;  %v9302_v37 = vld [vmem:[#allocation7 + $0x324] sm:$0xf0]  ;;  %v9227_v5 = vld [vmem:[#allocation7 + $0xd4] sm:$0xf] }
 0x2d5   :  { %v2355_v21 = vadd.f32 %v2354_v16, %v2321_v43  ;;  %11275 = vst [vmem:[#allocation37_spill] sm:$0xff] %v10883_v17  ;;  %v9229_v16 = vld [vmem:[#allocation7 + $0xe4] sm:$0xf]  ;;  %v7427_v43 = vld [vmem:[#allocation7 + $0xe8] sm:$0xf0]  ;;  %v7138_v28 = vor.u32 %v9302_v37, %v7137_v23 }
 0x2d6   :  { %2888 = vmatpush.bf16.msra.mxu2 %v7146_v41  ;;  %v7430_v59 = vor.u32 %v9229_v16, %v7427_v43  ;;  %2901 = vmatpush.bf16.msra.mxu3 %v7210_v54  ;;  %v9318_v26 = vld [vmem:[#allocation7 + $0x3a4] sm:$0xf0]  ;;  %v7419_v18 = vld [vmem:[#allocation7 + $0xd8] sm:$0xf0]  ;;  %v7129_v41 = vld [vmem:[#allocation7 + $0x310] sm:$0xf] }
 0x2d7   :  { %v10886_v8 = vadd.f32 %v2355_v21, %v10669_v38  ;;  %2927 = vmatpush.bf16.msra.mxu1 %v7150_v12  ;;  %v9301_v38 = vld [vmem:[#allocation7 + $0x324] sm:$0xf]  ;;  %v7139_v21 = vld [vmem:[#allocation7 + $0x328] sm:$0xf0]  ;;  %v7422_v46 = vor.u32 %v9227_v5, %v7419_v18  ;;  %v9300_v54 = vld [vmem:[#allocation7 + $0x314] sm:$0xf0] }
 0x2d8   :  { %3265 = vmatpush.bf16.msra.mxu0 %v7438_v58  ;;  %v10888_v22 = vpop.f32.mrf.mxu2  ;;  %v10890_v6 = vpop.f32.mrf.mxu3  ;;  %v7202_v58 = vor.u32 %v9318_v26, %v7201_v62  ;;  %v7142_v10 = vor.u32 %v9301_v38, %v7139_v21  ;;  %v7193_v12 = vld [vmem:[#allocation7 + $0x390] sm:$0xf]  ;;  %v7130_v16 = vor.u32 %v9300_v54, %v7129_v41  ;;  %v9316_v43 = vld [vmem:[#allocation7 + $0x394] sm:$0xf0]  ;;  %v9299_v17 = vld [vmem:[#allocation7 + $0x314] sm:$0xf] }
 0x2d9   :  { %11276 = vst [vmem:[#allocation38_spill] sm:$0xff] %v10886_v8  ;;  %v7131_v23 = vld [vmem:[#allocation7 + $0x318] sm:$0xf0]  ;;  %v7194_v40 = vor.u32 %v9316_v43, %v7193_v12  ;;  %v9225_v62 = vld [vmem:[#allocation7 + $0xc4] sm:$0xf] }
 0x2da   :  { %11277 = vst [vmem:[#allocation39_spill] sm:$0xff] %v10888_v22  ;;  %2889 = vmatpush.bf16.msra.mxu2 %v7138_v28  ;;  %2902 = vmatpush.bf16.msra.mxu3 %v7202_v58  ;;  %v7411_v26 = vld [vmem:[#allocation7 + $0xc8] sm:$0xf0]  ;;  %v7121_v58 = vld [vmem:[#allocation7 + $0x300] sm:$0xf] }
 0x2db   :  { %11278 = vst [vmem:[#allocation40_spill] sm:$0xff] %v10890_v6  ;;  %v2325_v1 = vpop.f32.mrf.mxu0  ;;  %2928 = vmatpush.bf16.msra.mxu1 %v7142_v10  ;;  %v2359_v37 = vpop.f32.mrf.mxu1  ;;  %v7414_v28 = vor.u32 %v9225_v62, %v7411_v26  ;;  %v9298_v10 = vld [vmem:[#allocation7 + $0x304] sm:$0xf0]  ;;  %v7185_v18 = vld [vmem:[#allocation7 + $0x380] sm:$0xf] }
 0x2dc   :  { %3266 = vmatpush.bf16.msra.mxu0 %v7430_v59  ;;  %v7134_v59 = vor.u32 %v9299_v17, %v7131_v23  ;;  %v7122_v41 = vor.u32 %v9298_v10, %v7121_v58  ;;  %v9314_v54 = vld [vmem:[#allocation7 + $0x384] sm:$0xf0]  ;;  %v9297_v6 = vld [vmem:[#allocation7 + $0x304] sm:$0xf]  ;;  %v7123_v22 = vld [vmem:[#allocation7 + $0x308] sm:$0xf0] }
 0x2dd   :  { %v7126_v17 = vor.u32 %v9297_v6, %v7123_v22  ;;  %v9327_v12 = vld [vmem:[#allocation7 + $0x3f4] sm:$0xf]  ;;  %v7243_v43 = vld [vmem:[#allocation7 + $0x3f8] sm:$0xf0]  ;;  %v7433_v26 = vld [vmem:[#allocation7 + $0xf0] sm:$0xf] }
 0x2de   :  { %2890 = vmatpush.bf16.msra.mxu2 %v7130_v16  ;;  %2903 = vmatpush.bf16.msra.mxu3 %v7194_v40  ;;  %v7246_v23 = vor.u32 %v9327_v12, %v7243_v43  ;;  %v9343_v16 = vld [vmem:[#allocation7 + $0x474] sm:$0xf]  ;;  %v7307_v62 = vld [vmem:[#allocation7 + $0x478] sm:$0xf0]  ;;  %v9230_v12 = vld [vmem:[#allocation7 + $0xe4] sm:$0xf0] }
 0x2df   :  { %2929 = vmatpush.bf16.msra.mxu1 %v7134_v59  ;;  %v7310_v59 = vor.u32 %v9343_v16, %v7307_v62  ;;  %v7403_v58 = vld [vmem:[#allocation7 + $0xb8] sm:$0xf0]  ;;  %v9221_v43 = vld [vmem:[#allocation7 + $0xa4] sm:$0xf] }
 0x2e0   :  { %3267 = vmatpush.bf16.msra.mxu0 %v7422_v46  ;;  %v1920_v38 = vpop.f32.mrf.mxu2  ;;  %v1954_v21 = vpop.f32.mrf.mxu3  ;;  %v7186_v46 = vor.u32 %v9314_v54, %v7185_v18 }
 0x2e1   :  { %v1955_v5 = vadd.f32 %v1954_v21, %v1920_v38  ;;  %v9232_v38 = vld [vmem:[#allocation7 + $0xf4] sm:$0xf0]  ;;  %v9223_v21 = vld [vmem:[#allocation7 + $0xb4] sm:$0xf] }
 0x2e2   :  { %2891 = vmatpush.bf16.msra.mxu2 %v7122_v41  ;;  %2904 = vmatpush.bf16.msra.mxu3 %v7186_v46  ;;  %v7434_v10 = vor.u32 %v9232_v38, %v7433_v26  ;;  %v9341_v41 = vld [vmem:[#allocation7 + $0x464] sm:$0xf]  ;;  %v9323_v26 = vld [vmem:[#allocation7 + $0x3d4] sm:$0xf] }
 0x2e3   :  { %v2326_v8 = vadd.f32 %v2325_v1, %v1955_v5  ;;  %2930 = vmatpush.bf16.msra.mxu1 %v7126_v17  ;;  %v7406_v1 = vor.u32 %v9223_v21, %v7403_v58  ;;  %v7235_v5 = vld [vmem:[#allocation7 + $0x3e8] sm:$0xf0]  ;;  %v10895_v6 = vpop.f32.mrf.mxu0  ;;  %v7291_v21 = vld [vmem:[#allocation7 + $0x458] sm:$0xf0]  ;;  %v7417_v58 = vld [vmem:[#allocation7 + $0xd0] sm:$0xf] }
 0x2e4   :  { %3268 = vmatpush.bf16.msra.mxu0 %v7414_v28  ;;  %v9325_v28 = vld [vmem:[#allocation7 + $0x3e4] sm:$0xf]  ;;  %11279 = vst [vmem:[#allocation41_spill] sm:$0xff] %v10895_v6 }
 0x2e5   :  { %v2360_v40 = vadd.f32 %v2359_v37, %v2326_v8  ;;  %v7238_v18 = vor.u32 %v9325_v28, %v7235_v5  ;;  %v7299_v8 = vld [vmem:[#allocation7 + $0x468] sm:$0xf0]  ;;  %v7425_v37 = vld [vmem:[#allocation7 + $0xe0] sm:$0xf]  ;;  %v9219_v28 = vld [vmem:[#allocation7 + $0x94] sm:$0xf] }
 0x2e6   :  { %2936 = vmatpush.bf16.msrb.mxu2 %v7246_v23  ;;  %2949 = vmatpush.bf16.msrb.mxu3 %v7310_v59  ;;  %v7302_v17 = vor.u32 %v9341_v41, %v7299_v8  ;;  %v7395_v23 = vld [vmem:[#allocation7 + $0xa8] sm:$0xf0]  ;;  %v7426_v16 = vor.u32 %v9230_v12, %v7425_v37  ;;  %v9339_v59 = vld [vmem:[#allocation7 + $0x454] sm:$0xf]  ;;  %v7387_v5 = vld [vmem:[#allocation7 + $0x98] sm:$0xf0] }
 0x2e7   :  { %v10893_v22 = vadd.f32 %v2360_v40, %v10683_v30  ;;  %3226 = vmatpush.bf16.msrb.mxu1 %v7434_v10  ;;  %v10901_v30 = vpop.f32.mrf.mxu1  ;;  %v7398_v62 = vor.u32 %v9221_v43, %v7395_v23  ;;  %v7227_v40 = vld [vmem:[#allocation7 + $0x3d8] sm:$0xf0]  ;;  %v7294_v10 = vor.u32 %v9339_v59, %v7291_v21  ;;  %v7390_v8 = vor.u32 %v9219_v28, %v7387_v5  ;;  %v9321_v37 = vld [vmem:[#allocation7 + $0x3c4] sm:$0xf]  ;;  %v7219_v12 = vld [vmem:[#allocation7 + $0x3c8] sm:$0xf0] }
 0x2e8   :  { %v10897_v54 = vpop.f32.mrf.mxu2  ;;  %v10899_v46 = vpop.f32.mrf.mxu3  ;;  %3269 = vmatpush.bf16.msra.mxu0 %v7406_v1  ;;  %11282 = vst [vmem:[#allocation44_spill] sm:$0xff] %v10901_v30  ;;  %v7230_v38 = vor.u32 %v9323_v26, %v7227_v40  ;;  %v9228_v1 = vld [vmem:[#allocation7 + $0xd4] sm:$0xf0]  ;;  %v7222_v43 = vor.u32 %v9321_v37, %v7219_v12  ;;  %v7283_v23 = vld [vmem:[#allocation7 + $0x448] sm:$0xf0] }
 0x2e9   :  { %11280 = vst [vmem:[#allocation42_spill] sm:$0xff] %v10897_v54  ;;  %v7418_v41 = vor.u32 %v9228_v1, %v7417_v58  ;;  %v7409_v30 = vld [vmem:[#allocation7 + $0xc0] sm:$0xf]  ;;  %v9217_v59 = vld [vmem:[#allocation7 + $0x84] sm:$0xf] }
 0x2ea   :  { %11281 = vst [vmem:[#allocation43_spill] sm:$0xff] %v10899_v46  ;;  %2937 = vmatpush.bf16.msrb.mxu2 %v7238_v18  ;;  %2950 = vmatpush.bf16.msrb.mxu3 %v7302_v17  ;;  %v9337_v18 = vld [vmem:[#allocation7 + $0x444] sm:$0xf]  ;;  %v9226_v17 = vld [vmem:[#allocation7 + $0xc4] sm:$0xf0] }
 0x2eb   :  { %3227 = vmatpush.bf16.msrb.mxu1 %v7426_v16  ;;  %v7286_v16 = vor.u32 %v9337_v18, %v7283_v23  ;;  %v7379_v21 = vld [vmem:[#allocation7 + $0x88] sm:$0xf0]  ;;  %v2330_v1 = vpop.f32.mrf.mxu0  ;;  %v7211_v28 = vld [vmem:[#allocation7 + $0x3b8] sm:$0xf0]  ;;  %v9335_v5 = vld [vmem:[#allocation7 + $0x434] sm:$0xf] }
 0x2ec   :  { %3270 = vmatpush.bf16.msra.mxu0 %v7398_v62  ;;  %v7410_v62 = vor.u32 %v9226_v17, %v7409_v30  ;;  %v7382_v58 = vor.u32 %v9217_v59, %v7379_v21  ;;  %v7275_v12 = vld [vmem:[#allocation7 + $0x438] sm:$0xf0]  ;;  %v7401_v46 = vld [vmem:[#allocation7 + $0xb0] sm:$0xf]  ;;  %v9317_v23 = vld [vmem:[#allocation7 + $0x3a4] sm:$0xf] }
 0x2ed   :  { %v7203_v17 = vld [vmem:[#allocation7 + $0x3a8] sm:$0xf0]  ;;  %v9222_v59 = vld [vmem:[#allocation7 + $0xa4] sm:$0xf0] }
 0x2ee   :  { %2938 = vmatpush.bf16.msrb.mxu2 %v7230_v38  ;;  %2951 = vmatpush.bf16.msrb.mxu3 %v7294_v10  ;;  %v9319_v38 = vld [vmem:[#allocation7 + $0x3b4] sm:$0xf] }
 0x2ef   :  { %3228 = vmatpush.bf16.msrb.mxu1 %v7418_v41  ;;  %v7214_v37 = vor.u32 %v9319_v38, %v7211_v28  ;;  %v2364_v54 = vpop.f32.mrf.mxu1  ;;  %v7278_v41 = vor.u32 %v9335_v5, %v7275_v12  ;;  %v9331_v38 = vld [vmem:[#allocation7 + $0x414] sm:$0xf]  ;;  %v7385_v5 = vld [vmem:[#allocation7 + $0x90] sm:$0xf] }
 0x2f0   :  { %v1925_v26 = vpop.f32.mrf.mxu2  ;;  %v1959_v40 = vpop.f32.mrf.mxu3  ;;  %3271 = vmatpush.bf16.msra.mxu0 %v7390_v8  ;;  %v9224_v8 = vld [vmem:[#allocation7 + $0xb4] sm:$0xf0] }
 0x2f1   :  { %v1960_v6 = vadd.f32 %v1959_v40, %v1925_v26  ;;  %v7402_v18 = vor.u32 %v9224_v8, %v7401_v46  ;;  %v9333_v26 = vld [vmem:[#allocation7 + $0x424] sm:$0xf]  ;;  %v7267_v40 = vld [vmem:[#allocation7 + $0x428] sm:$0xf0]  ;;  %v9315_v46 = vld [vmem:[#allocation7 + $0x394] sm:$0xf] }
 0x2f2   :  { %2939 = vmatpush.bf16.msrb.mxu2 %v7222_v43  ;;  %2952 = vmatpush.bf16.msrb.mxu3 %v7286_v16  ;;  %v7393_v16 = vld [vmem:[#allocation7 + $0xa0] sm:$0xf]  ;;  %v7187_v8 = vld [vmem:[#allocation7 + $0x388] sm:$0xf0] }
 0x2f3   :  { %v2331_v10 = vadd.f32 %v2330_v1, %v1960_v6  ;;  %3229 = vmatpush.bf16.msrb.mxu1 %v7410_v62  ;;  %v7206_v6 = vor.u32 %v9317_v23, %v7203_v17  ;;  %v7195_v1 = vld [vmem:[#allocation7 + $0x398] sm:$0xf0]  ;;  %v7251_v23 = vld [vmem:[#allocation7 + $0x408] sm:$0xf0]  ;;  %v7377_v17 = vld [vmem:[#allocation7 + $0x80] sm:$0xf] }
 0x2f4   :  { %3272 = vmatpush.bf16.msra.mxu0 %v7382_v58  ;;  %v7270_v58 = vor.u32 %v9333_v26, %v7267_v40  ;;  %v7198_v28 = vor.u32 %v9315_v46, %v7195_v1  ;;  %v9218_v26 = vld [vmem:[#allocation7 + $0x84] sm:$0xf0]  ;;  %v10915_v1 = vperm.slane %v10867_v0, 1 }
 0x2f5   :  { %v2365_v30 = vadd.f32 %v2364_v54, %v2331_v10  ;;  %v7394_v54 = vor.u32 %v9222_v59, %v7393_v16  ;;  %v7378_v59 = vor.u32 %v9218_v26, %v7377_v17 }
 0x2f6   :  { %2940 = vmatpush.bf16.msrb.mxu2 %v7214_v37  ;;  %2953 = vmatpush.bf16.msrb.mxu3 %v7278_v41  ;;  %v9220_v37 = vld [vmem:[#allocation7 + $0x94] sm:$0xf0]  ;;  %v9313_v41 = vld [vmem:[#allocation7 + $0x384] sm:$0xf] }
 0x2f7   :  { %v10904_v43 = vadd.f32 %v2365_v30, %v10697_v51  ;;  %3230 = vmatpush.bf16.msrb.mxu1 %v7402_v18  ;;  %v7259_v51 = vld [vmem:[#allocation7 + $0x418] sm:$0xf0]  ;;  %v7386_v12 = vor.u32 %v9220_v37, %v7385_v5  ;;  %v9329_v30 = vld [vmem:[#allocation7 + $0x404] sm:$0xf]  ;;  %v7190_v18 = vor.u32 %v9313_v41, %v7187_v8 }
 0x2f8   :  { %v10906_v21 = vpop.f32.mrf.mxu2  ;;  %v10908_v62 = vpop.f32.mrf.mxu3  ;;  %v7262_v10 = vor.u32 %v9331_v38, %v7259_v51  ;;  %v7254_v16 = vor.u32 %v9329_v30, %v7251_v23  ;;  %v9392_v30 = vld [vmem:[#allocation7 + $0x5f4] sm:$0xf0] }
 0x2fa   :  { %2941 = vmatpush.bf16.msrb.mxu2 %v7206_v6  ;;  %2954 = vmatpush.bf16.msrb.mxu3 %v7270_v58  ;;  %v10911_v58 = vperm.slane %v10867_v0, 0  ;;  %v7689_v0 = vld [vmem:[#allocation7 + $0x5f0] sm:$0xf] }
 0x2fb   :  { %3231 = vmatpush.bf16.msrb.mxu1 %v7394_v54  ;;  %v7690_v23 = vor.u32 %v9392_v30, %v7689_v0 }
 0x2fc   :  { %v2407_v38 = vadd.f32 %v10911_v58, %v10792_v34 }
 0x2fe   :  { %2942 = vmatpush.bf16.msrb.mxu2 %v7198_v28  ;;  %2955 = vmatpush.bf16.msrb.mxu3 %v7262_v10  ;;  %v2437_v37 = vmax.f32 %v2407_v38, 0.0 }
 0x2ff   :  { %3232 = vmatpush.bf16.msrb.mxu1 %v7386_v12 }
 0x300   :  { %v2242_v6 = vpop.f32.mrf.mxu2  ;;  %v2276_v40 = vpop.f32.mrf.mxu3 }
 0x301   :  { %v2243_v54 = vadd.f32 %v2242_v6, %v10711_v45  ;;  %v7681_v6 = vld [vmem:[#allocation7 + $0x5e0] sm:$0xf] }
 0x302   :  { %2943 = vmatpush.bf16.msrb.mxu2 %v7190_v18  ;;  %2956 = vmatpush.bf16.msrb.mxu3 %v7254_v16  ;;  %v2410_v18 = vadd.f32 %v10911_v58, %v10801_v35  ;;  %v1947_v35 = vadd.f32 %v10875_v60, %v10873_v14  ;;  %v9386_v14 = vld [vmem:[#allocation7 + $0x5c4] sm:$0xf0] }
 0x303   :  { %v2277_v46 = vadd.f32 %v2276_v40, %v2243_v54  ;;  %3233 = vmatpush.bf16.msrb.mxu1 %v7378_v59  ;;  %v9390_v40 = vld [vmem:[#allocation7 + $0x5e4] sm:$0xf0] }
 0x304   :  { %v2440_v59 = vmax.f32 %v2410_v18, 0.0 }
 0x305   :  { %v2370_v28 = vadd.f32 %v2277_v46, %v10719_v25 }
 0x307   :  { %v2408_v51 = vadd.f32 %v10915_v1, %v2370_v28 }
 0x308   :  { %v2244_v5 = vpop.f32.mrf.mxu2  ;;  %v2278_v10 = vpop.f32.mrf.mxu3 }
 0x309   :  { %v2438_v12 = vmax.f32 %v2408_v51, 0.0  ;;  %v2245_v45 = vadd.f32 %v2244_v5, %v10721_v50  ;;  %v7673_v51 = vld [vmem:[#allocation7 + $0x5d0] sm:$0xf]  ;;  %v9388_v5 = vld [vmem:[#allocation7 + $0x5d4] sm:$0xf0] }
 0x30b   :  { %v10922_v41 = vpack.c.bf16 %v2438_v12, %v2437_v37  ;;  %v2279_v8 = vadd.f32 %v2278_v10, %v2245_v45  ;;  %v2413_v10 = vadd.f32 %v10911_v58, %v10804_v42  ;;  %v2318_v12 = vadd.f32 %v10863_v49, %v1947_v35  ;;  %v9248_v49 = vld [vmem:[#allocation7 + $0x174] sm:$0xf0]  ;;  %v7499_v35 = vld [vmem:[#allocation7 + $0x178] sm:$0xf0] }
 0x30d   :  { %v2964_v34 = vunpack.c.l.b16 %v10922_v41  ;;  %v2373_v25 = vadd.f32 %v2279_v8, %v10723_v36  ;;  %v7682_v36 = vor.u32 %v9390_v40, %v7681_v6  ;;  %v7665_v8 = vld [vmem:[#allocation7 + $0x5c0] sm:$0xf]  ;;  %v2443_v30 = vmax.f32 %v2413_v10, 0.0  ;;  %v9215_v40 = vld [vmem:[#allocation7 + $0x74] sm:$0xf] }
 0x30e   :  { %v7666_v42 = vor.u32 %v9386_v14, %v7665_v8  ;;  %v2416_v6 = vadd.f32 %v10911_v58, %v10810_v57 }
 0x30f   :  { %v10928_v17 = vpack.c.b16 %v2964_v34, %v2964_v34  ;;  %v2411_v26 = vadd.f32 %v10915_v1, %v2373_v25  ;;  %v2352_v25 = vadd.f32 %v10865_v4, %v2318_v12  ;;  %v7657_v4 = vld [vmem:[#allocation7 + $0x5b0] sm:$0xf]  ;;  %v7489_v12 = vld [vmem:[#allocation7 + $0x160] sm:$0xf] }
 0x310   :  { %v2247_v50 = vpop.f32.mrf.mxu2  ;;  %v2281_v16 = vpop.f32.mrf.mxu3 }
 0x311   :  { %v2441_v54 = vmax.f32 %v2411_v26, 0.0  ;;  %v2248_v46 = vadd.f32 %v2247_v50, %v10725_v44  ;;  %3221 = vmatmul.bf16.vlgmr.msrb.gmra.mxu0 %v10928_v17  ;;  %v7674_v44 = vor.u32 %v9388_v5, %v7673_v51  ;;  %v7497_v26 = vld [vmem:[#allocation7 + $0x170] sm:$0xf]  ;;  %v7371_v50 = vld [vmem:[#allocation7 + $0x78] sm:$0xf0] }
 0x312   :  { %3617 = vmatpush.bf16.msrb.mxu0 %v7690_v23  ;;  %v7498_v51 = vor.u32 %v9248_v49, %v7497_v26 }
 0x313   :  { %v10935_v38 = vpack.c.bf16 %v2441_v54, %v2440_v59  ;;  %v2282_v28 = vadd.f32 %v2281_v16, %v2248_v46  ;;  %v9247_v16 = vld [vmem:[#allocation7 + $0x174] sm:$0xf]  ;;  %v2965_v59 = vunpack.c.h.b16 %v10922_v41  ;;  %v9213_v41 = vld [vmem:[#allocation7 + $0x64] sm:$0xf] }
 0x314   :  { %v7502_v14 = vor.u32 %v9247_v16, %v7499_v35  ;;  %v9244_v16 = vld [vmem:[#allocation7 + $0x154] sm:$0xf0]  ;;  %v2419_v35 = vadd.f32 %v10911_v58, %v10813_v33 }
 0x315   :  { %v2376_v37 = vadd.f32 %v2282_v28, %v10733_v56  ;;  %v2380_v28 = vadd.f32 %v2352_v25, %v10657_v63  ;;  %v2446_v63 = vmax.f32 %v2416_v6, 0.0 }
 0x316   :  { %3618 = vmatpush.bf16.msrb.mxu0 %v7682_v36  ;;  %v9384_v36 = vld [vmem:[#allocation7 + $0x5b4] sm:$0xf0] }
 0x317   :  { %v2414_v45 = vadd.f32 %v10915_v1, %v2376_v37  ;;  %v7374_v37 = vor.u32 %v9215_v40, %v7371_v50  ;;  %v7481_v50 = vld [vmem:[#allocation7 + $0x150] sm:$0xf] }
 0x318   :  { %v2249_v60 = vpop.f32.mrf.mxu2  ;;  %v2283_v0 = vpop.f32.mrf.mxu3 }
 0x319   :  { %v2444_v18 = vmax.f32 %v2414_v45, 0.0  ;;  %v2250_v34 = vadd.f32 %v2249_v60, %v10735_v39  ;;  %v7363_v60 = vld [vmem:[#allocation7 + $0x68] sm:$0xf0] }
 0x31a   :  { %3619 = vmatpush.bf16.msrb.mxu0 %v7674_v44  ;;  %v9246_v44 = vld [vmem:[#allocation7 + $0x164] sm:$0xf0]  ;;  %v7366_v6 = vor.u32 %v9213_v41, %v7363_v60  ;;  %v9241_v60 = vld [vmem:[#allocation7 + $0x144] sm:$0xf] }
 0x31b   :  { %v2471_v23 = vpack.c.bf16 %v2444_v18, %v2443_v30  ;;  %v2284_v56 = vadd.f32 %v2283_v0, %v2250_v34  ;;  %v9245_v0 = vld [vmem:[#allocation7 + $0x164] sm:$0xf]  ;;  %v7491_v30 = vld [vmem:[#allocation7 + $0x168] sm:$0xf0]  ;;  %v10952_v18 = vpack.c.b16 %v2965_v59, %v2965_v59  ;;  %v7490_v26 = vor.u32 %v9246_v44, %v7489_v12  ;;  %v7473_v44 = vld [vmem:[#allocation7 + $0x140] sm:$0xf] }
 0x31c   :  { %v9242_v41 = vld [vmem:[#allocation7 + $0x144] sm:$0xf0] }
 0x31d   :  { %v2635_v54 = vunpack.c.l.b16 %v2471_v23  ;;  %v2636_v46 = vunpack.c.h.b16 %v2471_v23  ;;  %v2379_v39 = vadd.f32 %v2284_v56, %v10737_v9  ;;  %v7658_v9 = vor.u32 %v9384_v36, %v7657_v4  ;;  %v9382_v23 = vld [vmem:[#allocation7 + $0x5a4] sm:$0xf0]  ;;  %v7483_v36 = vld [vmem:[#allocation7 + $0x158] sm:$0xf0] }
 0x31e   :  { %3620 = vmatpush.bf16.msrb.mxu0 %v7666_v42  ;;  %v7649_v42 = vld [vmem:[#allocation7 + $0x5a0] sm:$0xf]  ;;  %v2418_v56 = vadd.f32 %v10870_v31, %v2380_v28  ;;  %v7641_v28 = vld [vmem:[#allocation7 + $0x590] sm:$0xf] }
 0x31f   :  { %v2638_v5 = vpack.c.b16 %v2635_v54, %v2635_v54  ;;  %v10949_v10 = vpack.c.b16 %v2636_v46, %v2636_v46  ;;  %v2417_v57 = vadd.f32 %v10915_v1, %v2379_v39  ;;  %v7650_v59 = vor.u32 %v9382_v23, %v7649_v42  ;;  %v9211_v54 = vld [vmem:[#allocation7 + $0x54] sm:$0xf]  ;;  %v7355_v46 = vld [vmem:[#allocation7 + $0x58] sm:$0xf0]  ;;  %v9378_v42 = vld [vmem:[#allocation7 + $0x584] sm:$0xf0] }
 0x320   :  { %v2252_v45 = vpop.f32.mrf.mxu2  ;;  %v2286_v8 = vpop.f32.mrf.mxu3  ;;  %v9243_v39 = vld [vmem:[#allocation7 + $0x154] sm:$0xf]  ;;  %v7358_v12 = vor.u32 %v9211_v54, %v7355_v46  ;;  %v1821_v23 = vadd.f32 %v10830_v52, %v10828_v32  ;;  %v9240_v46 = vld [vmem:[#allocation7 + $0x134] sm:$0xf0]  ;;  %v2422_v32 = vadd.f32 %v10911_v58, %v10819_v15  ;;  %v7457_v15 = vld [vmem:[#allocation7 + $0x120] sm:$0xf] }
 0x321   :  { %v2447_v34 = vmax.f32 %v2417_v57, 0.0  ;;  %v2253_v25 = vadd.f32 %v2252_v45, %v10739_v48  ;;  %2892 = vmatmul.bf16.vlgmr.msra.gmra.mxu2 %v2638_v5  ;;  %2905 = vmatmul.bf16.vlgmr.msra.gmra.mxu3 %v10949_v10  ;;  %v7494_v48 = vor.u32 %v9245_v0, %v7491_v30  ;;  %v7482_v57 = vor.u32 %v9244_v16, %v7481_v50  ;;  %v9209_v45 = vld [vmem:[#allocation7 + $0x44] sm:$0xf]  ;;  %v7475_v0 = vld [vmem:[#allocation7 + $0x148] sm:$0xf0] }
 0x322   :  { %2931 = vmatmul.bf16.vlgmr.msra.gmra.mxu1 %v2638_v5  ;;  %3239 = vmatpush.bf16.msra.mxu2 %v7498_v51  ;;  %v9380_v51 = vld [vmem:[#allocation7 + $0x594] sm:$0xf0]  ;;  %v2448_v5 = vmax.f32 %v2418_v56, 0.0  ;;  %v7486_v33 = vor.u32 %v9243_v39, %v7483_v36  ;;  %v2449_v30 = vmax.f32 %v2419_v35, 0.0  ;;  %v7478_v54 = vor.u32 %v9241_v60, %v7475_v0  ;;  %v9207_v39 = vld [vmem:[#allocation7 + $0x34] sm:$0xf] }
 0x323   :  { %v10957_v49 = vpack.c.bf16 %v2447_v34, %v2446_v63  ;;  %v2287_v40 = vadd.f32 %v2286_v8, %v2253_v25  ;;  %3252 = vmatpush.bf16.msra.mxu3 %v7374_v37  ;;  %3273 = vmatmul.bf16.vlgmr.msra.gmra.mxu0 %v10952_v18  ;;  %v7633_v25 = vld [vmem:[#allocation7 + $0x580] sm:$0xf]  ;;  %v7339_v35 = vld [vmem:[#allocation7 + $0x38] sm:$0xf0]  ;;  %v9239_v36 = vld [vmem:[#allocation7 + $0x134] sm:$0xf] }
 0x324   :  { %3278 = vmatpush.bf16.msra.mxu1 %v7502_v14  ;;  %3621 = vmatpush.bf16.msrb.mxu0 %v7658_v9  ;;  %v7642_v9 = vor.u32 %v9380_v51, %v7641_v28  ;;  %v2474_v56 = vpack.c.bf16 %v2448_v5, %v2448_v5  ;;  %v7467_v28 = vld [vmem:[#allocation7 + $0x138] sm:$0xf0]  ;;  %v2192_v51 = vadd.f32 %v10821_v27, %v1821_v23  ;;  %v9205_v27 = vld [vmem:[#allocation7 + $0x24] sm:$0xf]  ;;  %v7737_v23 = vld [vmem:[#allocation7 + $0x1d0] sm:$0xf] }
 0x325   :  { %v2382_v4 = vadd.f32 %v2287_v40, %v10747_v3  ;;  %v7347_v3 = vld [vmem:[#allocation7 + $0x48] sm:$0xf0]  ;;  %v7753_v40 = vld [vmem:[#allocation7 + $0x1f0] sm:$0xf] }
 0x326   :  { %3240 = vmatpush.bf16.msra.mxu2 %v7490_v26  ;;  %v7474_v26 = vor.u32 %v9242_v41, %v7473_v44  ;;  %v3344_v5 = vunpack.c.l.b16 %v2474_v56  ;;  %v9260_v56 = vld [vmem:[#allocation7 + $0x1d4] sm:$0xf0] }
 0x327   :  { %v2420_v37 = vadd.f32 %v10915_v1, %v2382_v4  ;;  %3253 = vmatpush.bf16.msra.mxu3 %v7366_v6  ;;  %v9264_v6 = vld [vmem:[#allocation7 + $0x1f4] sm:$0xf0] }
 0x328   :  { %3279 = vmatpush.bf16.msra.mxu1 %v7494_v48  ;;  %3622 = vmatpush.bf16.msrb.mxu0 %v7650_v59  ;;  %v2254_v8 = vpop.f32.mrf.mxu2  ;;  %v2288_v14 = vpop.f32.mrf.mxu3  ;;  %v7350_v48 = vor.u32 %v9209_v45, %v7347_v3  ;;  %v7465_v59 = vld [vmem:[#allocation7 + $0x130] sm:$0xf]  ;;  %v7754_v4 = vor.u32 %v9264_v6, %v7753_v40  ;;  %v7342_v45 = vor.u32 %v9207_v39, %v7339_v35  ;;  %v2452_v3 = vmax.f32 %v2422_v32, 0.0  ;;  %v7729_v32 = vld [vmem:[#allocation7 + $0x1c0] sm:$0xf] }
 0x329   :  { %v2450_v63 = vmax.f32 %v2420_v37, 0.0  ;;  %v2255_v34 = vadd.f32 %v2254_v8, %v10749_v20  ;;  %v7634_v20 = vor.u32 %v9378_v42, %v7633_v25  ;;  %v9262_v37 = vld [vmem:[#allocation7 + $0x1e4] sm:$0xf0]  ;;  %v7466_v41 = vor.u32 %v9240_v46, %v7465_v59  ;;  %v7449_v6 = vld [vmem:[#allocation7 + $0x110] sm:$0xf] }
 0x32a   :  { %3241 = vmatpush.bf16.msra.mxu2 %v7482_v57  ;;  %v7745_v57 = vld [vmem:[#allocation7 + $0x1e0] sm:$0xf]  ;;  %v9238_v8 = vld [vmem:[#allocation7 + $0x124] sm:$0xf0]  ;;  %v10979_v25 = vpack.c.b16 %v3344_v5, %v3344_v5  ;;  %v7451_v46 = vld [vmem:[#allocation7 + $0x118] sm:$0xf0]  ;;  %v1889_v39 = vadd.f32 %v10765_v53, %v10763_v11 }
 0x32b   :  { %v10967_v50 = vpack.c.bf16 %v2450_v63, %v2449_v30  ;;  %v2289_v16 = vadd.f32 %v2288_v14, %v2255_v34  ;;  %3254 = vmatpush.bf16.msra.mxu3 %v7358_v12  ;;  %v2409_v12 = vadd.f32 %v10870_v31, %v10854_v2  ;;  %v7746_v2 = vor.u32 %v9262_v37, %v7745_v57  ;;  %v9237_v30 = vld [vmem:[#allocation7 + $0x124] sm:$0xf]  ;;  %v7459_v63 = vld [vmem:[#allocation7 + $0x128] sm:$0xf0] }
 0x32c   :  { %3280 = vmatpush.bf16.msra.mxu1 %v7486_v33  ;;  %3623 = vmatpush.bf16.msrb.mxu0 %v7642_v9  ;;  %v7470_v33 = vor.u32 %v9239_v36, %v7467_v28  ;;  %v7331_v9 = vld [vmem:[#allocation7 + $0x28] sm:$0xf0]  ;;  %v2226_v34 = vadd.f32 %v10823_v47, %v2192_v51  ;;  %v7458_v42 = vor.u32 %v9238_v8, %v7457_v15  ;;  %v9234_v51 = vld [vmem:[#allocation7 + $0x104] sm:$0xf0]  ;;  %v9233_v11 = vld [vmem:[#allocation7 + $0x104] sm:$0xf] }
 0x32d   :  { %v2385_v52 = vadd.f32 %v2289_v16, %v10751_v29  ;;  %v7462_v47 = vor.u32 %v9237_v30, %v7459_v63  ;;  %v9236_v16 = vld [vmem:[#allocation7 + $0x114] sm:$0xf0]  ;;  %v7315_v5 = vld [vmem:[#allocation7 + $0x8] sm:$0xf0]  ;;  %v7721_v63 = vld [vmem:[#allocation7 + $0x1b0] sm:$0xf] }
 0x32e   :  { %3242 = vmatpush.bf16.msra.mxu2 %v7474_v26  ;;  %v2439_v26 = vmax.f32 %v2409_v12, 0.0  ;;  %v2390_v35 = vadd.f32 %v2226_v34, %v10695_v13  ;;  %v7450_v28 = vor.u32 %v9236_v16, %v7449_v6  ;;  %v7443_v53 = vld [vmem:[#allocation7 + $0x108] sm:$0xf0]  ;;  %v7561_v13 = vld [vmem:[#allocation7 + $0x4f0] sm:$0xf] }
 0x32f   :  { %v2423_v44 = vadd.f32 %v10915_v1, %v2385_v52  ;;  %3255 = vmatpush.bf16.msra.mxu3 %v7350_v48  ;;  %v9203_v48 = vld [vmem:[#allocation7 + $0x14] sm:$0xf]  ;;  %v9258_v52 = vld [vmem:[#allocation7 + $0x1c4] sm:$0xf0]  ;;  %v9256_v34 = vld [vmem:[#allocation7 + $0x1b4] sm:$0xf0] }
 0x330   :  { %3281 = vmatpush.bf16.msra.mxu1 %v7478_v54  ;;  %3624 = vmatpush.bf16.msrb.mxu0 %v7634_v20  ;;  %v2257_v29 = vpop.f32.mrf.mxu2  ;;  %v2291_v14 = vpop.f32.mrf.mxu3  ;;  %v7738_v54 = vor.u32 %v9260_v56, %v7737_v23  ;;  %v9235_v20 = vld [vmem:[#allocation7 + $0x114] sm:$0xf]  ;;  %v2468_v57 = vpack.c.bf16 %v2439_v26, %v2439_v26  ;;  %v7730_v8 = vor.u32 %v9258_v52, %v7729_v32  ;;  %v11285_v32 = vld [vmem:[#allocation28_spill] sm:$0xff] }
 0x331   :  { %v2453_v60 = vmax.f32 %v2423_v44, 0.0  ;;  %v2258_v0 = vadd.f32 %v2257_v29, %v10753_v55  ;;  %2944 = vmatmul.bf16.vlgmr.msrb.gmra.mxu2 %v10949_v10  ;;  %2957 = vmatmul.bf16.vlgmr.msrb.gmra.mxu3 %v10878_v24  ;;  %v7334_v10 = vor.u32 %v9205_v27, %v7331_v9  ;;  %v7323_v24 = vld [vmem:[#allocation7 + $0x18] sm:$0xf0]  ;;  %v7454_v44 = vor.u32 %v9235_v20, %v7451_v46  ;;  %v9360_v29 = vld [vmem:[#allocation7 + $0x4f4] sm:$0xf0] }
 0x332   :  { %3234 = vmatmul.bf16.vlgmr.msrb.gmra.mxu1 %v10952_v18  ;;  %3243 = vmatpush.bf16.msra.mxu2 %v7466_v41  ;;  %v2425_v18 = vadd.f32 %v10911_v58, %v10826_v19  ;;  %v7326_v19 = vor.u32 %v9203_v48, %v7323_v24  ;;  %v9376_v9 = vld [vmem:[#allocation7 + $0x574] sm:$0xf0]  ;;  %v2966_v56 = vunpack.c.l.b16 %v2468_v57  ;;  %v7446_v26 = vor.u32 %v9233_v11, %v7443_v53  ;;  %v7553_v48 = vld [vmem:[#allocation7 + $0x4e0] sm:$0xf]  ;;  %v9358_v24 = vld [vmem:[#allocation7 + $0x4e4] sm:$0xf0] }
 0x333   :  { %v10983_v40 = vpack.c.bf16 %v2453_v60, %v2452_v3  ;;  %v2292_v55 = vadd.f32 %v2291_v14, %v2258_v0  ;;  %3256 = vmatpush.bf16.msra.mxu3 %v7342_v45  ;;  %3625 = vmatmul.bf16.vlgmr.msrb.gmra.mxu0 %v10979_v25  ;;  %v7625_v14 = vld [vmem:[#allocation7 + $0x570] sm:$0xf]  ;;  %v9359_v3 = vld [vmem:[#allocation7 + $0x4f4] sm:$0xf]  ;;  %v7563_v60 = vld [vmem:[#allocation7 + $0x4f8] sm:$0xf0] }
 0x334   :  { %3920 = vmatpush.bf16.msra.mxu0 %v7754_v4  ;;  %3282 = vmatpush.bf16.msra.mxu1 %v7470_v33  ;;  %v7441_v4 = vld [vmem:[#allocation7 + $0x100] sm:$0xf]  ;;  %v2455_v41 = vmax.f32 %v2425_v18, 0.0  ;;  %v2428_v33 = vadd.f32 %v10911_v58, %v2390_v35  ;;  %v7566_v16 = vor.u32 %v9359_v3, %v7563_v60  ;;  %v9357_v20 = vld [vmem:[#allocation7 + $0x4e4] sm:$0xf]  ;;  %v11286_v57 = vld [vmem:[#allocation23_spill] sm:$0xff] }
 0x335   :  { %v2388_v59 = vadd.f32 %v2292_v55, %v10761_v61  ;;  %v9201_v61 = vld [vmem:[#allocation7 + $0x4] sm:$0xf]  ;;  %v7442_v27 = vor.u32 %v9234_v51, %v7441_v4  ;;  %v7562_v55 = vor.u32 %v9360_v29, %v7561_v13  ;;  %v7617_v18 = vld [vmem:[#allocation7 + $0x560] sm:$0xf]  ;;  %v7555_v46 = vld [vmem:[#allocation7 + $0x4e8] sm:$0xf0]  ;;  %v2969_v4 = vpack.c.b16 %v2966_v56, %v2966_v56 }
 0x336   :  { %3244 = vmatpush.bf16.msra.mxu2 %v7458_v42  ;;  %v7318_v30 = vor.u32 %v9201_v61, %v7315_v5  ;;  %v11283_v42 = vld [vmem:[#allocation31_spill] sm:$0xff]  ;;  %v9254_v35 = vld [vmem:[#allocation7 + $0x1a4] sm:$0xf0]  ;;  %v7554_v51 = vor.u32 %v9358_v24, %v7553_v48  ;;  %v7545_v61 = vld [vmem:[#allocation7 + $0x4d0] sm:$0xf] }
 0x337   :  { %v2426_v36 = vadd.f32 %v10915_v1, %v2388_v59  ;;  %3257 = vmatpush.bf16.msra.mxu3 %v7334_v10  ;;  %v1826_v23 = vadd.f32 %v11283_v42, %v10842_v7  ;;  %v11284_v10 = vld [vmem:[#allocation22_spill] sm:$0xff]  ;;  %v7722_v59 = vor.u32 %v9256_v34, %v7721_v63  ;;  %v7713_v7 = vld [vmem:[#allocation7 + $0x1a0] sm:$0xf]  ;;  %v9356_v11 = vld [vmem:[#allocation7 + $0x4d4] sm:$0xf0] }
 0x338   :  { %3921 = vmatpush.bf16.msra.mxu0 %v7746_v2  ;;  %3283 = vmatpush.bf16.msra.mxu1 %v7462_v47  ;;  %v2259_v37 = vpop.f32.mrf.mxu2  ;;  %v2293_v12 = vpop.f32.mrf.mxu3  ;;  %v7626_v47 = vor.u32 %v9376_v9, %v7625_v14  ;;  %v7609_v53 = vld [vmem:[#allocation7 + $0x550] sm:$0xf]  ;;  %v7714_v13 = vor.u32 %v9254_v35, %v7713_v7  ;;  %v11288_v3 = vld [vmem:[#allocation29_spill] sm:$0xff] }
 0x339   :  { %v2456_v45 = vmax.f32 %v2426_v36, 0.0  ;;  %v2260_v15 = vadd.f32 %v2259_v37, %v1889_v39  ;;  %v2197_v52 = vadd.f32 %v11285_v32, %v1826_v23  ;;  %v2458_v36 = vmax.f32 %v2428_v33, 0.0  ;;  %v7705_v14 = vld [vmem:[#allocation7 + $0x190] sm:$0xf]  ;;  %v9252_v33 = vld [vmem:[#allocation7 + $0x194] sm:$0xf0] }
 0x33a   :  { %3245 = vmatpush.bf16.msra.mxu2 %v7450_v28  ;;  %v7537_v23 = vld [vmem:[#allocation7 + $0x4c0] sm:$0xf]  ;;  %v9354_v56 = vld [vmem:[#allocation7 + $0x4c4] sm:$0xf0]  ;;  %v9279_v32 = vld [vmem:[#allocation7 + $0x274] sm:$0xf] }
 0x33b   :  { %v10994_v0 = vpack.c.bf16 %v2456_v45, %v2455_v41  ;;  %v2294_v2 = vadd.f32 %v2293_v12, %v2260_v15  ;;  %3258 = vmatpush.bf16.msra.mxu3 %v7326_v19  ;;  %v9372_v41 = vld [vmem:[#allocation7 + $0x554] sm:$0xf0]  ;;  %v9355_v45 = vld [vmem:[#allocation7 + $0x4d4] sm:$0xf]  ;;  %v7547_v15 = vld [vmem:[#allocation7 + $0x4d8] sm:$0xf0]  ;;  %v2231_v60 = vadd.f32 %v11288_v3, %v2197_v52  ;;  %v7538_v35 = vor.u32 %v9354_v56, %v7537_v23 }
 0x33c   :  { %3922 = vmatpush.bf16.msra.mxu0 %v7738_v54  ;;  %3284 = vmatpush.bf16.msra.mxu1 %v7454_v44  ;;  %v9374_v54 = vld [vmem:[#allocation7 + $0x564] sm:$0xf0]  ;;  %v7558_v44 = vor.u32 %v9357_v20, %v7555_v46  ;;  %v7610_v34 = vor.u32 %v9372_v41, %v7609_v53  ;;  %v7550_v42 = vor.u32 %v9355_v45, %v7547_v15  ;;  %v11013_v46 = vpop.f32.mrf.mxu0  ;;  %v7819_v52 = vld [vmem:[#allocation7 + $0x278] sm:$0xf0]  ;;  %v9351_v41 = vld [vmem:[#allocation7 + $0x4b4] sm:$0xf] }
 0x33d   :  { %v2391_v6 = vadd.f32 %v2294_v2, %v11284_v10  ;;  %v7618_v12 = vor.u32 %v9374_v54, %v7617_v18  ;;  %v7546_v2 = vor.u32 %v9356_v11, %v7545_v61  ;;  %v9353_v10 = vld [vmem:[#allocation7 + $0x4c4] sm:$0xf]  ;;  %v7697_v18 = vld [vmem:[#allocation7 + $0x180] sm:$0xf]  ;;  %v9352_v61 = vld [vmem:[#allocation7 + $0x4b4] sm:$0xf0] }
 0x33e   :  { %3246 = vmatpush.bf16.msra.mxu2 %v7442_v27  ;;  %v11287_v27 = vld [vmem:[#allocation30_spill] sm:$0xff]  ;;  %v11292_v54 = vld [vmem:[#allocation21_spill] sm:$0xff]  ;;  %v7531_v45 = vld [vmem:[#allocation7 + $0x4b8] sm:$0xf0] }
 0x33f   :  { %v2429_v39 = vadd.f32 %v10915_v1, %v2391_v6  ;;  %3259 = vmatpush.bf16.msra.mxu3 %v7318_v30  ;;  %v2431_v9 = vadd.f32 %v10911_v58, %v11287_v27  ;;  %v11289_v30 = vld [vmem:[#allocation24_spill] sm:$0xff]  ;;  %v7539_v6 = vld [vmem:[#allocation7 + $0x4c8] sm:$0xf0]  ;;  %v2396_v20 = vadd.f32 %v2231_v60, %v11292_v54  ;;  %v11293_v27 = vld [vmem:[#allocation27_spill] sm:$0xff] }
 0x340   :  { %3923 = vmatpush.bf16.msra.mxu0 %v7730_v8  ;;  %3285 = vmatpush.bf16.msra.mxu1 %v7446_v26  ;;  %v2262_v28 = vpop.f32.mrf.mxu2  ;;  %v2296_v19 = vpop.f32.mrf.mxu3  ;;  %v7601_v26 = vld [vmem:[#allocation7 + $0x540] sm:$0xf]  ;;  %v9364_v54 = vld [vmem:[#allocation7 + $0x514] sm:$0xf0] }
 0x341   :  { %v2459_v5 = vmax.f32 %v2429_v39, 0.0  ;;  %v2263_v37 = vadd.f32 %v2262_v28, %v11286_v57  ;;  %3247 = vmatmul.bf16.vlgmr.msra.gmra.mxu2 %v2969_v4  ;;  %v2461_v39 = vmax.f32 %v2431_v9, 0.0  ;;  %v7521_v60 = vld [vmem:[#allocation7 + $0x4a0] sm:$0xf] }
 0x342   :  { %3591 = vmatpush.bf16.msrb.mxu2 %v7562_v55  ;;  %3260 = vmatmul.bf16.vlgmr.msra.gmra.mxu3 %v10928_v17  ;;  %v7706_v17 = vor.u32 %v9252_v33, %v7705_v14  ;;  %v9370_v55 = vld [vmem:[#allocation7 + $0x544] sm:$0xf0]  ;;  %v7811_v14 = vld [vmem:[#allocation7 + $0x268] sm:$0xf0]  ;;  %v2434_v33 = vadd.f32 %v10911_v58, %v2396_v20 }
 0x343   :  { %3604 = vmatpush.bf16.msrb.mxu3 %v7626_v47  ;;  %v11002_v8 = vpack.c.bf16 %v2459_v5, %v2458_v36  ;;  %v2297_v29 = vadd.f32 %v2296_v19, %v2263_v37  ;;  %3286 = vmatmul.bf16.vlgmr.msra.gmra.mxu1 %v2969_v4  ;;  %v11290_v47 = vld [vmem:[#allocation25_spill] sm:$0xff]  ;;  %v7602_v28 = vor.u32 %v9370_v55, %v7601_v26  ;;  %v7593_v37 = vld [vmem:[#allocation7 + $0x530] sm:$0xf] }
 0x344   :  { %3630 = vmatpush.bf16.msrb.mxu1 %v7566_v16  ;;  %3924 = vmatpush.bf16.msra.mxu0 %v7722_v59  ;;  %v11291_v16 = vld [vmem:[#allocation26_spill] sm:$0xff]  ;;  %v9250_v59 = vld [vmem:[#allocation7 + $0x184] sm:$0xf0]  ;;  %v7542_v19 = vor.u32 %v9353_v10, %v7539_v6  ;;  %v9349_v26 = vld [vmem:[#allocation7 + $0x4a4] sm:$0xf] }
 0x345   :  { %v2394_v63 = vadd.f32 %v2297_v29, %v11289_v30  ;;  %v1894_v48 = vadd.f32 %v11291_v16, %v11290_v47  ;;  %v7698_v57 = vor.u32 %v9250_v59, %v7697_v18  ;;  %v9277_v29 = vld [vmem:[#allocation7 + $0x264] sm:$0xf]  ;;  %v7534_v30 = vor.u32 %v9351_v41, %v7531_v45  ;;  %v9275_v10 = vld [vmem:[#allocation7 + $0x254] sm:$0xf]  ;;  %v7803_v6 = vld [vmem:[#allocation7 + $0x258] sm:$0xf0] }
 0x346   :  { %3592 = vmatpush.bf16.msrb.mxu2 %v7554_v51  ;;  %v7529_v51 = vld [vmem:[#allocation7 + $0x4b0] sm:$0xf]  ;;  %v7814_v56 = vor.u32 %v9277_v29, %v7811_v14  ;;  %v2464_v47 = vmax.f32 %v2434_v33, 0.0  ;;  %v9348_v18 = vld [vmem:[#allocation7 + $0x494] sm:$0xf0] }
 0x347   :  { %3605 = vmatpush.bf16.msrb.mxu3 %v7618_v12  ;;  %v2432_v24 = vadd.f32 %v10915_v1, %v2394_v63  ;;  %v9368_v12 = vld [vmem:[#allocation7 + $0x534] sm:$0xf0]  ;;  %v7530_v15 = vor.u32 %v9352_v61, %v7529_v51  ;;  %v7585_v63 = vld [vmem:[#allocation7 + $0x520] sm:$0xf]  ;;  %v7577_v59 = vld [vmem:[#allocation7 + $0x510] sm:$0xf] }
 0x348   :  { %3631 = vmatpush.bf16.msrb.mxu1 %v7558_v44  ;;  %3925 = vmatpush.bf16.msra.mxu0 %v7714_v13  ;;  %v2264_v7 = vpop.f32.mrf.mxu2  ;;  %v2298_v5 = vpop.f32.mrf.mxu3  ;;  %v3671_v44 = vunpack.c.l.b16 %v10935_v38  ;;  %v7822_v13 = vor.u32 %v9279_v32, %v7819_v52  ;;  %v7594_v3 = vor.u32 %v9368_v12, %v7593_v37  ;;  %v9273_v32 = vld [vmem:[#allocation7 + $0x244] sm:$0xf]  ;;  %v7569_v51 = vld [vmem:[#allocation7 + $0x500] sm:$0xf]  ;;  %v9362_v61 = vld [vmem:[#allocation7 + $0x504] sm:$0xf0] }
 0x349   :  { %v2462_v4 = vmax.f32 %v2432_v24, 0.0  ;;  %v2265_v36 = vadd.f32 %v2264_v7, %v1894_v48  ;;  %v7513_v24 = vld [vmem:[#allocation7 + $0x490] sm:$0xf]  ;;  %v9347_v7 = vld [vmem:[#allocation7 + $0x494] sm:$0xf] }
 0x34a   :  { %3593 = vmatpush.bf16.msrb.mxu2 %v7546_v2  ;;  %v9350_v2 = vld [vmem:[#allocation7 + $0x4a4] sm:$0xf0]  ;;  %v7514_v52 = vor.u32 %v9348_v18, %v7513_v24  ;;  %v7507_v37 = vld [vmem:[#allocation7 + $0x488] sm:$0xf0]  ;;  %v9375_v12 = vld [vmem:[#allocation7 + $0x574] sm:$0xf] }
 0x34b   :  { %3606 = vmatpush.bf16.msrb.mxu3 %v7610_v34  ;;  %v11016_v11 = vpack.c.bf16 %v2462_v4, %v2461_v39  ;;  %v2299_v53 = vadd.f32 %v2298_v5, %v2265_v36  ;;  %v9366_v34 = vld [vmem:[#allocation7 + $0x524] sm:$0xf0]  ;;  %v7522_v55 = vor.u32 %v9350_v2, %v7521_v60  ;;  %v7806_v39 = vor.u32 %v9275_v10, %v7803_v6  ;;  %v7795_v4 = vld [vmem:[#allocation7 + $0x248] sm:$0xf0]  ;;  %v7505_v36 = vld [vmem:[#allocation7 + $0x480] sm:$0xf] }
 0x34c   :  { %3632 = vmatpush.bf16.msrb.mxu1 %v7550_v42  ;;  %3926 = vmatpush.bf16.msra.mxu0 %v7706_v17  ;;  %v11020_v42 = vpack.c.b16 %v3671_v44, %v3671_v44  ;;  %v7523_v17 = vld [vmem:[#allocation7 + $0x4a8] sm:$0xf0]  ;;  %v7586_v48 = vor.u32 %v9366_v34, %v7585_v63  ;;  %v9345_v5 = vld [vmem:[#allocation7 + $0x484] sm:$0xf]  ;;  %v7627_v44 = vld [vmem:[#allocation7 + $0x578] sm:$0xf0]  ;;  %v3342_v60 = vunpack.c.l.b16 %v10957_v49  ;;  %v3343_v2 = vunpack.c.h.b16 %v10957_v49 }
 0x34d   :  { %v2397_v9 = vadd.f32 %v2299_v53, %v11293_v27  ;;  %v7798_v53 = vor.u32 %v9273_v32, %v7795_v4  ;;  %v7691_v41 = vld [vmem:[#allocation7 + $0x5f8] sm:$0xf0]  ;;  %v7817_v45 = vld [vmem:[#allocation7 + $0x270] sm:$0xf]  ;;  %v9280_v14 = vld [vmem:[#allocation7 + $0x274] sm:$0xf0] }
 0x34e   :  { %3594 = vmatpush.bf16.msrb.mxu2 %v7538_v35  ;;  %v7515_v35 = vld [vmem:[#allocation7 + $0x498] sm:$0xf0]  ;;  %v9271_v33 = vld [vmem:[#allocation7 + $0x234] sm:$0xf]  ;;  %v9373_v34 = vld [vmem:[#allocation7 + $0x564] sm:$0xf]  ;;  %v3345_v24 = vpack.c.b16 %v3342_v60, %v3342_v60  ;;  %v11030_v49 = vpack.c.b16 %v3343_v2, %v3343_v2 }
 0x34f   :  { %3607 = vmatpush.bf16.msrb.mxu3 %v7602_v28  ;;  %v2435_v23 = vadd.f32 %v10915_v1, %v2397_v9  ;;  %v7526_v1 = vor.u32 %v9349_v26, %v7523_v17  ;;  %v9346_v28 = vld [vmem:[#allocation7 + $0x484] sm:$0xf0]  ;;  %v7787_v27 = vld [vmem:[#allocation7 + $0x238] sm:$0xf0]  ;;  %v7570_v9 = vor.u32 %v9362_v61, %v7569_v51  ;;  %v9389_v17 = vld [vmem:[#allocation7 + $0x5e4] sm:$0xf] }
 0x350   :  { %3633 = vmatpush.bf16.msrb.mxu1 %v7542_v19  ;;  %3927 = vmatpush.bf16.msra.mxu0 %v7698_v57  ;;  %v11023_v58 = vpop.f32.mrf.mxu0  ;;  %v7578_v19 = vor.u32 %v9364_v54, %v7577_v59  ;;  %v7518_v57 = vor.u32 %v9347_v7, %v7515_v35  ;;  %v7506_v29 = vor.u32 %v9346_v28, %v7505_v36  ;;  %v7809_v10 = vld [vmem:[#allocation7 + $0x260] sm:$0xf]  ;;  %v9278_v6 = vld [vmem:[#allocation7 + $0x264] sm:$0xf0]  ;;  %v7611_v59 = vld [vmem:[#allocation7 + $0x558] sm:$0xf0] }
 0x351   :  { %v2465_v16 = vmax.f32 %v2435_v23, 0.0  ;;  %v7619_v23 = vld [vmem:[#allocation7 + $0x568] sm:$0xf0]  ;;  %v7790_v26 = vor.u32 %v9271_v33, %v7787_v27  ;;  %v7810_v54 = vor.u32 %v9278_v6, %v7809_v10  ;;  %v9387_v7 = vld [vmem:[#allocation7 + $0x5d4] sm:$0xf] }
 0x352   :  { %3595 = vmatpush.bf16.msrb.mxu2 %v7530_v15  ;;  %v7675_v35 = vld [vmem:[#allocation7 + $0x5d8] sm:$0xf0]  ;;  %v7801_v32 = vld [vmem:[#allocation7 + $0x250] sm:$0xf]  ;;  %v9267_v4 = vld [vmem:[#allocation7 + $0x214] sm:$0xf] }
 0x353   :  { %3928 = vmatmul.bf16.vlgmr.msra.gmra.mxu0 %v11020_v42  ;;  %3608 = vmatpush.bf16.msrb.mxu3 %v7594_v3  ;;  %v11026_v20 = vpack.c.bf16 %v2465_v16, %v2464_v47  ;;  %v7630_v3 = vor.u32 %v9375_v12, %v7627_v44  ;;  %v9269_v47 = vld [vmem:[#allocation7 + $0x224] sm:$0xf]  ;;  %v7779_v16 = vld [vmem:[#allocation7 + $0x228] sm:$0xf0]  ;;  %v7771_v36 = vld [vmem:[#allocation7 + $0x218] sm:$0xf0] }
 0x354   :  { %3972 = vmatpush.bf16.msrb.mxu0 %v7822_v13  ;;  %3634 = vmatpush.bf16.msrb.mxu1 %v7534_v30  ;;  %v9391_v13 = vld [vmem:[#allocation7 + $0x5f4] sm:$0xf]  ;;  %v7510_v30 = vor.u32 %v9345_v5, %v7507_v37  ;;  %v9369_v51 = vld [vmem:[#allocation7 + $0x544] sm:$0xf]  ;;  %v7603_v61 = vld [vmem:[#allocation7 + $0x548] sm:$0xf0] }
 0x355   :  { %v7694_v63 = vor.u32 %v9391_v13, %v7691_v41  ;;  %v9385_v37 = vld [vmem:[#allocation7 + $0x5c4] sm:$0xf]  ;;  %v7667_v12 = vld [vmem:[#allocation7 + $0x5c8] sm:$0xf0]  ;;  %v7793_v44 = vld [vmem:[#allocation7 + $0x240] sm:$0xf] }
 0x356   :  { %3596 = vmatpush.bf16.msrb.mxu2 %v7522_v55  ;;  %v7683_v55 = vld [vmem:[#allocation7 + $0x5e8] sm:$0xf0]  ;;  %v9265_v13 = vld [vmem:[#allocation7 + $0x204] sm:$0xf]  ;;  %v9367_v33 = vld [vmem:[#allocation7 + $0x534] sm:$0xf] }
 0x357   :  { %3609 = vmatpush.bf16.msrb.mxu3 %v7586_v48  ;;  %v7622_v48 = vor.u32 %v9373_v34, %v7619_v23  ;;  %v7686_v18 = vor.u32 %v9389_v17, %v7683_v55  ;;  %v7763_v41 = vld [vmem:[#allocation7 + $0x208] sm:$0xf0]  ;;  %v7595_v27 = vld [vmem:[#allocation7 + $0x538] sm:$0xf0]  ;;  %v9383_v60 = vld [vmem:[#allocation7 + $0x5b4] sm:$0xf] }
 0x358   :  { %3973 = vmatpush.bf16.msrb.mxu0 %v7814_v56  ;;  %3635 = vmatpush.bf16.msrb.mxu1 %v7526_v1  ;;  %v2921_v15 = vpop.f32.mrf.mxu0  ;;  %v7818_v56 = vor.u32 %v9280_v14, %v7817_v45  ;;  %v9371_v1 = vld [vmem:[#allocation7 + $0x554] sm:$0xf]  ;;  %v7606_v45 = vor.u32 %v9369_v51, %v7603_v61  ;;  %v7670_v14 = vor.u32 %v9385_v37, %v7667_v12  ;;  %v7659_v2 = vld [vmem:[#allocation7 + $0x5b8] sm:$0xf0]  ;;  %v7785_v34 = vld [vmem:[#allocation7 + $0x230] sm:$0xf] }
 0x359   :  { %v7614_v28 = vor.u32 %v9371_v1, %v7611_v59  ;;  %v8073_v15 = vld [vmem:[#allocation7 + $0x770] sm:$0xf]  ;;  %v9272_v23 = vld [vmem:[#allocation7 + $0x234] sm:$0xf0]  ;;  %v9438_v17 = vld [vmem:[#allocation7 + $0x764] sm:$0xf0]  ;;  %v7662_v55 = vor.u32 %v9383_v60, %v7659_v2 }
 0x35a   :  { %3597 = vmatpush.bf16.msrb.mxu2 %v7514_v52  ;;  %v9276_v52 = vld [vmem:[#allocation7 + $0x254] sm:$0xf0]  ;;  %v9365_v10 = vld [vmem:[#allocation7 + $0x524] sm:$0xf]  ;;  %v7587_v6 = vld [vmem:[#allocation7 + $0x528] sm:$0xf0] }
 0x35b   :  { %3610 = vmatpush.bf16.msrb.mxu3 %v7578_v19  ;;  %v7678_v19 = vor.u32 %v9387_v7, %v7675_v35  ;;  %v7802_v5 = vor.u32 %v9276_v52, %v7801_v32  ;;  %v9270_v1 = vld [vmem:[#allocation7 + $0x224] sm:$0xf0]  ;;  %v7590_v59 = vor.u32 %v9365_v10, %v7587_v6  ;;  %v9363_v35 = vld [vmem:[#allocation7 + $0x514] sm:$0xf]  ;;  %v7579_v32 = vld [vmem:[#allocation7 + $0x518] sm:$0xf0] }
 0x35c   :  { %3974 = vmatpush.bf16.msrb.mxu0 %v7806_v39  ;;  %3636 = vmatpush.bf16.msrb.mxu1 %v7518_v57  ;;  %v7782_v39 = vor.u32 %v9269_v47, %v7779_v16  ;;  %v7774_v57 = vor.u32 %v9267_v4, %v7771_v36  ;;  %v7786_v47 = vor.u32 %v9272_v23, %v7785_v34  ;;  %v9381_v16 = vld [vmem:[#allocation7 + $0x5a4] sm:$0xf]  ;;  %v9379_v4 = vld [vmem:[#allocation7 + $0x594] sm:$0xf]  ;;  %v7643_v36 = vld [vmem:[#allocation7 + $0x598] sm:$0xf0] }
 0x35d   :  { %v9268_v51 = vld [vmem:[#allocation7 + $0x214] sm:$0xf0]  ;;  %v8049_v61 = vld [vmem:[#allocation7 + $0x740] sm:$0xf]  ;;  %v9361_v37 = vld [vmem:[#allocation7 + $0x504] sm:$0xf] }
 0x35e   :  { %3598 = vmatpush.bf16.msrb.mxu2 %v7506_v29  ;;  %v9440_v29 = vld [vmem:[#allocation7 + $0x774] sm:$0xf0]  ;;  %v7571_v12 = vld [vmem:[#allocation7 + $0x508] sm:$0xf0]  ;;  %v7883_v2 = vld [vmem:[#allocation7 + $0x2f8] sm:$0xf0] }
 0x35f   :  { %3611 = vmatpush.bf16.msrb.mxu3 %v7570_v9  ;;  %v7574_v60 = vor.u32 %v9361_v37, %v7571_v12  ;;  %v7873_v10 = vld [vmem:[#allocation7 + $0x2e0] sm:$0xf]  ;;  %v9294_v6 = vld [vmem:[#allocation7 + $0x2e4] sm:$0xf0]  ;;  %v7739_v37 = vld [vmem:[#allocation7 + $0x1d8] sm:$0xf0] }
 0x360   :  { %3975 = vmatpush.bf16.msrb.mxu0 %v7798_v53  ;;  %3637 = vmatpush.bf16.msrb.mxu1 %v7510_v30  ;;  %v9274_v53 = vld [vmem:[#allocation7 + $0x244] sm:$0xf0]  ;;  %v3672_v30 = vunpack.c.h.b16 %v10935_v38  ;;  %v9291_v12 = vld [vmem:[#allocation7 + $0x2d4] sm:$0xf] }
 0x361   :  { %3599 = vmatmul.bf16.vlgmr.msrb.gmra.mxu2 %v3345_v24  ;;  %v7794_v9 = vor.u32 %v9274_v53, %v7793_v44  ;;  %v7646_v44 = vor.u32 %v9379_v4, %v7643_v36  ;;  %v9377_v53 = vld [vmem:[#allocation7 + $0x584] sm:$0xf]  ;;  %v7865_v36 = vld [vmem:[#allocation7 + $0x2d0] sm:$0xf] }
 0x362   :  { %3643 = vmatpush.bf16.msra.mxu2 %v7630_v3  ;;  %3612 = vmatmul.bf16.vlgmr.msrb.gmra.mxu3 %v11030_v49  ;;  %v7766_v3 = vor.u32 %v9265_v13, %v7763_v41  ;;  %v7635_v13 = vld [vmem:[#allocation7 + $0x588] sm:$0xf0]  ;;  %v7761_v41 = vld [vmem:[#allocation7 + $0x200] sm:$0xf] }
 0x363   :  { %3656 = vmatpush.bf16.msra.mxu3 %v7694_v63  ;;  %3638 = vmatmul.bf16.vlgmr.msrb.gmra.mxu1 %v3345_v24  ;;  %v8074_v63 = vor.u32 %v9440_v29, %v8073_v15  ;;  %v11034_v24 = vpack.c.b16 %v3672_v30, %v3672_v30  ;;  %v9266_v15 = vld [vmem:[#allocation7 + $0x204] sm:$0xf0]  ;;  %v7881_v29 = vld [vmem:[#allocation7 + $0x2f0] sm:$0xf]  ;;  %v7638_v34 = vor.u32 %v9377_v53, %v7635_v13  ;;  %v9428_v13 = vld [vmem:[#allocation7 + $0x714] sm:$0xf0] }
 0x364   :  { %3933 = vmatpush.bf16.msra.mxu1 %v7818_v56  ;;  %3976 = vmatpush.bf16.msrb.mxu0 %v7790_v26  ;;  %v7598_v56 = vor.u32 %v9367_v33, %v7595_v27  ;;  %v8065_v26 = vld [vmem:[#allocation7 + $0x760] sm:$0xf]  ;;  %v9263_v27 = vld [vmem:[#allocation7 + $0x1f4] sm:$0xf]  ;;  %v8041_v30 = vld [vmem:[#allocation7 + $0x730] sm:$0xf] }
 0x365   :  { %v8066_v38 = vor.u32 %v9438_v17, %v8065_v26  ;;  %v7762_v17 = vor.u32 %v9266_v15, %v7761_v41  ;;  %v8025_v53 = vld [vmem:[#allocation7 + $0x710] sm:$0xf]  ;;  %v7857_v15 = vld [vmem:[#allocation7 + $0x2c0] sm:$0xf] }
 0x366   :  { %3644 = vmatpush.bf16.msra.mxu2 %v7622_v48  ;;  %v7651_v48 = vld [vmem:[#allocation7 + $0x5a8] sm:$0xf0] }
 0x367   :  { %3657 = vmatpush.bf16.msra.mxu3 %v7686_v18  ;;  %v7777_v18 = vld [vmem:[#allocation7 + $0x220] sm:$0xf]  ;;  %v7654_v7 = vor.u32 %v9381_v16, %v7651_v48  ;;  %v11296_v16 = vld [vmem:[#allocation35_spill] sm:$0xff] }
 0x368   :  { %3934 = vmatpush.bf16.msra.mxu1 %v7810_v54  ;;  %3977 = vmatpush.bf16.msrb.mxu0 %v7782_v39  ;;  %v8057_v54 = vld [vmem:[#allocation7 + $0x750] sm:$0xf]  ;;  %v9436_v39 = vld [vmem:[#allocation7 + $0x754] sm:$0xf0]  ;;  %v7778_v52 = vor.u32 %v9270_v1, %v7777_v18  ;;  %v9261_v1 = vld [vmem:[#allocation7 + $0x1e4] sm:$0xf] }
 0x36a   :  { %3645 = vmatpush.bf16.msra.mxu2 %v7614_v28  ;;  %v8058_v28 = vor.u32 %v9436_v39, %v8057_v54  ;;  %v9293_v54 = vld [vmem:[#allocation7 + $0x2e4] sm:$0xf]  ;;  %v7875_v39 = vld [vmem:[#allocation7 + $0x2e8] sm:$0xf0] }
 0x36b   :  { %3658 = vmatpush.bf16.msra.mxu3 %v7678_v19  ;;  %v7769_v19 = vld [vmem:[#allocation7 + $0x210] sm:$0xf] }
 0x36c   :  { %3935 = vmatpush.bf16.msra.mxu1 %v7802_v5  ;;  %3978 = vmatpush.bf16.msrb.mxu0 %v7774_v57  ;;  %v7582_v5 = vor.u32 %v9363_v35, %v7579_v32  ;;  %v9434_v57 = vld [vmem:[#allocation7 + $0x744] sm:$0xf0]  ;;  %v7874_v32 = vor.u32 %v9294_v6, %v7873_v10 }
 0x36d   :  { %v8050_v33 = vor.u32 %v9434_v57, %v8049_v61  ;;  %v9430_v35 = vld [vmem:[#allocation7 + $0x724] sm:$0xf0]  ;;  %v7878_v61 = vor.u32 %v9293_v54, %v7875_v39  ;;  %v9259_v57 = vld [vmem:[#allocation7 + $0x1d4] sm:$0xf]  ;;  %v8129_v39 = vld [vmem:[#allocation7 + $0x7e0] sm:$0xf] }
 0x36e   :  { %3646 = vmatpush.bf16.msra.mxu2 %v7606_v45  ;;  %v7770_v45 = vor.u32 %v9268_v51, %v7769_v19  ;;  %v11297_v19 = vld [vmem:[#allocation32_spill] sm:$0xff] }
 0x36f   :  { %3659 = vmatpush.bf16.msra.mxu3 %v7670_v14  ;;  %v9296_v14 = vld [vmem:[#allocation7 + $0x2f4] sm:$0xf0] }
 0x370   :  { %3936 = vmatpush.bf16.msra.mxu1 %v7794_v9  ;;  %3979 = vmatpush.bf16.msrb.mxu0 %v7766_v3  ;;  %v7755_v9 = vld [vmem:[#allocation7 + $0x1f8] sm:$0xf0]  ;;  %v9295_v3 = vld [vmem:[#allocation7 + $0x2f4] sm:$0xf]  ;;  %v7882_v23 = vor.u32 %v9296_v14, %v7881_v29  ;;  %v9290_v29 = vld [vmem:[#allocation7 + $0x2c4] sm:$0xf0] }
 0x371   :  { %v11298_v14 = vld [vmem:[#allocation33_spill] sm:$0xff] }
 0x372   :  { %3647 = vmatpush.bf16.msra.mxu2 %v7598_v56  ;;  %v11294_v56 = vld [vmem:[#allocation38_spill] sm:$0xff] }
 0x373   :  { %3980 = vmatmul.bf16.vlgmr.msrb.gmra.mxu0 %v11034_v24  ;;  %3660 = vmatpush.bf16.msra.mxu3 %v7662_v55  ;;  %v2421_v26 = vadd.f32 %v10870_v31, %v11294_v56  ;;  %v7758_v55 = vor.u32 %v9263_v27, %v7755_v9  ;;  %v8026_v9 = vor.u32 %v9428_v13, %v8025_v53  ;;  %v7833_v13 = vld [vmem:[#allocation7 + $0x290] sm:$0xf] }
 0x374   :  { %4324 = vmatpush.bf16.msra.mxu0 %v8074_v63  ;;  %3937 = vmatpush.bf16.msra.mxu1 %v7786_v47  ;;  %v9432_v63 = vld [vmem:[#allocation7 + $0x734] sm:$0xf0]  ;;  %v11295_v47 = vld [vmem:[#allocation34_spill] sm:$0xff] }
 0x375   :  { %v1942_v48 = vadd.f32 %v11296_v16, %v11295_v47  ;;  %v8042_v18 = vor.u32 %v9432_v63, %v8041_v30  ;;  %v8017_v30 = vld [vmem:[#allocation7 + $0x700] sm:$0xf]  ;;  %v9426_v63 = vld [vmem:[#allocation7 + $0x704] sm:$0xf0]  ;;  %v9255_v16 = vld [vmem:[#allocation7 + $0x1b4] sm:$0xf] }
 0x376   :  { %3648 = vmatpush.bf16.msra.mxu2 %v7590_v59  ;;  %v7747_v59 = vld [vmem:[#allocation7 + $0x1e8] sm:$0xf0]  ;;  %v8018_v47 = vor.u32 %v9426_v63, %v8017_v30  ;;  %v9282_v30 = vld [vmem:[#allocation7 + $0x284] sm:$0xf0] }
 0x377   :  { %3661 = vmatpush.bf16.msra.mxu3 %v7654_v7  ;;  %v8033_v7 = vld [vmem:[#allocation7 + $0x720] sm:$0xf]  ;;  %v7750_v4 = vor.u32 %v9261_v1, %v7747_v59  ;;  %v2313_v51 = vadd.f32 %v11297_v19, %v1942_v48  ;;  %v7723_v48 = vld [vmem:[#allocation7 + $0x1b8] sm:$0xf0]  ;;  %v9287_v1 = vld [vmem:[#allocation7 + $0x2b4] sm:$0xf] }
 0x378   :  { %4325 = vmatpush.bf16.msra.mxu0 %v8066_v38  ;;  %3938 = vmatpush.bf16.msra.mxu1 %v7778_v52  ;;  %v7886_v38 = vor.u32 %v9295_v3, %v7883_v2  ;;  %v2451_v52 = vmax.f32 %v2421_v26, 0.0  ;;  %v7731_v3 = vld [vmem:[#allocation7 + $0x1c8] sm:$0xf0]  ;;  %v7849_v26 = vld [vmem:[#allocation7 + $0x2b0] sm:$0xf] }
 0x379   :  { %v7859_v2 = vld [vmem:[#allocation7 + $0x2c8] sm:$0xf0]  ;;  %v7851_v59 = vld [vmem:[#allocation7 + $0x2b8] sm:$0xf0] }
 0x37a   :  { %3649 = vmatpush.bf16.msra.mxu2 %v7582_v5  ;;  %v8034_v5 = vor.u32 %v9430_v35, %v8033_v7  ;;  %v9454_v7 = vld [vmem:[#allocation7 + $0x7e4] sm:$0xf0]  ;;  %v7726_v35 = vor.u32 %v9255_v16, %v7723_v48  ;;  %v7715_v19 = vld [vmem:[#allocation7 + $0x1a8] sm:$0xf0]  ;;  %v9424_v16 = vld [vmem:[#allocation7 + $0x6f4] sm:$0xf0] }
 0x37b   :  { %3662 = vmatpush.bf16.msra.mxu3 %v7646_v44  ;;  %v7867_v44 = vld [vmem:[#allocation7 + $0x2d8] sm:$0xf0]  ;;  %v9407_v48 = vld [vmem:[#allocation7 + $0x674] sm:$0xf] }
 0x37c   :  { %4326 = vmatpush.bf16.msra.mxu0 %v8058_v28  ;;  %3939 = vmatpush.bf16.msra.mxu1 %v7770_v45  ;;  %v9292_v28 = vld [vmem:[#allocation7 + $0x2d4] sm:$0xf0]  ;;  %v7742_v45 = vor.u32 %v9259_v57, %v7739_v37  ;;  %v7870_v27 = vor.u32 %v9291_v12, %v7867_v44  ;;  %v7843_v57 = vld [vmem:[#allocation7 + $0x2a8] sm:$0xf0]  ;;  %v8121_v12 = vld [vmem:[#allocation7 + $0x7d0] sm:$0xf] }
 0x37d   :  { %v7866_v41 = vor.u32 %v9292_v28, %v7865_v36  ;;  %v7854_v36 = vor.u32 %v9287_v1, %v7851_v59  ;;  %v9253_v28 = vld [vmem:[#allocation7 + $0x1a4] sm:$0xf]  ;;  %v9452_v44 = vld [vmem:[#allocation7 + $0x7d4] sm:$0xf0]  ;;  %v8105_v1 = vld [vmem:[#allocation7 + $0x7b0] sm:$0xf] }
 0x37e   :  { %3650 = vmatpush.bf16.msra.mxu2 %v7574_v60  ;;  %v2476_v60 = vpack.c.bf16 %v2451_v52, %v2451_v52  ;;  %v9286_v52 = vld [vmem:[#allocation7 + $0x2a4] sm:$0xf0]  ;;  %v7718_v53 = vor.u32 %v9253_v28, %v7715_v19  ;;  %v9448_v59 = vld [vmem:[#allocation7 + $0x7b4] sm:$0xf0]  ;;  %v8001_v19 = vld [vmem:[#allocation7 + $0x6e0] sm:$0xf] }
 0x37f   :  { %3663 = vmatpush.bf16.msra.mxu3 %v7638_v34  ;;  %v8137_v34 = vld [vmem:[#allocation7 + $0x7f0] sm:$0xf]  ;;  %v8106_v28 = vor.u32 %v9448_v59, %v8105_v1 }
 0x380   :  { %4327 = vmatpush.bf16.msra.mxu0 %v8050_v33  ;;  %3940 = vmatpush.bf16.msra.mxu1 %v7762_v17  ;;  %v2347_v33 = vadd.f32 %v11298_v14, %v2313_v51  ;;  %v9288_v17 = vld [vmem:[#allocation7 + $0x2b4] sm:$0xf0]  ;;  %v7707_v14 = vld [vmem:[#allocation7 + $0x198] sm:$0xf0]  ;;  %v7913_v59 = vld [vmem:[#allocation7 + $0x630] sm:$0xf] }
 0x381   :  { %3651 = vmatmul.bf16.vlgmr.msra.gmra.mxu2 %v11030_v49  ;;  %v9257_v49 = vld [vmem:[#allocation7 + $0x1c4] sm:$0xf]  ;;  %v7850_v54 = vor.u32 %v9288_v17, %v7849_v26  ;;  %v7827_v17 = vld [vmem:[#allocation7 + $0x288] sm:$0xf0] }
 0x382   :  { %3946 = vmatpush.bf16.msrb.mxu2 %v7882_v23  ;;  %3664 = vmatmul.bf16.vlgmr.msra.gmra.mxu3 %v10979_v25  ;;  %v9289_v25 = vld [vmem:[#allocation7 + $0x2c4] sm:$0xf]  ;;  %v9456_v23 = vld [vmem:[#allocation7 + $0x7f4] sm:$0xf0]  ;;  %v7734_v56 = vor.u32 %v9257_v49, %v7731_v3  ;;  %v8113_v49 = vld [vmem:[#allocation7 + $0x7c0] sm:$0xf] }
 0x383   :  { %3959 = vmatpush.bf16.msrb.mxu3 %v7758_v55  ;;  %3941 = vmatmul.bf16.vlgmr.msra.gmra.mxu1 %v11034_v24  ;;  %v7858_v24 = vor.u32 %v9290_v29, %v7857_v15  ;;  %v11299_v55 = vld [vmem:[#allocation17_spill] sm:$0xff]  ;;  %v7862_v6 = vor.u32 %v9289_v25, %v7859_v2  ;;  %v9251_v29 = vld [vmem:[#allocation7 + $0x194] sm:$0xf]  ;;  %v7825_v2 = vld [vmem:[#allocation7 + $0x280] sm:$0xf] }
 0x384   :  { %3985 = vmatpush.bf16.msrb.mxu1 %v7886_v38  ;;  %4328 = vmatpush.bf16.msra.mxu0 %v8042_v18  ;;  %v2374_v10 = vadd.f32 %v2347_v33, %v11299_v55  ;;  %v4051_v38 = vunpack.c.l.b16 %v2476_v60  ;;  %v8138_v18 = vor.u32 %v9456_v23, %v8137_v34  ;;  %v8122_v33 = vor.u32 %v9452_v44, %v8121_v12  ;;  %v9450_v60 = vld [vmem:[#allocation7 + $0x7c4] sm:$0xf0]  ;;  %v7699_v34 = vld [vmem:[#allocation7 + $0x188] sm:$0xf0]  ;;  %v9281_v23 = vld [vmem:[#allocation7 + $0x284] sm:$0xf] }
 0x385   :  { %v7710_v63 = vor.u32 %v9251_v29, %v7707_v14  ;;  %v7945_v55 = vld [vmem:[#allocation7 + $0x670] sm:$0xf]  ;;  %v8097_v12 = vld [vmem:[#allocation7 + $0x7a0] sm:$0xf]  ;;  %v9446_v44 = vld [vmem:[#allocation7 + $0x7a4] sm:$0xf0] }
 0x386   :  { %3947 = vmatpush.bf16.msrb.mxu2 %v7874_v32  ;;  %v7841_v32 = vld [vmem:[#allocation7 + $0x2a0] sm:$0xf]  ;;  %v11048_v51 = vpack.c.b16 %v4051_v38, %v4051_v38  ;;  %v7826_v38 = vor.u32 %v9282_v30, %v7825_v2  ;;  %v9404_v29 = vld [vmem:[#allocation7 + $0x654] sm:$0xf0] }
 0x387   :  { %3960 = vmatpush.bf16.msrb.mxu3 %v7750_v4  ;;  %v2412_v4 = vadd.f32 %v10870_v31, %v2374_v10  ;;  %v7842_v37 = vor.u32 %v9286_v52, %v7841_v32  ;;  %v9408_v10 = vld [vmem:[#allocation7 + $0x674] sm:$0xf0]  ;;  %v7937_v52 = vld [vmem:[#allocation7 + $0x660] sm:$0xf] }
 0x388   :  { %3986 = vmatpush.bf16.msrb.mxu1 %v7878_v61  ;;  %4329 = vmatpush.bf16.msra.mxu0 %v8034_v5  ;;  %v8130_v61 = vor.u32 %v9454_v7, %v8129_v39  ;;  %v9285_v5 = vld [vmem:[#allocation7 + $0x2a4] sm:$0xf]  ;;  %v7946_v39 = vor.u32 %v9408_v10, %v7945_v55  ;;  %v9444_v2 = vld [vmem:[#allocation7 + $0x794] sm:$0xf0]  ;;  %v7923_v10 = vld [vmem:[#allocation7 + $0x648] sm:$0xf0] }
 0x389   :  { %v7846_v15 = vor.u32 %v9285_v5, %v7843_v57  ;;  %v9405_v5 = vld [vmem:[#allocation7 + $0x664] sm:$0xf] }
 0x38a   :  { %3948 = vmatpush.bf16.msrb.mxu2 %v7866_v41  ;;  %v9284_v41 = vld [vmem:[#allocation7 + $0x294] sm:$0xf0]  ;;  %v9401_v55 = vld [vmem:[#allocation7 + $0x644] sm:$0xf] }
 0x38b   :  { %3961 = vmatpush.bf16.msrb.mxu3 %v7742_v45  ;;  %v2442_v45 = vmax.f32 %v2412_v4, 0.0  ;;  %v7834_v25 = vor.u32 %v9284_v41, %v7833_v13  ;;  %v9406_v4 = vld [vmem:[#allocation7 + $0x664] sm:$0xf0] }
 0x38c   :  { %3987 = vmatpush.bf16.msrb.mxu1 %v7870_v27  ;;  %4330 = vmatpush.bf16.msra.mxu0 %v8026_v9  ;;  %v9283_v27 = vld [vmem:[#allocation7 + $0x294] sm:$0xf]  ;;  %v7835_v9 = vld [vmem:[#allocation7 + $0x298] sm:$0xf0]  ;;  %v7938_v13 = vor.u32 %v9406_v4, %v7937_v52  ;;  %v4429_v52 = vunpack.c.l.b16 %v10983_v40 }
 0x38d   :  { %v7838_v26 = vor.u32 %v9283_v27, %v7835_v9  ;;  %v7993_v27 = vld [vmem:[#allocation7 + $0x6d0] sm:$0xf]  ;;  %v9420_v9 = vld [vmem:[#allocation7 + $0x6d4] sm:$0xf0] }
 0x38e   :  { %3949 = vmatpush.bf16.msrb.mxu2 %v7858_v24  ;;  %v11051_v3 = vpop.f32.mrf.mxu0  ;;  %v9249_v24 = vld [vmem:[#allocation7 + $0x184] sm:$0xf] }
 0x38f   :  { %3962 = vmatpush.bf16.msrb.mxu3 %v7734_v56  ;;  %v2470_v56 = vpack.c.bf16 %v2442_v45, %v2442_v45 }
 0x390   :  { %3988 = vmatpush.bf16.msrb.mxu1 %v7862_v6  ;;  %4331 = vmatpush.bf16.msra.mxu0 %v8018_v47  ;;  %v8114_v6 = vor.u32 %v9450_v60, %v8113_v49  ;;  %v8009_v47 = vld [vmem:[#allocation7 + $0x6f0] sm:$0xf]  ;;  %v9403_v49 = vld [vmem:[#allocation7 + $0x654] sm:$0xf] }
 0x391   :  { %v3673_v7 = vunpack.c.l.b16 %v2470_v56  ;;  %v8010_v32 = vor.u32 %v9424_v16, %v8009_v47  ;;  %v8089_v60 = vld [vmem:[#allocation7 + $0x790] sm:$0xf] }
 0x392   :  { %3950 = vmatpush.bf16.msrb.mxu2 %v7850_v54  ;;  %v7702_v54 = vor.u32 %v9249_v24, %v7699_v34  ;;  %v7921_v24 = vld [vmem:[#allocation7 + $0x640] sm:$0xf]  ;;  %v9402_v34 = vld [vmem:[#allocation7 + $0x644] sm:$0xf0]  ;;  %v8090_v56 = vor.u32 %v9444_v2, %v8089_v60  ;;  %v9467_v2 = vld [vmem:[#allocation7 + $0x854] sm:$0xf] }
 0x393   :  { %4332 = vmatmul.bf16.vlgmr.msra.gmra.mxu0 %v11048_v51  ;;  %3963 = vmatpush.bf16.msrb.mxu3 %v7726_v35  ;;  %v7830_v35 = vor.u32 %v9281_v23, %v7827_v17  ;;  %v3676_v41 = vpack.c.b16 %v3673_v7, %v3673_v7  ;;  %v9418_v17 = vld [vmem:[#allocation7 + $0x6c4] sm:$0xf0]  ;;  %v7922_v16 = vor.u32 %v9402_v34, %v7921_v24  ;;  %v7897_v34 = vld [vmem:[#allocation7 + $0x610] sm:$0xf] }
 0x394   :  { %4678 = vmatpush.bf16.msrb.mxu0 %v8138_v18  ;;  %3989 = vmatpush.bf16.msrb.mxu1 %v7854_v36  ;;  %v7947_v18 = vld [vmem:[#allocation7 + $0x678] sm:$0xf0] }
 0x395   :  { %v7950_v36 = vor.u32 %v9407_v48, %v7947_v18  ;;  %v9471_v48 = vld [vmem:[#allocation7 + $0x874] sm:$0xf] }
 0x396   :  { %3951 = vmatpush.bf16.msrb.mxu2 %v7842_v37  ;;  %v3224_v57 = vpop.f32.mrf.mxu0  ;;  %v7939_v37 = vld [vmem:[#allocation7 + $0x668] sm:$0xf0] }
 0x397   :  { %3964 = vmatpush.bf16.msrb.mxu3 %v7718_v53  ;;  %v11053_v53 = vpop.f32.mrf.mxu1  ;;  %v7942_v14 = vor.u32 %v9405_v5, %v7939_v37  ;;  %v8195_v5 = vld [vmem:[#allocation7 + $0x868] sm:$0xf0] }
 0x398   :  { %4679 = vmatpush.bf16.msrb.mxu0 %v8130_v61  ;;  %3990 = vmatpush.bf16.msrb.mxu1 %v7846_v15  ;;  %v9422_v61 = vld [vmem:[#allocation7 + $0x6e4] sm:$0xf0]  ;;  %v7929_v15 = vld [vmem:[#allocation7 + $0x650] sm:$0xf] }
 0x399   :  { %v8002_v45 = vor.u32 %v9422_v61, %v8001_v19  ;;  %v7930_v30 = vor.u32 %v9404_v29, %v7929_v15  ;;  %v9469_v61 = vld [vmem:[#allocation7 + $0x864] sm:$0xf]  ;;  %v7969_v15 = vld [vmem:[#allocation7 + $0x6a0] sm:$0xf]  ;;  %v9414_v29 = vld [vmem:[#allocation7 + $0x6a4] sm:$0xf0] }
 0x39a   :  { %3952 = vmatpush.bf16.msrb.mxu2 %v7834_v25  ;;  %v7931_v25 = vld [vmem:[#allocation7 + $0x658] sm:$0xf0]  ;;  %v7970_v24 = vor.u32 %v9414_v29, %v7969_v15 }
 0x39b   :  { %3965 = vmatpush.bf16.msrb.mxu3 %v7710_v63  ;;  %v7994_v63 = vor.u32 %v9420_v9, %v7993_v27  ;;  %v7934_v23 = vor.u32 %v9403_v49, %v7931_v25  ;;  %v9397_v27 = vld [vmem:[#allocation7 + $0x624] sm:$0xf]  ;;  %v7907_v9 = vld [vmem:[#allocation7 + $0x628] sm:$0xf0] }
 0x39c   :  { %4680 = vmatpush.bf16.msrb.mxu0 %v8122_v33  ;;  %3991 = vmatpush.bf16.msrb.mxu1 %v7838_v26  ;;  %v8098_v33 = vor.u32 %v9446_v44, %v8097_v12  ;;  %v7985_v26 = vld [vmem:[#allocation7 + $0x6c0] sm:$0xf] }
 0x39d   :  { %v7986_v1 = vor.u32 %v9418_v17, %v7985_v26  ;;  %v7905_v44 = vld [vmem:[#allocation7 + $0x620] sm:$0xf]  ;;  %v7961_v26 = vld [vmem:[#allocation7 + $0x690] sm:$0xf]  ;;  %v9412_v17 = vld [vmem:[#allocation7 + $0x694] sm:$0xf0] }
 0x39e   :  { %3953 = vmatpush.bf16.msrb.mxu2 %v7826_v38  ;;  %v8203_v38 = vld [vmem:[#allocation7 + $0x878] sm:$0xf0] }
 0x39f   :  { %3966 = vmatpush.bf16.msrb.mxu3 %v7702_v54  ;;  %v11056_v47 = vpop.f32.mrf.mxu1  ;;  %v9400_v54 = vld [vmem:[#allocation7 + $0x634] sm:$0xf0]  ;;  %v8206_v4 = vor.u32 %v9471_v48, %v8203_v38  ;;  %v8179_v48 = vld [vmem:[#allocation7 + $0x848] sm:$0xf0]  ;;  %v7889_v38 = vld [vmem:[#allocation7 + $0x600] sm:$0xf] }
 0x3a0   :  { %4681 = vmatpush.bf16.msrb.mxu0 %v8114_v6  ;;  %3992 = vmatpush.bf16.msrb.mxu1 %v7830_v35  ;;  %v8081_v6 = vld [vmem:[#allocation7 + $0x780] sm:$0xf]  ;;  %v11058_v18 = vpop.f32.mrf.mxu0  ;;  %v7977_v35 = vld [vmem:[#allocation7 + $0x6b0] sm:$0xf]  ;;  %v7914_v19 = vor.u32 %v9400_v54, %v7913_v59 }
 0x3a1   :  { %3954 = vmatmul.bf16.vlgmr.msrb.gmra.mxu2 %v3676_v41 }
 0x3a2   :  { %4298 = vmatpush.bf16.msra.mxu2 %v7946_v39  ;;  %3967 = vmatmul.bf16.vlgmr.msrb.gmra.mxu3 %v11020_v42  ;;  %v9442_v42 = vld [vmem:[#allocation7 + $0x784] sm:$0xf0]  ;;  %v7926_v39 = vor.u32 %v9401_v55, %v7923_v10  ;;  %v9395_v10 = vld [vmem:[#allocation7 + $0x614] sm:$0xf] }
 0x3a3   :  { %4311 = vmatpush.bf16.msra.mxu3 %v8010_v32  ;;  %3993 = vmatmul.bf16.vlgmr.msrb.gmra.mxu1 %v3676_v41  ;;  %v8082_v7 = vor.u32 %v9442_v42, %v8081_v6  ;;  %v9416_v32 = vld [vmem:[#allocation7 + $0x6b4] sm:$0xf0]  ;;  %v7899_v6 = vld [vmem:[#allocation7 + $0x618] sm:$0xf0]  ;;  %v9465_v42 = vld [vmem:[#allocation7 + $0x844] sm:$0xf] }
 0x3a4   :  { %4337 = vmatpush.bf16.msra.mxu1 %v7950_v36  ;;  %4682 = vmatpush.bf16.msrb.mxu0 %v8106_v28  ;;  %v9399_v36 = vld [vmem:[#allocation7 + $0x634] sm:$0xf]  ;;  %v7915_v28 = vld [vmem:[#allocation7 + $0x638] sm:$0xf0]  ;;  %v2893_v57 = vpop.f32.mrf.mxu2  ;;  %v2906_v37 = vpop.f32.mrf.mxu3  ;;  %v7978_v12 = vor.u32 %v9416_v32, %v7977_v35  ;;  %v9410_v35 = vld [vmem:[#allocation7 + $0x684] sm:$0xf0] }
 0x3a5   :  { %v2907_v41 = vadd.f32 %v2906_v37, %v2893_v57  ;;  %v9393_v32 = vld [vmem:[#allocation7 + $0x604] sm:$0xf] }
 0x3a6   :  { %4299 = vmatpush.bf16.msra.mxu2 %v7938_v13  ;;  %v9398_v13 = vld [vmem:[#allocation7 + $0x624] sm:$0xf0] }
 0x3a7   :  { %4312 = vmatpush.bf16.msra.mxu3 %v8002_v45  ;;  %v7918_v45 = vor.u32 %v9399_v36, %v7915_v28  ;;  %v2920_v49 = vadd.f32 %v11023_v58, %v2907_v41  ;;  %v2934_v25 = vpop.f32.mrf.mxu1  ;;  %v7906_v60 = vor.u32 %v9398_v13, %v7905_v44  ;;  %v8011_v36 = vld [vmem:[#allocation7 + $0x6f8] sm:$0xf0]  ;;  %v8182_v28 = vor.u32 %v9465_v42, %v8179_v48  ;;  %v9463_v44 = vld [vmem:[#allocation7 + $0x834] sm:$0xf] }
 0x3a8   :  { %4338 = vmatpush.bf16.msra.mxu1 %v7942_v14  ;;  %4683 = vmatpush.bf16.msrb.mxu0 %v8098_v33  ;;  %v11061_v14 = vpack.c.b16 %v4429_v52, %v4429_v52  ;;  %v8198_v33 = vor.u32 %v9469_v61, %v8195_v5  ;;  %v7902_v52 = vor.u32 %v9395_v10, %v7899_v6  ;;  %v8075_v61 = vld [vmem:[#allocation7 + $0x778] sm:$0xf0]  ;;  %v8201_v5 = vld [vmem:[#allocation7 + $0x870] sm:$0xf]  ;;  %v4049_v41 = vunpack.c.l.b16 %v10967_v50  ;;  %v9421_v25 = vld [vmem:[#allocation7 + $0x6e4] sm:$0xf] }
 0x3a9   :  { %v3223_v55 = vadd.f32 %v11051_v3, %v2920_v49  ;;  %v7891_v3 = vld [vmem:[#allocation7 + $0x608] sm:$0xf0]  ;;  %v8171_v13 = vld [vmem:[#allocation7 + $0x838] sm:$0xf0] }
 0x3aa   :  { %4300 = vmatpush.bf16.msra.mxu2 %v7930_v30  ;;  %v8187_v30 = vld [vmem:[#allocation7 + $0x858] sm:$0xf0] }
 0x3ab   :  { %4313 = vmatpush.bf16.msra.mxu3 %v7994_v63  ;;  %v3276_v63 = vpop.f32.mrf.mxu0  ;;  %v8190_v58 = vor.u32 %v9467_v2, %v8187_v30  ;;  %v8174_v30 = vor.u32 %v9463_v44, %v8171_v13  ;;  %v7995_v48 = vld [vmem:[#allocation7 + $0x6d8] sm:$0xf0]  ;;  %v9466_v44 = vld [vmem:[#allocation7 + $0x844] sm:$0xf0]  ;;  %v9457_v13 = vld [vmem:[#allocation7 + $0x804] sm:$0xf] }
 0x3ac   :  { %4339 = vmatpush.bf16.msra.mxu1 %v7934_v23  ;;  %4684 = vmatpush.bf16.msrb.mxu0 %v8090_v56  ;;  %v9396_v23 = vld [vmem:[#allocation7 + $0x614] sm:$0xf0]  ;;  %v7910_v56 = vor.u32 %v9397_v27, %v7907_v9  ;;  %v2895_v59 = vpop.f32.mrf.mxu2  ;;  %v2908_v54 = vpop.f32.mrf.mxu3  ;;  %v7894_v9 = vor.u32 %v9393_v32, %v7891_v3  ;;  %v9437_v63 = vld [vmem:[#allocation7 + $0x764] sm:$0xf] }
 0x3ad   :  { %v9435_v59 = vld [vmem:[#allocation7 + $0x754] sm:$0xf]  ;;  %v8059_v54 = vld [vmem:[#allocation7 + $0x758] sm:$0xf0]  ;;  %v9468_v32 = vld [vmem:[#allocation7 + $0x854] sm:$0xf0] }
 0x3ae   :  { %4301 = vmatpush.bf16.msra.mxu2 %v7922_v16  ;;  %v7898_v16 = vor.u32 %v9396_v23, %v7897_v34  ;;  %v8193_v34 = vld [vmem:[#allocation7 + $0x860] sm:$0xf]  ;;  %v9470_v23 = vld [vmem:[#allocation7 + $0x864] sm:$0xf0] }
 0x3af   :  { %4314 = vmatpush.bf16.msra.mxu3 %v7986_v1  ;;  %v9394_v1 = vld [vmem:[#allocation7 + $0x604] sm:$0xf0]  ;;  %v3235_v57 = vpop.f32.mrf.mxu1 }
 0x3b0   :  { %4340 = vmatpush.bf16.msra.mxu1 %v7926_v39  ;;  %4685 = vmatpush.bf16.msrb.mxu0 %v8082_v7  ;;  %v7962_v39 = vor.u32 %v9412_v17, %v7961_v26  ;;  %v7953_v7 = vld [vmem:[#allocation7 + $0x680] sm:$0xf]  ;;  %v7890_v37 = vor.u32 %v9394_v1, %v7889_v38  ;;  %v8163_v26 = vld [vmem:[#allocation7 + $0x828] sm:$0xf0]  ;;  %v4052_v17 = vpack.c.b16 %v4049_v41, %v4049_v41 }
 0x3b1   :  { %v7954_v15 = vor.u32 %v9410_v35, %v7953_v7  ;;  %v8194_v38 = vor.u32 %v9470_v23, %v8193_v34  ;;  %v8147_v41 = vld [vmem:[#allocation7 + $0x808] sm:$0xf0]  ;;  %v8043_v34 = vld [vmem:[#allocation7 + $0x738] sm:$0xf0]  ;;  %v4430_v23 = vunpack.c.h.b16 %v10983_v40 }
 0x3b2   :  { %4302 = vmatpush.bf16.msra.mxu2 %v7914_v19  ;;  %v9439_v19 = vld [vmem:[#allocation7 + $0x774] sm:$0xf] }
 0x3b3   :  { %4686 = vmatmul.bf16.vlgmr.msrb.gmra.mxu0 %v11061_v14  ;;  %4315 = vmatpush.bf16.msra.mxu3 %v7978_v12  ;;  %v9472_v12 = vld [vmem:[#allocation7 + $0x874] sm:$0xf0]  ;;  %v11070_v27 = vpop.f32.mrf.mxu0  ;;  %v8078_v49 = vor.u32 %v9439_v19, %v8075_v61  ;;  %v7987_v19 = vld [vmem:[#allocation7 + $0x6c8] sm:$0xf0] }
 0x3b4   :  { %4730 = vmatpush.bf16.msra.mxu0 %v8206_v4  ;;  %4341 = vmatpush.bf16.msra.mxu1 %v7918_v45  ;;  %v9423_v4 = vld [vmem:[#allocation7 + $0x6f4] sm:$0xf]  ;;  %v11067_v45 = vadd.f32 %v3235_v57, %v3223_v55  ;;  %v8202_v2 = vor.u32 %v9472_v12, %v8201_v5  ;;  %v2958_v6 = vpop.f32.mrf.mxu3  ;;  %v9433_v57 = vld [vmem:[#allocation7 + $0x744] sm:$0xf]  ;;  %v8177_v12 = vld [vmem:[#allocation7 + $0x840] sm:$0xf] }
 0x3b5   :  { %v8014_v29 = vor.u32 %v9423_v4, %v8011_v36  ;;  %v8062_v36 = vor.u32 %v9435_v59, %v8059_v54  ;;  %v8035_v59 = vld [vmem:[#allocation7 + $0x728] sm:$0xf0]  ;;  %v11081_v54 = vpack.c.b16 %v4430_v23, %v4430_v23  ;;  %v9488_v23 = vld [vmem:[#allocation7 + $0x8f4] sm:$0xf0] }
 0x3b6   :  { %4303 = vmatpush.bf16.msra.mxu2 %v7906_v60  ;;  %v8003_v60 = vld [vmem:[#allocation7 + $0x6e8] sm:$0xf0] }
 0x3b7   :  { %4316 = vmatpush.bf16.msra.mxu3 %v7970_v24  ;;  %v8067_v24 = vld [vmem:[#allocation7 + $0x768] sm:$0xf0]  ;;  %v8006_v55 = vor.u32 %v9421_v25, %v8003_v60  ;;  %v3237_v35 = vpop.f32.mrf.mxu1  ;;  %v9415_v60 = vld [vmem:[#allocation7 + $0x6b4] sm:$0xf] }
 0x3b8   :  { %4731 = vmatpush.bf16.msra.mxu0 %v8198_v33  ;;  %4342 = vmatpush.bf16.msra.mxu1 %v7910_v56  ;;  %v4050_v33 = vunpack.c.h.b16 %v10967_v50  ;;  %v9461_v56 = vld [vmem:[#allocation7 + $0x824] sm:$0xf]  ;;  %v2945_v50 = vpop.f32.mrf.mxu2  ;;  %v8070_v42 = vor.u32 %v9437_v63, %v8067_v24  ;;  %v8150_v63 = vor.u32 %v9457_v13, %v8147_v41  ;;  %v9431_v24 = vld [vmem:[#allocation7 + $0x734] sm:$0xf]  ;;  %v9462_v35 = vld [vmem:[#allocation7 + $0x824] sm:$0xf0] }
 0x3b9   :  { %v2946_v10 = vadd.f32 %v2945_v50, %v11056_v47  ;;  %v8166_v1 = vor.u32 %v9461_v56, %v8163_v26  ;;  %v8155_v47 = vld [vmem:[#allocation7 + $0x818] sm:$0xf0]  ;;  %v8169_v26 = vld [vmem:[#allocation7 + $0x830] sm:$0xf]  ;;  %v9460_v41 = vld [vmem:[#allocation7 + $0x814] sm:$0xf0] }
 0x3ba   :  { %4304 = vmatpush.bf16.msra.mxu2 %v7898_v16  ;;  %v9419_v16 = vld [vmem:[#allocation7 + $0x6d4] sm:$0xf]  ;;  %v8153_v13 = vld [vmem:[#allocation7 + $0x810] sm:$0xf] }
 0x3bb   :  { %4317 = vmatpush.bf16.msra.mxu3 %v7962_v39  ;;  %v8185_v39 = vld [vmem:[#allocation7 + $0x850] sm:$0xf]  ;;  %v11075_v7 = vadd.f32 %v2958_v6, %v2946_v10  ;;  %v7998_v3 = vor.u32 %v9419_v16, %v7995_v48  ;;  %v3628_v4 = vpop.f32.mrf.mxu0  ;;  %v8449_v10 = vld [vmem:[#allocation7 + $0xa60] sm:$0xf]  ;;  %v9534_v6 = vld [vmem:[#allocation7 + $0xa64] sm:$0xf0] }
 0x3bc   :  { %4732 = vmatpush.bf16.msra.mxu0 %v8190_v58  ;;  %4343 = vmatpush.bf16.msra.mxu1 %v7902_v52  ;;  %v11072_v58 = vpack.c.b16 %v4050_v33, %v4050_v33  ;;  %v9459_v52 = vld [vmem:[#allocation7 + $0x814] sm:$0xf]  ;;  %v8186_v61 = vor.u32 %v9468_v32, %v8185_v39  ;;  %v8457_v33 = vld [vmem:[#allocation7 + $0xa70] sm:$0xf]  ;;  %v9413_v16 = vld [vmem:[#allocation7 + $0x6a4] sm:$0xf]  ;;  %v8450_v40 = vor.u32 %v9534_v6, %v8449_v10 }
 0x3bd   :  { %v8158_v5 = vor.u32 %v9459_v52, %v8155_v47  ;;  %v7971_v48 = vld [vmem:[#allocation7 + $0x6a8] sm:$0xf0]  ;;  %v8161_v39 = vld [vmem:[#allocation7 + $0x820] sm:$0xf]  ;;  %v8441_v52 = vld [vmem:[#allocation7 + $0xa50] sm:$0xf] }
 0x3be   :  { %4305 = vmatpush.bf16.msra.mxu2 %v7890_v37  ;;  %v8051_v37 = vld [vmem:[#allocation7 + $0x748] sm:$0xf0]  ;;  %v7974_v32 = vor.u32 %v9413_v16, %v7971_v48  ;;  %v9532_v47 = vld [vmem:[#allocation7 + $0xa54] sm:$0xf0]  ;;  %v8267_v6 = vld [vmem:[#allocation7 + $0x8f8] sm:$0xf0] }
 0x3bf   :  { %4318 = vmatpush.bf16.msra.mxu3 %v7954_v15  ;;  %v8054_v25 = vor.u32 %v9433_v57, %v8051_v37  ;;  %v9427_v57 = vld [vmem:[#allocation7 + $0x714] sm:$0xf]  ;;  %v8027_v37 = vld [vmem:[#allocation7 + $0x718] sm:$0xf0]  ;;  %v9528_v16 = vld [vmem:[#allocation7 + $0xa34] sm:$0xf0] }
 0x3c0   :  { %4733 = vmatpush.bf16.msra.mxu0 %v8182_v28  ;;  %4344 = vmatpush.bf16.msra.mxu1 %v7894_v9  ;;  %v9417_v28 = vld [vmem:[#allocation7 + $0x6c4] sm:$0xf]  ;;  %v2947_v15 = vpop.f32.mrf.mxu2  ;;  %v9536_v9 = vld [vmem:[#allocation7 + $0xa74] sm:$0xf0]  ;;  %v11079_v50 = vpop.f32.mrf.mxu1 }
 0x3c1   :  { %4306 = vmatmul.bf16.vlgmr.msra.gmra.mxu2 %v4052_v17  ;;  %v8458_v56 = vor.u32 %v9536_v9, %v8457_v33  ;;  %v8433_v15 = vld [vmem:[#allocation7 + $0xa40] sm:$0xf]  ;;  %v9530_v9 = vld [vmem:[#allocation7 + $0xa44] sm:$0xf0] }
 0x3c2   :  { %4350 = vmatpush.bf16.msrb.mxu2 %v8014_v29  ;;  %4319 = vmatmul.bf16.vlgmr.msra.gmra.mxu3 %v11072_v58  ;;  %v7990_v29 = vor.u32 %v9417_v28, %v7987_v19  ;;  %v7963_v28 = vld [vmem:[#allocation7 + $0x698] sm:$0xf0] }
 0x3c3   :  { %4363 = vmatpush.bf16.msrb.mxu3 %v8078_v49  ;;  %4345 = vmatmul.bf16.vlgmr.msra.gmra.mxu1 %v4052_v17  ;;  %v2960_v49 = vpop.f32.mrf.mxu3  ;;  %v9464_v17 = vld [vmem:[#allocation7 + $0x834] sm:$0xf0] }
 0x3c4   :  { %4691 = vmatpush.bf16.msrb.mxu1 %v8202_v2  ;;  %4734 = vmatpush.bf16.msra.mxu0 %v8174_v30  ;;  %v7979_v2 = vld [vmem:[#allocation7 + $0x6b8] sm:$0xf0]  ;;  %v8178_v30 = vor.u32 %v9466_v44, %v8177_v12  ;;  %v8442_v44 = vor.u32 %v9532_v47, %v8441_v52  ;;  %v9409_v49 = vld [vmem:[#allocation7 + $0x684] sm:$0xf]  ;;  %v9486_v52 = vld [vmem:[#allocation7 + $0x8e4] sm:$0xf0] }
 0x3c5   :  { %v11300_v47 = vld [vmem:[#allocation39_spill] sm:$0xff] }
 0x3c6   :  { %4351 = vmatpush.bf16.msrb.mxu2 %v8006_v55  ;;  %v7982_v55 = vor.u32 %v9415_v60, %v7979_v2  ;;  %v8030_v60 = vor.u32 %v9427_v57, %v8027_v37  ;;  %v9425_v2 = vld [vmem:[#allocation7 + $0x704] sm:$0xf]  ;;  %v8259_v37 = vld [vmem:[#allocation7 + $0x8e8] sm:$0xf0] }
 0x3c7   :  { %4364 = vmatpush.bf16.msrb.mxu3 %v8070_v42  ;;  %v8046_v42 = vor.u32 %v9431_v24, %v8043_v34  ;;  %v8154_v24 = vor.u32 %v9460_v41, %v8153_v13  ;;  %v8265_v34 = vld [vmem:[#allocation7 + $0x8f0] sm:$0xf]  ;;  %v9485_v57 = vld [vmem:[#allocation7 + $0x8e4] sm:$0xf] }
 0x3c8   :  { %4692 = vmatpush.bf16.msrb.mxu1 %v8194_v38  ;;  %4735 = vmatpush.bf16.msra.mxu0 %v8166_v1  ;;  %v8170_v38 = vor.u32 %v9464_v17, %v8169_v26  ;;  %v9429_v1 = vld [vmem:[#allocation7 + $0x724] sm:$0xf]  ;;  %v9455_v26 = vld [vmem:[#allocation7 + $0x7f4] sm:$0xf]  ;;  %v8139_v17 = vld [vmem:[#allocation7 + $0x7f8] sm:$0xf0] }
 0x3c9   :  { %v8038_v4 = vor.u32 %v9429_v1, %v8035_v59  ;;  %v8266_v1 = vor.u32 %v9488_v23, %v8265_v34  ;;  %v2427_v59 = vadd.f32 %v10870_v31, %v10893_v22  ;;  %v8417_v22 = vld [vmem:[#allocation7 + $0xa20] sm:$0xf] }
 0x3ca   :  { %4352 = vmatpush.bf16.msrb.mxu2 %v7998_v3  ;;  %v3248_v3 = vpop.f32.mrf.mxu2 }
 0x3cb   :  { %4365 = vmatpush.bf16.msrb.mxu3 %v8062_v36  ;;  %v9411_v36 = vld [vmem:[#allocation7 + $0x694] sm:$0xf]  ;;  %v11085_v19 = vadd.f32 %v3248_v3, %v11067_v45  ;;  %v11301_v3 = vld [vmem:[#allocation40_spill] sm:$0xff]  ;;  %v2457_v13 = vmax.f32 %v2427_v59, 0.0  ;;  %v8521_v59 = vld [vmem:[#allocation7 + $0xaf0] sm:$0xf] }
 0x3cc   :  { %4693 = vmatpush.bf16.msrb.mxu1 %v8186_v61  ;;  %4736 = vmatpush.bf16.msra.mxu0 %v8158_v5  ;;  %v3261_v61 = vpop.f32.mrf.mxu3  ;;  %v8162_v5 = vor.u32 %v9462_v35, %v8161_v39  ;;  %v7966_v33 = vor.u32 %v9411_v36, %v7963_v28 }
 0x3cd   :  { %v3262_v12 = vadd.f32 %v3261_v61, %v11075_v7  ;;  %v9458_v7 = vld [vmem:[#allocation7 + $0x804] sm:$0xf0]  ;;  %v9453_v61 = vld [vmem:[#allocation7 + $0x7e4] sm:$0xf] }
 0x3ce   :  { %4353 = vmatpush.bf16.msrb.mxu2 %v7990_v29  ;;  %v3289_v29 = vpop.f32.mrf.mxu1 }
 0x3cf   :  { %4366 = vmatpush.bf16.msrb.mxu3 %v8054_v25  ;;  %v7955_v25 = vld [vmem:[#allocation7 + $0x688] sm:$0xf0]  ;;  %v3275_v45 = vadd.f32 %v11058_v18, %v3262_v12  ;;  %v9526_v12 = vld [vmem:[#allocation7 + $0xa24] sm:$0xf0]  ;;  %v9484_v29 = vld [vmem:[#allocation7 + $0x8d4] sm:$0xf0] }
 0x3d0   :  { %4694 = vmatpush.bf16.msrb.mxu1 %v8178_v30  ;;  %4737 = vmatpush.bf16.msra.mxu0 %v8150_v63  ;;  %v8019_v30 = vld [vmem:[#allocation7 + $0x708] sm:$0xf0]  ;;  %v8145_v63 = vld [vmem:[#allocation7 + $0x800] sm:$0xf]  ;;  %v7958_v18 = vor.u32 %v9409_v49, %v7955_v25  ;;  %v8262_v49 = vor.u32 %v9485_v57, %v8259_v37  ;;  %v8418_v25 = vor.u32 %v9526_v12, %v8417_v22  ;;  %v9479_v57 = vld [vmem:[#allocation7 + $0x8b4] sm:$0xf] }
 0x3d1   :  { %v11090_v10 = vadd.f32 %v11079_v50, %v3275_v45  ;;  %v8146_v35 = vor.u32 %v9458_v7, %v8145_v63  ;;  %v8257_v50 = vld [vmem:[#allocation7 + $0x8e0] sm:$0xf]  ;;  %v9451_v45 = vld [vmem:[#allocation7 + $0x7d4] sm:$0xf]  ;;  %v8409_v63 = vld [vmem:[#allocation7 + $0xa10] sm:$0xf] }
 0x3d2   :  { %4354 = vmatpush.bf16.msrb.mxu2 %v7982_v55  ;;  %v9487_v55 = vld [vmem:[#allocation7 + $0x8f4] sm:$0xf]  ;;  %v3250_v48 = vpop.f32.mrf.mxu2  ;;  %v8235_v37 = vld [vmem:[#allocation7 + $0x8b8] sm:$0xf0]  ;;  %v8513_v12 = vld [vmem:[#allocation7 + $0xae0] sm:$0xf] }
 0x3d3   :  { %4738 = vmatmul.bf16.vlgmr.msra.gmra.mxu0 %v11081_v54  ;;  %4367 = vmatpush.bf16.msrb.mxu3 %v8046_v42  ;;  %v8425_v42 = vld [vmem:[#allocation7 + $0xa30] sm:$0xf]  ;;  %v8270_v36 = vor.u32 %v9487_v55, %v8267_v6  ;;  %v9449_v6 = vld [vmem:[#allocation7 + $0x7c4] sm:$0xf]  ;;  %v8243_v48 = vld [vmem:[#allocation7 + $0x8c8] sm:$0xf0] }
 0x3d4   :  { %5084 = vmatpush.bf16.msrb.mxu0 %v8458_v56  ;;  %4695 = vmatpush.bf16.msrb.mxu1 %v8170_v38  ;;  %v8434_v56 = vor.u32 %v9530_v9, %v8433_v15  ;;  %v8022_v38 = vor.u32 %v9425_v2, %v8019_v30  ;;  %v3263_v39 = vpop.f32.mrf.mxu3  ;;  %v8426_v28 = vor.u32 %v9528_v16, %v8425_v42  ;;  %v8249_v15 = vld [vmem:[#allocation7 + $0x8d0] sm:$0xf]  ;;  %v9483_v2 = vld [vmem:[#allocation7 + $0x8d4] sm:$0xf]  ;;  %v8251_v30 = vld [vmem:[#allocation7 + $0x8d8] sm:$0xf0] }
 0x3d5   :  { %v8250_v7 = vor.u32 %v9484_v29, %v8249_v15  ;;  %v9481_v42 = vld [vmem:[#allocation7 + $0x8c4] sm:$0xf]  ;;  %v2480_v16 = vpack.c.bf16 %v2457_v13, %v2457_v13  ;;  %v9552_v39 = vld [vmem:[#allocation7 + $0xaf4] sm:$0xf0]  ;;  %v8225_v15 = vld [vmem:[#allocation7 + $0x8a0] sm:$0xf] }
 0x3d6   :  { %4355 = vmatpush.bf16.msrb.mxu2 %v7974_v32  ;;  %v8142_v32 = vor.u32 %v9455_v26, %v8139_v17  ;;  %v9482_v26 = vld [vmem:[#allocation7 + $0x8c4] sm:$0xf0] }
 0x3d7   :  { %4368 = vmatpush.bf16.msrb.mxu3 %v8038_v4  ;;  %v1952_v4 = vadd.f32 %v11301_v3, %v11300_v47  ;;  %v11303_v17 = vld [vmem:[#allocation37_spill] sm:$0xff]  ;;  %v8246_v3 = vor.u32 %v9481_v42, %v8243_v48  ;;  %v8219_v48 = vld [vmem:[#allocation7 + $0x898] sm:$0xf0] }
 0x3d8   :  { %5085 = vmatpush.bf16.msrb.mxu0 %v8450_v40  ;;  %4696 = vmatpush.bf16.msrb.mxu1 %v8162_v5  ;;  %v11094_v40 = vpop.f32.mrf.mxu0  ;;  %v8131_v5 = vld [vmem:[#allocation7 + $0x7e8] sm:$0xf0]  ;;  %v9478_v29 = vld [vmem:[#allocation7 + $0x8a4] sm:$0xf0] }
 0x3d9   :  { %v8134_v41 = vor.u32 %v9453_v61, %v8131_v5  ;;  %v4811_v61 = vunpack.c.l.b16 %v2480_v16  ;;  %v8522_v5 = vor.u32 %v9552_v39, %v8521_v59  ;;  %v9475_v16 = vld [vmem:[#allocation7 + $0x894] sm:$0xf]  ;;  %v8209_v59 = vld [vmem:[#allocation7 + $0x880] sm:$0xf]  ;;  %v9474_v39 = vld [vmem:[#allocation7 + $0x884] sm:$0xf0] }
 0x3da   :  { %4356 = vmatpush.bf16.msrb.mxu2 %v7966_v33  ;;  %v11302_v33 = vld [vmem:[#allocation36_spill] sm:$0xff] }
 0x3db   :  { %4369 = vmatpush.bf16.msrb.mxu3 %v8030_v60  ;;  %v2323_v9 = vadd.f32 %v11302_v33, %v1952_v4  ;;  %v8123_v60 = vld [vmem:[#allocation7 + $0x7d8] sm:$0xf0] }
 0x3dc   :  { %5086 = vmatpush.bf16.msrb.mxu0 %v8442_v44  ;;  %4697 = vmatpush.bf16.msrb.mxu1 %v8154_v24  ;;  %v8258_v44 = vor.u32 %v9486_v52, %v8257_v50  ;;  %v9524_v24 = vld [vmem:[#allocation7 + $0xa14] sm:$0xf0]  ;;  %v8126_v23 = vor.u32 %v9451_v45, %v8123_v60  ;;  %v11304_v52 = vld [vmem:[#allocation18_spill] sm:$0xff]  ;;  %v11107_v45 = vpack.c.b16 %v4811_v61, %v4811_v61 }
 0x3dd   :  { %v2357_v55 = vadd.f32 %v11303_v17, %v2323_v9  ;;  %v9480_v50 = vld [vmem:[#allocation7 + $0x8b4] sm:$0xf0]  ;;  %v8238_v9 = vor.u32 %v9479_v57, %v8235_v37  ;;  %v8329_v61 = vld [vmem:[#allocation7 + $0x970] sm:$0xf] }
 0x3de   :  { %4357 = vmatpush.bf16.msrb.mxu2 %v7958_v18  ;;  %v8254_v18 = vor.u32 %v9483_v2, %v8251_v30  ;;  %v9477_v2 = vld [vmem:[#allocation7 + $0x8a4] sm:$0xf]  ;;  %v8227_v30 = vld [vmem:[#allocation7 + $0x8a8] sm:$0xf0]  ;;  %v8393_v37 = vld [vmem:[#allocation7 + $0x9f0] sm:$0xf] }
 0x3df   :  { %4370 = vmatpush.bf16.msrb.mxu3 %v8022_v38  ;;  %v8401_v38 = vld [vmem:[#allocation7 + $0xa00] sm:$0xf]  ;;  %v2386_v47 = vadd.f32 %v2357_v55, %v11304_v52  ;;  %v9441_v52 = vld [vmem:[#allocation7 + $0x784] sm:$0xf] }
 0x3e0   :  { %5087 = vmatpush.bf16.msrb.mxu0 %v8434_v56  ;;  %4698 = vmatpush.bf16.msrb.mxu1 %v8146_v35  ;;  %v3931_v34 = vpop.f32.mrf.mxu0  ;;  %v8241_v56 = vld [vmem:[#allocation7 + $0x8c0] sm:$0xf]  ;;  %v11104_v13 = vpop.f32.mrf.mxu1 }
 0x3e1   :  { %4358 = vmatmul.bf16.vlgmr.msrb.gmra.mxu2 %v11072_v58  ;;  %v8410_v58 = vor.u32 %v9524_v24, %v8409_v63  ;;  %v2424_v33 = vadd.f32 %v10870_v31, %v2386_v47  ;;  %v8226_v63 = vor.u32 %v9478_v29, %v8225_v15  ;;  %v8505_v24 = vld [vmem:[#allocation7 + $0xad0] sm:$0xf]  ;;  %v8083_v47 = vld [vmem:[#allocation7 + $0x788] sm:$0xf0]  ;;  %v9544_v29 = vld [vmem:[#allocation7 + $0xab4] sm:$0xf0] }
 0x3e2   :  { %4704 = vmatpush.bf16.msra.mxu2 %v8266_v1  ;;  %4371 = vmatmul.bf16.vlgmr.msrb.gmra.mxu3 %v11048_v51  ;;  %v8115_v51 = vld [vmem:[#allocation7 + $0x7c8] sm:$0xf0]  ;;  %v8242_v1 = vor.u32 %v9482_v26, %v8241_v56  ;;  %v9476_v56 = vld [vmem:[#allocation7 + $0x894] sm:$0xf0]  ;;  %v8489_v15 = vld [vmem:[#allocation7 + $0xab0] sm:$0xf] }
 0x3e3   :  { %4717 = vmatpush.bf16.msra.mxu3 %v8142_v32  ;;  %4699 = vmatmul.bf16.vlgmr.msrb.gmra.mxu1 %v11081_v54  ;;  %v9522_v54 = vld [vmem:[#allocation7 + $0xa04] sm:$0xf0]  ;;  %v8118_v35 = vor.u32 %v9449_v6, %v8115_v51  ;;  %v8233_v32 = vld [vmem:[#allocation7 + $0x8b0] sm:$0xf]  ;;  %v2454_v26 = vmax.f32 %v2424_v33, 0.0  ;;  %v8086_v33 = vor.u32 %v9441_v52, %v8083_v47 }
 0x3e4   :  { %4743 = vmatpush.bf16.msra.mxu1 %v8270_v36  ;;  %5088 = vmatpush.bf16.msrb.mxu0 %v8426_v28  ;;  %v8402_v4 = vor.u32 %v9522_v54, %v8401_v38  ;;  %v9447_v36 = vld [vmem:[#allocation7 + $0x7b4] sm:$0xf]  ;;  %v8107_v28 = vld [vmem:[#allocation7 + $0x7b8] sm:$0xf0]  ;;  %v8234_v22 = vor.u32 %v9480_v50, %v8233_v32  ;;  %v3600_v17 = vpop.f32.mrf.mxu2  ;;  %v8497_v38 = vld [vmem:[#allocation7 + $0xac0] sm:$0xf] }
 0x3e5   :  { %v3613_v55 = vpop.f32.mrf.mxu3  ;;  %v8091_v6 = vld [vmem:[#allocation7 + $0x798] sm:$0xf0] }
 0x3e6   :  { %4705 = vmatpush.bf16.msra.mxu2 %v8258_v44  ;;  %v9550_v44 = vld [vmem:[#allocation7 + $0xae4] sm:$0xf0]  ;;  %v3614_v51 = vadd.f32 %v3613_v55, %v3600_v17  ;;  %v8323_v17 = vld [vmem:[#allocation7 + $0x968] sm:$0xf0]  ;;  %v8481_v55 = vld [vmem:[#allocation7 + $0xaa0] sm:$0xf] }
 0x3e7   :  { %4718 = vmatpush.bf16.msra.mxu3 %v8134_v41  ;;  %v8110_v41 = vor.u32 %v9447_v36, %v8107_v28  ;;  %v8514_v60 = vor.u32 %v9550_v44, %v8513_v12  ;;  %v8222_v36 = vor.u32 %v9475_v16, %v8219_v48  ;;  %v8211_v28 = vld [vmem:[#allocation7 + $0x888] sm:$0xf0]  ;;  %v9503_v12 = vld [vmem:[#allocation7 + $0x974] sm:$0xf]  ;;  %v9500_v16 = vld [vmem:[#allocation7 + $0x954] sm:$0xf0] }
 0x3e8   :  { %4744 = vmatpush.bf16.msra.mxu1 %v8262_v49  ;;  %5089 = vmatpush.bf16.msrb.mxu0 %v8418_v25  ;;  %v9445_v49 = vld [vmem:[#allocation7 + $0x7a4] sm:$0xf]  ;;  %v8099_v25 = vld [vmem:[#allocation7 + $0x7a8] sm:$0xf0]  ;;  %v3641_v32 = vpop.f32.mrf.mxu1 }
 0x3e9   :  { %v8102_v34 = vor.u32 %v9445_v49, %v8099_v25  ;;  %v9540_v32 = vld [vmem:[#allocation7 + $0xa94] sm:$0xf0] }
 0x3ea   :  { %4706 = vmatpush.bf16.msra.mxu2 %v8250_v7  ;;  %v9548_v7 = vld [vmem:[#allocation7 + $0xad4] sm:$0xf0] }
 0x3eb   :  { %4719 = vmatpush.bf16.msra.mxu3 %v8126_v23  ;;  %v8217_v23 = vld [vmem:[#allocation7 + $0x890] sm:$0xf]  ;;  %v8506_v42 = vor.u32 %v9548_v7, %v8505_v24  ;;  %v9502_v24 = vld [vmem:[#allocation7 + $0x964] sm:$0xf0] }
 0x3ec   :  { %4745 = vmatpush.bf16.msra.mxu1 %v8254_v18  ;;  %5090 = vmatpush.bf16.msrb.mxu0 %v8410_v58  ;;  %v8230_v18 = vor.u32 %v9477_v2, %v8227_v30  ;;  %v9443_v58 = vld [vmem:[#allocation7 + $0x794] sm:$0xf]  ;;  %v8218_v54 = vor.u32 %v9476_v56, %v8217_v23  ;;  %v8385_v23 = vld [vmem:[#allocation7 + $0x9e0] sm:$0xf]  ;;  %v9518_v56 = vld [vmem:[#allocation7 + $0x9e4] sm:$0xf0] }
 0x3ed   :  { %v8094_v50 = vor.u32 %v9443_v58, %v8091_v6  ;;  %v3615_v7 = vpop.f32.mrf.mxu3 }
 0x3ee   :  { %4707 = vmatpush.bf16.msra.mxu2 %v8242_v1  ;;  %v9546_v1 = vld [vmem:[#allocation7 + $0xac4] sm:$0xf0]  ;;  %v8299_v7 = vld [vmem:[#allocation7 + $0x938] sm:$0xf0] }
 0x3ef   :  { %4720 = vmatpush.bf16.msra.mxu3 %v8118_v35  ;;  %v3627_v35 = vadd.f32 %v11070_v27, %v3614_v51  ;;  %v8498_v57 = vor.u32 %v9546_v1, %v8497_v38  ;;  %v8210_v27 = vor.u32 %v9474_v39, %v8209_v59  ;;  %v8386_v51 = vor.u32 %v9518_v56, %v8385_v23  ;;  %v9516_v1 = vld [vmem:[#allocation7 + $0x9d4] sm:$0xf0]  ;;  %v9499_v59 = vld [vmem:[#allocation7 + $0x954] sm:$0xf]  ;;  %v8315_v39 = vld [vmem:[#allocation7 + $0x958] sm:$0xf0] }
 0x3f0   :  { %4746 = vmatpush.bf16.msra.mxu1 %v8246_v3  ;;  %5091 = vmatpush.bf16.msrb.mxu0 %v8402_v4  ;;  %v9473_v3 = vld [vmem:[#allocation7 + $0x884] sm:$0xf]  ;;  %v2478_v4 = vpack.c.bf16 %v2454_v26, %v2454_v26  ;;  %v11114_v25 = vpop.f32.mrf.mxu0  ;;  %v8579_v23 = vld [vmem:[#allocation7 + $0xb68] sm:$0xf0] }
 0x3f1   :  { %v11112_v44 = vadd.f32 %v11094_v40, %v3627_v35  ;;  %v8214_v2 = vor.u32 %v9473_v3, %v8211_v28  ;;  %v9501_v26 = vld [vmem:[#allocation7 + $0x964] sm:$0xf]  ;;  %v8473_v35 = vld [vmem:[#allocation7 + $0xa90] sm:$0xf]  ;;  %v8305_v3 = vld [vmem:[#allocation7 + $0x940] sm:$0xf] }
 0x3f2   :  { %4708 = vmatpush.bf16.msra.mxu2 %v8234_v22  ;;  %v9520_v22 = vld [vmem:[#allocation7 + $0x9f4] sm:$0xf0]  ;;  %v4431_v49 = vunpack.c.l.b16 %v2478_v4  ;;  %v8326_v48 = vor.u32 %v9501_v26, %v8323_v17  ;;  %v9498_v4 = vld [vmem:[#allocation7 + $0x944] sm:$0xf0]  ;;  %v8474_v28 = vor.u32 %v9540_v32, %v8473_v35  ;;  %v8289_v17 = vld [vmem:[#allocation7 + $0x920] sm:$0xf] }
 0x3f3   :  { %5092 = vmatmul.bf16.vlgmr.msrb.gmra.mxu0 %v11107_v45  ;;  %4721 = vmatpush.bf16.msra.mxu3 %v8110_v41  ;;  %v8331_v41 = vld [vmem:[#allocation7 + $0x978] sm:$0xf0]  ;;  %v8394_v30 = vor.u32 %v9520_v22, %v8393_v37  ;;  %v8307_v37 = vld [vmem:[#allocation7 + $0x948] sm:$0xf0]  ;;  %v9538_v22 = vld [vmem:[#allocation7 + $0xa84] sm:$0xf0] }
 0x3f4   :  { %5438 = vmatpush.bf16.msra.mxu0 %v8522_v5  ;;  %4747 = vmatpush.bf16.msra.mxu1 %v8238_v9  ;;  %v9504_v5 = vld [vmem:[#allocation7 + $0x974] sm:$0xf0]  ;;  %v8334_v40 = vor.u32 %v9503_v12, %v8331_v41  ;;  %v4434_v6 = vpack.c.b16 %v4431_v49, %v4431_v49  ;;  %v8306_v12 = vor.u32 %v9498_v4, %v8305_v3  ;;  %v8587_v41 = vld [vmem:[#allocation7 + $0xb78] sm:$0xf0] }
 0x3f5   :  { %v8330_v9 = vor.u32 %v9504_v5, %v8329_v61  ;;  %v8369_v61 = vld [vmem:[#allocation7 + $0x9c0] sm:$0xf]  ;;  %v9514_v5 = vld [vmem:[#allocation7 + $0x9c4] sm:$0xf0]  ;;  %v9492_v35 = vld [vmem:[#allocation7 + $0x914] sm:$0xf0] }
 0x3f6   :  { %4709 = vmatpush.bf16.msra.mxu2 %v8226_v63  ;;  %v8321_v63 = vld [vmem:[#allocation7 + $0x960] sm:$0xf]  ;;  %v9508_v3 = vld [vmem:[#allocation7 + $0x994] sm:$0xf0] }
 0x3f7   :  { %4722 = vmatpush.bf16.msra.mxu3 %v8102_v34  ;;  %v8490_v34 = vor.u32 %v9544_v29, %v8489_v15  ;;  %v8322_v58 = vor.u32 %v9502_v24, %v8321_v63  ;;  %v8370_v15 = vor.u32 %v9514_v5, %v8369_v61  ;;  %v8297_v29 = vld [vmem:[#allocation7 + $0x930] sm:$0xf]  ;;  %v9495_v24 = vld [vmem:[#allocation7 + $0x934] sm:$0xf]  ;;  %v8283_v61 = vld [vmem:[#allocation7 + $0x918] sm:$0xf0] }
 0x3f8   :  { %5439 = vmatpush.bf16.msra.mxu0 %v8514_v60  ;;  %4748 = vmatpush.bf16.msra.mxu1 %v8230_v18  ;;  %v3602_v60 = vpop.f32.mrf.mxu2  ;;  %v9542_v18 = vld [vmem:[#allocation7 + $0xaa4] sm:$0xf0]  ;;  %v3983_v52 = vpop.f32.mrf.mxu0  ;;  %v9561_v5 = vld [vmem:[#allocation7 + $0xb44] sm:$0xf] }
 0x3f9   :  { %v8482_v38 = vor.u32 %v9542_v18, %v8481_v55  ;;  %v8361_v60 = vld [vmem:[#allocation7 + $0x9b0] sm:$0xf]  ;;  %v9494_v55 = vld [vmem:[#allocation7 + $0x924] sm:$0xf0] }
 0x3fa   :  { %4710 = vmatpush.bf16.msra.mxu2 %v8218_v54  ;;  %v8377_v54 = vld [vmem:[#allocation7 + $0x9d0] sm:$0xf] }
 0x3fb   :  { %4723 = vmatpush.bf16.msra.mxu3 %v8094_v50  ;;  %v8378_v47 = vor.u32 %v9516_v1, %v8377_v54  ;;  %v8290_v54 = vor.u32 %v9494_v55, %v8289_v17  ;;  %v9563_v1 = vld [vmem:[#allocation7 + $0xb54] sm:$0xf]  ;;  %v4809_v17 = vunpack.c.l.b16 %v10994_v0  ;;  %v4810_v55 = vunpack.c.h.b16 %v10994_v0 }
 0x3fc   :  { %5440 = vmatpush.bf16.msra.mxu0 %v8506_v42  ;;  %4749 = vmatpush.bf16.msra.mxu1 %v8222_v36  ;;  %v8313_v42 = vld [vmem:[#allocation7 + $0x950] sm:$0xf]  ;;  %v8318_v36 = vor.u32 %v9499_v59, %v8315_v39  ;;  %v8571_v59 = vld [vmem:[#allocation7 + $0xb58] sm:$0xf0] }
 0x3fd   :  { %v8314_v50 = vor.u32 %v9500_v16, %v8313_v42  ;;  %v8281_v39 = vld [vmem:[#allocation7 + $0x910] sm:$0xf] }
 0x3fe   :  { %4711 = vmatpush.bf16.msra.mxu2 %v8210_v27  ;;  %v9567_v27 = vld [vmem:[#allocation7 + $0xb74] sm:$0xf] }
 0x3ff   :  { %4724 = vmatpush.bf16.msra.mxu3 %v8086_v33  ;;  %v9496_v33 = vld [vmem:[#allocation7 + $0x934] sm:$0xf0]  ;;  %v8590_v63 = vor.u32 %v9567_v27, %v8587_v41 }
 0x400   :  { %5441 = vmatpush.bf16.msra.mxu0 %v8498_v57  ;;  %4750 = vmatpush.bf16.msra.mxu1 %v8214_v2  ;;  %v9497_v57 = vld [vmem:[#allocation7 + $0x944] sm:$0xf]  ;;  %v9512_v2 = vld [vmem:[#allocation7 + $0x9b4] sm:$0xf0]  ;;  %v3942_v56 = vpop.f32.mrf.mxu1 }
 0x401   :  { %4712 = vmatmul.bf16.vlgmr.msra.gmra.mxu2 %v4434_v6  ;;  %v8362_v26 = vor.u32 %v9512_v2, %v8361_v60  ;;  %v11119_v18 = vadd.f32 %v3942_v56, %v11112_v44  ;;  %v8395_v60 = vld [vmem:[#allocation7 + $0x9f8] sm:$0xf0] }
 0x402   :  { %5058 = vmatpush.bf16.msrb.mxu2 %v8330_v9  ;;  %4725 = vmatmul.bf16.vlgmr.msra.gmra.mxu3 %v11061_v14  ;;  %v8465_v14 = vld [vmem:[#allocation7 + $0xa80] sm:$0xf]  ;;  %v8310_v9 = vor.u32 %v9497_v57, %v8307_v37  ;;  %v8282_v57 = vor.u32 %v9492_v35, %v8281_v39  ;;  %v8563_v37 = vld [vmem:[#allocation7 + $0xb48] sm:$0xf0] }
 0x403   :  { %5071 = vmatpush.bf16.msrb.mxu3 %v8394_v30  ;;  %4751 = vmatmul.bf16.vlgmr.msra.gmra.mxu1 %v4434_v6  ;;  %v8466_v49 = vor.u32 %v9538_v22, %v8465_v14  ;;  %v5189_v30 = vunpack.c.l.b16 %v11002_v8  ;;  %v8353_v6 = vld [vmem:[#allocation7 + $0x9a0] sm:$0xf]  ;;  %v9490_v22 = vld [vmem:[#allocation7 + $0x904] sm:$0xf0]  ;;  %v8566_v2 = vor.u32 %v9561_v5, %v8563_v37  ;;  %v8451_v39 = vld [vmem:[#allocation7 + $0xa68] sm:$0xf0] }
 0x404   :  { %5097 = vmatpush.bf16.msrb.mxu1 %v8334_v40  ;;  %5442 = vmatpush.bf16.msra.mxu0 %v8490_v34  ;;  %v8298_v40 = vor.u32 %v9496_v33, %v8297_v29  ;;  %v9565_v34 = vld [vmem:[#allocation7 + $0xb64] sm:$0xf]  ;;  %v3652_v32 = vpop.f32.mrf.mxu2  ;;  %v8273_v14 = vld [vmem:[#allocation7 + $0x900] sm:$0xf]  ;;  %v9506_v29 = vld [vmem:[#allocation7 + $0x984] sm:$0xf0] }
 0x405   :  { %v11121_v42 = vpack.c.b16 %v5189_v30, %v5189_v30  ;;  %v8582_v16 = vor.u32 %v9565_v34, %v8579_v23  ;;  %v3653_v4 = vadd.f32 %v3652_v32, %v11104_v13  ;;  %v9489_v33 = vld [vmem:[#allocation7 + $0x904] sm:$0xf]  ;;  %v9535_v30 = vld [vmem:[#allocation7 + $0xa74] sm:$0xf]  ;;  %v8555_v23 = vld [vmem:[#allocation7 + $0xb38] sm:$0xf0] }
 0x406   :  { %5059 = vmatpush.bf16.msrb.mxu2 %v8322_v58  ;;  %v8302_v58 = vor.u32 %v9495_v24, %v8299_v7  ;;  %v8585_v24 = vld [vmem:[#allocation7 + $0xb70] sm:$0xf]  ;;  %v8274_v7 = vor.u32 %v9490_v22, %v8273_v14  ;;  %v9559_v34 = vld [vmem:[#allocation7 + $0xb34] sm:$0xf]  ;;  %v8577_v35 = vld [vmem:[#allocation7 + $0xb60] sm:$0xf] }
 0x407   :  { %5072 = vmatpush.bf16.msrb.mxu3 %v8386_v51  ;;  %v9510_v51 = vld [vmem:[#allocation7 + $0x9a4] sm:$0xf0]  ;;  %v8443_v37 = vld [vmem:[#allocation7 + $0xa58] sm:$0xf0]  ;;  %v8569_v14 = vld [vmem:[#allocation7 + $0xb50] sm:$0xf] }
 0x408   :  { %5098 = vmatpush.bf16.msrb.mxu1 %v8326_v48  ;;  %5443 = vmatpush.bf16.msra.mxu0 %v8482_v38  ;;  %v9493_v48 = vld [vmem:[#allocation7 + $0x924] sm:$0xf]  ;;  %v8291_v38 = vld [vmem:[#allocation7 + $0x928] sm:$0xf0]  ;;  %v8354_v44 = vor.u32 %v9510_v51, %v8353_v6  ;;  %v3944_v27 = vpop.f32.mrf.mxu1  ;;  %v9566_v32 = vld [vmem:[#allocation7 + $0xb64] sm:$0xf0] }
 0x409   :  { %v8294_v52 = vor.u32 %v9493_v48, %v8291_v38  ;;  %v9517_v48 = vld [vmem:[#allocation7 + $0x9e4] sm:$0xf]  ;;  %v8387_v38 = vld [vmem:[#allocation7 + $0x9e8] sm:$0xf0]  ;;  %v9564_v22 = vld [vmem:[#allocation7 + $0xb54] sm:$0xf0] }
 0x40a   :  { %5060 = vmatpush.bf16.msrb.mxu2 %v8314_v50  ;;  %v3665_v50 = vpop.f32.mrf.mxu3  ;;  %v8390_v0 = vor.u32 %v9517_v48, %v8387_v38  ;;  %v9555_v27 = vld [vmem:[#allocation7 + $0xb14] sm:$0xf]  ;;  %v8427_v48 = vld [vmem:[#allocation7 + $0xa38] sm:$0xf0]  ;;  %v5190_v38 = vunpack.c.h.b16 %v11002_v8 }
 0x40b   :  { %5073 = vmatpush.bf16.msrb.mxu3 %v8378_v47  ;;  %v8345_v47 = vld [vmem:[#allocation7 + $0x990] sm:$0xf] }
 0x40c   :  { %5099 = vmatpush.bf16.msrb.mxu1 %v8318_v36  ;;  %5444 = vmatpush.bf16.msra.mxu0 %v8474_v28  ;;  %v8574_v36 = vor.u32 %v9563_v1, %v8571_v59  ;;  %v9491_v28 = vld [vmem:[#allocation7 + $0x914] sm:$0xf]  ;;  %v8346_v41 = vor.u32 %v9508_v3, %v8345_v47  ;;  %v3654_v6 = vpop.f32.mrf.mxu2  ;;  %v8558_v59 = vor.u32 %v9559_v34, %v8555_v23  ;;  %v8841_v23 = vld [vmem:[#allocation7 + $0xd70] sm:$0xf] }
 0x40d   :  { %v8286_v13 = vor.u32 %v9491_v28, %v8283_v61  ;;  %v4812_v47 = vpack.c.b16 %v4809_v17, %v4809_v17  ;;  %v11131_v3 = vpack.c.b16 %v4810_v55, %v4810_v55  ;;  %v8379_v28 = vld [vmem:[#allocation7 + $0x9d8] sm:$0xf0]  ;;  %v8578_v61 = vor.u32 %v9566_v32, %v8577_v35  ;;  %v9511_v17 = vld [vmem:[#allocation7 + $0x9b4] sm:$0xf]  ;;  %v9630_v35 = vld [vmem:[#allocation7 + $0xd64] sm:$0xf0] }
 0x40e   :  { %5061 = vmatpush.bf16.msrb.mxu2 %v8306_v12  ;;  %v11125_v12 = vadd.f32 %v3665_v50, %v3653_v4  ;;  %v9557_v50 = vld [vmem:[#allocation7 + $0xb24] sm:$0xf]  ;;  %v8363_v55 = vld [vmem:[#allocation7 + $0x9b8] sm:$0xf0] }
 0x40f   :  { %5074 = vmatpush.bf16.msrb.mxu3 %v8370_v15  ;;  %v8337_v15 = vld [vmem:[#allocation7 + $0x980] sm:$0xf] }
 0x410   :  { %5100 = vmatpush.bf16.msrb.mxu1 %v8310_v9  ;;  %5445 = vmatpush.bf16.msra.mxu0 %v8466_v49  ;;  %v8275_v9 = vld [vmem:[#allocation7 + $0x908] sm:$0xf0]  ;;  %v9519_v49 = vld [vmem:[#allocation7 + $0x9f4] sm:$0xf]  ;;  %v8338_v56 = vor.u32 %v9506_v29, %v8337_v15 }
 0x411   :  { %v8278_v51 = vor.u32 %v9489_v33, %v8275_v9  ;;  %v8371_v9 = vld [vmem:[#allocation7 + $0x9c8] sm:$0xf0] }
 0x412   :  { %5062 = vmatpush.bf16.msrb.mxu2 %v8298_v40  ;;  %v9568_v40 = vld [vmem:[#allocation7 + $0xb74] sm:$0xf0] }
 0x413   :  { %5446 = vmatmul.bf16.vlgmr.msra.gmra.mxu0 %v11121_v42  ;;  %5075 = vmatpush.bf16.msrb.mxu3 %v8362_v26  ;;  %v8398_v26 = vor.u32 %v9519_v49, %v8395_v60  ;;  %v8586_v1 = vor.u32 %v9568_v40, %v8585_v24  ;;  %v8570_v49 = vor.u32 %v9564_v22, %v8569_v14  ;;  %v9562_v24 = vld [vmem:[#allocation7 + $0xb44] sm:$0xf0]  ;;  %v8531_v40 = vld [vmem:[#allocation7 + $0xb08] sm:$0xf0]  ;;  %v9628_v14 = vld [vmem:[#allocation7 + $0xd54] sm:$0xf0] }
 0x414   :  { %5490 = vmatpush.bf16.msrb.mxu0 %v8590_v63  ;;  %5101 = vmatpush.bf16.msrb.mxu1 %v8302_v58  ;;  %v8459_v63 = vld [vmem:[#allocation7 + $0xa78] sm:$0xf0]  ;;  %v11129_v58 = vpop.f32.mrf.mxu0 }
 0x416   :  { %5063 = vmatpush.bf16.msrb.mxu2 %v8290_v54  ;;  %v3667_v54 = vpop.f32.mrf.mxu3 }
 0x417   :  { %5076 = vmatpush.bf16.msrb.mxu3 %v8354_v44  ;;  %v9533_v44 = vld [vmem:[#allocation7 + $0xa64] sm:$0xf] }
 0x418   :  { %5491 = vmatpush.bf16.msrb.mxu0 %v8582_v16  ;;  %5102 = vmatpush.bf16.msrb.mxu1 %v8294_v52  ;;  %v8462_v16 = vor.u32 %v9535_v30, %v8459_v63  ;;  %v8547_v52 = vld [vmem:[#allocation7 + $0xb28] sm:$0xf0]  ;;  %v8454_v4 = vor.u32 %v9533_v44, %v8451_v39  ;;  %v8561_v63 = vld [vmem:[#allocation7 + $0xb40] sm:$0xf]  ;;  %v8366_v44 = vor.u32 %v9511_v17, %v8363_v55  ;;  %v9521_v55 = vld [vmem:[#allocation7 + $0xa04] sm:$0xf] }
 0x419   :  { %v8550_v5 = vor.u32 %v9557_v50, %v8547_v52  ;;  %v8435_v30 = vld [vmem:[#allocation7 + $0xa48] sm:$0xf0]  ;;  %v8562_v6 = vor.u32 %v9562_v24, %v8561_v63  ;;  %v8833_v39 = vld [vmem:[#allocation7 + $0xd60] sm:$0xf]  ;;  %v9509_v52 = vld [vmem:[#allocation7 + $0x9a4] sm:$0xf] }
 0x41a   :  { %5064 = vmatpush.bf16.msrb.mxu2 %v8282_v57  ;;  %v9531_v57 = vld [vmem:[#allocation7 + $0xa54] sm:$0xf]  ;;  %v8834_v8 = vor.u32 %v9630_v35, %v8833_v39  ;;  %v9556_v63 = vld [vmem:[#allocation7 + $0xb14] sm:$0xf0]  ;;  %v8817_v24 = vld [vmem:[#allocation7 + $0xd40] sm:$0xf] }
 0x41b   :  { %5077 = vmatpush.bf16.msrb.mxu3 %v8346_v41  ;;  %v8539_v41 = vld [vmem:[#allocation7 + $0xb18] sm:$0xf0]  ;;  %v8446_v33 = vor.u32 %v9531_v57, %v8443_v37  ;;  %v8825_v37 = vld [vmem:[#allocation7 + $0xd50] sm:$0xf] }
 0x41c   :  { %5492 = vmatpush.bf16.msrb.mxu0 %v8574_v36  ;;  %5103 = vmatpush.bf16.msrb.mxu1 %v8286_v13  ;;  %v9515_v36 = vld [vmem:[#allocation7 + $0x9d4] sm:$0xf]  ;;  %v4335_v29 = vpop.f32.mrf.mxu0  ;;  %v9513_v13 = vld [vmem:[#allocation7 + $0x9c4] sm:$0xf]  ;;  %v8542_v60 = vor.u32 %v9555_v27, %v8539_v41  ;;  %v8347_v41 = vld [vmem:[#allocation7 + $0x998] sm:$0xf0] }
 0x41d   :  { %v8382_v15 = vor.u32 %v9515_v36, %v8379_v28  ;;  %v8374_v34 = vor.u32 %v9513_v13, %v8371_v9  ;;  %v8419_v36 = vld [vmem:[#allocation7 + $0xa28] sm:$0xf0]  ;;  %v11135_v28 = vpack.c.b16 %v5190_v38, %v5190_v38  ;;  %v9507_v27 = vld [vmem:[#allocation7 + $0x994] sm:$0xf]  ;;  %v8411_v9 = vld [vmem:[#allocation7 + $0xa18] sm:$0xf0] }
 0x41e   :  { %5065 = vmatpush.bf16.msrb.mxu2 %v8274_v7  ;;  %v9553_v7 = vld [vmem:[#allocation7 + $0xb04] sm:$0xf]  ;;  %v9523_v13 = vld [vmem:[#allocation7 + $0xa14] sm:$0xf]  ;;  %v8651_v39 = vld [vmem:[#allocation7 + $0xbf8] sm:$0xf0] }
 0x41f   :  { %5078 = vmatpush.bf16.msrb.mxu3 %v8338_v56  ;;  %v9632_v56 = vld [vmem:[#allocation7 + $0xd74] sm:$0xf0]  ;;  %v8414_v17 = vor.u32 %v9523_v13, %v8411_v9  ;;  %v8809_v35 = vld [vmem:[#allocation7 + $0xd30] sm:$0xf]  ;;  %v8801_v13 = vld [vmem:[#allocation7 + $0xd20] sm:$0xf] }
 0x420   :  { %5493 = vmatpush.bf16.msrb.mxu0 %v8566_v2  ;;  %5104 = vmatpush.bf16.msrb.mxu1 %v8278_v51  ;;  %v9529_v2 = vld [vmem:[#allocation7 + $0xa44] sm:$0xf]  ;;  %v8534_v51 = vor.u32 %v9553_v7, %v8531_v40  ;;  %v8842_v54 = vor.u32 %v9632_v56, %v8841_v23  ;;  %v3994_v32 = vpop.f32.mrf.mxu1  ;;  %v8350_v7 = vor.u32 %v9507_v27, %v8347_v41  ;;  %v9626_v40 = vld [vmem:[#allocation7 + $0xd44] sm:$0xf0]  ;;  %v8339_v23 = vld [vmem:[#allocation7 + $0x988] sm:$0xf0] }
 0x421   :  { %5066 = vmatmul.bf16.vlgmr.msrb.gmra.mxu2 %v4812_v47  ;;  %v9622_v9 = vld [vmem:[#allocation7 + $0xd24] sm:$0xf0] }
 0x422   :  { %5110 = vmatpush.bf16.msra.mxu2 %v8398_v26  ;;  %5079 = vmatmul.bf16.vlgmr.msrb.gmra.mxu3 %v11131_v3  ;;  %v8438_v26 = vor.u32 %v9529_v2, %v8435_v30  ;;  %v8826_v2 = vor.u32 %v9628_v14, %v8825_v37  ;;  %v8537_v30 = vld [vmem:[#allocation7 + $0xb10] sm:$0xf]  ;;  %v11306_v37 = vld [vmem:[#allocation43_spill] sm:$0xff] }
 0x423   :  { %5123 = vmatpush.bf16.msra.mxu3 %v8462_v16  ;;  %5105 = vmatmul.bf16.vlgmr.msrb.gmra.mxu1 %v4812_v47  ;;  %v9527_v16 = vld [vmem:[#allocation7 + $0xa34] sm:$0xf] }
 0x424   :  { %5451 = vmatpush.bf16.msra.mxu1 %v8586_v1  ;;  %5494 = vmatpush.bf16.msrb.mxu0 %v8558_v59  ;;  %v8553_v1 = vld [vmem:[#allocation7 + $0xb30] sm:$0xf]  ;;  %v9560_v59 = vld [vmem:[#allocation7 + $0xb34] sm:$0xf0]  ;;  %v8430_v50 = vor.u32 %v9527_v16, %v8427_v48 }
 0x425   :  { %v8554_v47 = vor.u32 %v9560_v59, %v8553_v1  ;;  %v3968_v29 = vpop.f32.mrf.mxu3  ;;  %v8649_v16 = vld [vmem:[#allocation7 + $0xbf0] sm:$0xf]  ;;  %v9584_v48 = vld [vmem:[#allocation7 + $0xbf4] sm:$0xf0]  ;;  %v9551_v1 = vld [vmem:[#allocation7 + $0xaf4] sm:$0xf] }
 0x426   :  { %5111 = vmatpush.bf16.msra.mxu2 %v8390_v0  ;;  %v8355_v0 = vld [vmem:[#allocation7 + $0x9a8] sm:$0xf0]  ;;  %v8523_v59 = vld [vmem:[#allocation7 + $0xaf8] sm:$0xf0] }
 0x427   :  { %5124 = vmatpush.bf16.msra.mxu3 %v8454_v4  ;;  %v9525_v4 = vld [vmem:[#allocation7 + $0xa24] sm:$0xf]  ;;  %v8358_v57 = vor.u32 %v9509_v52, %v8355_v0  ;;  %v8650_v0 = vor.u32 %v9584_v48, %v8649_v16  ;;  %v8625_v48 = vld [vmem:[#allocation7 + $0xbc0] sm:$0xf] }
 0x428   :  { %5452 = vmatpush.bf16.msra.mxu1 %v8578_v61  ;;  %5495 = vmatpush.bf16.msrb.mxu0 %v8550_v5  ;;  %v8545_v61 = vld [vmem:[#allocation7 + $0xb20] sm:$0xf]  ;;  %v9558_v5 = vld [vmem:[#allocation7 + $0xb24] sm:$0xf0]  ;;  %v8422_v22 = vor.u32 %v9525_v4, %v8419_v36 }
 0x42a   :  { %5112 = vmatpush.bf16.msra.mxu2 %v8382_v15  ;;  %v3955_v15 = vpop.f32.mrf.mxu2 }
 0x42b   :  { %5125 = vmatpush.bf16.msra.mxu3 %v8446_v33  ;;  %v8546_v33 = vor.u32 %v9558_v5, %v8545_v61  ;;  %v8641_v61 = vld [vmem:[#allocation7 + $0xbe0] sm:$0xf]  ;;  %v9582_v5 = vld [vmem:[#allocation7 + $0xbe4] sm:$0xf0] }
 0x42c   :  { %5453 = vmatpush.bf16.msra.mxu1 %v8570_v49  ;;  %5496 = vmatpush.bf16.msrb.mxu0 %v8542_v60  ;;  %v11139_v49 = vadd.f32 %v3955_v15, %v11119_v18  ;;  %v3969_v60 = vadd.f32 %v3968_v29, %v11125_v12  ;;  %v8403_v18 = vld [vmem:[#allocation7 + $0xa08] sm:$0xf0]  ;;  %v8538_v12 = vor.u32 %v9556_v63, %v8537_v30  ;;  %v9549_v15 = vld [vmem:[#allocation7 + $0xae4] sm:$0xf]  ;;  %v8633_v63 = vld [vmem:[#allocation7 + $0xbd0] sm:$0xf] }
 0x42d   :  { %v8406_v52 = vor.u32 %v9521_v55, %v8403_v18  ;;  %v8515_v29 = vld [vmem:[#allocation7 + $0xae8] sm:$0xf0]  ;;  %v8635_v55 = vld [vmem:[#allocation7 + $0xbd8] sm:$0xf0]  ;;  %v8793_v18 = vld [vmem:[#allocation7 + $0xd10] sm:$0xf] }
 0x42e   :  { %5113 = vmatpush.bf16.msra.mxu2 %v8374_v34  ;;  %v9505_v34 = vld [vmem:[#allocation7 + $0x984] sm:$0xf]  ;;  %v3982_v56 = vadd.f32 %v11114_v25, %v3969_v60  ;;  %v8642_v60 = vor.u32 %v9582_v5, %v8641_v61  ;;  %v8518_v30 = vor.u32 %v9549_v15, %v8515_v29  ;;  %v9576_v61 = vld [vmem:[#allocation7 + $0xbb4] sm:$0xf0]  ;;  %v9575_v29 = vld [vmem:[#allocation7 + $0xbb4] sm:$0xf] }
 0x42f   :  { %5126 = vmatpush.bf16.msra.mxu3 %v8438_v26  ;;  %v3996_v26 = vpop.f32.mrf.mxu1  ;;  %v8342_v25 = vor.u32 %v9505_v34, %v8339_v23  ;;  %v8802_v23 = vor.u32 %v9622_v9, %v8801_v13  ;;  %v11309_v5 = vld [vmem:[#allocation19_spill] sm:$0xff]  ;;  %v8897_v13 = vld [vmem:[#allocation7 + $0xde0] sm:$0xf]  ;;  %v9646_v9 = vld [vmem:[#allocation7 + $0xde4] sm:$0xf0] }
 0x430   :  { %5454 = vmatpush.bf16.msra.mxu1 %v8562_v6  ;;  %5497 = vmatpush.bf16.msrb.mxu0 %v8534_v51  ;;  %v8529_v6 = vld [vmem:[#allocation7 + $0xb00] sm:$0xf]  ;;  %v9554_v51 = vld [vmem:[#allocation7 + $0xb04] sm:$0xf0]  ;;  %v11143_v38 = vadd.f32 %v3994_v32, %v3982_v56  ;;  %v11147_v4 = vpop.f32.mrf.mxu0  ;;  %v9547_v56 = vld [vmem:[#allocation7 + $0xad4] sm:$0xf] }
 0x431   :  { %v8530_v36 = vor.u32 %v9554_v51, %v8529_v6  ;;  %v8507_v26 = vld [vmem:[#allocation7 + $0xad8] sm:$0xf0]  ;;  %v9620_v6 = vld [vmem:[#allocation7 + $0xd14] sm:$0xf0] }
 0x432   :  { %5114 = vmatpush.bf16.msra.mxu2 %v8366_v44  ;;  %v9583_v44 = vld [vmem:[#allocation7 + $0xbf4] sm:$0xf]  ;;  %v3957_v32 = vpop.f32.mrf.mxu2  ;;  %v8510_v16 = vor.u32 %v9547_v56, %v8507_v26  ;;  %v8898_v56 = vor.u32 %v9646_v9, %v8897_v13  ;;  %v9573_v26 = vld [vmem:[#allocation7 + $0xba4] sm:$0xf]  ;;  %v8715_v9 = vld [vmem:[#allocation7 + $0xc78] sm:$0xf0] }
 0x433   :  { %5498 = vmatmul.bf16.vlgmr.msrb.gmra.mxu0 %v11135_v28  ;;  %5127 = vmatpush.bf16.msra.mxu3 %v8430_v50  ;;  %v9624_v50 = vld [vmem:[#allocation7 + $0xd34] sm:$0xf0]  ;;  %v8654_v27 = vor.u32 %v9583_v44, %v8651_v39  ;;  %v9577_v39 = vld [vmem:[#allocation7 + $0xbc4] sm:$0xf] }
 0x434   :  { %5844 = vmatpush.bf16.msra.mxu0 %v8842_v54  ;;  %5455 = vmatpush.bf16.msra.mxu1 %v8554_v47  ;;  %v8818_v54 = vor.u32 %v9626_v40, %v8817_v24  ;;  %v2433_v47 = vadd.f32 %v10870_v31, %v10904_v43  ;;  %v8810_v41 = vor.u32 %v9624_v50, %v8809_v35  ;;  %v8643_v43 = vld [vmem:[#allocation7 + $0xbe8] sm:$0xf0]  ;;  %v9580_v24 = vld [vmem:[#allocation7 + $0xbd4] sm:$0xf0] }
 0x435   :  { %v8627_v50 = vld [vmem:[#allocation7 + $0xbc8] sm:$0xf0]  ;;  %v9648_v32 = vld [vmem:[#allocation7 + $0xdf4] sm:$0xf0] }
 0x436   :  { %5115 = vmatpush.bf16.msra.mxu2 %v8358_v57  ;;  %v11305_v57 = vld [vmem:[#allocation42_spill] sm:$0xff] }
 0x437   :  { %5128 = vmatpush.bf16.msra.mxu3 %v8422_v22  ;;  %v1957_v14 = vadd.f32 %v11306_v37, %v11305_v57  ;;  %v3970_v22 = vpop.f32.mrf.mxu3  ;;  %v8630_v37 = vor.u32 %v9577_v39, %v8627_v50  ;;  %v9571_v39 = vld [vmem:[#allocation7 + $0xb94] sm:$0xf]  ;;  %v8881_v50 = vld [vmem:[#allocation7 + $0xdc0] sm:$0xf] }
 0x438   :  { %5845 = vmatpush.bf16.msra.mxu0 %v8834_v8  ;;  %5456 = vmatpush.bf16.msra.mxu1 %v8546_v33  ;;  %v8526_v8 = vor.u32 %v9551_v1, %v8523_v59  ;;  %v9581_v33 = vld [vmem:[#allocation7 + $0xbe4] sm:$0xf]  ;;  %v4689_v51 = vpop.f32.mrf.mxu0  ;;  %v11308_v1 = vld [vmem:[#allocation44_spill] sm:$0xff]  ;;  %v9543_v22 = vld [vmem:[#allocation7 + $0xab4] sm:$0xf] }
 0x439   :  { %v8646_v34 = vor.u32 %v9581_v33, %v8643_v43  ;;  %v8619_v33 = vld [vmem:[#allocation7 + $0xbb8] sm:$0xf0]  ;;  %v8601_v51 = vld [vmem:[#allocation7 + $0xb90] sm:$0xf] }
 0x43a   :  { %5116 = vmatpush.bf16.msra.mxu2 %v8350_v7  ;;  %v11307_v7 = vld [vmem:[#allocation41_spill] sm:$0xff] }
 0x43b   :  { %5129 = vmatpush.bf16.msra.mxu3 %v8414_v17  ;;  %v2328_v40 = vadd.f32 %v11307_v7, %v1957_v14  ;;  %v9579_v17 = vld [vmem:[#allocation7 + $0xbd4] sm:$0xf]  ;;  %v8622_v7 = vor.u32 %v9575_v29, %v8619_v33  ;;  %v8777_v33 = vld [vmem:[#allocation7 + $0xcf0] sm:$0xf] }
 0x43c   :  { %5846 = vmatpush.bf16.msra.mxu0 %v8826_v2  ;;  %5457 = vmatpush.bf16.msra.mxu1 %v8538_v12  ;;  %v2463_v2 = vmax.f32 %v2433_v47, 0.0  ;;  %v8634_v12 = vor.u32 %v9580_v24, %v8633_v63  ;;  %v8638_v44 = vor.u32 %v9579_v17, %v8635_v55  ;;  %v8905_v47 = vld [vmem:[#allocation7 + $0xdf0] sm:$0xf]  ;;  %v9574_v63 = vld [vmem:[#allocation7 + $0xba4] sm:$0xf0] }
 0x43d   :  { %v2362_v59 = vadd.f32 %v11308_v1, %v2328_v40  ;;  %v8906_v15 = vor.u32 %v9648_v32, %v8905_v47  ;;  %v9541_v40 = vld [vmem:[#allocation7 + $0xaa4] sm:$0xf]  ;;  %v8611_v17 = vld [vmem:[#allocation7 + $0xba8] sm:$0xf0]  ;;  %v9570_v47 = vld [vmem:[#allocation7 + $0xb84] sm:$0xf0] }
 0x43e   :  { %5117 = vmatpush.bf16.msra.mxu2 %v8342_v25  ;;  %v9545_v25 = vld [vmem:[#allocation7 + $0xac4] sm:$0xf]  ;;  %v2484_v35 = vpack.c.bf16 %v2463_v2, %v2463_v2 }
 0x43f   :  { %5130 = vmatpush.bf16.msra.mxu3 %v8406_v52  ;;  %v8785_v52 = vld [vmem:[#allocation7 + $0xd00] sm:$0xf]  ;;  %v2392_v57 = vadd.f32 %v2362_v59, %v11309_v5  ;;  %v8614_v59 = vor.u32 %v9573_v26, %v8611_v17  ;;  %v8467_v5 = vld [vmem:[#allocation7 + $0xa88] sm:$0xf0]  ;;  %v9598_v17 = vld [vmem:[#allocation7 + $0xc64] sm:$0xf0] }
 0x440   :  { %5847 = vmatpush.bf16.msra.mxu0 %v8818_v54  ;;  %5458 = vmatpush.bf16.msra.mxu1 %v8530_v36  ;;  %v9578_v54 = vld [vmem:[#allocation7 + $0xbc4] sm:$0xf0]  ;;  %v8705_v26 = vld [vmem:[#allocation7 + $0xc60] sm:$0xf] }
 0x441   :  { %5118 = vmatmul.bf16.vlgmr.msra.gmra.mxu2 %v11131_v3  ;;  %v8794_v3 = vor.u32 %v9620_v6, %v8793_v18  ;;  %v2430_v24 = vadd.f32 %v10870_v31, %v2392_v57  ;;  %v8889_v18 = vld [vmem:[#allocation7 + $0xdd0] sm:$0xf]  ;;  %v9644_v6 = vld [vmem:[#allocation7 + $0xdd4] sm:$0xf0]  ;;  %v9569_v57 = vld [vmem:[#allocation7 + $0xb84] sm:$0xf] }
 0x442   :  { %5464 = vmatpush.bf16.msrb.mxu2 %v8650_v0  ;;  %5131 = vmatmul.bf16.vlgmr.msra.gmra.mxu3 %v11107_v45  ;;  %v8499_v45 = vld [vmem:[#allocation7 + $0xac8] sm:$0xf0]  ;;  %v8626_v0 = vor.u32 %v9578_v54, %v8625_v48 }
 0x443   :  { %5477 = vmatpush.bf16.msrb.mxu3 %v8526_v8  ;;  %5459 = vmatmul.bf16.vlgmr.msra.gmra.mxu1 %v11135_v28  ;;  %v9618_v28 = vld [vmem:[#allocation7 + $0xd04] sm:$0xf0]  ;;  %v8502_v36 = vor.u32 %v9545_v25, %v8499_v45  ;;  %v8617_v8 = vld [vmem:[#allocation7 + $0xbb0] sm:$0xf]  ;;  %v2460_v48 = vmax.f32 %v2430_v24, 0.0  ;;  %v8890_v45 = vor.u32 %v9644_v6, %v8889_v18 }
 0x444   :  { %5503 = vmatpush.bf16.msrb.mxu1 %v8654_v27  ;;  %5848 = vmatpush.bf16.msra.mxu0 %v8810_v41  ;;  %v8786_v14 = vor.u32 %v9618_v28, %v8785_v52  ;;  %v8491_v27 = vld [vmem:[#allocation7 + $0xab8] sm:$0xf0]  ;;  %v5571_v41 = vunpack.c.l.b16 %v2484_v35  ;;  %v8618_v43 = vor.u32 %v9576_v61, %v8617_v8  ;;  %v4307_v54 = vpop.f32.mrf.mxu2  ;;  %v9642_v28 = vld [vmem:[#allocation7 + $0xdc4] sm:$0xf0]  ;;  %v9537_v61 = vld [vmem:[#allocation7 + $0xa84] sm:$0xf] }
 0x445   :  { %v8494_v2 = vor.u32 %v9543_v22, %v8491_v27  ;;  %v4320_v1 = vpop.f32.mrf.mxu3  ;;  %v8603_v35 = vld [vmem:[#allocation7 + $0xb98] sm:$0xf0]  ;;  %v8595_v22 = vld [vmem:[#allocation7 + $0xb88] sm:$0xf0]  ;;  %v8713_v27 = vld [vmem:[#allocation7 + $0xc70] sm:$0xf]  ;;  %v8882_v29 = vor.u32 %v9642_v28, %v8881_v50 }
 0x446   :  { %5465 = vmatpush.bf16.msrb.mxu2 %v8642_v60  ;;  %v11157_v60 = vpop.f32.mrf.mxu1  ;;  %v4321_v25 = vadd.f32 %v4320_v1, %v4307_v54  ;;  %v8865_v54 = vld [vmem:[#allocation7 + $0xda0] sm:$0xf]  ;;  %v9638_v1 = vld [vmem:[#allocation7 + $0xda4] sm:$0xf0]  ;;  %v8761_v50 = vld [vmem:[#allocation7 + $0xcd0] sm:$0xf] }
 0x447   :  { %5478 = vmatpush.bf16.msrb.mxu3 %v8518_v30  ;;  %v8609_v30 = vld [vmem:[#allocation7 + $0xba0] sm:$0xf]  ;;  %v9595_v28 = vld [vmem:[#allocation7 + $0xc54] sm:$0xf] }
 0x448   :  { %5504 = vmatpush.bf16.msrb.mxu1 %v8646_v34  ;;  %5849 = vmatpush.bf16.msra.mxu0 %v8802_v23  ;;  %v8483_v34 = vld [vmem:[#allocation7 + $0xaa8] sm:$0xf0]  ;;  %v11160_v23 = vpack.c.b16 %v5571_v41, %v5571_v41  ;;  %v8610_v55 = vor.u32 %v9574_v63, %v8609_v30  ;;  %v4334_v32 = vadd.f32 %v11129_v58, %v4321_v25  ;;  %v9600_v41 = vld [vmem:[#allocation7 + $0xc74] sm:$0xf0]  ;;  %v9599_v58 = vld [vmem:[#allocation7 + $0xc74] sm:$0xf] }
 0x449   :  { %v9640_v30 = vld [vmem:[#allocation7 + $0xdb4] sm:$0xf0]  ;;  %v8470_v63 = vor.u32 %v9537_v61, %v8467_v5  ;;  %v8714_v24 = vor.u32 %v9600_v41, %v8713_v27  ;;  %v8718_v18 = vor.u32 %v9599_v58, %v8715_v9  ;;  %v8697_v25 = vld [vmem:[#allocation7 + $0xc50] sm:$0xf]  ;;  %v8689_v5 = vld [vmem:[#allocation7 + $0xc40] sm:$0xf] }
 0x44a   :  { %5466 = vmatpush.bf16.msrb.mxu2 %v8634_v12  ;;  %v8486_v12 = vor.u32 %v9541_v40, %v8483_v34  ;;  %v9610_v27 = vld [vmem:[#allocation7 + $0xcc4] sm:$0xf0]  ;;  %v9593_v41 = vld [vmem:[#allocation7 + $0xc44] sm:$0xf]  ;;  %v9663_v58 = vld [vmem:[#allocation7 + $0xe74] sm:$0xf] }
 0x44b   :  { %5479 = vmatpush.bf16.msrb.mxu3 %v8510_v16  ;;  %v9572_v16 = vld [vmem:[#allocation7 + $0xb94] sm:$0xf0] }
 0x44c   :  { %5505 = vmatpush.bf16.msrb.mxu1 %v8638_v44  ;;  %5850 = vmatpush.bf16.msra.mxu0 %v8794_v3  ;;  %v9539_v44 = vld [vmem:[#allocation7 + $0xa94] sm:$0xf]  ;;  %v8475_v3 = vld [vmem:[#allocation7 + $0xa98] sm:$0xf0]  ;;  %v8602_v52 = vor.u32 %v9572_v16, %v8601_v51  ;;  %v4309_v34 = vpop.f32.mrf.mxu2  ;;  %v9614_v51 = vld [vmem:[#allocation7 + $0xce4] sm:$0xf0] }
 0x44d   :  { %v8478_v8 = vor.u32 %v9539_v44, %v8475_v3  ;;  %v9597_v16 = vld [vmem:[#allocation7 + $0xc64] sm:$0xf]  ;;  %v9608_v34 = vld [vmem:[#allocation7 + $0xcb4] sm:$0xf0] }
 0x44e   :  { %5467 = vmatpush.bf16.msrb.mxu2 %v8626_v0  ;;  %v8593_v0 = vld [vmem:[#allocation7 + $0xb80] sm:$0xf] }
 0x44f   :  { %5480 = vmatpush.bf16.msrb.mxu3 %v8502_v36  ;;  %v4348_v36 = vpop.f32.mrf.mxu1  ;;  %v8594_v13 = vor.u32 %v9570_v47, %v8593_v0  ;;  %v8699_v0 = vld [vmem:[#allocation7 + $0xc58] sm:$0xf0]  ;;  %v8857_v47 = vld [vmem:[#allocation7 + $0xd90] sm:$0xf] }
 0x450   :  { %5506 = vmatpush.bf16.msrb.mxu1 %v8630_v37  ;;  %5851 = vmatpush.bf16.msra.mxu0 %v8786_v14  ;;  %v2482_v37 = vpack.c.bf16 %v2460_v48, %v2460_v48  ;;  %v8606_v14 = vor.u32 %v9571_v39, %v8603_v35  ;;  %v11167_v40 = vpop.f32.mrf.mxu0  ;;  %v8707_v48 = vld [vmem:[#allocation7 + $0xc68] sm:$0xf0]  ;;  %v8866_v35 = vor.u32 %v9638_v1, %v8865_v54 }
 0x451   :  { %v8710_v39 = vor.u32 %v9597_v16, %v8707_v48  ;;  %v8673_v16 = vld [vmem:[#allocation7 + $0xc20] sm:$0xf]  ;;  %v9590_v48 = vld [vmem:[#allocation7 + $0xc24] sm:$0xf0] }
 0x452   :  { %5468 = vmatpush.bf16.msrb.mxu2 %v8618_v43  ;;  %v9616_v43 = vld [vmem:[#allocation7 + $0xcf4] sm:$0xf0] }
 0x453   :  { %5852 = vmatmul.bf16.vlgmr.msra.gmra.mxu0 %v11160_v23  ;;  %5481 = vmatpush.bf16.msrb.mxu3 %v8494_v2  ;;  %v8873_v2 = vld [vmem:[#allocation7 + $0xdb0] sm:$0xf] }
 0x454   :  { %6198 = vmatpush.bf16.msrb.mxu0 %v8906_v15  ;;  %5507 = vmatpush.bf16.msrb.mxu1 %v8622_v7  ;;  %v11165_v15 = vadd.f32 %v4334_v32, %v11085_v19  ;;  %v5191_v7 = vunpack.c.l.b16 %v2482_v37  ;;  %v8598_v19 = vor.u32 %v9569_v57, %v8595_v22  ;;  %v8874_v6 = vor.u32 %v9640_v30, %v8873_v2  ;;  %v9636_v32 = vld [vmem:[#allocation7 + $0xd94] sm:$0xf0]  ;;  %v9594_v57 = vld [vmem:[#allocation7 + $0xc44] sm:$0xf0]  ;;  %v8753_v22 = vld [vmem:[#allocation7 + $0xcc0] sm:$0xf] }
 0x455   :  { %v8702_v37 = vor.u32 %v9595_v28, %v8699_v0  ;;  %v8754_v9 = vor.u32 %v9610_v27, %v8753_v22  ;;  %v8681_v2 = vld [vmem:[#allocation7 + $0xc30] sm:$0xf]  ;;  %v9592_v30 = vld [vmem:[#allocation7 + $0xc34] sm:$0xf0]  ;;  %v9657_v22 = vld [vmem:[#allocation7 + $0xe44] sm:$0xf] }
 0x456   :  { %5469 = vmatpush.bf16.msrb.mxu2 %v8610_v55  ;;  %v4322_v55 = vpop.f32.mrf.mxu3  ;;  %v5194_v44 = vpack.c.b16 %v5191_v7, %v5191_v7  ;;  %v8745_v7 = vld [vmem:[#allocation7 + $0xcb0] sm:$0xf]  ;;  %v9588_v0 = vld [vmem:[#allocation7 + $0xc14] sm:$0xf0] }
 0x457   :  { %5482 = vmatpush.bf16.msrb.mxu3 %v8486_v12  ;;  %v8769_v12 = vld [vmem:[#allocation7 + $0xce0] sm:$0xf]  ;;  %v8682_v55 = vor.u32 %v9592_v30, %v8681_v2  ;;  %v8665_v28 = vld [vmem:[#allocation7 + $0xc10] sm:$0xf]  ;;  %v9585_v2 = vld [vmem:[#allocation7 + $0xc04] sm:$0xf] }
 0x458   :  { %6199 = vmatpush.bf16.msrb.mxu0 %v8898_v56  ;;  %5508 = vmatpush.bf16.msrb.mxu1 %v8614_v59  ;;  %v8778_v56 = vor.u32 %v9616_v43, %v8777_v33  ;;  %v8706_v59 = vor.u32 %v9598_v17, %v8705_v26  ;;  %v8770_v3 = vor.u32 %v9614_v51, %v8769_v12  ;;  %v9634_v33 = vld [vmem:[#allocation7 + $0xd84] sm:$0xf0]  ;;  %v9591_v26 = vld [vmem:[#allocation7 + $0xc34] sm:$0xf]  ;;  %v8683_v17 = vld [vmem:[#allocation7 + $0xc38] sm:$0xf0] }
 0x459   :  { %v8690_v43 = vor.u32 %v9594_v57, %v8689_v5  ;;  %v8746_v51 = vor.u32 %v9608_v34, %v8745_v7  ;;  %v8686_v1 = vor.u32 %v9591_v26, %v8683_v17  ;;  %v8666_v27 = vor.u32 %v9588_v0, %v8665_v28  ;;  %v8969_v26 = vld [vmem:[#allocation7 + $0xe70] sm:$0xf]  ;;  %v8961_v28 = vld [vmem:[#allocation7 + $0xe60] sm:$0xf]  ;;  %v9662_v0 = vld [vmem:[#allocation7 + $0xe64] sm:$0xf0] }
 0x45a   :  { %5470 = vmatpush.bf16.msrb.mxu2 %v8602_v52  ;;  %v9612_v52 = vld [vmem:[#allocation7 + $0xcd4] sm:$0xf0] }
 0x45b   :  { %5483 = vmatpush.bf16.msrb.mxu3 %v8478_v8  ;;  %v4741_v8 = vpop.f32.mrf.mxu0  ;;  %v8762_v61 = vor.u32 %v9612_v52, %v8761_v50  ;;  %v9659_v50 = vld [vmem:[#allocation7 + $0xe54] sm:$0xf]  ;;  %v8955_v52 = vld [vmem:[#allocation7 + $0xe58] sm:$0xf0] }
 0x45c   :  { %6200 = vmatpush.bf16.msrb.mxu0 %v8890_v45  ;;  %5509 = vmatpush.bf16.msrb.mxu1 %v8606_v14  ;;  %v9596_v45 = vld [vmem:[#allocation7 + $0xc54] sm:$0xf0]  ;;  %v8858_v14 = vor.u32 %v9636_v32, %v8857_v47  ;;  %v8729_v8 = vld [vmem:[#allocation7 + $0xc90] sm:$0xf]  ;;  %v8958_v57 = vor.u32 %v9659_v50, %v8955_v52  ;;  %v9629_v52 = vld [vmem:[#allocation7 + $0xd64] sm:$0xf] }
 0x45d   :  { %v8698_v36 = vor.u32 %v9596_v45, %v8697_v25  ;;  %v9589_v45 = vld [vmem:[#allocation7 + $0xc24] sm:$0xf] }
 0x45e   :  { %5471 = vmatpush.bf16.msrb.mxu2 %v8594_v13  ;;  %v8971_v13 = vld [vmem:[#allocation7 + $0xe78] sm:$0xf0] }
 0x45f   :  { %5484 = vmatpush.bf16.msrb.mxu3 %v8470_v63 }
 0x460   :  { %6201 = vmatpush.bf16.msrb.mxu0 %v8882_v29  ;;  %5510 = vmatpush.bf16.msrb.mxu1 %v8598_v19  ;;  %v8691_v29 = vld [vmem:[#allocation7 + $0xc48] sm:$0xf0]  ;;  %v5949_v19 = vunpack.c.l.b16 %v11026_v20  ;;  %v4700_v12 = vpop.f32.mrf.mxu1 }
 0x461   :  { %5472 = vmatmul.bf16.vlgmr.msrb.gmra.mxu2 %v5194_v44  ;;  %v8694_v63 = vor.u32 %v9593_v41, %v8691_v29  ;;  %v11172_v54 = vadd.f32 %v4700_v12, %v11147_v4  ;;  %v8947_v41 = vld [vmem:[#allocation7 + $0xe48] sm:$0xf0]  ;;  %v8657_v29 = vld [vmem:[#allocation7 + $0xc00] sm:$0xf] }
 0x462   :  { %5818 = vmatpush.bf16.msra.mxu2 %v8714_v24  ;;  %5485 = vmatmul.bf16.vlgmr.msrb.gmra.mxu3 %v11121_v42  ;;  %v8849_v42 = vld [vmem:[#allocation7 + $0xd80] sm:$0xf]  ;;  %v8950_v34 = vor.u32 %v9657_v22, %v8947_v41  ;;  %v9627_v22 = vld [vmem:[#allocation7 + $0xd54] sm:$0xf]  ;;  %v8953_v41 = vld [vmem:[#allocation7 + $0xe50] sm:$0xf] }
 0x463   :  { %5831 = vmatpush.bf16.msra.mxu3 %v8778_v56  ;;  %5511 = vmatmul.bf16.vlgmr.msrb.gmra.mxu1 %v5194_v44  ;;  %v8850_v24 = vor.u32 %v9634_v33, %v8849_v42  ;;  %v8974_v56 = vor.u32 %v9663_v58, %v8971_v13  ;;  %v9606_v44 = vld [vmem:[#allocation7 + $0xca4] sm:$0xf0]  ;;  %v8721_v13 = vld [vmem:[#allocation7 + $0xc80] sm:$0xf] }
 0x464   :  { %5857 = vmatpush.bf16.msra.mxu1 %v8718_v18  ;;  %6202 = vmatpush.bf16.msrb.mxu0 %v8874_v6  ;;  %v9661_v18 = vld [vmem:[#allocation7 + $0xe64] sm:$0xf]  ;;  %v8963_v6 = vld [vmem:[#allocation7 + $0xe68] sm:$0xf0]  ;;  %v4359_v47 = vpop.f32.mrf.mxu2  ;;  %v9586_v42 = vld [vmem:[#allocation7 + $0xc04] sm:$0xf0] }
 0x465   :  { %v8966_v25 = vor.u32 %v9661_v18, %v8963_v6  ;;  %v4372_v32 = vpop.f32.mrf.mxu3  ;;  %v4360_v5 = vadd.f32 %v4359_v47, %v11157_v60  ;;  %v8659_v60 = vld [vmem:[#allocation7 + $0xc08] sm:$0xf0]  ;;  %v8658_v17 = vor.u32 %v9586_v42, %v8657_v29  ;;  %v9655_v18 = vld [vmem:[#allocation7 + $0xe34] sm:$0xf]  ;;  %v8939_v6 = vld [vmem:[#allocation7 + $0xe38] sm:$0xf0] }
 0x466   :  { %5819 = vmatpush.bf16.msra.mxu2 %v8706_v59  ;;  %v8737_v59 = vld [vmem:[#allocation7 + $0xca0] sm:$0xf]  ;;  %v8942_v50 = vor.u32 %v9655_v18, %v8939_v6  ;;  %v9653_v47 = vld [vmem:[#allocation7 + $0xe24] sm:$0xf]  ;;  %v9660_v29 = vld [vmem:[#allocation7 + $0xe54] sm:$0xf0] }
 0x467   :  { %5832 = vmatpush.bf16.msra.mxu3 %v8770_v3  ;;  %v11174_v3 = vpack.c.b16 %v5949_v19, %v5949_v19  ;;  %v8738_v4 = vor.u32 %v9606_v44, %v8737_v59  ;;  %v4373_v33 = vadd.f32 %v4372_v32, %v4360_v5  ;;  %v9631_v19 = vld [vmem:[#allocation7 + $0xd74] sm:$0xf]  ;;  %v8662_v59 = vor.u32 %v9585_v2, %v8659_v60  ;;  %v8931_v32 = vld [vmem:[#allocation7 + $0xe28] sm:$0xf0]  ;;  %v8747_v6 = vld [vmem:[#allocation7 + $0xcb8] sm:$0xf0] }
 0x468   :  { %5858 = vmatpush.bf16.msra.mxu1 %v8710_v39  ;;  %6203 = vmatpush.bf16.msrb.mxu0 %v8866_v35  ;;  %v8675_v39 = vld [vmem:[#allocation7 + $0xc28] sm:$0xf0]  ;;  %v8674_v35 = vor.u32 %v9590_v48, %v8673_v16  ;;  %v5569_v16 = vunpack.c.l.b16 %v11016_v11  ;;  %v5570_v48 = vunpack.c.h.b16 %v11016_v11  ;;  %v9611_v5 = vld [vmem:[#allocation7 + $0xcd4] sm:$0xf] }
 0x469   :  { %v11179_v7 = vadd.f32 %v4373_v33, %v11090_v10  ;;  %v9651_v42 = vld [vmem:[#allocation7 + $0xe14] sm:$0xf]  ;;  %v8923_v33 = vld [vmem:[#allocation7 + $0xe18] sm:$0xf0]  ;;  %v8755_v2 = vld [vmem:[#allocation7 + $0xcc8] sm:$0xf0] }
 0x46a   :  { %5820 = vmatpush.bf16.msra.mxu2 %v8698_v36  ;;  %v8678_v36 = vor.u32 %v9589_v45, %v8675_v39  ;;  %v8771_v45 = vld [vmem:[#allocation7 + $0xce8] sm:$0xf0]  ;;  %v8926_v60 = vor.u32 %v9651_v42, %v8923_v33  ;;  %v9607_v18 = vld [vmem:[#allocation7 + $0xcb4] sm:$0xf]  ;;  %v9652_v42 = vld [vmem:[#allocation7 + $0xe14] sm:$0xf0] }
 0x46b   :  { %5833 = vmatpush.bf16.msra.mxu3 %v8762_v61  ;;  %v9604_v61 = vld [vmem:[#allocation7 + $0xc94] sm:$0xf0] }
 0x46c   :  { %5859 = vmatpush.bf16.msra.mxu1 %v8702_v37  ;;  %6204 = vmatpush.bf16.msrb.mxu0 %v8858_v14  ;;  %v9587_v37 = vld [vmem:[#allocation7 + $0xc14] sm:$0xf]  ;;  %v8667_v14 = vld [vmem:[#allocation7 + $0xc18] sm:$0xf0]  ;;  %v8730_v58 = vor.u32 %v9604_v61, %v8729_v8  ;;  %v4361_v10 = vpop.f32.mrf.mxu2  ;;  %v11185_v8 = vpack.c.b16 %v5570_v48, %v5570_v48 }
 0x46d   :  { %v8670_v30 = vor.u32 %v9587_v37, %v8667_v14  ;;  %v4374_v39 = vpop.f32.mrf.mxu3  ;;  %v8962_v37 = vor.u32 %v9662_v0, %v8961_v28  ;;  %v8934_v14 = vor.u32 %v9653_v47, %v8931_v32  ;;  %v8811_v48 = vld [vmem:[#allocation7 + $0xd38] sm:$0xf0]  ;;  %v5950_v10 = vunpack.c.h.b16 %v11026_v20  ;;  %v8803_v28 = vld [vmem:[#allocation7 + $0xd28] sm:$0xf0]  ;;  %v8929_v47 = vld [vmem:[#allocation7 + $0xe20] sm:$0xf] }
 0x46e   :  { %5821 = vmatpush.bf16.msra.mxu2 %v8690_v43  ;;  %v4702_v43 = vpop.f32.mrf.mxu1  ;;  %v9654_v32 = vld [vmem:[#allocation7 + $0xe24] sm:$0xf0] }
 0x46f   :  { %5834 = vmatpush.bf16.msra.mxu3 %v8754_v9  ;;  %v9602_v9 = vld [vmem:[#allocation7 + $0xc84] sm:$0xf0]  ;;  %v11189_v0 = vpack.c.b16 %v5950_v10, %v5950_v10 }
 0x470   :  { %5860 = vmatpush.bf16.msra.mxu1 %v8694_v63  ;;  %6205 = vmatpush.bf16.msrb.mxu0 %v8850_v24  ;;  %v9615_v63 = vld [vmem:[#allocation7 + $0xcf4] sm:$0xf]  ;;  %v8779_v24 = vld [vmem:[#allocation7 + $0xcf8] sm:$0xf0]  ;;  %v8722_v12 = vor.u32 %v9602_v9, %v8721_v13  ;;  %v9609_v9 = vld [vmem:[#allocation7 + $0xcc4] sm:$0xf] }
 0x472   :  { %5822 = vmatpush.bf16.msra.mxu2 %v8682_v55  ;;  %v9664_v55 = vld [vmem:[#allocation7 + $0xe74] sm:$0xf0] }
 0x473   :  { %6206 = vmatmul.bf16.vlgmr.msrb.gmra.mxu0 %v11174_v3  ;;  %5835 = vmatpush.bf16.msra.mxu3 %v8746_v51  ;;  %v8782_v51 = vor.u32 %v9615_v63, %v8779_v24  ;;  %v9625_v63 = vld [vmem:[#allocation7 + $0xd44] sm:$0xf]  ;;  %v8819_v24 = vld [vmem:[#allocation7 + $0xd48] sm:$0xf0] }
 0x474   :  { %6250 = vmatpush.bf16.msra.mxu0 %v8974_v56  ;;  %5861 = vmatpush.bf16.msra.mxu1 %v8686_v1  ;;  %v8843_v56 = vld [vmem:[#allocation7 + $0xd78] sm:$0xf0]  ;;  %v11183_v1 = vpop.f32.mrf.mxu0 }
 0x475   :  { %v8846_v44 = vor.u32 %v9631_v19, %v8843_v56  ;;  %v9658_v19 = vld [vmem:[#allocation7 + $0xe44] sm:$0xf0]  ;;  %v9649_v56 = vld [vmem:[#allocation7 + $0xe04] sm:$0xf] }
 0x476   :  { %5823 = vmatpush.bf16.msra.mxu2 %v8674_v35  ;;  %v8970_v35 = vor.u32 %v9664_v55, %v8969_v26  ;;  %v8915_v26 = vld [vmem:[#allocation7 + $0xe08] sm:$0xf0]  ;;  %v8822_v55 = vor.u32 %v9625_v63, %v8819_v24 }
 0x477   :  { %5836 = vmatpush.bf16.msra.mxu3 %v8738_v4  ;;  %v8835_v4 = vld [vmem:[#allocation7 + $0xd68] sm:$0xf0] }
 0x478   :  { %6251 = vmatpush.bf16.msra.mxu0 %v8966_v25  ;;  %5862 = vmatpush.bf16.msra.mxu1 %v8678_v36  ;;  %v9613_v25 = vld [vmem:[#allocation7 + $0xce4] sm:$0xf]  ;;  %v5572_v36 = vpack.c.b16 %v5569_v16, %v5569_v16  ;;  %v8838_v61 = vor.u32 %v9629_v52, %v8835_v4  ;;  %v9623_v16 = vld [vmem:[#allocation7 + $0xd34] sm:$0xf]  ;;  %v8787_v63 = vld [vmem:[#allocation7 + $0xd08] sm:$0xf0] }
 0x479   :  { %v8774_v11 = vor.u32 %v9613_v25, %v8771_v45  ;;  %v8750_v25 = vor.u32 %v9607_v18, %v8747_v6  ;;  %v8814_v39 = vor.u32 %v9623_v16, %v8811_v48  ;;  %v9621_v4 = vld [vmem:[#allocation7 + $0xd24] sm:$0xf]  ;;  %v9035_v18 = vld [vmem:[#allocation7 + $0xef8] sm:$0xf0] }
 0x47a   :  { %5824 = vmatpush.bf16.msra.mxu2 %v8666_v27  ;;  %v8827_v27 = vld [vmem:[#allocation7 + $0xd58] sm:$0xf0] }
 0x47b   :  { %5837 = vmatpush.bf16.msra.mxu3 %v8730_v58  ;;  %v8830_v13 = vor.u32 %v9627_v22, %v8827_v27  ;;  %v8795_v22 = vld [vmem:[#allocation7 + $0xd18] sm:$0xf0] }
 0x47c   :  { %6252 = vmatpush.bf16.msra.mxu0 %v8958_v57  ;;  %5863 = vmatpush.bf16.msra.mxu1 %v8670_v30  ;;  %v8763_v57 = vld [vmem:[#allocation7 + $0xcd8] sm:$0xf0]  ;;  %v5095_v58 = vpop.f32.mrf.mxu0  ;;  %v8954_v30 = vor.u32 %v9660_v29, %v8953_v41  ;;  %v8921_v29 = vld [vmem:[#allocation7 + $0xe10] sm:$0xf] }
 0x47d   :  { %v8766_v43 = vor.u32 %v9611_v5, %v8763_v57  ;;  %v8922_v24 = vor.u32 %v9652_v42, %v8921_v29  ;;  %v9673_v29 = vld [vmem:[#allocation7 + $0xec4] sm:$0xf]  ;;  %v9011_v42 = vld [vmem:[#allocation7 + $0xec8] sm:$0xf0] }
 0x47e   :  { %5825 = vmatpush.bf16.msra.mxu2 %v8658_v17  ;;  %v8758_v17 = vor.u32 %v9609_v9, %v8755_v2 }
 0x47f   :  { %5838 = vmatpush.bf16.msra.mxu3 %v8722_v12 }
 0x480   :  { %6253 = vmatpush.bf16.msra.mxu0 %v8950_v34  ;;  %5864 = vmatpush.bf16.msra.mxu1 %v8662_v59  ;;  %v8945_v34 = vld [vmem:[#allocation7 + $0xe40] sm:$0xf]  ;;  %v8937_v59 = vld [vmem:[#allocation7 + $0xe30] sm:$0xf]  ;;  %v4752_v45 = vpop.f32.mrf.mxu1 }
 0x481   :  { %5826 = vmatmul.bf16.vlgmr.msra.gmra.mxu2 %v5572_v36  ;;  %v8946_v12 = vor.u32 %v9658_v19, %v8945_v34  ;;  %v9033_v34 = vld [vmem:[#allocation7 + $0xef0] sm:$0xf] }
 0x482   :  { %5870 = vmatpush.bf16.msrb.mxu2 %v8782_v51  ;;  %5839 = vmatmul.bf16.vlgmr.msra.gmra.mxu3 %v11185_v8  ;;  %v8918_v51 = vor.u32 %v9649_v56, %v8915_v26  ;;  %v9650_v56 = vld [vmem:[#allocation7 + $0xe04] sm:$0xf0]  ;;  %v9647_v26 = vld [vmem:[#allocation7 + $0xdf4] sm:$0xf] }
 0x483   :  { %5883 = vmatpush.bf16.msrb.mxu3 %v8846_v44  ;;  %5865 = vmatmul.bf16.vlgmr.msra.gmra.mxu1 %v5572_v36  ;;  %v9656_v44 = vld [vmem:[#allocation7 + $0xe34] sm:$0xf0]  ;;  %v9603_v36 = vld [vmem:[#allocation7 + $0xc94] sm:$0xf] }
 0x484   :  { %6211 = vmatpush.bf16.msrb.mxu1 %v8970_v35  ;;  %6254 = vmatpush.bf16.msra.mxu0 %v8942_v50  ;;  %v9605_v35 = vld [vmem:[#allocation7 + $0xca4] sm:$0xf]  ;;  %v8739_v50 = vld [vmem:[#allocation7 + $0xca8] sm:$0xf0]  ;;  %v8938_v52 = vor.u32 %v9656_v44, %v8937_v59  ;;  %v4713_v5 = vpop.f32.mrf.mxu2  ;;  %v9025_v59 = vld [vmem:[#allocation7 + $0xee0] sm:$0xf] }
 0x485   :  { %v8742_v20 = vor.u32 %v9605_v35, %v8739_v50  ;;  %v4726_v57 = vpop.f32.mrf.mxu3  ;;  %v4714_v27 = vadd.f32 %v4713_v5, %v11172_v54  ;;  %v8913_v54 = vld [vmem:[#allocation7 + $0xe00] sm:$0xf]  ;;  %v9678_v44 = vld [vmem:[#allocation7 + $0xee4] sm:$0xf0]  ;;  %v8899_v35 = vld [vmem:[#allocation7 + $0xde8] sm:$0xf0] }
 0x486   :  { %5871 = vmatpush.bf16.msrb.mxu2 %v8774_v11  ;;  %v8806_v11 = vor.u32 %v9621_v4, %v8803_v28  ;;  %v4740_v41 = vadd.f32 %v11167_v40, %v4726_v57  ;;  %v9680_v40 = vld [vmem:[#allocation7 + $0xef4] sm:$0xf0]  ;;  %v8914_v10 = vor.u32 %v9650_v56, %v8913_v54  ;;  %v9677_v50 = vld [vmem:[#allocation7 + $0xee4] sm:$0xf]  ;;  %v9026_v4 = vor.u32 %v9678_v44, %v9025_v59  ;;  %v9017_v28 = vld [vmem:[#allocation7 + $0xed0] sm:$0xf] }
 0x487   :  { %5884 = vmatpush.bf16.msrb.mxu3 %v8838_v61  ;;  %v8731_v61 = vld [vmem:[#allocation7 + $0xc98] sm:$0xf0]  ;;  %v11195_v58 = vadd.f32 %v4714_v27, %v11139_v49  ;;  %v9641_v27 = vld [vmem:[#allocation7 + $0xdc4] sm:$0xf]  ;;  %v8993_v56 = vld [vmem:[#allocation7 + $0xea0] sm:$0xf] }
 0x488   :  { %6212 = vmatpush.bf16.msrb.mxu1 %v8962_v37  ;;  %6255 = vmatpush.bf16.msra.mxu0 %v8934_v14  ;;  %v8930_v37 = vor.u32 %v9654_v32, %v8929_v47  ;;  %v9619_v14 = vld [vmem:[#allocation7 + $0xd14] sm:$0xf]  ;;  %v8734_v33 = vor.u32 %v9603_v36, %v8731_v61  ;;  %v4754_v9 = vpop.f32.mrf.mxu1  ;;  %v9676_v47 = vld [vmem:[#allocation7 + $0xed4] sm:$0xf0]  ;;  %v9019_v61 = vld [vmem:[#allocation7 + $0xed8] sm:$0xf0] }
 0x489   :  { %v8798_v2 = vor.u32 %v9619_v14, %v8795_v22  ;;  %v9675_v36 = vld [vmem:[#allocation7 + $0xed4] sm:$0xf]  ;;  %v9018_v5 = vor.u32 %v9676_v47, %v9017_v28  ;;  %v9009_v14 = vld [vmem:[#allocation7 + $0xec0] sm:$0xf]  ;;  %v9674_v22 = vld [vmem:[#allocation7 + $0xec4] sm:$0xf0] }
 0x48a   :  { %5872 = vmatpush.bf16.msrb.mxu2 %v8766_v43  ;;  %v9601_v43 = vld [vmem:[#allocation7 + $0xc84] sm:$0xf]  ;;  %v9672_v9 = vld [vmem:[#allocation7 + $0xeb4] sm:$0xf0]  ;;  %v8977_v47 = vld [vmem:[#allocation7 + $0xe80] sm:$0xf] }
 0x48b   :  { %5885 = vmatpush.bf16.msrb.mxu3 %v8830_v13  ;;  %v4753_v13 = vadd.f32 %v4752_v45, %v4740_v41  ;;  %v8883_v41 = vld [vmem:[#allocation7 + $0xdc8] sm:$0xf0] }
 0x48c   :  { %6213 = vmatpush.bf16.msrb.mxu1 %v8954_v30  ;;  %6256 = vmatpush.bf16.msra.mxu0 %v8926_v60  ;;  %v8723_v30 = vld [vmem:[#allocation7 + $0xc88] sm:$0xf0]  ;;  %v9617_v60 = vld [vmem:[#allocation7 + $0xd04] sm:$0xf]  ;;  %v4715_v48 = vpop.f32.mrf.mxu2 }
 0x48d   :  { %v11198_v19 = vadd.f32 %v4753_v13, %v11143_v38  ;;  %v8726_v49 = vor.u32 %v9601_v43, %v8723_v30  ;;  %v8790_v6 = vor.u32 %v9617_v60, %v8787_v63  ;;  %v9001_v13 = vld [vmem:[#allocation7 + $0xeb0] sm:$0xf]  ;;  %v8875_v30 = vld [vmem:[#allocation7 + $0xdb8] sm:$0xf0]  ;;  %v9671_v60 = vld [vmem:[#allocation7 + $0xeb4] sm:$0xf] }
 0x48e   :  { %5873 = vmatpush.bf16.msrb.mxu2 %v8758_v17  ;;  %v8907_v17 = vld [vmem:[#allocation7 + $0xdf8] sm:$0xf0] }
 0x48f   :  { %5886 = vmatpush.bf16.msrb.mxu3 %v8822_v55  ;;  %v9679_v55 = vld [vmem:[#allocation7 + $0xef4] sm:$0xf]  ;;  %v8910_v38 = vor.u32 %v9647_v26, %v8907_v17  ;;  %v9003_v63 = vld [vmem:[#allocation7 + $0xeb8] sm:$0xf0]  ;;  %v9670_v26 = vld [vmem:[#allocation7 + $0xea4] sm:$0xf0] }
 0x490   :  { %6214 = vmatpush.bf16.msrb.mxu1 %v8946_v12  ;;  %6257 = vmatpush.bf16.msra.mxu0 %v8918_v51  ;;  %v9034_v12 = vor.u32 %v9680_v40, %v9033_v34  ;;  %v1962_v51 = vadd.f32 %v10908_v62, %v10906_v21  ;;  %v11202_v16 = vpop.f32.mrf.mxu0  ;;  %v9038_v45 = vor.u32 %v9679_v55, %v9035_v18  ;;  %v8867_v55 = vld [vmem:[#allocation7 + $0xda8] sm:$0xf0]  ;;  %v9669_v18 = vld [vmem:[#allocation7 + $0xea4] sm:$0xf] }
 0x491   :  { %v9006_v17 = vor.u32 %v9671_v60, %v9003_v63 }
 0x492   :  { %5874 = vmatpush.bf16.msrb.mxu2 %v8750_v25  ;;  %v4728_v25 = vpop.f32.mrf.mxu3  ;;  %v2333_v21 = vadd.f32 %v11013_v46, %v1962_v51 }
 0x493   :  { %6258 = vmatmul.bf16.vlgmr.msra.gmra.mxu0 %v11189_v0  ;;  %5887 = vmatpush.bf16.msrb.mxu3 %v8814_v39  ;;  %v9645_v39 = vld [vmem:[#allocation7 + $0xde4] sm:$0xf]  ;;  %v9635_v25 = vld [vmem:[#allocation7 + $0xd94] sm:$0xf] }
 0x494   :  { %6215 = vmatpush.bf16.msrb.mxu1 %v8938_v52  ;;  %v9027_v52 = vld [vmem:[#allocation7 + $0xee8] sm:$0xf0]  ;;  %v8902_v62 = vor.u32 %v9645_v39, %v8899_v35  ;;  %v2367_v46 = vadd.f32 %v11053_v53, %v2333_v21  ;;  %v9014_v53 = vor.u32 %v9673_v29, %v9011_v42  ;;  %v9667_v35 = vld [vmem:[#allocation7 + $0xe94] sm:$0xf] }
 0x495   :  { %v9030_v32 = vor.u32 %v9677_v50, %v9027_v52  ;;  %v8987_v50 = vld [vmem:[#allocation7 + $0xe98] sm:$0xf0] }
 0x496   :  { %5875 = vmatpush.bf16.msrb.mxu2 %v8742_v20  ;;  %v9643_v20 = vld [vmem:[#allocation7 + $0xdd4] sm:$0xf] }
 0x497   :  { %5888 = vmatpush.bf16.msrb.mxu3 %v8806_v11  ;;  %v8891_v11 = vld [vmem:[#allocation7 + $0xdd8] sm:$0xf0] }
 0x498   :  { %6216 = vmatpush.bf16.msrb.mxu1 %v8930_v37  ;;  %v5449_v57 = vpop.f32.mrf.mxu0  ;;  %v8894_v37 = vor.u32 %v9643_v20, %v8891_v11  ;;  %v8990_v20 = vor.u32 %v9667_v35, %v8987_v50  ;;  %v9633_v11 = vld [vmem:[#allocation7 + $0xd84] sm:$0xf] }
 0x499   :  { %v6302_v50 = vld [vmem:[#allocation10 + $0x60] sm:$0xff] }
 0x49a   :  { %5876 = vmatpush.bf16.msrb.mxu2 %v8734_v33  ;;  %v11310_v33 = vld [vmem:[#allocation20_spill] sm:$0xff] }
 0x49b   :  { %5889 = vmatpush.bf16.msrb.mxu3 %v8798_v2  ;;  %v2398_v43 = vadd.f32 %v2367_v46, %v11310_v33  ;;  %v9639_v2 = vld [vmem:[#allocation7 + $0xdb4] sm:$0xf]  ;;  %v8979_v46 = vld [vmem:[#allocation7 + $0xe88] sm:$0xf0] }
 0x49c   :  { %6217 = vmatpush.bf16.msrb.mxu1 %v8922_v24  ;;  %v9002_v24 = vor.u32 %v9672_v9, %v9001_v13  ;;  %v8878_v40 = vor.u32 %v9639_v2, %v8875_v30 }
 0x49d   :  { %v2436_v54 = vadd.f32 %v10870_v31, %v2398_v43 }
 0x49e   :  { %5877 = vmatpush.bf16.msrb.mxu2 %v8726_v49  ;;  %v9637_v49 = vld [vmem:[#allocation7 + $0xda4] sm:$0xf] }
 0x49f   :  { %5890 = vmatpush.bf16.msrb.mxu3 %v8790_v6  ;;  %v8995_v6 = vld [vmem:[#allocation7 + $0xea8] sm:$0xf0]  ;;  %v2466_v51 = vmax.f32 %v2436_v54, 0.0  ;;  %v8870_v48 = vor.u32 %v9637_v49, %v8867_v55 }
 0x4a0   :  { %6218 = vmatpush.bf16.msrb.mxu1 %v8914_v10  ;;  %v11211_v34 = vpop.f32.mrf.mxu1  ;;  %v8985_v10 = vld [vmem:[#allocation7 + $0xe90] sm:$0xf]  ;;  %v8998_v44 = vor.u32 %v9669_v18, %v8995_v6 }
 0x4a1   :  { %5878 = vmatmul.bf16.vlgmr.msrb.gmra.mxu2 %v11185_v8  ;;  %v9022_v8 = vor.u32 %v9675_v36, %v9019_v61  ;;  %v8851_v36 = vld [vmem:[#allocation7 + $0xd88] sm:$0xf0] }
 0x4a2   :  { %6224 = vmatpush.bf16.msra.mxu2 %v9034_v12  ;;  %5891 = vmatmul.bf16.vlgmr.msrb.gmra.mxu3 %v11160_v23  ;;  %v9010_v23 = vor.u32 %v9674_v22, %v9009_v14  ;;  %v8994_v12 = vor.u32 %v9670_v26, %v8993_v56  ;;  %v8854_v14 = vor.u32 %v9633_v11, %v8851_v36  ;;  %v6315_v11 = vld [vmem:[#allocation10 + $0xc8] sm:$0xff]  ;;  %v6297_v36 = vld [vmem:[#allocation10 + $0x38] sm:$0xff] }
 0x4a3   :  { %6237 = vmatpush.bf16.msra.mxu3 %v8910_v38  ;;  %6219 = vmatmul.bf16.vlgmr.msrb.gmra.mxu1 %v11189_v0  ;;  %v8886_v0 = vor.u32 %v9641_v27, %v8883_v41  ;;  %v9668_v38 = vld [vmem:[#allocation7 + $0xe94] sm:$0xf0] }
 0x4a4   :  { %6263 = vmatpush.bf16.msra.mxu1 %v9038_v45  ;;  %v5067_v31 = vpop.f32.mrf.mxu2  ;;  %v8859_v45 = vld [vmem:[#allocation7 + $0xd98] sm:$0xf0]  ;;  %v8986_v52 = vor.u32 %v9668_v38, %v8985_v10 }
 0x4a5   :  { %v5080_v59 = vpop.f32.mrf.mxu3  ;;  %v8862_v28 = vor.u32 %v9635_v25, %v8859_v45  ;;  %v6319_v25 = vld [vmem:[#allocation10 + $0xe8] sm:$0xff] }
 0x4a6   :  { %6225 = vmatpush.bf16.msra.mxu2 %v9026_v4  ;;  %v5081_v39 = vadd.f32 %v5080_v59, %v5067_v31  ;;  %v2486_v4 = vpack.c.bf16 %v2466_v51, %v2466_v51  ;;  %v6304_v31 = vld [vmem:[#allocation10 + $0x70] sm:$0xff]  ;;  %v6321_v59 = vld [vmem:[#allocation10 + $0xf8] sm:$0xff] }
 0x4a7   :  { %6238 = vmatpush.bf16.msra.mxu3 %v8902_v62 }
 0x4a8   :  { %6264 = vmatpush.bf16.msra.mxu1 %v9030_v32  ;;  %v5094_v21 = vadd.f32 %v11183_v1, %v5081_v39  ;;  %v5108_v62 = vpop.f32.mrf.mxu1  ;;  %v9666_v32 = vld [vmem:[#allocation7 + $0xe84] sm:$0xf0] }
 0x4a9   :  { %v8978_v57 = vor.u32 %v9666_v32, %v8977_v47  ;;  %v6300_v62 = vld [vmem:[#allocation10 + $0x50] sm:$0xff]  ;;  %v6299_v47 = vld [vmem:[#allocation10 + $0x48] sm:$0xff] }
 0x4aa   :  { %6226 = vmatpush.bf16.msra.mxu2 %v9018_v5  ;;  %v5136_v61 = vadd.f32 %v5094_v21, %v11165_v15  ;;  %v9665_v5 = vld [vmem:[#allocation7 + $0xe84] sm:$0xf]  ;;  %v6317_v21 = vld [vmem:[#allocation10 + $0xd8] sm:$0xff] }
 0x4ab   :  { %6239 = vmatpush.bf16.msra.mxu3 %v8894_v37  ;;  %v5951_v37 = vunpack.c.l.b16 %v2486_v4  ;;  %v6301_v4 = vld [vmem:[#allocation10 + $0x58] sm:$0xff] }
 0x4ac   :  { %6265 = vmatpush.bf16.msra.mxu1 %v9022_v8  ;;  %v5069_v1 = vpop.f32.mrf.mxu2  ;;  %v8982_v8 = vor.u32 %v9665_v5, %v8979_v46  ;;  %v6296_v5 = vld [vmem:[#allocation10 + $0x30] sm:$0xff]  ;;  %v6313_v46 = vld [vmem:[#allocation10 + $0xb8] sm:$0xff] }
 0x4ad   :  { %v5082_v27 = vpop.f32.mrf.mxu3  ;;  %v5954_v41 = vpack.c.b16 %v5951_v37, %v5951_v37  ;;  %v6295_v37 = vld [vmem:[#allocation10 + $0x28] sm:$0xff]  ;;  %v6294_v1 = vld [vmem:[#allocation10 + $0x20] sm:$0xff] }
 0x4ae   :  { %6227 = vmatpush.bf16.msra.mxu2 %v9010_v23 }
 0x4af   :  { %6240 = vmatpush.bf16.msra.mxu3 %v8886_v0 }
 0x4b0   :  { %6266 = vmatpush.bf16.msra.mxu1 %v9014_v53  ;;  %v5499_v22 = vpop.f32.mrf.mxu0 }
 0x4b2   :  { %6228 = vmatpush.bf16.msra.mxu2 %v9002_v24 }
 0x4b3   :  { %6241 = vmatpush.bf16.msra.mxu3 %v8878_v40 }
 0x4b4   :  { %6267 = vmatpush.bf16.msra.mxu1 %v9006_v17 }
 0x4b6   :  { %6229 = vmatpush.bf16.msra.mxu2 %v8994_v12 }
 0x4b7   :  { %6242 = vmatpush.bf16.msra.mxu3 %v8870_v48 }
 0x4b8   :  { %6268 = vmatpush.bf16.msra.mxu1 %v8998_v44  ;;  %v5501_v15 = vpop.f32.mrf.mxu0  ;;  %v6303_v44 = vld [vmem:[#allocation10 + $0x68] sm:$0xff] }
 0x4b9   :  { %v6310_v15 = vld [vmem:[#allocation10 + $0xa0] sm:$0xff] }
 0x4ba   :  { %6230 = vmatpush.bf16.msra.mxu2 %v8986_v52  ;;  %v6318_v52 = vld [vmem:[#allocation10 + $0xe0] sm:$0xff] }
 0x4bb   :  { %6243 = vmatpush.bf16.msra.mxu3 %v8862_v28  ;;  %v6316_v28 = vld [vmem:[#allocation10 + $0xd0] sm:$0xff] }
 0x4bc   :  { %6269 = vmatpush.bf16.msra.mxu1 %v8990_v20  ;;  %v6298_v20 = vld [vmem:[#allocation10 + $0x40] sm:$0xff] }
 0x4be   :  { %6231 = vmatpush.bf16.msra.mxu2 %v8978_v57 }
 0x4bf   :  { %6244 = vmatpush.bf16.msra.mxu3 %v8854_v14  ;;  %v6312_v14 = vld [vmem:[#allocation10 + $0xb0] sm:$0xff] }
 0x4c0   :  { %6270 = vmatpush.bf16.msra.mxu1 %v8982_v8  ;;  %v5460_v29 = vpop.f32.mrf.mxu1  ;;  %v6311_v8 = vld [vmem:[#allocation10 + $0xa8] sm:$0xff] }
 0x4c1   :  { %6232 = vmatmul.bf16.vlgmr.msra.gmra.mxu2 %v5954_v41  ;;  %v5461_v42 = vadd.f32 %v5460_v29, %v11202_v16 }
 0x4c2   :  { %6245 = vmatmul.bf16.vlgmr.msra.gmra.mxu3 %v11174_v3 }
 0x4c3   :  { %6271 = vmatmul.bf16.vlgmr.msra.gmra.mxu1 %v5954_v41  ;;  %6346 = vmatpush.msrb.mxu3 %v6321_v59  ;;  %v6293_v41 = vld [vmem:[#allocation10 + $0x18] sm:$0xff] }
 0x4c4   :  { %v5119_v23 = vpop.f32.mrf.mxu2 }
 0x4c5   :  { %v5132_v33 = vpop.f32.mrf.mxu3  ;;  %v5120_v43 = vadd.f32 %v5119_v23, %v11211_v34  ;;  %v6309_v23 = vld [vmem:[#allocation10 + $0x98] sm:$0xff] }
 0x4c7   :  { %v5133_v0 = vadd.f32 %v5132_v33, %v5120_v43  ;;  %v6291_v33 = vld [vmem:[#allocation10 + $0x8] sm:$0xff]  ;;  %v6308_v43 = vld [vmem:[#allocation10 + $0x90] sm:$0xff] }
 0x4c8   :  { %v5462_v13 = vpop.f32.mrf.mxu1 }
 0x4c9   :  { %v11219_v9 = vadd.f32 %v5133_v0, %v11179_v7  ;;  %v6290_v13 = vld [vmem:[#allocation10] sm:$0xff] }
 0x4cc   :  { %v5121_v2 = vpop.f32.mrf.mxu2 }
 0x4cd   :  { %v5134_v30 = vpop.f32.mrf.mxu3 }
 0x4ce   :  { %v6306_v30 = vld [vmem:[#allocation10 + $0x80] sm:$0xff] }
 0x4d0   :  { %v5853_v53 = vpop.f32.mrf.mxu0 }
 0x4d8   :  { %v5855_v60 = vpop.f32.mrf.mxu0 }
 0x4e0   :  { %v5512_v63 = vpop.f32.mrf.mxu1 }
 0x4e4   :  { %v5473_v3 = vpop.f32.mrf.mxu2 }
 0x4e5   :  { %v5486_v24 = vpop.f32.mrf.mxu3  ;;  %v5474_v54 = vadd.f32 %v5473_v3, %v5461_v42  ;;  %v6292_v42 = vld [vmem:[#allocation10 + $0x10] sm:$0xff] }
 0x4e6   :  { %v5500_v40 = vadd.f32 %v5499_v22, %v5486_v24 }
 0x4e7   :  { %v11222_v16 = vadd.f32 %v5474_v54, %v11195_v58  ;;  %v6305_v58 = vld [vmem:[#allocation10 + $0x78] sm:$0xff] }
 0x4e8   :  { %v5513_v56 = vadd.f32 %v5512_v63, %v5500_v40  ;;  %v5514_v26 = vpop.f32.mrf.mxu1  ;;  %6326 = vmatpush.msrb.mxu2 %v6305_v58  ;;  %v6280_v54 = vld [vmem:[#allocation9] sm:$0x3] }
 0x4ea   :  { %v11225_v34 = vadd.f32 %v5513_v56, %v11198_v19  ;;  %v6320_v19 = vld [vmem:[#allocation10 + $0xf0] sm:$0xff]  ;;  %6327 = vmatpush.msrb.mxu2 %v6304_v31 }
 0x4eb   :  { %6347 = vmatpush.msrb.mxu3 %v6320_v19 }
 0x4ec   :  { %v5475_v7 = vpop.f32.mrf.mxu2  ;;  %6328 = vmatpush.msrb.mxu2 %v6303_v44 }
 0x4ed   :  { %v5488_v49 = vpop.f32.mrf.mxu3  ;;  %6348 = vmatpush.msrb.mxu3 %v6319_v25 }
 0x4ee   :  { %6329 = vmatpush.msrb.mxu2 %v6302_v50 }
 0x4ef   :  { %6349 = vmatpush.msrb.mxu3 %v6318_v52 }
 0x4f0   :  { %v11227_v17 = vpop.f32.mrf.mxu0  ;;  %6330 = vmatpush.msrb.mxu2 %v6301_v4 }
 0x4f1   :  { %6350 = vmatpush.msrb.mxu3 %v6317_v21 }
 0x4f2   :  { %6331 = vmatpush.msrb.mxu2 %v6300_v62 }
 0x4f3   :  { %6351 = vmatpush.msrb.mxu3 %v6316_v28 }
 0x4f4   :  { %6332 = vmatpush.msrb.mxu2 %v6299_v47 }
 0x4f5   :  { %6352 = vmatpush.msrb.mxu3 %v6315_v11 }
 0x4f6   :  { %6333 = vmatpush.msrb.mxu2 %v6298_v20 }
 0x4f8   :  { %v6209_v55 = vpop.f32.mrf.mxu0  ;;  %6334 = vmatpush.msrb.mxu2 %v6297_v36 }
 0x4f9   :  { %v6282_v55 = vperm.slane %v6280_v54, 0 }
 0x4fa   :  { %6335 = vmatpush.msrb.mxu2 %v6296_v5 }
 0x4fc   :  { %6336 = vmatpush.msrb.mxu2 %v6295_v37 }
 0x4fe   :  { %6337 = vmatpush.msrb.mxu2 %v6294_v1 }
 0x500   :  { %v11229_v18 = vpop.f32.mrf.mxu1  ;;  %6338 = vmatpush.msrb.mxu2 %v6293_v41 }
 0x502   :  { %6339 = vmatpush.msrb.mxu2 %v6292_v42 }
 0x504   :  { %v5827_v6 = vpop.f32.mrf.mxu2  ;;  %6340 = vmatpush.msrb.mxu2 %v6291_v33 }
 0x505   :  { %v5840_v12 = vpop.f32.mrf.mxu3 }
 0x506   :  { %v5841_v51 = vadd.f32 %v5840_v12, %v5827_v6  ;;  %6341 = vmatpush.msrb.mxu2 %v6290_v13 }
 0x508   :  { %v5854_v48 = vadd.f32 %v5853_v53, %v5841_v51  ;;  %v5868_v10 = vpop.f32.mrf.mxu1  ;;  %v6307_v53 = vld [vmem:[#allocation10 + $0x88] sm:$0xff] }
 0x509   :  { %v6283_v10 = vperm.slane %v6280_v54, 1 }
 0x50a   :  { %v11231_v38 = vadd.f32 %v5854_v48, %v5136_v61  ;;  %v6314_v61 = vld [vmem:[#allocation10 + $0xc0] sm:$0xff] }
 0x50b   :  { %6353 = vmatpush.msrb.mxu3 %v6314_v61 }
 0x50c   :  { %v5829_v39 = vpop.f32.mrf.mxu2 }
 0x50d   :  { %v5842_v35 = vpop.f32.mrf.mxu3  ;;  %6354 = vmatpush.msrb.mxu3 %v6313_v46 }
 0x50f   :  { %6355 = vmatpush.msrb.mxu3 %v6312_v14 }
 0x510   :  { %v11233_v45 = vpop.f32.mrf.mxu0 }
 0x511   :  { %6356 = vmatpush.msrb.mxu3 %v6311_v8 }
 0x513   :  { %6357 = vmatpush.msrb.mxu3 %v6310_v15 }
 0x515   :  { %6358 = vmatpush.msrb.mxu3 %v6309_v23 }
 0x517   :  { %6359 = vmatpush.msrb.mxu3 %v6308_v43 }
 0x518   :  { %v6261_v32 = vpop.f32.mrf.mxu0 }
 0x519   :  { %6360 = vmatpush.msrb.mxu3 %v6307_v53 }
 0x51b   :  { %6361 = vmatpush.msrb.mxu3 %v6306_v30 }
 0x520   :  { %v6220_v57 = vpop.f32.mrf.mxu1 }
 0x521   :  { %v6221_v3 = vadd.f32 %v6220_v57, %v11227_v17 }
 0x524   :  { %v5879_v22 = vpop.f32.mrf.mxu2 }
 0x525   :  { %v5892_v27 = vpop.f32.mrf.mxu3  ;;  %v5880_v63 = vadd.f32 %v5879_v22, %v11229_v18 }
 0x527   :  { %v5893_v26 = vadd.f32 %v5892_v27, %v5880_v63 }
 0x528   :  { %v6222_v29 = vpop.f32.mrf.mxu1 }
 0x529   :  { %v5897_v48 = vadd.f32 %v5893_v26, %v11219_v9  ;;  %v9958_v9 = vmov 4  }
 0x52a   :  { %9766 = vset.pattern.permute.xlu0 %v9958_v9 }
 0x52c   :  { %v5881_v0 = vpop.f32.mrf.mxu2 }
 0x52d   :  { %v5894_v2 = vpop.f32.mrf.mxu3 }
 0x540   :  { %v6272_v60 = vpop.f32.mrf.mxu1 }
 0x544   :  { %v6233_v24 = vpop.f32.mrf.mxu2 }
 0x545   :  { %v6234_v40 = vadd.f32 %v6233_v24, %v6221_v3  ;;  %v6246_v56 = vpop.f32.mrf.mxu3 }
 0x546   :  { %v6260_v7 = vadd.f32 %v11233_v45, %v6246_v56 }
 0x547   :  { %v6276_v49 = vadd.f32 %v6234_v40, %v11222_v16  ;;  %v9767_v16 = vld [vmem:[#allocation12] ss:$0 sm:$0xff] }
 0x548   :  { %v6273_v6 = vadd.f32 %v6272_v60, %v6260_v7  ;;  %v6274_v12 = vpop.f32.mrf.mxu1 }
 0x549   :  { %v6278_v51 = vadd.f32 %v6276_v49, %v11231_v38 }
 0x54a   :  { %v6277_v18 = vadd.f32 %v6273_v6, %v11225_v34  ;;  %v9959_v34 = vmov 4.0  }
 0x54b   :  { %v6286_v17 = vadd.f32 %v6282_v55, %v6278_v51  ;;  %9768 = vrcp.f32 %v9959_v34 }
 0x54c   :  { %v6279_v58 = vadd.f32 %v6277_v18, %v5897_v48  ;;  %v6235_v31 = vpop.f32.mrf.mxu2 }
 0x54d   :  { %v6288_v59 = vmax.f32 %v6286_v17, 0.0  ;;  %v6248_v19 = vpop.f32.mrf.mxu3 }
 0x54e   :  { %v6287_v44 = vadd.f32 %v6283_v10, %v6279_v58 }
 0x54f   :  { %6342 = vmatmul.f32.vlgmr.msrb.gmra.mxu2 %v6288_v59 }
 0x550   :  { %v6289_v25 = vmax.f32 %v6287_v44, 0.0 }
 0x551   :  { %v9769_v52 = vpop.eup %9768 }
 0x552   :  { %6362 = vmatmul.f32.vlgmr.msrb.gmra.mxu3 %v6289_v25  ;;  %v6371_v4 = vmul.f32 4.0, %v9769_v52  ;;  %vm6375_vm2 = vweird.f32 %v9769_v52 }
 0x554   :  { %v6372_v21 = vsub.f32 1.0, %v6371_v4 }
 0x556   :  { %v6373_v62 = vmul.f32 %v9769_v52, %v6372_v21 }
 0x558   :  { %v6374_v28 = vadd.f32 %v9769_v52, %v6373_v62 }
 0x55a   :  { %v6376_v47 = vsel %vm6375_vm2, %v9769_v52, %v6374_v28 }
 0x5d2   :  { %v6343_v45 = vpop.f32.mrf.mxu2 }
 0x5d3   :  { %v6344_v39 = vadd.f32 %v9767_v16, %v6343_v45 }
 0x5d5   :  { %v6363_v35 = vpop.f32.mrf.mxu3 }
 0x5d6   :  { %v6364_v38 = vadd.f32 %v6363_v35, %v6344_v39 }
 0x5d8   :  { %v6367_v50 = vsel %vm6366_vm1, %v6364_v38, 0.0 }
 0x5d9   :  { %6368 = vadd.xlane.f32.xlu0 %v6367_v50 }
 0x64c   :  { %v6369_v32 = vpop.xlane.xlu0 %6368 }
 0x64d   :  { %v6377_v20 = vmul.f32 %v6376_v47, %v6369_v32 }
 0x64f   :  { %v6378_v11 = vsub.f32 %v6364_v38, %v6377_v20 }
 0x651   :  { %6381 = vperm.xlu0 %9766, %v6378_v11  }
 0x6c3   :  { %v6382_v36 = vpop.permute.xlu0 %6381 }
 0x6c4   :  { %v6384_v61 = vadd.f32 %v6382_v36, %v6364_v38 }
 0x6c6   :  { %6385 = vst [vmem:[%s11254_s9] sm:$0xff] %v6384_v61 }
 0x6c7   :  { %6390 = vsyncpa [#allocation3], 1 }
 0x6c8   :  { %6391 = vsyncpa [#allocation5], 1 }
 0x6c9   :  { %6392 = vsyncpa [#allocation8], 1 }
 0x6ca   :  { %6393 = vsyncpa [#allocation11], 1 }

</bundles_post_ra>
